<compile_context>
chip_gen: v5e
topology: v5e:2x2
jax: 0.10.0
libtpu: 0.0.40
codegen_flags: <defaults>
</compile_context>

<pallas_src>
import jax
import jax.numpy as jnp
from jax.experimental import pallas as pl
from jax.experimental.pallas import tpu as pltpu

L = 8           # program token sequence length
S = 16          # number of stroke tokens
EMB = 8         # ProgramEncoder embedding dim
HID = 32        # lstm hidden dim == embed_dim
HEADS = 4
HEAD_DIM = HID // HEADS
FF = 128
NCLS = 10
VOCAB = 10
EPS = 1e-5      # nn.LayerNorm default eps

# ---- packed weight slab row offsets (all weights stored pre-transposed, lane=128) ----
_W_IH = 0                 # [EMB, 4*HID]                 rows [  0,   8)
_W_HH = _W_IH + EMB       # [HID, 4*HID]                 rows [  8,  40)
_ATTN = _W_HH + HID       # [HID, 128] = q_T|k_T|v_T|o_T rows [ 40,  72)
_W1 = _ATTN + HID         # [HID, FF]                    rows [ 72, 104)
_W2 = _W1 + HID           # [FF, HID]   (cols 0:32)      rows [104, 232)
_WC = _W2 + FF            # [HID, NCLS] (cols 0:10)      rows [232, 264)
W_ROWS = _WC + HID        # 264
B_ROWS = 8                # bias slab sublane-padded to 8 rows


def _tm_to_sm(x):
    """[L, TB, H] time-major -> [TB, L, H] sample-major (minor/lane dim unchanged)."""
    if hasattr(pltpu, "einshape"):
        return pltpu.einshape("tbh->bth", x)
    return jnp.swapaxes(x, 0, 1)


def program_prediction_kernel(emb_ref, stroke_ref, w_ref, b_ref, logits_ref):
    TB = stroke_ref.shape[0]                               # samples per grid step

    # ---- pre-transposed, VMEM-resident weights (static slab slices) ----
    w_ih_T = w_ref[_W_IH:_W_IH + EMB, :]                   # [EMB, 4H]
    w_hh_T = w_ref[_W_HH:_W_HH + HID, :]                   # [HID, 4H]
    wq_T = w_ref[_ATTN:_ATTN + HID, 0:HID]                 # [HID, HID]
    wkv_T = w_ref[_ATTN:_ATTN + HID, HID:3 * HID]          # [HID, 2*HID]  fused k|v
    wo_T = w_ref[_ATTN:_ATTN + HID, 3 * HID:4 * HID]       # [HID, HID]
    w1_T = w_ref[_W1:_W1 + HID, :]                         # [HID, FF]
    w2_T = w_ref[_W2:_W2 + FF, 0:HID]                      # [FF, HID]
    wc_T = w_ref[_WC:_WC + HID, 0:NCLS]                    # [HID, NCLS]

    b_lstm = b_ref[0:1, :]                                 # [1, 4H] (= b_ih + b_hh)
    bq = b_ref[1:2, 0:HID]
    bkv = b_ref[1:2, HID:3 * HID]
    bo = b_ref[1:2, 3 * HID:4 * HID]
    gamma = b_ref[2:3, 0:HID]
    beta = b_ref[2:3, HID:2 * HID]
    b2 = b_ref[2:3, 2 * HID:3 * HID]
    bc = b_ref[2:3, 3 * HID:3 * HID + NCLS]
    b1 = b_ref[3:4, :]                                     # [1, FF]

    # ---- ProgramEncoder LSTM, batched over TB samples (PyTorch gate order i,f,g,o) ----
    emb_tm = emb_ref[...].reshape(L * TB, EMB)             # time-major [L*TB, EMB]
    xw = jnp.dot(emb_tm, w_ih_T, preferred_element_type=jnp.float32) + b_lstm   # [L*TB, 4H]

    h = jnp.zeros((TB, HID), jnp.float32)
    c = jnp.zeros((TB, HID), jnp.float32)
    hs = []
    for t in range(L):
        gates = xw[t * TB:(t + 1) * TB, :] + jnp.dot(
            h, w_hh_T, preferred_element_type=jnp.float32)                      # [TB, 4H]
        sig = jax.nn.sigmoid(gates)                         # i, f, o gates
        g_g = jnp.tanh(gates[:, 2 * HID:3 * HID])           # tanh only on the g slice
        i_g = sig[:, 0:HID]
        f_g = sig[:, HID:2 * HID]
        o_g = sig[:, 3 * HID:4 * HID]
        c = f_g * c + i_g * g_g
        h = o_g * jnp.tanh(c)
        hs.append(h)

    lstm_tm = jnp.stack(hs, axis=0)                         # [L, TB, HID] time-major
    lstm_sm3 = _tm_to_sm(lstm_tm)                           # [TB, L, HID] sample-major
    lstm2d = lstm_sm3.reshape(TB * L, HID)                  # [TB*L, HID]

    # ---- cross attention: query = program embedding, key = value = stroke ----
    stroke2d = stroke_ref[...].reshape(TB * S, HID)         # [TB*S, HID]
    scale = 1.0 / (HEAD_DIM ** 0.5)
    q2d = (jnp.dot(lstm2d, wq_T, preferred_element_type=jnp.float32) + bq) * scale
    kv2d = jnp.dot(stroke2d, wkv_T, preferred_element_type=jnp.float32) + bkv   # [TB*S, 2H]

    q3 = q2d.reshape(TB, L, HID)
    k3 = kv2d[:, 0:HID].reshape(TB, S, HID)
    v3 = kv2d[:, HID:2 * HID].reshape(TB, S, HID)

    # per-head scores stacked along dim 1 -> one softmax pass for all heads
    s_list = []
    for hd in range(HEADS):
        lo = hd * HEAD_DIM
        s_h = jax.lax.dot_general(
            q3[:, :, lo:lo + HEAD_DIM], k3[:, :, lo:lo + HEAD_DIM],
            dimension_numbers=(((2,), (2,)), ((0,), (0,))),
            preferred_element_type=jnp.float32)             # [TB, L, S]
        s_list.append(s_h)
    sc = jnp.concatenate(s_list, axis=1)                    # [TB, HEADS*L, S]
    sc = sc - jnp.max(sc, axis=-1, keepdims=True)
    e = jnp.exp(sc)
    p = e / jnp.sum(e, axis=-1, keepdims=True)              # exact softmax

    # per-head context, lane-concatenated -> single output-projection matmul
    ao_list = []
    for hd in range(HEADS):
        lo = hd * HEAD_DIM
        ao_h = jax.lax.dot_general(
            p[:, hd * L:(hd + 1) * L, :], v3[:, :, lo:lo + HEAD_DIM],
            dimension_numbers=(((2,), (1,)), ((0,), (0,))),
            preferred_element_type=jnp.float32)             # [TB, L, Dh]
        ao_list.append(ao_h)
    ctx2d = jnp.concatenate(ao_list, axis=2).reshape(TB * L, HID)                # [TB*L, HID]
    attn = jnp.dot(ctx2d, wo_T, preferred_element_type=jnp.float32) + bo         # [TB*L, HID]

    # ---- residual + LayerNorm ----
    res = lstm2d + attn
    mu = jnp.mean(res, axis=-1, keepdims=True)
    var = jnp.mean((res - mu) ** 2, axis=-1, keepdims=True)
    normed = (res - mu) * jax.lax.rsqrt(var + EPS) * gamma + beta

    # ---- feed-forward (Linear -> ReLU -> Linear) ----
    h1 = jnp.maximum(jnp.dot(normed, w1_T, preferred_element_type=jnp.float32) + b1, 0.0)
    ffo = jnp.dot(h1, w2_T, preferred_element_type=jnp.float32) + b2             # [TB*L, HID]

    # ---- mean over sequence (dim 0 of each sample) + classifier ----
    pooled = jnp.mean(ffo.reshape(TB, L, HID), axis=1)                           # [TB, HID]
    logits_ref[...] = jnp.dot(pooled, wc_T, preferred_element_type=jnp.float32) + bc


def pack_params(params):
    """Pack all weights (pre-transposed) into one [W_ROWS,128] slab + one [8,128] bias slab."""
    w = jnp.zeros((W_ROWS, 128), jnp.float32)
    w = w.at[_W_IH:_W_IH + EMB, :].set(params["w_ih"].T)
    w = w.at[_W_HH:_W_HH + HID, :].set(params["w_hh"].T)
    in_w = params["in_w"]
    w = w.at[_ATTN:_ATTN + HID, 0 * HID:1 * HID].set(in_w[0 * HID:1 * HID, :].T)
    w = w.at[_ATTN:_ATTN + HID, 1 * HID:2 * HID].set(in_w[1 * HID:2 * HID, :].T)
    w = w.at[_ATTN:_ATTN + HID, 2 * HID:3 * HID].set(in_w[2 * HID:3 * HID, :].T)
    w = w.at[_ATTN:_ATTN + HID, 3 * HID:4 * HID].set(params["out_w"].T)
    w = w.at[_W1:_W1 + HID, :].set(params["w1"].T)
    w = w.at[_W2:_W2 + FF, 0:HID].set(params["w2"].T)
    w = w.at[_WC:_WC + HID, 0:NCLS].set(params["wc"].T)

    b = jnp.zeros((B_ROWS, 128), jnp.float32)
    b = b.at[0:1, :].set(params["b_ih"] + params["b_hh"])
    in_b = params["in_b"]
    b = b.at[1:2, 0:3 * HID].set(in_b)
    b = b.at[1:2, 3 * HID:4 * HID].set(params["out_b"])
    b = b.at[2:3, 0:HID].set(params["gamma"])
    b = b.at[2:3, HID:2 * HID].set(params["beta"])
    b = b.at[2:3, 2 * HID:3 * HID].set(params["b2"])
    b = b.at[2:3, 3 * HID:3 * HID + NCLS].set(params["bc"])
    b = b.at[3:4, :].set(params["b1"])
    return w, b


def _choose_tb(batch):
    """Batch-tile size: fill the MXU M dim (TB*L) while keeping >= 2 grid steps when possible."""
    return min(32, max(8, ((batch // 2) // 8) * 8))


def program_prediction(params, program_tokens, stroke, tb=None):
    """program_tokens: [B, L] int32; stroke: [B, S, HID] f32 -> logits [B, NCLS]."""
    # TODO(synk): the len(program_tokens)==0 -> zeros(1,32) branch of the PyTorch forward
    # is a Python-level dynamic-shape branch; only the non-empty path is implemented.
    batch = program_tokens.shape[0]
    if tb is None:
        tb = _choose_tb(batch)
    padded = ((batch + tb - 1) // tb) * tb
    pad = padded - batch
    if pad:
        program_tokens = jnp.concatenate(
            [program_tokens, jnp.zeros((pad, L), program_tokens.dtype)], axis=0)
        stroke = jnp.concatenate(
            [stroke, jnp.zeros((pad, S, HID), stroke.dtype)], axis=0)

    emb = params["emb_table"][program_tokens].astype(jnp.float32)      # [B, L, EMB]
    emb_tm = jnp.transpose(emb, (1, 0, 2))                             # time-major [L, B, EMB]
    stroke = stroke.astype(jnp.float32)
    w_slab, b_slab = pack_params(params)

    grid = (padded // tb,)
    grid_spec = pltpu.PrefetchScalarGridSpec(
        num_scalar_prefetch=0,
        grid=grid,
        in_specs=[
            pl.BlockSpec((L, tb, EMB), lambda i: (0, i, 0)),    # per-block program embeddings
            pl.BlockSpec((tb, S, HID), lambda i: (i, 0, 0)),    # per-block strokes
            pl.BlockSpec((W_ROWS, 128), lambda i: (0, 0)),      # weight slab: VMEM-resident
            pl.BlockSpec((B_ROWS, 128), lambda i: (0, 0)),      # bias slab: VMEM-resident
        ],
        out_specs=pl.BlockSpec((tb, NCLS), lambda i: (i, 0)),
    )
    logits = pl.pallas_call(
        program_prediction_kernel,
        out_shape=jax.ShapeDtypeStruct((padded, NCLS), jnp.float32),
        grid_spec=grid_spec,
        compiler_params=pltpu.CompilerParams(dimension_semantics=("parallel",)),
    )(emb_tm, stroke, w_slab, b_slab)
    return logits[:batch]                                              # [B, NCLS]


def init_params(key):
    ks = jax.random.split(key, 16)

    def unif(k, shape, fan_in):
        bound = 1.0 / (fan_in ** 0.5)
        return jax.random.uniform(k, shape, jnp.float32, -bound, bound)

    return dict(
        # ProgramEncoder
        emb_table=jax.random.normal(ks[0], (VOCAB, EMB), jnp.float32),
        w_ih=unif(ks[1], (4 * HID, EMB), HID),
        w_hh=unif(ks[2], (4 * HID, HID), HID),
        b_ih=unif(ks[3], (1, 4 * HID), HID),
        b_hh=unif(ks[4], (1, 4 * HID), HID),
        # MultiheadAttention
        in_w=unif(ks[5], (3 * HID, HID), HID),
        in_b=jnp.zeros((1, 3 * HID), jnp.float32),
        out_w=unif(ks[6], (HID, HID), HID),
        out_b=jnp.zeros((1, HID), jnp.float32),
        # LayerNorm
        gamma=jnp.ones((1, HID), jnp.float32),
        beta=jnp.zeros((1, HID), jnp.float32),
        # Feed-forward
        w1=unif(ks[7], (FF, HID), HID),
        b1=unif(ks[8], (1, FF), HID),
        w2=unif(ks[9], (HID, FF), FF),
        b2=unif(ks[10], (1, HID), FF),
        # Classifier
        wc=unif(ks[11], (NCLS, HID), HID),
        bc=unif(ks[12], (1, NCLS), HID),
    )


if __name__ == "__main__":
    key = jax.random.PRNGKey(0)
    pk, tk, sk = jax.random.split(key, 3)
    params = init_params(pk)

    BATCH = 32   # tb=16 -> grid of 2 blocks, so both v7x TensorCores get work
    program_tokens = jax.random.randint(tk, (BATCH, L), 0, VOCAB, dtype=jnp.int32)
    stroke = jax.random.normal(sk, (BATCH, S, HID), jnp.float32)   # x_dict['stroke'] per sample

    logits = program_prediction(params, program_tokens, stroke)
    jax.block_until_ready(logits)
    assert logits.shape == (BATCH, NCLS) and logits.dtype == jnp.float32
    assert bool(jnp.all(jnp.isfinite(logits)))
    print("KERNEL_OK")
</pallas_src>

<mosaic_0001>
module attributes {stable_mosaic.version = 11 : i64} {
  func.func @program_prediction_kernel(%arg0: i32, %arg1: memref<8x16x8xf32, #tpu.memory_space<vmem>>, %arg2: memref<16x16x32xf32, #tpu.memory_space<vmem>>, %arg3: memref<264x128xf32, #tpu.memory_space<vmem>>, %arg4: memref<8x128xf32, #tpu.memory_space<vmem>>, %arg5: memref<16x10xf32, #tpu.memory_space<vmem>>) attributes {dimension_semantics = [#tpu.dimension_semantics<parallel>], iteration_bounds = array<i64: 2>, scalar_prefetch = 0 : i64, scratch_operands = 0 : i64, tpu.core_type = #tpu.core_type<tc>, window_params = [{transform_indices = @transform_0, window_bounds = array<i64: 8, 16, 8>}, {transform_indices = @transform_1, window_bounds = array<i64: 16, 16, 32>}, {pipeline_mode = #tpu.pipeline_mode<synchronous>, transform_indices = @transform_2, window_bounds = array<i64: 264, 128>}, {pipeline_mode = #tpu.pipeline_mode<synchronous>, transform_indices = @transform_3, window_bounds = array<i64: 8, 128>}, {transform_indices = @transform_4, window_bounds = array<i64: 16, 10>}]} {
    %c0 = arith.constant 0 : index
    %c0_0 = arith.constant 0 : index
    %0 = vector.load %arg3[%c0, %c0_0] : memref<264x128xf32, #tpu.memory_space<vmem>>, vector<8x128xf32>
    %c8 = arith.constant 8 : index
    %c0_1 = arith.constant 0 : index
    %1 = vector.load %arg3[%c8, %c0_1] : memref<264x128xf32, #tpu.memory_space<vmem>>, vector<32x128xf32>
    %c40 = arith.constant 40 : index
    %c0_2 = arith.constant 0 : index
    %2 = vector.load %arg3[%c40, %c0_2] : memref<264x128xf32, #tpu.memory_space<vmem>>, vector<32x32xf32>
    %c40_3 = arith.constant 40 : index
    %c32 = arith.constant 32 : index
    %3 = vector.load %arg3[%c40_3, %c32] : memref<264x128xf32, #tpu.memory_space<vmem>>, vector<32x64xf32>
    %c40_4 = arith.constant 40 : index
    %c96 = arith.constant 96 : index
    %4 = vector.load %arg3[%c40_4, %c96] : memref<264x128xf32, #tpu.memory_space<vmem>>, vector<32x32xf32>
    %c72 = arith.constant 72 : index
    %c0_5 = arith.constant 0 : index
    %5 = vector.load %arg3[%c72, %c0_5] : memref<264x128xf32, #tpu.memory_space<vmem>>, vector<32x128xf32>
    %c104 = arith.constant 104 : index
    %c0_6 = arith.constant 0 : index
    %6 = vector.load %arg3[%c104, %c0_6] : memref<264x128xf32, #tpu.memory_space<vmem>>, vector<128x32xf32>
    %c232 = arith.constant 232 : index
    %c0_7 = arith.constant 0 : index
    %7 = vector.load %arg3[%c232, %c0_7] : memref<264x128xf32, #tpu.memory_space<vmem>>, vector<32x10xf32>
    %c0_8 = arith.constant 0 : index
    %c0_9 = arith.constant 0 : index
    %8 = vector.load %arg4[%c0_8, %c0_9] : memref<8x128xf32, #tpu.memory_space<vmem>>, vector<1x128xf32>
    %c1 = arith.constant 1 : index
    %c0_10 = arith.constant 0 : index
    %9 = vector.load %arg4[%c1, %c0_10] : memref<8x128xf32, #tpu.memory_space<vmem>>, vector<1x32xf32>
    %c1_11 = arith.constant 1 : index
    %c32_12 = arith.constant 32 : index
    %10 = vector.load %arg4[%c1_11, %c32_12] : memref<8x128xf32, #tpu.memory_space<vmem>>, vector<1x64xf32>
    %c1_13 = arith.constant 1 : index
    %c96_14 = arith.constant 96 : index
    %11 = vector.load %arg4[%c1_13, %c96_14] : memref<8x128xf32, #tpu.memory_space<vmem>>, vector<1x32xf32>
    %c2 = arith.constant 2 : index
    %c0_15 = arith.constant 0 : index
    %12 = vector.load %arg4[%c2, %c0_15] : memref<8x128xf32, #tpu.memory_space<vmem>>, vector<1x32xf32>
    %c2_16 = arith.constant 2 : index
    %c32_17 = arith.constant 32 : index
    %13 = vector.load %arg4[%c2_16, %c32_17] : memref<8x128xf32, #tpu.memory_space<vmem>>, vector<1x32xf32>
    %c2_18 = arith.constant 2 : index
    %c64 = arith.constant 64 : index
    %14 = vector.load %arg4[%c2_18, %c64] : memref<8x128xf32, #tpu.memory_space<vmem>>, vector<1x32xf32>
    %c2_19 = arith.constant 2 : index
    %c96_20 = arith.constant 96 : index
    %15 = vector.load %arg4[%c2_19, %c96_20] : memref<8x128xf32, #tpu.memory_space<vmem>>, vector<1x10xf32>
    %c3 = arith.constant 3 : index
    %c0_21 = arith.constant 0 : index
    %16 = vector.load %arg4[%c3, %c0_21] : memref<8x128xf32, #tpu.memory_space<vmem>>, vector<1x128xf32>
    %c0_22 = arith.constant 0 : index
    %c0_23 = arith.constant 0 : index
    %c0_24 = arith.constant 0 : index
    %17 = vector.load %arg1[%c0_22, %c0_23, %c0_24] : memref<8x16x8xf32, #tpu.memory_space<vmem>>, vector<8x16x8xf32>
    %18 = vector.shape_cast %17 : vector<8x16x8xf32> to vector<128x8xf32>
    %cst = arith.constant dense<0.000000e+00> : vector<128x128xf32>
    %19 = tpu.matmul %18, %0, %cst {dimension_numbers = #tpu.dot_dimension_numbers<[1], [0], [0], [1], [0, 0, 1, 1], [], []>} : vector<128x8xf32>, vector<8x128xf32>, vector<128x128xf32> -> vector<128x128xf32>
    %20 = vector.broadcast %8 : vector<1x128xf32> to vector<128x128xf32>
    %21 = arith.addf %19, %20 : vector<128x128xf32>
    %cst_25 = arith.constant 0.000000e+00 : f32
    %22 = vector.broadcast %cst_25 : f32 to vector<16x32xf32>
    %cst_26 = arith.constant 0.000000e+00 : f32
    %23 = vector.broadcast %cst_26 : f32 to vector<16x32xf32>
    %24 = vector.extract_strided_slice %21 {offsets = [0, 0], sizes = [16, 128], strides = [1, 1]} : vector<128x128xf32> to vector<16x128xf32>
    %cst_27 = arith.constant dense<0.000000e+00> : vector<16x128xf32>
    %25 = tpu.matmul %22, %1, %cst_27 {dimension_numbers = #tpu.dot_dimension_numbers<[1], [0], [0], [1], [0, 0, 1, 1], [], []>} : vector<16x32xf32>, vector<32x128xf32>, vector<16x128xf32> -> vector<16x128xf32>
    %26 = arith.addf %24, %25 : vector<16x128xf32>
    %27 = arith.negf %26 : vector<16x128xf32>
    %28 = math.exp %27 : vector<16x128xf32>
    %cst_28 = arith.constant 1.000000e+00 : f32
    %29 = vector.broadcast %cst_28 : f32 to vector<16x128xf32>
    %30 = arith.addf %29, %28 : vector<16x128xf32>
    %31 = arith.divf %29, %30 : vector<16x128xf32>
    %32 = vector.extract_strided_slice %26 {offsets = [0, 64], sizes = [16, 32], strides = [1, 1]} : vector<16x128xf32> to vector<16x32xf32>
    %33 = math.tanh %32 : vector<16x32xf32>
    %34 = vector.extract_strided_slice %31 {offsets = [0, 0], sizes = [16, 32], strides = [1, 1]} : vector<16x128xf32> to vector<16x32xf32>
    %35 = vector.extract_strided_slice %31 {offsets = [0, 32], sizes = [16, 32], strides = [1, 1]} : vector<16x128xf32> to vector<16x32xf32>
    %36 = vector.extract_strided_slice %31 {offsets = [0, 96], sizes = [16, 32], strides = [1, 1]} : vector<16x128xf32> to vector<16x32xf32>
    %37 = arith.mulf %35, %23 : vector<16x32xf32>
    %38 = arith.mulf %34, %33 : vector<16x32xf32>
    %39 = arith.addf %37, %38 : vector<16x32xf32>
    %40 = math.tanh %39 : vector<16x32xf32>
    %41 = arith.mulf %36, %40 : vector<16x32xf32>
    %42 = vector.extract_strided_slice %21 {offsets = [16, 0], sizes = [16, 128], strides = [1, 1]} : vector<128x128xf32> to vector<16x128xf32>
    %cst_29 = arith.constant dense<0.000000e+00> : vector<16x128xf32>
    %43 = tpu.matmul %41, %1, %cst_29 {dimension_numbers = #tpu.dot_dimension_numbers<[1], [0], [0], [1], [0, 0, 1, 1], [], []>} : vector<16x32xf32>, vector<32x128xf32>, vector<16x128xf32> -> vector<16x128xf32>
    %44 = arith.addf %42, %43 : vector<16x128xf32>
    %45 = arith.negf %44 : vector<16x128xf32>
    %46 = math.exp %45 : vector<16x128xf32>
    %cst_30 = arith.constant 1.000000e+00 : f32
    %47 = vector.broadcast %cst_30 : f32 to vector<16x128xf32>
    %48 = arith.addf %47, %46 : vector<16x128xf32>
    %49 = arith.divf %47, %48 : vector<16x128xf32>
    %50 = vector.extract_strided_slice %44 {offsets = [0, 64], sizes = [16, 32], strides = [1, 1]} : vector<16x128xf32> to vector<16x32xf32>
    %51 = math.tanh %50 : vector<16x32xf32>
    %52 = vector.extract_strided_slice %49 {offsets = [0, 0], sizes = [16, 32], strides = [1, 1]} : vector<16x128xf32> to vector<16x32xf32>
    %53 = vector.extract_strided_slice %49 {offsets = [0, 32], sizes = [16, 32], strides = [1, 1]} : vector<16x128xf32> to vector<16x32xf32>
    %54 = vector.extract_strided_slice %49 {offsets = [0, 96], sizes = [16, 32], strides = [1, 1]} : vector<16x128xf32> to vector<16x32xf32>
    %55 = arith.mulf %53, %39 : vector<16x32xf32>
    %56 = arith.mulf %52, %51 : vector<16x32xf32>
    %57 = arith.addf %55, %56 : vector<16x32xf32>
    %58 = math.tanh %57 : vector<16x32xf32>
    %59 = arith.mulf %54, %58 : vector<16x32xf32>
    %60 = vector.extract_strided_slice %21 {offsets = [32, 0], sizes = [16, 128], strides = [1, 1]} : vector<128x128xf32> to vector<16x128xf32>
    %cst_31 = arith.constant dense<0.000000e+00> : vector<16x128xf32>
    %61 = tpu.matmul %59, %1, %cst_31 {dimension_numbers = #tpu.dot_dimension_numbers<[1], [0], [0], [1], [0, 0, 1, 1], [], []>} : vector<16x32xf32>, vector<32x128xf32>, vector<16x128xf32> -> vector<16x128xf32>
    %62 = arith.addf %60, %61 : vector<16x128xf32>
    %63 = arith.negf %62 : vector<16x128xf32>
    %64 = math.exp %63 : vector<16x128xf32>
    %cst_32 = arith.constant 1.000000e+00 : f32
    %65 = vector.broadcast %cst_32 : f32 to vector<16x128xf32>
    %66 = arith.addf %65, %64 : vector<16x128xf32>
    %67 = arith.divf %65, %66 : vector<16x128xf32>
    %68 = vector.extract_strided_slice %62 {offsets = [0, 64], sizes = [16, 32], strides = [1, 1]} : vector<16x128xf32> to vector<16x32xf32>
    %69 = math.tanh %68 : vector<16x32xf32>
    %70 = vector.extract_strided_slice %67 {offsets = [0, 0], sizes = [16, 32], strides = [1, 1]} : vector<16x128xf32> to vector<16x32xf32>
    %71 = vector.extract_strided_slice %67 {offsets = [0, 32], sizes = [16, 32], strides = [1, 1]} : vector<16x128xf32> to vector<16x32xf32>
    %72 = vector.extract_strided_slice %67 {offsets = [0, 96], sizes = [16, 32], strides = [1, 1]} : vector<16x128xf32> to vector<16x32xf32>
    %73 = arith.mulf %71, %57 : vector<16x32xf32>
    %74 = arith.mulf %70, %69 : vector<16x32xf32>
    %75 = arith.addf %73, %74 : vector<16x32xf32>
    %76 = math.tanh %75 : vector<16x32xf32>
    %77 = arith.mulf %72, %76 : vector<16x32xf32>
    %78 = vector.extract_strided_slice %21 {offsets = [48, 0], sizes = [16, 128], strides = [1, 1]} : vector<128x128xf32> to vector<16x128xf32>
    %cst_33 = arith.constant dense<0.000000e+00> : vector<16x128xf32>
    %79 = tpu.matmul %77, %1, %cst_33 {dimension_numbers = #tpu.dot_dimension_numbers<[1], [0], [0], [1], [0, 0, 1, 1], [], []>} : vector<16x32xf32>, vector<32x128xf32>, vector<16x128xf32> -> vector<16x128xf32>
    %80 = arith.addf %78, %79 : vector<16x128xf32>
    %81 = arith.negf %80 : vector<16x128xf32>
    %82 = math.exp %81 : vector<16x128xf32>
    %cst_34 = arith.constant 1.000000e+00 : f32
    %83 = vector.broadcast %cst_34 : f32 to vector<16x128xf32>
    %84 = arith.addf %83, %82 : vector<16x128xf32>
    %85 = arith.divf %83, %84 : vector<16x128xf32>
    %86 = vector.extract_strided_slice %80 {offsets = [0, 64], sizes = [16, 32], strides = [1, 1]} : vector<16x128xf32> to vector<16x32xf32>
    %87 = math.tanh %86 : vector<16x32xf32>
    %88 = vector.extract_strided_slice %85 {offsets = [0, 0], sizes = [16, 32], strides = [1, 1]} : vector<16x128xf32> to vector<16x32xf32>
    %89 = vector.extract_strided_slice %85 {offsets = [0, 32], sizes = [16, 32], strides = [1, 1]} : vector<16x128xf32> to vector<16x32xf32>
    %90 = vector.extract_strided_slice %85 {offsets = [0, 96], sizes = [16, 32], strides = [1, 1]} : vector<16x128xf32> to vector<16x32xf32>
    %91 = arith.mulf %89, %75 : vector<16x32xf32>
    %92 = arith.mulf %88, %87 : vector<16x32xf32>
    %93 = arith.addf %91, %92 : vector<16x32xf32>
    %94 = math.tanh %93 : vector<16x32xf32>
    %95 = arith.mulf %90, %94 : vector<16x32xf32>
    %96 = vector.extract_strided_slice %21 {offsets = [64, 0], sizes = [16, 128], strides = [1, 1]} : vector<128x128xf32> to vector<16x128xf32>
    %cst_35 = arith.constant dense<0.000000e+00> : vector<16x128xf32>
    %97 = tpu.matmul %95, %1, %cst_35 {dimension_numbers = #tpu.dot_dimension_numbers<[1], [0], [0], [1], [0, 0, 1, 1], [], []>} : vector<16x32xf32>, vector<32x128xf32>, vector<16x128xf32> -> vector<16x128xf32>
    %98 = arith.addf %96, %97 : vector<16x128xf32>
    %99 = arith.negf %98 : vector<16x128xf32>
    %100 = math.exp %99 : vector<16x128xf32>
    %cst_36 = arith.constant 1.000000e+00 : f32
    %101 = vector.broadcast %cst_36 : f32 to vector<16x128xf32>
    %102 = arith.addf %101, %100 : vector<16x128xf32>
    %103 = arith.divf %101, %102 : vector<16x128xf32>
    %104 = vector.extract_strided_slice %98 {offsets = [0, 64], sizes = [16, 32], strides = [1, 1]} : vector<16x128xf32> to vector<16x32xf32>
    %105 = math.tanh %104 : vector<16x32xf32>
    %106 = vector.extract_strided_slice %103 {offsets = [0, 0], sizes = [16, 32], strides = [1, 1]} : vector<16x128xf32> to vector<16x32xf32>
    %107 = vector.extract_strided_slice %103 {offsets = [0, 32], sizes = [16, 32], strides = [1, 1]} : vector<16x128xf32> to vector<16x32xf32>
    %108 = vector.extract_strided_slice %103 {offsets = [0, 96], sizes = [16, 32], strides = [1, 1]} : vector<16x128xf32> to vector<16x32xf32>
    %109 = arith.mulf %107, %93 : vector<16x32xf32>
    %110 = arith.mulf %106, %105 : vector<16x32xf32>
    %111 = arith.addf %109, %110 : vector<16x32xf32>
    %112 = math.tanh %111 : vector<16x32xf32>
    %113 = arith.mulf %108, %112 : vector<16x32xf32>
    %114 = vector.extract_strided_slice %21 {offsets = [80, 0], sizes = [16, 128], strides = [1, 1]} : vector<128x128xf32> to vector<16x128xf32>
    %cst_37 = arith.constant dense<0.000000e+00> : vector<16x128xf32>
    %115 = tpu.matmul %113, %1, %cst_37 {dimension_numbers = #tpu.dot_dimension_numbers<[1], [0], [0], [1], [0, 0, 1, 1], [], []>} : vector<16x32xf32>, vector<32x128xf32>, vector<16x128xf32> -> vector<16x128xf32>
    %116 = arith.addf %114, %115 : vector<16x128xf32>
    %117 = arith.negf %116 : vector<16x128xf32>
    %118 = math.exp %117 : vector<16x128xf32>
    %cst_38 = arith.constant 1.000000e+00 : f32
    %119 = vector.broadcast %cst_38 : f32 to vector<16x128xf32>
    %120 = arith.addf %119, %118 : vector<16x128xf32>
    %121 = arith.divf %119, %120 : vector<16x128xf32>
    %122 = vector.extract_strided_slice %116 {offsets = [0, 64], sizes = [16, 32], strides = [1, 1]} : vector<16x128xf32> to vector<16x32xf32>
    %123 = math.tanh %122 : vector<16x32xf32>
    %124 = vector.extract_strided_slice %121 {offsets = [0, 0], sizes = [16, 32], strides = [1, 1]} : vector<16x128xf32> to vector<16x32xf32>
    %125 = vector.extract_strided_slice %121 {offsets = [0, 32], sizes = [16, 32], strides = [1, 1]} : vector<16x128xf32> to vector<16x32xf32>
    %126 = vector.extract_strided_slice %121 {offsets = [0, 96], sizes = [16, 32], strides = [1, 1]} : vector<16x128xf32> to vector<16x32xf32>
    %127 = arith.mulf %125, %111 : vector<16x32xf32>
    %128 = arith.mulf %124, %123 : vector<16x32xf32>
    %129 = arith.addf %127, %128 : vector<16x32xf32>
    %130 = math.tanh %129 : vector<16x32xf32>
    %131 = arith.mulf %126, %130 : vector<16x32xf32>
    %132 = vector.extract_strided_slice %21 {offsets = [96, 0], sizes = [16, 128], strides = [1, 1]} : vector<128x128xf32> to vector<16x128xf32>
    %cst_39 = arith.constant dense<0.000000e+00> : vector<16x128xf32>
    %133 = tpu.matmul %131, %1, %cst_39 {dimension_numbers = #tpu.dot_dimension_numbers<[1], [0], [0], [1], [0, 0, 1, 1], [], []>} : vector<16x32xf32>, vector<32x128xf32>, vector<16x128xf32> -> vector<16x128xf32>
    %134 = arith.addf %132, %133 : vector<16x128xf32>
    %135 = arith.negf %134 : vector<16x128xf32>
    %136 = math.exp %135 : vector<16x128xf32>
    %cst_40 = arith.constant 1.000000e+00 : f32
    %137 = vector.broadcast %cst_40 : f32 to vector<16x128xf32>
    %138 = arith.addf %137, %136 : vector<16x128xf32>
    %139 = arith.divf %137, %138 : vector<16x128xf32>
    %140 = vector.extract_strided_slice %134 {offsets = [0, 64], sizes = [16, 32], strides = [1, 1]} : vector<16x128xf32> to vector<16x32xf32>
    %141 = math.tanh %140 : vector<16x32xf32>
    %142 = vector.extract_strided_slice %139 {offsets = [0, 0], sizes = [16, 32], strides = [1, 1]} : vector<16x128xf32> to vector<16x32xf32>
    %143 = vector.extract_strided_slice %139 {offsets = [0, 32], sizes = [16, 32], strides = [1, 1]} : vector<16x128xf32> to vector<16x32xf32>
    %144 = vector.extract_strided_slice %139 {offsets = [0, 96], sizes = [16, 32], strides = [1, 1]} : vector<16x128xf32> to vector<16x32xf32>
    %145 = arith.mulf %143, %129 : vector<16x32xf32>
    %146 = arith.mulf %142, %141 : vector<16x32xf32>
    %147 = arith.addf %145, %146 : vector<16x32xf32>
    %148 = math.tanh %147 : vector<16x32xf32>
    %149 = arith.mulf %144, %148 : vector<16x32xf32>
    %150 = vector.extract_strided_slice %21 {offsets = [112, 0], sizes = [16, 128], strides = [1, 1]} : vector<128x128xf32> to vector<16x128xf32>
    %cst_41 = arith.constant dense<0.000000e+00> : vector<16x128xf32>
    %151 = tpu.matmul %149, %1, %cst_41 {dimension_numbers = #tpu.dot_dimension_numbers<[1], [0], [0], [1], [0, 0, 1, 1], [], []>} : vector<16x32xf32>, vector<32x128xf32>, vector<16x128xf32> -> vector<16x128xf32>
    %152 = arith.addf %150, %151 : vector<16x128xf32>
    %153 = arith.negf %152 : vector<16x128xf32>
    %154 = math.exp %153 : vector<16x128xf32>
    %cst_42 = arith.constant 1.000000e+00 : f32
    %155 = vector.broadcast %cst_42 : f32 to vector<16x128xf32>
    %156 = arith.addf %155, %154 : vector<16x128xf32>
    %157 = arith.divf %155, %156 : vector<16x128xf32>
    %158 = vector.extract_strided_slice %152 {offsets = [0, 64], sizes = [16, 32], strides = [1, 1]} : vector<16x128xf32> to vector<16x32xf32>
    %159 = math.tanh %158 : vector<16x32xf32>
    %160 = vector.extract_strided_slice %157 {offsets = [0, 0], sizes = [16, 32], strides = [1, 1]} : vector<16x128xf32> to vector<16x32xf32>
    %161 = vector.extract_strided_slice %157 {offsets = [0, 32], sizes = [16, 32], strides = [1, 1]} : vector<16x128xf32> to vector<16x32xf32>
    %162 = vector.extract_strided_slice %157 {offsets = [0, 96], sizes = [16, 32], strides = [1, 1]} : vector<16x128xf32> to vector<16x32xf32>
    %163 = arith.mulf %161, %147 : vector<16x32xf32>
    %164 = arith.mulf %160, %159 : vector<16x32xf32>
    %165 = arith.addf %163, %164 : vector<16x32xf32>
    %166 = math.tanh %165 : vector<16x32xf32>
    %167 = arith.mulf %162, %166 : vector<16x32xf32>
    %168 = vector.shape_cast %41 : vector<16x32xf32> to vector<1x16x32xf32>
    %169 = vector.shape_cast %59 : vector<16x32xf32> to vector<1x16x32xf32>
    %170 = vector.shape_cast %77 : vector<16x32xf32> to vector<1x16x32xf32>
    %171 = vector.shape_cast %95 : vector<16x32xf32> to vector<1x16x32xf32>
    %172 = vector.shape_cast %113 : vector<16x32xf32> to vector<1x16x32xf32>
    %173 = vector.shape_cast %131 : vector<16x32xf32> to vector<1x16x32xf32>
    %174 = vector.shape_cast %149 : vector<16x32xf32> to vector<1x16x32xf32>
    %175 = vector.shape_cast %167 : vector<16x32xf32> to vector<1x16x32xf32>
    %176 = tpu.concatenate %168, %169, %170, %171, %172, %173, %174, %175 in 0 : vector<1x16x32xf32>, vector<1x16x32xf32>, vector<1x16x32xf32>, vector<1x16x32xf32>, vector<1x16x32xf32>, vector<1x16x32xf32>, vector<1x16x32xf32>, vector<1x16x32xf32> -> vector<8x16x32xf32>
    %177 = tpu.transpose %176, [1, 0, 2] : vector<8x16x32xf32> -> vector<16x8x32xf32>
    %178 = vector.shape_cast %177 : vector<16x8x32xf32> to vector<128x32xf32>
    %c0_43 = arith.constant 0 : index
    %c0_44 = arith.constant 0 : index
    %c0_45 = arith.constant 0 : index
    %179 = vector.load %arg2[%c0_43, %c0_44, %c0_45] : memref<16x16x32xf32, #tpu.memory_space<vmem>>, vector<16x16x32xf32>
    %180 = vector.shape_cast %179 : vector<16x16x32xf32> to vector<256x32xf32>
    %cst_46 = arith.constant dense<0.000000e+00> : vector<128x32xf32>
    %181 = tpu.matmul %178, %2, %cst_46 {dimension_numbers = #tpu.dot_dimension_numbers<[1], [0], [0], [1], [0, 0, 1, 1], [], []>} : vector<128x32xf32>, vector<32x32xf32>, vector<128x32xf32> -> vector<128x32xf32>
    %182 = vector.broadcast %9 : vector<1x32xf32> to vector<128x32xf32>
    %183 = arith.addf %181, %182 : vector<128x32xf32>
    %cst_47 = arith.constant 0.353553385 : f32
    %184 = vector.broadcast %cst_47 : f32 to vector<128x32xf32>
    %185 = arith.mulf %183, %184 : vector<128x32xf32>
    %cst_48 = arith.constant dense<0.000000e+00> : vector<256x64xf32>
    %186 = tpu.matmul %180, %3, %cst_48 {dimension_numbers = #tpu.dot_dimension_numbers<[1], [0], [0], [1], [0, 0, 1, 1], [], []>} : vector<256x32xf32>, vector<32x64xf32>, vector<256x64xf32> -> vector<256x64xf32>
    %187 = vector.broadcast %10 : vector<1x64xf32> to vector<256x64xf32>
    %188 = arith.addf %186, %187 : vector<256x64xf32>
    %189 = vector.shape_cast %185 : vector<128x32xf32> to vector<16x8x32xf32>
    %190 = vector.extract_strided_slice %188 {offsets = [0, 0], sizes = [256, 32], strides = [1, 1]} : vector<256x64xf32> to vector<256x32xf32>
    %191 = vector.shape_cast %190 : vector<256x32xf32> to vector<16x16x32xf32>
    %192 = vector.extract_strided_slice %188 {offsets = [0, 32], sizes = [256, 32], strides = [1, 1]} : vector<256x64xf32> to vector<256x32xf32>
    %193 = vector.shape_cast %192 : vector<256x32xf32> to vector<16x16x32xf32>
    %194 = vector.extract_strided_slice %189 {offsets = [0, 0, 0], sizes = [16, 8, 8], strides = [1, 1, 1]} : vector<16x8x32xf32> to vector<16x8x8xf32>
    %195 = vector.extract_strided_slice %191 {offsets = [0, 0, 0], sizes = [16, 16, 8], strides = [1, 1, 1]} : vector<16x16x32xf32> to vector<16x16x8xf32>
    %cst_49 = arith.constant dense<0.000000e+00> : vector<16x8x16xf32>
    %196 = tpu.matmul %194, %195, %cst_49 {dimension_numbers = #tpu.dot_dimension_numbers<[2], [2], [1], [1], [0, 0, 0, 1, 1, 1], [0], [0]>} : vector<16x8x8xf32>, vector<16x16x8xf32>, vector<16x8x16xf32> -> vector<16x8x16xf32>
    %197 = vector.extract_strided_slice %189 {offsets = [0, 0, 8], sizes = [16, 8, 8], strides = [1, 1, 1]} : vector<16x8x32xf32> to vector<16x8x8xf32>
    %198 = vector.extract_strided_slice %191 {offsets = [0, 0, 8], sizes = [16, 16, 8], strides = [1, 1, 1]} : vector<16x16x32xf32> to vector<16x16x8xf32>
    %cst_50 = arith.constant dense<0.000000e+00> : vector<16x8x16xf32>
    %199 = tpu.matmul %197, %198, %cst_50 {dimension_numbers = #tpu.dot_dimension_numbers<[2], [2], [1], [1], [0, 0, 0, 1, 1, 1], [0], [0]>} : vector<16x8x8xf32>, vector<16x16x8xf32>, vector<16x8x16xf32> -> vector<16x8x16xf32>
    %200 = vector.extract_strided_slice %189 {offsets = [0, 0, 16], sizes = [16, 8, 8], strides = [1, 1, 1]} : vector<16x8x32xf32> to vector<16x8x8xf32>
    %201 = vector.extract_strided_slice %191 {offsets = [0, 0, 16], sizes = [16, 16, 8], strides = [1, 1, 1]} : vector<16x16x32xf32> to vector<16x16x8xf32>
    %cst_51 = arith.constant dense<0.000000e+00> : vector<16x8x16xf32>
    %202 = tpu.matmul %200, %201, %cst_51 {dimension_numbers = #tpu.dot_dimension_numbers<[2], [2], [1], [1], [0, 0, 0, 1, 1, 1], [0], [0]>} : vector<16x8x8xf32>, vector<16x16x8xf32>, vector<16x8x16xf32> -> vector<16x8x16xf32>
    %203 = vector.extract_strided_slice %189 {offsets = [0, 0, 24], sizes = [16, 8, 8], strides = [1, 1, 1]} : vector<16x8x32xf32> to vector<16x8x8xf32>
    %204 = vector.extract_strided_slice %191 {offsets = [0, 0, 24], sizes = [16, 16, 8], strides = [1, 1, 1]} : vector<16x16x32xf32> to vector<16x16x8xf32>
    %cst_52 = arith.constant dense<0.000000e+00> : vector<16x8x16xf32>
    %205 = tpu.matmul %203, %204, %cst_52 {dimension_numbers = #tpu.dot_dimension_numbers<[2], [2], [1], [1], [0, 0, 0, 1, 1, 1], [0], [0]>} : vector<16x8x8xf32>, vector<16x16x8xf32>, vector<16x8x16xf32> -> vector<16x8x16xf32>
    %206 = tpu.concatenate %196, %199, %202, %205 in 1 : vector<16x8x16xf32>, vector<16x8x16xf32>, vector<16x8x16xf32>, vector<16x8x16xf32> -> vector<16x32x16xf32>
    %cst_53 = arith.constant dense<0xFF800000> : vector<16x32xf32>
    %207 = vector.multi_reduction <maximumf>, %206, %cst_53 [2] : vector<16x32x16xf32> to vector<16x32xf32>
    %208 = vector.shape_cast %207 : vector<16x32xf32> to vector<16x32x1xf32>
    %209 = vector.broadcast %208 : vector<16x32x1xf32> to vector<16x32x16xf32>
    %210 = arith.subf %206, %209 : vector<16x32x16xf32>
    %211 = math.exp %210 : vector<16x32x16xf32>
    %cst_54 = arith.constant dense<0.000000e+00> : vector<16x32xf32>
    %212 = vector.multi_reduction <add>, %211, %cst_54 [2] : vector<16x32x16xf32> to vector<16x32xf32>
    %213 = vector.shape_cast %212 : vector<16x32xf32> to vector<16x32x1xf32>
    %214 = vector.broadcast %213 : vector<16x32x1xf32> to vector<16x32x16xf32>
    %215 = arith.divf %211, %214 : vector<16x32x16xf32>
    %216 = vector.extract_strided_slice %215 {offsets = [0, 0, 0], sizes = [16, 8, 16], strides = [1, 1, 1]} : vector<16x32x16xf32> to vector<16x8x16xf32>
    %217 = vector.extract_strided_slice %193 {offsets = [0, 0, 0], sizes = [16, 16, 8], strides = [1, 1, 1]} : vector<16x16x32xf32> to vector<16x16x8xf32>
    %cst_55 = arith.constant dense<0.000000e+00> : vector<16x8x8xf32>
    %218 = tpu.matmul %216, %217, %cst_55 {dimension_numbers = #tpu.dot_dimension_numbers<[2], [1], [1], [2], [0, 0, 0, 1, 1, 2], [0], [0]>} : vector<16x8x16xf32>, vector<16x16x8xf32>, vector<16x8x8xf32> -> vector<16x8x8xf32>
    %219 = vector.extract_strided_slice %215 {offsets = [0, 8, 0], sizes = [16, 8, 16], strides = [1, 1, 1]} : vector<16x32x16xf32> to vector<16x8x16xf32>
    %220 = vector.extract_strided_slice %193 {offsets = [0, 0, 8], sizes = [16, 16, 8], strides = [1, 1, 1]} : vector<16x16x32xf32> to vector<16x16x8xf32>
    %cst_56 = arith.constant dense<0.000000e+00> : vector<16x8x8xf32>
    %221 = tpu.matmul %219, %220, %cst_56 {dimension_numbers = #tpu.dot_dimension_numbers<[2], [1], [1], [2], [0, 0, 0, 1, 1, 2], [0], [0]>} : vector<16x8x16xf32>, vector<16x16x8xf32>, vector<16x8x8xf32> -> vector<16x8x8xf32>
    %222 = vector.extract_strided_slice %215 {offsets = [0, 16, 0], sizes = [16, 8, 16], strides = [1, 1, 1]} : vector<16x32x16xf32> to vector<16x8x16xf32>
    %223 = vector.extract_strided_slice %193 {offsets = [0, 0, 16], sizes = [16, 16, 8], strides = [1, 1, 1]} : vector<16x16x32xf32> to vector<16x16x8xf32>
    %cst_57 = arith.constant dense<0.000000e+00> : vector<16x8x8xf32>
    %224 = tpu.matmul %222, %223, %cst_57 {dimension_numbers = #tpu.dot_dimension_numbers<[2], [1], [1], [2], [0, 0, 0, 1, 1, 2], [0], [0]>} : vector<16x8x16xf32>, vector<16x16x8xf32>, vector<16x8x8xf32> -> vector<16x8x8xf32>
    %225 = vector.extract_strided_slice %215 {offsets = [0, 24, 0], sizes = [16, 8, 16], strides = [1, 1, 1]} : vector<16x32x16xf32> to vector<16x8x16xf32>
    %226 = vector.extract_strided_slice %193 {offsets = [0, 0, 24], sizes = [16, 16, 8], strides = [1, 1, 1]} : vector<16x16x32xf32> to vector<16x16x8xf32>
    %cst_58 = arith.constant dense<0.000000e+00> : vector<16x8x8xf32>
    %227 = tpu.matmul %225, %226, %cst_58 {dimension_numbers = #tpu.dot_dimension_numbers<[2], [1], [1], [2], [0, 0, 0, 1, 1, 2], [0], [0]>} : vector<16x8x16xf32>, vector<16x16x8xf32>, vector<16x8x8xf32> -> vector<16x8x8xf32>
    %228 = tpu.concatenate %218, %221, %224, %227 in 2 : vector<16x8x8xf32>, vector<16x8x8xf32>, vector<16x8x8xf32>, vector<16x8x8xf32> -> vector<16x8x32xf32>
    %229 = vector.shape_cast %228 : vector<16x8x32xf32> to vector<128x32xf32>
    %cst_59 = arith.constant dense<0.000000e+00> : vector<128x32xf32>
    %230 = tpu.matmul %229, %4, %cst_59 {dimension_numbers = #tpu.dot_dimension_numbers<[1], [0], [0], [1], [0, 0, 1, 1], [], []>} : vector<128x32xf32>, vector<32x32xf32>, vector<128x32xf32> -> vector<128x32xf32>
    %231 = vector.broadcast %11 : vector<1x32xf32> to vector<128x32xf32>
    %232 = arith.addf %230, %231 : vector<128x32xf32>
    %233 = arith.addf %178, %232 : vector<128x32xf32>
    %cst_60 = arith.constant dense<0.000000e+00> : vector<128xf32>
    %234 = vector.multi_reduction <add>, %233, %cst_60 [1] : vector<128x32xf32> to vector<128xf32>
    %235 = vector.shape_cast %234 : vector<128xf32> to vector<128x1xf32>
    %cst_61 = arith.constant 3.200000e+01 : f32
    %236 = vector.broadcast %cst_61 : f32 to vector<128x1xf32>
    %237 = arith.divf %235, %236 : vector<128x1xf32>
    %238 = vector.broadcast %237 : vector<128x1xf32> to vector<128x32xf32>
    %239 = arith.subf %233, %238 : vector<128x32xf32>
    %240 = arith.mulf %239, %239 : vector<128x32xf32>
    %cst_62 = arith.constant dense<0.000000e+00> : vector<128xf32>
    %241 = vector.multi_reduction <add>, %240, %cst_62 [1] : vector<128x32xf32> to vector<128xf32>
    %242 = vector.shape_cast %241 : vector<128xf32> to vector<128x1xf32>
    %cst_63 = arith.constant 3.200000e+01 : f32
    %243 = vector.broadcast %cst_63 : f32 to vector<128x1xf32>
    %244 = arith.divf %242, %243 : vector<128x1xf32>
    %245 = vector.broadcast %237 : vector<128x1xf32> to vector<128x32xf32>
    %246 = arith.subf %233, %245 : vector<128x32xf32>
    %cst_64 = arith.constant 9.99999974E-6 : f32
    %247 = vector.broadcast %cst_64 : f32 to vector<128x1xf32>
    %248 = arith.addf %244, %247 : vector<128x1xf32>
    %249 = math.rsqrt %248 : vector<128x1xf32>
    %250 = vector.broadcast %249 : vector<128x1xf32> to vector<128x32xf32>
    %251 = arith.mulf %246, %250 : vector<128x32xf32>
    %252 = vector.broadcast %12 : vector<1x32xf32> to vector<128x32xf32>
    %253 = arith.mulf %251, %252 : vector<128x32xf32>
    %254 = vector.broadcast %13 : vector<1x32xf32> to vector<128x32xf32>
    %255 = arith.addf %253, %254 : vector<128x32xf32>
    %cst_65 = arith.constant dense<0.000000e+00> : vector<128x128xf32>
    %256 = tpu.matmul %255, %5, %cst_65 {dimension_numbers = #tpu.dot_dimension_numbers<[1], [0], [0], [1], [0, 0, 1, 1], [], []>} : vector<128x32xf32>, vector<32x128xf32>, vector<128x128xf32> -> vector<128x128xf32>
    %257 = vector.broadcast %16 : vector<1x128xf32> to vector<128x128xf32>
    %258 = arith.addf %256, %257 : vector<128x128xf32>
    %cst_66 = arith.constant 0.000000e+00 : f32
    %259 = vector.broadcast %cst_66 : f32 to vector<128x128xf32>
    %260 = arith.maximumf %258, %259 : vector<128x128xf32>
    %cst_67 = arith.constant dense<0.000000e+00> : vector<128x32xf32>
    %261 = tpu.matmul %260, %6, %cst_67 {dimension_numbers = #tpu.dot_dimension_numbers<[1], [0], [0], [1], [0, 0, 1, 1], [], []>} : vector<128x128xf32>, vector<128x32xf32>, vector<128x32xf32> -> vector<128x32xf32>
    %262 = vector.broadcast %14 : vector<1x32xf32> to vector<128x32xf32>
    %263 = arith.addf %261, %262 : vector<128x32xf32>
    %264 = vector.shape_cast %263 : vector<128x32xf32> to vector<16x8x32xf32>
    %cst_68 = arith.constant dense<0.000000e+00> : vector<16x32xf32>
    %265 = vector.multi_reduction <add>, %264, %cst_68 [1] : vector<16x8x32xf32> to vector<16x32xf32>
    %cst_69 = arith.constant 8.000000e+00 : f32
    %266 = vector.broadcast %cst_69 : f32 to vector<16x32xf32>
    %267 = arith.divf %265, %266 : vector<16x32xf32>
    %cst_70 = arith.constant dense<0.000000e+00> : vector<16x10xf32>
    %268 = tpu.matmul %267, %7, %cst_70 {dimension_numbers = #tpu.dot_dimension_numbers<[1], [0], [0], [1], [0, 0, 1, 1], [], []>} : vector<16x32xf32>, vector<32x10xf32>, vector<16x10xf32> -> vector<16x10xf32>
    %269 = vector.broadcast %15 : vector<1x10xf32> to vector<16x10xf32>
    %270 = arith.addf %268, %269 : vector<16x10xf32>
    %c0_71 = arith.constant 0 : index
    %c0_72 = arith.constant 0 : index
    %271 = vector.load %arg5[%c0_71, %c0_72] : memref<16x10xf32, #tpu.memory_space<vmem>>, vector<16x10xf32>
    tpu.vector_store %arg5[%c0_71, %c0_72], %270 {strides = array<i32>} : memref<16x10xf32, #tpu.memory_space<vmem>>, vector<16x10xf32>,
    return
  }
  func.func @transform_0(%arg0: i32) -> (i32, i32, i32) {
    %c0_i32 = arith.constant 0 : i32
    %c0_i32_0 = arith.constant 0 : i32
    %c0_i32_1 = arith.constant 0 : i32
    return %c0_i32, %arg0, %c0_i32_0 : i32, i32, i32
  }
  func.func @transform_1(%arg0: i32) -> (i32, i32, i32) {
    %c0_i32 = arith.constant 0 : i32
    %c0_i32_0 = arith.constant 0 : i32
    %c0_i32_1 = arith.constant 0 : i32
    return %arg0, %c0_i32, %c0_i32_0 : i32, i32, i32
  }
  func.func @transform_2(%arg0: i32) -> (i32, i32) {
    %c0_i32 = arith.constant 0 : i32
    %c0_i32_0 = arith.constant 0 : i32
    %c0_i32_1 = arith.constant 0 : i32
    return %c0_i32, %c0_i32_0 : i32, i32
  }
  func.func @transform_3(%arg0: i32) -> (i32, i32) {
    %c0_i32 = arith.constant 0 : i32
    %c0_i32_0 = arith.constant 0 : i32
    %c0_i32_1 = arith.constant 0 : i32
    return %c0_i32, %c0_i32_0 : i32, i32
  }
  func.func @transform_4(%arg0: i32) -> (i32, i32) {
    %c0_i32 = arith.constant 0 : i32
    %c0_i32_0 = arith.constant 0 : i32
    return %arg0, %c0_i32 : i32, i32
  }
}

</mosaic_0001>

<bundles_post_ra>
// kernel: tpu_custom_call.1
= control target key start
LH: loop header
LB: loop body
LE: loop exit
PB: predicated region body
PF: predicated region fallthrough
CT: control target
= control target key end

     0   :  { %9 = vsyncpa [#allocation4], 0  ;;  %s14569_s0 = inlined_call_operand.vmem [shape: f32[8,32,8], index: 0, kind: input, shape index: {}]   ;;  %s14570_s1 = inlined_call_operand.hbm [shape: f32[32,16,32], index: 1, kind: input, shape index: {}]   ;;  %s14571_s2 = inlined_call_operand.vmem [shape: f32[264,128], index: 2, kind: input, shape index: {}]   ;;  %s14572_s3 = inlined_call_operand.vmem [shape: f32[8,128], index: 3, kind: input, shape index: {}]   ;;  %s14573_s4 = inlined_call_operand.vmem [shape: f32[32,10], index: 4, kind: output, shape index: {}]  }
   0x1   :  { %11 = vsyncpa [#allocation4 + $0x1], 0  ;;  %s10028_s15 = smov 0   ;;  %s10030_s16 = smov 0  }
   0x2   :  { %s10032_s17 = smov 0   ;;  %s10034_s18 = smov 0  }
   0x3 LB: > { %s8674_s19 = sadd.s32 4294967295, %s9982_s18   ;;  %s10048_s20 = sadd.s32 1, %s9982_s18   ;;  %s9982_s18 = sphi %s10034_s18, %s15275_s18   ;;  %s9978_s17 = sphi %s10032_s17, %s15274_s17   ;;  %s9974_s16 = sphi %s10030_s16, %s15273_s16   ;;  %s9970_s15 = sphi %s10028_s15, %s15272_s15  }
   0x4   : > { %s21_s21 = ssub.s32 %s9982_s18, %s10048_s20  ;;  %s24_s22 = sadd.s32 1, %s9978_s17 }
   0x5   : > { %p22_p0 = scmp.eq.s32.totalorder %s21_s21, 0  ;;  %p31_p1 = scmp.ne.s32.totalorder %s9978_s17, %s9974_s16 }
   0x6   : > { %p32_p2 = scmp.eq.s32.totalorder %s9982_s18, 0  ;;  %p63_p3 = scmp.ne.s32.totalorder %s9974_s16, %s9970_s15 }
   0x7   : > { %s10058_s23 = scalar_select %p22_p0, %s9978_s17, %s24_s22  }
   0x8   : > { %p10060_p4 = por %p32_p2, %p31_p1  ;;  %p64_p5 = scmp.eq.s32.totalorder %s8674_s19, 0 }
   0x9   : > { %p8677_p7 = scmp.ge.s32.totalorder %s9982_s18, 2 }
   0xa   : > { %p10066_p6 = por %p64_p5, %p63_p3 }
   0xb   : > { %157 = sbr.rel (%p8677_p7) target bundleno = 53 (0x35), region = 24 }
  0x10   : > { %160 = sbr.rel (!%p10060_p4) target bundleno = 36 (0x24), region = 28  ;;  %s162_s26 = sand.u32 (%p10060_p4), 1, %s9978_s17  }
  0x11   : > { %s9076_s27 = sshll.u32 (%p10060_p4), %s9982_s18, 4  ;;  %s8678_s28 = sshll.u32 (%p10060_p4), %s162_s26, 7 }
  0x12   : > { %s10078_s5 = scalar_lea.vmem (%p10060_p4), %s14569_s0, %s9076_s27  ;;  %s164_s6 = scalar_lea.vmem (%p10060_p4), [#allocation2], %s8678_s28 }
  0x13   : > { %v226_v0 = vld [vmem:[%s10078_s5] sm:$0xff] (%p10060_p4)  ;;  %v228_v1 = vld [vmem:[%s10078_s5 + $0x8] sm:$0xff] (%p10060_p4) }
  0x14   : > { %v230_v2 = vld [vmem:[%s10078_s5 + $0x20] sm:$0xff] (%p10060_p4)  ;;  %227 = vst [vmem:[%s164_s6] sm:$0xff] (%p10060_p4), %v226_v0  ;;  %v232_v3 = vld [vmem:[%s10078_s5 + $0x28] sm:$0xff] (%p10060_p4) }
  0x15   : > { %229 = vst [vmem:[%s164_s6 + $0x8] sm:$0xff] %v228_v1  ;;  %v234_v4 = vld [vmem:[%s10078_s5 + $0x40] sm:$0xff]  ;;  %v236_v5 = vld [vmem:[%s10078_s5 + $0x48] sm:$0xff] }
  0x16   : > { %231 = vst [vmem:[%s164_s6 + $0x10] sm:$0xff] %v230_v2  ;;  %v238_v6 = vld [vmem:[%s10078_s5 + $0x60] sm:$0xff]  ;;  %v240_v7 = vld [vmem:[%s10078_s5 + $0x68] sm:$0xff] }
  0x17   : > { %233 = vst [vmem:[%s164_s6 + $0x18] sm:$0xff] %v232_v3  ;;  %v242_v8 = vld [vmem:[%s10078_s5 + $0x80] sm:$0xff]  ;;  %v244_v9 = vld [vmem:[%s10078_s5 + $0x88] sm:$0xff] }
  0x18   : > { %235 = vst [vmem:[%s164_s6 + $0x20] sm:$0xff] %v234_v4  ;;  %v246_v10 = vld [vmem:[%s10078_s5 + $0xa0] sm:$0xff]  ;;  %v248_v11 = vld [vmem:[%s10078_s5 + $0xa8] sm:$0xff] }
  0x19   : > { %237 = vst [vmem:[%s164_s6 + $0x28] sm:$0xff] %v236_v5  ;;  %v250_v12 = vld [vmem:[%s10078_s5 + $0xc0] sm:$0xff]  ;;  %v252_v13 = vld [vmem:[%s10078_s5 + $0xc8] sm:$0xff] }
  0x1a   : > { %239 = vst [vmem:[%s164_s6 + $0x30] sm:$0xff] %v238_v6  ;;  %v254_v14 = vld [vmem:[%s10078_s5 + $0xe0] sm:$0xff]  ;;  %v256_v15 = vld [vmem:[%s10078_s5 + $0xe8] sm:$0xff] }
  0x1b   : > { %241 = vst [vmem:[%s164_s6 + $0x38] sm:$0xff] %v240_v7 }
  0x1c   : > { %243 = vst [vmem:[%s164_s6 + $0x40] sm:$0xff] %v242_v8 }
  0x1d   : > { %245 = vst [vmem:[%s164_s6 + $0x48] sm:$0xff] %v244_v9 }
  0x1e   : > { %247 = vst [vmem:[%s164_s6 + $0x50] sm:$0xff] %v246_v10 }
  0x1f   : > { %249 = vst [vmem:[%s164_s6 + $0x58] sm:$0xff] %v248_v11 }
  0x20   : > { %251 = vst [vmem:[%s164_s6 + $0x60] sm:$0xff] %v250_v12 }
  0x21   : > { %253 = vst [vmem:[%s164_s6 + $0x68] sm:$0xff] %v252_v13 }
  0x22   : > { %255 = vst [vmem:[%s164_s6 + $0x70] sm:$0xff] %v254_v14 }
  0x23   : > { %257 = vst [vmem:[%s164_s6 + $0x78] sm:$0xff] %v256_v15 }
  0x24 PF: > { %s264_s7 = sand.u32 1, %s9978_s17   ;;  %s9078_s8 = sshll.u32 %s9982_s18, 8 }
  0x25   : > { %s8681_s9 = sshll.u32 %s264_s7, 8  ;;  %s274_s12 = scalar_lea.hbm %s14570_s1, %s9078_s8 }
  0x26   : > { %s275_s13 = sshll.u32 %s274_s12, 4  ;;  %s268_s14 = scalar_lea.vmem [#allocation3], %s8681_s9  ;;  %s276_s13 = int_to_ptr.hbm [resolvable:$true] %s275_s13 }
  0x27   : > { %s277_s15 = sshll.u32 %s268_s14, 4  ;;  %s265_s21 = scalar_lea.sflag [#allocation4], %s264_s7  ;;  %s278_s15 = int_to_ptr.vmem [resolvable:$true] %s277_s15 }
  0x28   : > { %s9920_s22 = sshra.s32 %s276_s13, 4  ;;  %s9926_s29 = scalar_lea.hbm %s14570_s1, 512  ;;  %s9921_s22 = int_to_ptr.hbm [resolvable:$true] %s9920_s22 }
  0x29   : > { %s9922_s26 = scalar_lea.hbm %s9921_s22, 256  ;;  %p9927_p11 = scmp.lt.s32.totalorder %s9921_s22, %s14570_s1 }
  0x2a   : > { %p9923_p8 = scmp.ne.s32.totalorder %s9921_s22, %s9922_s26  ;;  %p9928_p12 = scmp.lt.s32.totalorder %s9926_s29, %s9922_s26 }
  0x2c   : > { %p9924_p9 = pnand %p9923_p8, %p10060_p4  ;;  %p9929_p13 = por %p9928_p12, %p9927_p11 }
  0x2e   : > { %p9925_p10 = pneg %p9924_p9 }
  0x30   : > { %p9930_p0 = pnand %p9929_p13, %p9925_p10 }
  0x32   : > { %9933 = shalt.err (!%p9930_p0)
}
  0x33   : > { %s9984_s6 = smov 128   ;;  %s9985_s7 = smov 8  }
  0x34   : > { %9096 = dma.hbm_to_vmem [thread:$0]  (%p10060_p4), %s276_s13, 4096, %s278_s15, %s265_s21, %s9984_s6, %s9984_s6, %s9985_s7  }
  0x35 PF: > { %p8685_p1 = scmp.ge.s32.totalorder %s9982_s18, 1  ;;  %p285_p2 = scmp.lt.s32.totalorder %s9982_s18, 3 }
  0x37   : > { %p286_p3 = pnand %p8685_p1, %p285_p2 }
  0x39   : > { %289 = sbr.rel (%p286_p3) target bundleno = 7303 (0x1c87), region = 70 }
  0x3e   : > { %s292_s8 = sand.u32 1, %s9974_s16  }
  0x3f   : > { %s8686_s9 = sshll.u32 %s292_s8, 7  ;;  %s8687_s10 = sshll.u32 %s292_s8, 8 }
  0x40   : > { %s10114_s11 = scalar_lea.vmem [#allocation2], %s8686_s9  ;;  %s299_s12 = scalar_lea.sflag [#allocation4], %s292_s8 }
  0x41   : > { %s10116_s14 = scalar_lea.vmem [#allocation3], %s8687_s10 }
  0x42   : > { %9965 = dma.done.wait (%p10066_p6), %s299_s12, 4096  }
  0x43   : > { %9967 = vsyncadd (%p10066_p6), %s299_s12, 4294963200  ;;  %vm394_vm0 = vcmask 64512   ;;  %v340_v16 = vld [vmem:[%s14571_s2] sm:$0xff]  ;;  %v392_v17 = vld [vmem:[%s10114_s11 + $0x78] sm:$0xff]  ;;  %v9986_v24 = vmov 0.0   ;;  %s9987_s6 = smov 64  }
  0x44   : > { %v10129_v18 = vld [vmem:[%s14571_s2 + $0x20] sm:$0xff]  ;;  %9079 = vmatpush.msra.mxu3 %v340_v16  ;;  %458 = vmatpush.msra.mxu0 %v340_v16  ;;  %v10135_v19 = vld [vmem:[%s14571_s2 + $0x18] sm:$0xff]  ;;  %v10144_v21 = vld [vmem:[%s14571_s2 + $0x10] sm:$0xff]  ;;  %s9988_s7 = smov 32   ;;  %vm508_vm9 = vcmask 261120   ;;  %s9989_s26 = smov 96  }
  0x45   : > { %8705 = vmatmul.msk.f32.vlgmr.msra.gmra.mxu3 %vm394_vm0, %v392_v17  ;;  %v377_v20 = vld [vmem:[%s10114_s11] sm:$0xff]  ;;  %633 = vmatpush.msra.mxu2 %v10129_v18  ;;  %v10152_v22 = vld [vmem:[%s14571_s2 + $0x8] sm:$0xff]  ;;  %v379_v15 = vld [vmem:[%s10114_s11 + $0x10] sm:$0xff]  ;;  %s9990_s29 = smov 120   ;;  %s9993_s30 = smov 88  }
  0x46   : > { %524 = vmatpush.msrb.mxu3 %v10129_v18  ;;  %8690 = vmatmul.msk.f32.vlgmr.msra.gmra.mxu0 %vm394_vm0, %v377_v20  ;;  %v378_v23 = vld [vmem:[%s10114_s11 + $0x8] sm:$0xff]  ;;  %v10184_v27 = vld [vmem:[%s14572_s3] ss:$0 sm:$0xff]  ;;  %v380_v16 = vld [vmem:[%s10114_s11 + $0x18] sm:$0xff]  ;;  %s9994_s5 = smov 80   ;;  %s9995_s8 = smov 72  }
  0x47   : > { %634 = vmatpush.msra.mxu2 %v10135_v19  ;;  %851 = vmatpush.msra.mxu1 %v10129_v18  ;;  %s9998_s21 = smov 8   ;;  %s8688_s27 = sshll.u32 %s8674_s19, 1 }
  0x48   : > { %525 = vmatpush.msrb.mxu3 %v10135_v19  ;;  %p335_p4 = scmp.lt.s32.totalorder %s8688_s27, 3 }
  0x49   : > { %635 = vmatpush.msra.mxu2 %v10144_v21  ;;  %852 = vmatpush.msra.mxu1 %v10135_v19 }
  0x4a   : > { %526 = vmatpush.msrb.mxu3 %v10144_v21  ;;  %s15277_s27 = smov (!%p335_p4, %s8688_s27), 3 }
  0x4b   : > { %636 = vmatpush.msra.mxu2 %v10152_v22  ;;  %853 = vmatpush.msra.mxu1 %v10144_v21  ;;  %s8689_s28 = sshll.u32 %s15277_s27, 3 }
  0x4c   : > { %527 = vmatpush.msrb.mxu3 %v10152_v22 }
  0x4d   : > { %960 = vmatpush.msrb.mxu2 %v10129_v18  ;;  %528 = vmatmul.f32.vlgmr.msrb.gmra.mxu3 %v9986_v24 }
  0x4e   : > { %854 = vmatpush.msra.mxu1 %v10152_v22  ;;  %8691 = vmatmul.msk.f32.gmra.mxu0 %vm394_vm0, %v378_v23 }
  0x4f   : > { %742 = vmatpush.msra.mxu3 %v10129_v18  ;;  %961 = vmatpush.msrb.mxu2 %v10135_v19 }
  0x50   : > { %1178 = vmatpush.msrb.mxu1 %v10129_v18 }
  0x51   : > { %743 = vmatpush.msra.mxu3 %v10135_v19  ;;  %962 = vmatpush.msrb.mxu2 %v10144_v21 }
  0x52   : > { %1179 = vmatpush.msrb.mxu1 %v10135_v19 }
  0x53   : > { %744 = vmatpush.msra.mxu3 %v10144_v21  ;;  %963 = vmatpush.msrb.mxu2 %v10152_v22 }
  0x54   : > { %1180 = vmatpush.msrb.mxu1 %v10144_v21 }
  0x55   : > { %745 = vmatpush.msra.mxu3 %v10152_v22 }
  0x56   : > { %531 = vmatmul.f32.gmra.mxu3 %v9986_v24  ;;  %1181 = vmatpush.msrb.mxu1 %v10152_v22 }
  0x57   : > { %1069 = vmatpush.msrb.mxu3 %v10129_v18  ;;  %8692 = vmatmul.msk.f32.gmra.mxu0 %vm394_vm0, %v379_v15 }
  0x59   : > { %1070 = vmatpush.msrb.mxu3 %v10135_v19 }
  0x5b   : > { %1071 = vmatpush.msrb.mxu3 %v10144_v21 }
  0x5d   : > { %1072 = vmatpush.msrb.mxu3 %v10152_v22 }
  0x5f   : > { %8693 = vmatmul.msk.f32.gmra.mxu0 %vm394_vm0, %v380_v16 }
  0xc3   : > { %v460_v26 = vpop.f32.mrf.mxu0 }
  0xc4   : > { %v461_v28 = vadd.f32 %v10184_v27, %v460_v26 }
  0xc8   : > { %v10179_v25 = vpop.f32.mrf.mxu3 }
  0xcb   : > { %v463_v31 = vpop.f32.mrf.mxu0 }
  0xcc   : > { %v464_v32 = vadd.f32 %v10184_v27, %v463_v31 }
  0xd0   : > { %v529_v29 = vpop.f32.mrf.mxu3 }
  0xd1   : > { %v535_v30 = vadd.f32 %v529_v29, %v461_v28 }
  0xd3   : > { %9493 = vtanh.f32 %v535_v30  ;;  %v8706_v37 = vmul.f32 -1.442695, %v535_v30 }
  0xd4   : > { %v466_v23 = vpop.f32.mrf.mxu0 }
  0xd5   : > { %v467_v24 = vadd.f32 %v10184_v27, %v466_v23 }
  0xd9   : > { %v532_v33 = vpop.f32.mrf.mxu3  ;;  %v9494_v34 = vpop.eup %9493 }
  0xda   : > { %v536_v35 = vadd.f32 %v532_v33, %v464_v32  ;;  %581 = vrot.lane.b32.xlu0 %v9494_v34, %s9987_s6 }
  0xdc   : > { %9495 = vtanh.f32 %v536_v35  ;;  %v8707_v38 = vmul.f32 -1.442695, %v536_v35  ;;  %v469_v29 = vpop.f32.mrf.mxu0 }
  0xdd   : > { %9497 = vpow2.f32 %v8706_v37 }
  0xde   : > { %9499 = vpow2.f32 %v8707_v38 }
  0xe2   : > { %v9496_v36 = vpop.eup %9495 }
  0xe3   : > { %583 = vrot.lane.b32.xlu1 %v9496_v36, %s9987_s6  ;;  %v9498_v39 = vpop.eup %9497 }
  0xe4   : > { %v543_v40 = vadd.f32 1.0, %v9498_v39  ;;  %v9500_v41 = vpop.eup %9499 }
  0xe5   : > { %v544_v42 = vadd.f32 1.0, %v9500_v41 }
  0xe6   : > { %9501 = vrcp.f32 %v543_v40  ;;  %v556_v51 = vand.u32 2147483648, %v543_v40  ;;  %vm550_vm2 = vweird.f32 %v543_v40  ;;  %v554_v52 = vand.u32 2147483647, %v543_v40 }
  0xe7   : > { %9503 = vrcp.f32 %v544_v42  ;;  %vm565_vm4 = vweird.f32 %v544_v42  ;;  %v571_v56 = vand.u32 2147483648, %v544_v42  ;;  %v569_v58 = vand.u32 2147483647, %v544_v42 }
  0xe8   : > { %v557_v55 = vor.u32 1.1754944e-38, %v556_v51  ;;  %vm555_vm6 = vcmp.eq.f32.partialorder %v554_v52, 8.507059e+37 }
  0xe9   : > { %v572_v62 = vor.u32 1.1754944e-38, %v571_v56  ;;  %vm570_vm8 = vcmp.eq.f32.partialorder %v569_v58, 8.507059e+37 }
  0xec   : > { %v9502_v43 = vpop.eup %9501 }
  0xed   : > { %v546_v44 = vmul.f32 %v9502_v43, %v543_v40  ;;  %v9504_v45 = vpop.eup %9503  ;;  %vm551_vm1 = vweird.f32 %v9502_v43 }
  0xee   : > { %v561_v47 = vmul.f32 %v9504_v45, %v544_v42  ;;  %vm552_vm3 = vmor %vm550_vm2, %vm551_vm1  ;;  %vm566_vm5 = vweird.f32 %v9504_v45 }
  0xef   : > { %v547_v46 = vsub.f32 1.0, %v546_v44  ;;  %vm567_vm7 = vmor %vm565_vm4, %vm566_vm5 }
  0xf0   : > { %v562_v49 = vsub.f32 1.0, %v561_v47 }
  0xf1   : > { %v548_v48 = vmul.f32 %v9502_v43, %v547_v46 }
  0xf2   : > { %v563_v53 = vmul.f32 %v9504_v45, %v562_v49 }
  0xf3   : > { %v549_v50 = vadd.f32 %v9502_v43, %v548_v48 }
  0xf4   : > { %v564_v57 = vadd.f32 %v9504_v45, %v563_v53 }
  0xf5   : > { %v553_v54 = vsel %vm552_vm3, %v9502_v43, %v549_v50 }
  0xf6   : > { %v558_v60 = vsel %vm555_vm6, %v557_v55, %v553_v54  ;;  %v568_v63 = vsel %vm567_vm7, %v9504_v45, %v564_v57 }
  0xf7   : > { %v573_v0 = vsel %vm570_vm8, %v572_v62, %v568_v63  ;;  %v577_v7 = vmul.f32 0.0, %v558_v60 }
  0xf8   : > { %v578_v3 = vmul.f32 0.0, %v573_v0 }
 0x14c   : > { %v582_v59 = vpop.permute.xlu0 %581 }
 0x14d   : > { %v587_v61 = vmul.f32 %v582_v59, %v558_v60 }
 0x14f   : > { %591 = vrot.lane.b32.xlu0 %v587_v61, %s9988_s7 }
 0x155   : > { %v584_v1 = vpop.permute.xlu1 %583 }
 0x156   : > { %v588_v2 = vmul.f32 %v584_v1, %v573_v0 }
 0x158   : > { %593 = vrot.lane.b32.xlu2 %v588_v2, %s9988_s7 }
 0x1b2   : > { %v594_v4 = vpop.permute.xlu2 %593 }
 0x1b3   : > { %v10192_v5 = vadd.f32 %v594_v4, %v578_v3 }
 0x1b5   : > { %9505 = vtanh.f32 %v10192_v5 }
 0x1bb   : > { %v9506_v6 = vpop.eup %9505 }
 0x1bc   : > { %605 = vrot.lane.b32.xlu0 %v9506_v6, %s9987_s6 }
 0x1c1   : > { %v592_v8 = vpop.permute.xlu0 %591 }
 0x1c2   : > { %v10196_v9 = vadd.f32 %v592_v8, %v577_v7 }
 0x1c4   : > { %9507 = vtanh.f32 %v10196_v9 }
 0x1ca   : > { %v9508_v10 = vpop.eup %9507 }
 0x1cb   : > { %603 = vrot.lane.b32.xlu1 %v9508_v10, %s9987_s6  ;;  %v381_v10 = vld [vmem:[%s10114_s11 + $0x20] sm:$0xff] }
 0x1cc   : > { %8694 = vmatmul.msk.f32.gmra.mxu0 %vm394_vm0, %v381_v10 }
 0x22e   : > { %v606_v11 = vpop.permute.xlu0 %605 }
 0x22f   : > { %v610_v12 = vmul.f32 %v606_v11, %v573_v0  ;;  %v382_v11 = vld [vmem:[%s10114_s11 + $0x28] sm:$0xff] }
 0x230   : > { %8695 = vmatmul.msk.f32.gmra.mxu0 %vm394_vm0, %v382_v11 }
 0x231   : > { %615 = vrot.lane.b32.xlu1 %v610_v12, %s9988_s7 }
 0x23d   : > { %v604_v13 = vpop.permute.xlu1 %603 }
 0x23e   : > { %v609_v14 = vmul.f32 %v604_v13, %v558_v60 }
 0x240   : > { %613 = vrot.lane.b32.xlu2 %v609_v14, %s9988_s7 }
 0x249   : > { %v472_v13 = vpop.f32.mrf.mxu0 }
 0x24a   : > { %v473_v14 = vadd.f32 %v10184_v27, %v472_v13 }
 0x29a   : > { %v10206_v17 = vpop.permute.xlu2 %613 }
 0x29b   : > { %8708 = vmatmul.msk.f32.vlgmr.msra.gmra.mxu2 %vm508_vm9, %v10206_v17 }
 0x29c   : > { %1287 = vmatpush.msra.mxu2 %v10129_v18  ;;  %v470_v18 = vadd.f32 %v10184_v27, %v469_v29 }
 0x29e   : > { %1288 = vmatpush.msra.mxu2 %v10135_v19 }
 0x2a0   : > { %1289 = vmatpush.msra.mxu2 %v10144_v21 }
 0x2a2   : > { %1290 = vmatpush.msra.mxu2 %v10152_v22 }
 0x2a3   : > { %v10213_v20 = vpop.permute.xlu1 %615 }
 0x2a4   : > { %14725 = vst [vmem:[#allocation6_spill] sm:$0xff] %v10213_v20  ;;  %8709 = vmatmul.msk.f32.gmra.mxu2 %vm508_vm9, %v10213_v20 }
 0x31e   : > { %v638_v26 = vpop.f32.mrf.mxu2 }
 0x31f   : > { %v644_v28 = vadd.f32 %v638_v26, %v467_v24  ;;  %v475_v24 = vpop.f32.mrf.mxu0 }
 0x320   : > { %v476_v26 = vadd.f32 %v10184_v27, %v475_v24 }
 0x321   : > { %9509 = vtanh.f32 %v644_v28  ;;  %v8710_v22 = vmul.f32 -1.442695, %v644_v28 }
 0x327   : > { %v641_v30 = vpop.f32.mrf.mxu2  ;;  %v9510_v19 = vpop.eup %9509 }
 0x328   : > { %v645_v31 = vadd.f32 %v641_v30, %v470_v18  ;;  %690 = vrot.lane.b32.xlu2 %v9510_v19, %s9987_s6 }
 0x32a   : > { %9511 = vtanh.f32 %v645_v31  ;;  %v8711_v37 = vmul.f32 -1.442695, %v645_v31 }
 0x32b   : > { %9513 = vpow2.f32 %v8710_v22 }
 0x330   : > { %v9512_v21 = vpop.eup %9511 }
 0x331   : > { %692 = vrot.lane.b32.xlu1 %v9512_v21, %s9987_s6  ;;  %v9514_v32 = vpop.eup %9513 }
 0x332   : > { %v652_v33 = vadd.f32 1.0, %v9514_v32 }
 0x334   : > { %9515 = vrcp.f32 %v652_v33  ;;  %v665_v40 = vand.u32 2147483648, %v652_v33  ;;  %vm659_vm11 = vweird.f32 %v652_v33  ;;  %v663_v41 = vand.u32 2147483647, %v652_v33 }
 0x335   : > { %9517 = vpow2.f32 %v8711_v37 }
 0x336   : > { %v666_v44 = vor.u32 1.1754944e-38, %v665_v40  ;;  %vm664_vm13 = vcmp.eq.f32.partialorder %v663_v41, 8.507059e+37 }
 0x33a   : > { %v9516_v34 = vpop.eup %9515 }
 0x33b   : > { %v655_v35 = vmul.f32 %v9516_v34, %v652_v33  ;;  %vm660_vm10 = vweird.f32 %v9516_v34  ;;  %v9518_v42 = vpop.eup %9517 }
 0x33c   : > { %vm661_vm12 = vmor %vm659_vm11, %vm660_vm10  ;;  %v653_v45 = vadd.f32 1.0, %v9518_v42 }
 0x33d   : > { %v656_v36 = vsub.f32 1.0, %v655_v35 }
 0x33e   : > { %9519 = vrcp.f32 %v653_v45  ;;  %v680_v54 = vand.u32 2147483648, %v653_v45  ;;  %vm674_vm15 = vweird.f32 %v653_v45  ;;  %v678_v55 = vand.u32 2147483647, %v653_v45 }
 0x33f   : > { %v657_v38 = vmul.f32 %v9516_v34, %v656_v36 }
 0x340   : > { %v681_v57 = vor.u32 1.1754944e-38, %v680_v54  ;;  %vm679_vm2 = vcmp.eq.f32.partialorder %v678_v55, 8.507059e+37 }
 0x341   : > { %v658_v39 = vadd.f32 %v9516_v34, %v657_v38 }
 0x343   : > { %v662_v43 = vsel %vm661_vm12, %v9516_v34, %v658_v39 }
 0x344   : > { %v667_v47 = vsel %vm664_vm13, %v666_v44, %v662_v43  ;;  %v9520_v49 = vpop.eup %9519 }
 0x345   : > { %v670_v50 = vmul.f32 %v9520_v49, %v653_v45  ;;  %vm675_vm14 = vweird.f32 %v9520_v49  ;;  %v686_v61 = vmul.f32 %v667_v47, %v10196_v9 }
 0x346   : > { %vm676_vm1 = vmor %vm674_vm15, %vm675_vm14 }
 0x347   : > { %v671_v51 = vsub.f32 1.0, %v670_v50 }
 0x349   : > { %v672_v52 = vmul.f32 %v9520_v49, %v671_v51 }
 0x34b   : > { %v673_v53 = vadd.f32 %v9520_v49, %v672_v52 }
 0x34d   : > { %v677_v56 = vsel %vm676_vm1, %v9520_v49, %v673_v53 }
 0x34e   : > { %v682_v59 = vsel %vm679_vm2, %v681_v57, %v677_v56 }
 0x34f   : > { %v687_v1 = vmul.f32 %v682_v59, %v10192_v5 }
 0x382   : > { %v691_v46 = vpop.permute.xlu2 %690 }
 0x383   : > { %v696_v48 = vmul.f32 %v691_v46, %v667_v47 }
 0x385   : > { %700 = vrot.lane.b32.xlu0 %v696_v48, %s9988_s7 }
 0x3a3   : > { %v693_v58 = vpop.permute.xlu1 %692 }
 0x3a4   : > { %v697_v60 = vmul.f32 %v693_v58, %v682_v59 }
 0x3a6   : > { %702 = vrot.lane.b32.xlu0 %v697_v60, %s9988_s7 }
 0x3f7   : > { %v701_v62 = vpop.permute.xlu0 %700 }
 0x3f8   : > { %v10225_v63 = vadd.f32 %v701_v62, %v686_v61 }
 0x3fa   : > { %9521 = vtanh.f32 %v10225_v63 }
 0x400   : > { %v9522_v0 = vpop.eup %9521 }
 0x401   : > { %712 = vrot.lane.b32.xlu2 %v9522_v0, %s9987_s6 }
 0x418   : > { %v703_v2 = vpop.permute.xlu0 %702 }
 0x419   : > { %v10230_v3 = vadd.f32 %v703_v2, %v687_v1 }
 0x41b   : > { %9523 = vtanh.f32 %v10230_v3 }
 0x421   : > { %v9524_v4 = vpop.eup %9523 }
 0x422   : > { %714 = vrot.lane.b32.xlu2 %v9524_v4, %s9987_s6  ;;  %v383_v4 = vld [vmem:[%s10114_s11 + $0x30] sm:$0xff] }
 0x423   : > { %8696 = vmatmul.msk.f32.gmra.mxu0 %vm394_vm0, %v383_v4 }
 0x45b   : > { %v713_v6 = vpop.permute.xlu2 %712 }
 0x45c   : > { %v718_v7 = vmul.f32 %v713_v6, %v667_v47 }
 0x45e   : > { %722 = vrot.lane.b32.xlu1 %v718_v7, %s9988_s7 }
 0x47c   : > { %v715_v8 = vpop.permute.xlu2 %714 }
 0x47d   : > { %v719_v9 = vmul.f32 %v715_v8, %v682_v59 }
 0x47f   : > { %724 = vrot.lane.b32.xlu0 %v719_v9, %s9988_s7 }
 0x4a0   : > { %v478_v10 = vpop.f32.mrf.mxu0 }
 0x4a1   : > { %v479_v11 = vadd.f32 %v10184_v27, %v478_v10 }
 0x4d0   : > { %v10238_v5 = vpop.permute.xlu1 %722 }
 0x4d1   : > { %8712 = vmatmul.msk.f32.vlgmr.msra.gmra.mxu3 %vm508_vm9, %v10238_v5 }
 0x4f1   : > { %v10244_v12 = vpop.permute.xlu0 %724 }
 0x4f2   : > { %8713 = vmatmul.msk.f32.gmra.mxu3 %vm508_vm9, %v10244_v12 }
 0x554   : > { %v747_v15 = vpop.f32.mrf.mxu3 }
 0x555   : > { %v753_v16 = vadd.f32 %v747_v15, %v473_v14 }
 0x557   : > { %9525 = vtanh.f32 %v753_v16  ;;  %v8714_v30 = vmul.f32 -1.442695, %v753_v16 }
 0x55d   : > { %v9526_v23 = vpop.eup %9525 }
 0x55e   : > { %799 = vrot.lane.b32.xlu1 %v9526_v23, %s9987_s6 }
 0x575   : > { %v750_v28 = vpop.f32.mrf.mxu3 }
 0x576   : > { %v754_v29 = vadd.f32 %v750_v28, %v476_v26 }
 0x578   : > { %9527 = vtanh.f32 %v754_v29  ;;  %v8715_v33 = vmul.f32 -1.442695, %v754_v29 }
 0x579   : > { %9529 = vpow2.f32 %v8714_v30 }
 0x57e   : > { %v9528_v18 = vpop.eup %9527 }
 0x57f   : > { %801 = vrot.lane.b32.xlu0 %v9528_v18, %s9987_s6  ;;  %v9530_v19 = vpop.eup %9529 }
 0x580   : > { %v761_v31 = vadd.f32 1.0, %v9530_v19 }
 0x582   : > { %9531 = vrcp.f32 %v761_v31  ;;  %v774_v36 = vand.u32 2147483648, %v761_v31  ;;  %vm768_vm4 = vweird.f32 %v761_v31  ;;  %v772_v37 = vand.u32 2147483647, %v761_v31 }
 0x583   : > { %9533 = vpow2.f32 %v8715_v33 }
 0x584   : > { %v775_v40 = vor.u32 1.1754944e-38, %v774_v36  ;;  %vm773_vm6 = vcmp.eq.f32.partialorder %v772_v37, 8.507059e+37 }
 0x588   : > { %v9532_v21 = vpop.eup %9531 }
 0x589   : > { %v764_v22 = vmul.f32 %v9532_v21, %v761_v31  ;;  %vm769_vm3 = vweird.f32 %v9532_v21  ;;  %v9534_v38 = vpop.eup %9533 }
 0x58a   : > { %vm770_vm5 = vmor %vm768_vm4, %vm769_vm3  ;;  %v762_v41 = vadd.f32 1.0, %v9534_v38 }
 0x58b   : > { %v765_v32 = vsub.f32 1.0, %v764_v22 }
 0x58c   : > { %9535 = vrcp.f32 %v762_v41  ;;  %v789_v50 = vand.u32 2147483648, %v762_v41  ;;  %vm783_vm8 = vweird.f32 %v762_v41  ;;  %v787_v51 = vand.u32 2147483647, %v762_v41 }
 0x58d   : > { %v766_v34 = vmul.f32 %v9532_v21, %v765_v32 }
 0x58e   : > { %v790_v53 = vor.u32 1.1754944e-38, %v789_v50  ;;  %vm788_vm11 = vcmp.eq.f32.partialorder %v787_v51, 8.507059e+37 }
 0x58f   : > { %v767_v35 = vadd.f32 %v9532_v21, %v766_v34 }
 0x591   : > { %v771_v39 = vsel %vm770_vm5, %v9532_v21, %v767_v35 }
 0x592   : > { %v776_v43 = vsel %vm773_vm6, %v775_v40, %v771_v39  ;;  %v9536_v45 = vpop.eup %9535 }
 0x593   : > { %v779_v46 = vmul.f32 %v9536_v45, %v762_v41  ;;  %vm784_vm7 = vweird.f32 %v9536_v45  ;;  %v795_v57 = vmul.f32 %v776_v43, %v10225_v63 }
 0x594   : > { %vm785_vm10 = vmor %vm783_vm8, %vm784_vm7 }
 0x595   : > { %v780_v47 = vsub.f32 1.0, %v779_v46 }
 0x597   : > { %v781_v48 = vmul.f32 %v9536_v45, %v780_v47 }
 0x599   : > { %v782_v49 = vadd.f32 %v9536_v45, %v781_v48 }
 0x59b   : > { %v786_v52 = vsel %vm785_vm10, %v9536_v45, %v782_v49 }
 0x59c   : > { %v791_v55 = vsel %vm788_vm11, %v790_v53, %v786_v52 }
 0x59d   : > { %v796_v61 = vmul.f32 %v791_v55, %v10230_v3  ;;  %v384_v3 = vld [vmem:[%s10114_s11 + $0x38] sm:$0xff] }
 0x59e   : > { %8697 = vmatmul.msk.f32.gmra.mxu0 %vm394_vm0, %v384_v3 }
 0x5d0   : > { %v800_v42 = vpop.permute.xlu1 %799 }
 0x5d1   : > { %v805_v44 = vmul.f32 %v800_v42, %v776_v43 }
 0x5d3   : > { %809 = vrot.lane.b32.xlu2 %v805_v44, %s9988_s7 }
 0x5f1   : > { %v802_v54 = vpop.permute.xlu0 %801 }
 0x5f2   : > { %v806_v56 = vmul.f32 %v802_v54, %v791_v55 }
 0x5f4   : > { %811 = vrot.lane.b32.xlu2 %v806_v56, %s9988_s7 }
 0x61b   : > { %v481_v15 = vpop.f32.mrf.mxu0 }
 0x61c   : > { %v482_v16 = vadd.f32 %v10184_v27, %v481_v15 }
 0x62d   : > { %v810_v58 = vpop.permute.xlu2 %809 }
 0x62e   : > { %v10255_v59 = vadd.f32 %v810_v58, %v795_v57 }
 0x630   : > { %9537 = vtanh.f32 %v10255_v59 }
 0x636   : > { %v9538_v60 = vpop.eup %9537 }
 0x637   : > { %821 = vrot.lane.b32.xlu1 %v9538_v60, %s9987_s6 }
 0x64e   : > { %v812_v62 = vpop.permute.xlu2 %811 }
 0x64f   : > { %v10260_v0 = vadd.f32 %v812_v62, %v796_v61 }
 0x651   : > { %9539 = vtanh.f32 %v10260_v0 }
 0x657   : > { %v9540_v1 = vpop.eup %9539 }
 0x658   : > { %823 = vrot.lane.b32.xlu1 %v9540_v1, %s9987_s6 }
 0x6a9   : > { %v822_v63 = vpop.permute.xlu1 %821 }
 0x6aa   : > { %v827_v2 = vmul.f32 %v822_v63, %v776_v43 }
 0x6ac   : > { %831 = vrot.lane.b32.xlu0 %v827_v2, %s9988_s7 }
 0x6ca   : > { %v824_v6 = vpop.permute.xlu1 %823 }
 0x6cb   : > { %v828_v7 = vmul.f32 %v824_v6, %v791_v55 }
 0x6cd   : > { %833 = vrot.lane.b32.xlu2 %v828_v7, %s9988_s7  ;;  %v386_v7 = vld [vmem:[%s10114_s11 + $0x48] sm:$0xff] }
 0x71e   : > { %v10270_v8 = vpop.permute.xlu0 %831 }
 0x71f   : > { %8716 = vmatmul.msk.f32.vlgmr.msra.gmra.mxu1 %vm508_vm9, %v10270_v8 }
 0x727   : > { %v10274_v9 = vpop.permute.xlu2 %833 }
 0x728   : > { %14726 = vst [vmem:[#allocation7_spill] sm:$0xff] %v10274_v9  ;;  %8717 = vmatmul.msk.f32.gmra.mxu1 %vm508_vm9, %v10274_v9 }
 0x79c   : > { %v856_v13 = vpop.f32.mrf.mxu1 }
 0x79d   : > { %v862_v14 = vadd.f32 %v856_v13, %v479_v11 }
 0x79f   : > { %9541 = vtanh.f32 %v862_v14  ;;  %v8718_v29 = vmul.f32 -1.442695, %v862_v14 }
 0x7a5   : > { %v859_v23 = vpop.f32.mrf.mxu1  ;;  %v9542_v24 = vpop.eup %9541 }
 0x7a6   : > { %v863_v26 = vadd.f32 %v859_v23, %v482_v16  ;;  %908 = vrot.lane.b32.xlu0 %v9542_v24, %s9987_s6 }
 0x7a8   : > { %9543 = vtanh.f32 %v863_v26  ;;  %v8719_v18 = vmul.f32 -1.442695, %v863_v26 }
 0x7a9   : > { %9545 = vpow2.f32 %v8718_v29 }
 0x7aa   : > { %9547 = vpow2.f32 %v8719_v18 }
 0x7ae   : > { %v9544_v28 = vpop.eup %9543 }
 0x7af   : > { %910 = vrot.lane.b32.xlu2 %v9544_v28, %s9987_s6  ;;  %v9546_v30 = vpop.eup %9545 }
 0x7b0   : > { %v870_v19 = vadd.f32 1.0, %v9546_v30  ;;  %v9548_v31 = vpop.eup %9547 }
 0x7b1   : > { %v871_v21 = vadd.f32 1.0, %v9548_v31 }
 0x7b2   : > { %9549 = vrcp.f32 %v870_v19  ;;  %v883_v39 = vand.u32 2147483648, %v870_v19  ;;  %vm877_vm13 = vweird.f32 %v870_v19  ;;  %v881_v40 = vand.u32 2147483647, %v870_v19 }
 0x7b3   : > { %9551 = vrcp.f32 %v871_v21  ;;  %v898_v48 = vand.u32 2147483648, %v871_v21  ;;  %vm892_vm2 = vweird.f32 %v871_v21  ;;  %v896_v49 = vand.u32 2147483647, %v871_v21 }
 0x7b4   : > { %v884_v43 = vor.u32 1.1754944e-38, %v883_v39  ;;  %vm882_vm15 = vcmp.eq.f32.partialorder %v881_v40, 8.507059e+37 }
 0x7b5   : > { %v899_v52 = vor.u32 1.1754944e-38, %v898_v48  ;;  %vm897_vm4 = vcmp.eq.f32.partialorder %v896_v49, 8.507059e+37 }
 0x7b8   : > { %v9550_v22 = vpop.eup %9549 }
 0x7b9   : > { %v873_v32 = vmul.f32 %v9550_v22, %v870_v19  ;;  %v9552_v34 = vpop.eup %9551  ;;  %vm878_vm12 = vweird.f32 %v9550_v22 }
 0x7ba   : > { %v888_v35 = vmul.f32 %v9552_v34, %v871_v21  ;;  %vm879_vm14 = vmor %vm877_vm13, %vm878_vm12  ;;  %vm893_vm1 = vweird.f32 %v9552_v34 }
 0x7bb   : > { %v874_v33 = vsub.f32 1.0, %v873_v32  ;;  %vm894_vm3 = vmor %vm892_vm2, %vm893_vm1 }
 0x7bc   : > { %v889_v37 = vsub.f32 1.0, %v888_v35 }
 0x7bd   : > { %v875_v36 = vmul.f32 %v9550_v22, %v874_v33 }
 0x7be   : > { %v890_v41 = vmul.f32 %v9552_v34, %v889_v37 }
 0x7bf   : > { %v876_v38 = vadd.f32 %v9550_v22, %v875_v36 }
 0x7c0   : > { %v891_v46 = vadd.f32 %v9552_v34, %v890_v41 }
 0x7c1   : > { %v880_v42 = vsel %vm879_vm14, %v9550_v22, %v876_v38 }
 0x7c2   : > { %v885_v45 = vsel %vm882_vm15, %v884_v43, %v880_v42  ;;  %v895_v50 = vsel %vm894_vm3, %v9552_v34, %v891_v46 }
 0x7c3   : > { %v900_v53 = vsel %vm897_vm4, %v899_v52, %v895_v50  ;;  %v904_v55 = vmul.f32 %v885_v45, %v10255_v59 }
 0x7c4   : > { %v905_v58 = vmul.f32 %v900_v53, %v10260_v0  ;;  %v385_v0 = vld [vmem:[%s10114_s11 + $0x40] sm:$0xff] }
 0x7c5   : > { %8698 = vmatmul.msk.f32.gmra.mxu0 %vm394_vm0, %v385_v0 }
 0x7cd   : > { %8699 = vmatmul.msk.f32.gmra.mxu0 %vm394_vm0, %v386_v7  ;;  %v387_v7 = vld [vmem:[%s10114_s11 + $0x50] sm:$0xff] }
 0x7d5   : > { %8700 = vmatmul.msk.f32.gmra.mxu0 %vm394_vm0, %v387_v7  ;;  %v389_v7 = vld [vmem:[%s10114_s11 + $0x60] sm:$0xff] }
 0x809   : > { %v911_v51 = vpop.permute.xlu2 %910 }
 0x80a   : > { %v915_v54 = vmul.f32 %v911_v51, %v900_v53 }
 0x818   : > { %v909_v44 = vpop.permute.xlu0 %908 }
 0x819   : > { %v914_v47 = vmul.f32 %v909_v44, %v885_v45 }
 0x81b   : > { %918 = vrot.lane.b32.xlu1 %v914_v47, %s9988_s7 }
 0x823   : > { %920 = vrot.lane.b32.xlu1 %v915_v54, %s9988_s7 }
 0x842   : > { %v484_v10 = vpop.f32.mrf.mxu0 }
 0x843   : > { %v485_v11 = vadd.f32 %v10184_v27, %v484_v10  ;;  %v388_v10 = vld [vmem:[%s10114_s11 + $0x58] sm:$0xff] }
 0x844   : > { %8701 = vmatmul.msk.f32.gmra.mxu0 %vm394_vm0, %v388_v10 }
 0x84a   : > { %v487_v16 = vpop.f32.mrf.mxu0 }
 0x84b   : > { %v488_v23 = vadd.f32 %v10184_v27, %v487_v16 }
 0x84c   : > { %8702 = vmatmul.msk.f32.gmra.mxu0 %vm394_vm0, %v389_v7 }
 0x88d   : > { %v919_v56 = vpop.permute.xlu1 %918 }
 0x88e   : > { %v10285_v57 = vadd.f32 %v919_v56, %v904_v55 }
 0x890   : > { %9553 = vtanh.f32 %v10285_v57 }
 0x895   : > { %v921_v60 = vpop.permute.xlu1 %920 }
 0x896   : > { %v9554_v61 = vpop.eup %9553  ;;  %v10289_v62 = vadd.f32 %v921_v60, %v905_v58 }
 0x897   : > { %930 = vrot.lane.b32.xlu0 %v9554_v61, %s9987_s6 }
 0x898   : > { %9555 = vtanh.f32 %v10289_v62 }
 0x89e   : > { %v9556_v1 = vpop.eup %9555 }
 0x89f   : > { %932 = vrot.lane.b32.xlu0 %v9556_v1, %s9987_s6 }
 0x909   : > { %v931_v59 = vpop.permute.xlu0 %930 }
 0x90a   : > { %v936_v63 = vmul.f32 %v931_v59, %v885_v45 }
 0x90c   : > { %940 = vrot.lane.b32.xlu2 %v936_v63, %s9988_s7 }
 0x911   : > { %v933_v2 = vpop.permute.xlu0 %932 }
 0x912   : > { %v937_v4 = vmul.f32 %v933_v2, %v900_v53 }
 0x914   : > { %942 = vrot.lane.b32.xlu1 %v937_v4, %s9988_s7 }
 0x966   : > { %v10298_v6 = vpop.permute.xlu2 %940 }
 0x967   : > { %8720 = vmatmul.msk.f32.vlgmr.msrb.gmra.mxu2 %vm508_vm9, %v10298_v6 }
 0x986   : > { %v10304_v3 = vpop.permute.xlu1 %942 }
 0x987   : > { %8721 = vmatmul.msk.f32.gmra.mxu2 %vm508_vm9, %v10304_v3 }
 0x9ea   : > { %v965_v13 = vpop.f32.mrf.mxu2 }
 0x9eb   : > { %v971_v14 = vadd.f32 %v965_v13, %v485_v11  ;;  %v490_v13 = vpop.f32.mrf.mxu0 }
 0x9ed   : > { %9557 = vtanh.f32 %v971_v14  ;;  %v8722_v29 = vmul.f32 -1.442695, %v971_v14  ;;  %v491_v14 = vadd.f32 %v10184_v27, %v490_v13 }
 0x9f3   : > { %v9558_v15 = vpop.eup %9557 }
 0x9f4   : > { %1017 = vrot.lane.b32.xlu2 %v9558_v15, %s9987_s6 }
 0xa0a   : > { %v968_v24 = vpop.f32.mrf.mxu2 }
 0xa0b   : > { %v972_v26 = vadd.f32 %v968_v24, %v488_v23  ;;  %v493_v24 = vpop.f32.mrf.mxu0 }
 0xa0d   : > { %9559 = vtanh.f32 %v972_v26  ;;  %v8723_v40 = vmul.f32 -1.442695, %v972_v26  ;;  %v494_v26 = vadd.f32 %v10184_v27, %v493_v24 }
 0xa0e   : > { %9561 = vpow2.f32 %v8722_v29 }
 0xa13   : > { %v9560_v28 = vpop.eup %9559 }
 0xa14   : > { %1019 = vrot.lane.b32.xlu1 %v9560_v28, %s9987_s6  ;;  %v9562_v18 = vpop.eup %9561 }
 0xa15   : > { %v979_v30 = vadd.f32 1.0, %v9562_v18 }
 0xa17   : > { %9563 = vrcp.f32 %v979_v30  ;;  %v992_v33 = vand.u32 2147483648, %v979_v30  ;;  %vm986_vm6 = vweird.f32 %v979_v30  ;;  %v990_v34 = vand.u32 2147483647, %v979_v30 }
 0xa18   : > { %9565 = vpow2.f32 %v8723_v40 }
 0xa19   : > { %v993_v36 = vor.u32 1.1754944e-38, %v992_v33  ;;  %vm991_vm8 = vcmp.eq.f32.partialorder %v990_v34, 8.507059e+37 }
 0xa1d   : > { %v9564_v19 = vpop.eup %9563 }
 0xa1e   : > { %v982_v31 = vmul.f32 %v9564_v19, %v979_v30  ;;  %vm987_vm5 = vweird.f32 %v9564_v19  ;;  %v9566_v41 = vpop.eup %9565 }
 0xa1f   : > { %vm988_vm7 = vmor %vm986_vm6, %vm987_vm5  ;;  %v980_v42 = vadd.f32 1.0, %v9566_v41 }
 0xa20   : > { %v983_v21 = vsub.f32 1.0, %v982_v31 }
 0xa21   : > { %9567 = vrcp.f32 %v980_v42  ;;  %v1007_v48 = vand.u32 2147483648, %v980_v42  ;;  %vm1001_vm11 = vweird.f32 %v980_v42  ;;  %v1005_v49 = vand.u32 2147483647, %v980_v42 }
 0xa22   : > { %v984_v22 = vmul.f32 %v9564_v19, %v983_v21 }
 0xa23   : > { %v1008_v51 = vor.u32 1.1754944e-38, %v1007_v48  ;;  %vm1006_vm13 = vcmp.eq.f32.partialorder %v1005_v49, 8.507059e+37 }
 0xa24   : > { %v985_v32 = vadd.f32 %v9564_v19, %v984_v22 }
 0xa26   : > { %v989_v35 = vsel %vm988_vm7, %v9564_v19, %v985_v32 }
 0xa27   : > { %v994_v38 = vsel %vm991_vm8, %v993_v36, %v989_v35  ;;  %v9568_v43 = vpop.eup %9567 }
 0xa28   : > { %v997_v44 = vmul.f32 %v9568_v43, %v980_v42  ;;  %vm1002_vm10 = vweird.f32 %v9568_v43  ;;  %v1013_v55 = vmul.f32 %v994_v38, %v10285_v57 }
 0xa29   : > { %vm1003_vm12 = vmor %vm1001_vm11, %vm1002_vm10 }
 0xa2a   : > { %v998_v45 = vsub.f32 1.0, %v997_v44 }
 0xa2c   : > { %v999_v46 = vmul.f32 %v9568_v43, %v998_v45 }
 0xa2e   : > { %v1000_v47 = vadd.f32 %v9568_v43, %v999_v46 }
 0xa30   : > { %v1004_v50 = vsel %vm1003_vm12, %v9568_v43, %v1000_v47 }
 0xa31   : > { %v1009_v53 = vsel %vm1006_vm13, %v1008_v51, %v1004_v50 }
 0xa32   : > { %v1014_v61 = vmul.f32 %v1009_v53, %v10289_v62 }
 0xa4e   : > { %v1018_v37 = vpop.permute.xlu2 %1017 }
 0xa4f   : > { %v1023_v39 = vmul.f32 %v1018_v37, %v994_v38 }
 0xa51   : > { %1027 = vrot.lane.b32.xlu0 %v1023_v39, %s9988_s7 }
 0xa86   : > { %v1020_v52 = vpop.permute.xlu1 %1019 }
 0xa87   : > { %v1024_v54 = vmul.f32 %v1020_v52, %v1009_v53 }
 0xa89   : > { %1029 = vrot.lane.b32.xlu0 %v1024_v54, %s9988_s7 }
 0xac3   : > { %v1028_v56 = vpop.permute.xlu0 %1027 }
 0xac4   : > { %v10315_v58 = vadd.f32 %v1028_v56, %v1013_v55 }
 0xac6   : > { %9569 = vtanh.f32 %v10315_v58 }
 0xacc   : > { %v9570_v60 = vpop.eup %9569 }
 0xacd   : > { %1039 = vrot.lane.b32.xlu2 %v9570_v60, %s9987_s6 }
 0xafb   : > { %v1030_v1 = vpop.permute.xlu0 %1029 }
 0xafc   : > { %v10320_v59 = vadd.f32 %v1030_v1, %v1014_v61 }
 0xafe   : > { %9571 = vtanh.f32 %v10320_v59 }
 0xb04   : > { %v9572_v63 = vpop.eup %9571 }
 0xb05   : > { %1041 = vrot.lane.b32.xlu2 %v9572_v63, %s9987_s6 }
 0xb27   : > { %v1040_v57 = vpop.permute.xlu2 %1039 }
 0xb28   : > { %v1045_v2 = vmul.f32 %v1040_v57, %v994_v38 }
 0xb2a   : > { %1049 = vrot.lane.b32.xlu1 %v1045_v2, %s9988_s7 }
 0xb5f   : > { %v1042_v4 = vpop.permute.xlu2 %1041 }
 0xb60   : > { %v1046_v0 = vmul.f32 %v1042_v4, %v1009_v53 }
 0xb62   : > { %1051 = vrot.lane.b32.xlu0 %v1046_v0, %s9988_s7 }
 0xb9c   : > { %v10328_v62 = vpop.permute.xlu1 %1049 }
 0xb9d   : > { %8724 = vmatmul.msk.f32.vlgmr.msrb.gmra.mxu3 %vm508_vm9, %v10328_v62 }
 0xbd4   : > { %v10334_v11 = vpop.permute.xlu0 %1051 }
 0xbd5   : > { %14727 = vst [vmem:[#allocation8_spill] sm:$0xff] %v10334_v11  ;;  %8725 = vmatmul.msk.f32.gmra.mxu3 %vm508_vm9, %v10334_v11 }
 0xc20   : > { %v1074_v15 = vpop.f32.mrf.mxu3 }
 0xc21   : > { %v1080_v16 = vadd.f32 %v1074_v15, %v491_v14 }
 0xc23   : > { %9573 = vtanh.f32 %v1080_v16  ;;  %v8726_v30 = vmul.f32 -1.442695, %v1080_v16  ;;  %v496_v16 = vpop.f32.mrf.mxu0 }
 0xc29   : > { %v9574_v23 = vpop.eup %9573 }
 0xc2a   : > { %1126 = vrot.lane.b32.xlu1 %v9574_v23, %s9987_s6  ;;  %v10371_v23 = vld [vmem:[%s14572_s3] ss:$0 sm:$0xff] }
 0xc2b   : > { %v497_v24 = vadd.f32 %v10371_v23, %v496_v16 }
 0xc58   : > { %v1077_v28 = vpop.f32.mrf.mxu3 }
 0xc59   : > { %v1081_v29 = vadd.f32 %v1077_v28, %v494_v26 }
 0xc5b   : > { %9575 = vtanh.f32 %v1081_v29  ;;  %v8727_v41 = vmul.f32 -1.442695, %v1081_v29 }
 0xc5c   : > { %9577 = vpow2.f32 %v8726_v30 }
 0xc61   : > { %v9576_v18 = vpop.eup %9575 }
 0xc62   : > { %1128 = vrot.lane.b32.xlu0 %v9576_v18, %s9987_s6  ;;  %v9578_v19 = vpop.eup %9577 }
 0xc63   : > { %v1088_v31 = vadd.f32 1.0, %v9578_v19 }
 0xc65   : > { %9579 = vrcp.f32 %v1088_v31  ;;  %v1101_v35 = vand.u32 2147483648, %v1088_v31  ;;  %vm1095_vm15 = vweird.f32 %v1088_v31  ;;  %v1099_v27 = vand.u32 2147483647, %v1088_v31 }
 0xc66   : > { %9581 = vpow2.f32 %v8727_v41 }
 0xc67   : > { %v1102_v37 = vor.u32 1.1754944e-38, %v1101_v35  ;;  %vm1100_vm2 = vcmp.eq.f32.partialorder %v1099_v27, 8.507059e+37 }
 0xc6b   : > { %v9580_v21 = vpop.eup %9579 }
 0xc6c   : > { %v1091_v22 = vmul.f32 %v9580_v21, %v1088_v31  ;;  %vm1096_vm14 = vweird.f32 %v9580_v21  ;;  %v9582_v42 = vpop.eup %9581 }
 0xc6d   : > { %vm1097_vm1 = vmor %vm1095_vm15, %vm1096_vm14  ;;  %v1089_v43 = vadd.f32 1.0, %v9582_v42 }
 0xc6e   : > { %v1092_v32 = vsub.f32 1.0, %v1091_v22 }
 0xc6f   : > { %9583 = vrcp.f32 %v1089_v43  ;;  %v1116_v49 = vand.u32 2147483648, %v1089_v43  ;;  %vm1110_vm4 = vweird.f32 %v1089_v43  ;;  %v1114_v50 = vand.u32 2147483647, %v1089_v43 }
 0xc70   : > { %v1093_v33 = vmul.f32 %v9580_v21, %v1092_v32 }
 0xc71   : > { %v1117_v52 = vor.u32 1.1754944e-38, %v1116_v49  ;;  %vm1115_vm6 = vcmp.eq.f32.partialorder %v1114_v50, 8.507059e+37 }
 0xc72   : > { %v1094_v34 = vadd.f32 %v9580_v21, %v1093_v33 }
 0xc74   : > { %v1098_v36 = vsel %vm1097_vm1, %v9580_v21, %v1094_v34 }
 0xc75   : > { %v1103_v39 = vsel %vm1100_vm2, %v1102_v37, %v1098_v36  ;;  %v9584_v44 = vpop.eup %9583 }
 0xc76   : > { %v1106_v45 = vmul.f32 %v9584_v44, %v1089_v43  ;;  %vm1111_vm3 = vweird.f32 %v9584_v44  ;;  %v1122_v56 = vmul.f32 %v1103_v39, %v10315_v58 }
 0xc77   : > { %vm1112_vm5 = vmor %vm1110_vm4, %vm1111_vm3 }
 0xc78   : > { %v1107_v46 = vsub.f32 1.0, %v1106_v45 }
 0xc7a   : > { %v1108_v47 = vmul.f32 %v9584_v44, %v1107_v46 }
 0xc7c   : > { %v1109_v48 = vadd.f32 %v9584_v44, %v1108_v47 }
 0xc7e   : > { %v1113_v51 = vsel %vm1112_vm5, %v9584_v44, %v1109_v48 }
 0xc7f   : > { %v1118_v54 = vsel %vm1115_vm6, %v1117_v52, %v1113_v51 }
 0xc80   : > { %v1123_v63 = vmul.f32 %v1118_v54, %v10320_v59  ;;  %v390_v59 = vld [vmem:[%s10114_s11 + $0x68] sm:$0xff] }
 0xc81   : > { %8703 = vmatmul.msk.f32.gmra.mxu0 %vm394_vm0, %v390_v59 }
 0xc9c   : > { %v1127_v38 = vpop.permute.xlu1 %1126 }
 0xc9d   : > { %v1132_v40 = vmul.f32 %v1127_v38, %v1103_v39 }
 0xc9f   : > { %1136 = vrot.lane.b32.xlu2 %v1132_v40, %s9988_s7 }
 0xcd4   : > { %v1129_v53 = vpop.permute.xlu0 %1128 }
 0xcd5   : > { %v1133_v55 = vmul.f32 %v1129_v53, %v1118_v54 }
 0xcd7   : > { %1138 = vrot.lane.b32.xlu2 %v1133_v55, %s9988_s7 }
 0xcf9   : > { %v1137_v60 = vpop.permute.xlu2 %1136 }
 0xcfa   : > { %v10345_v61 = vadd.f32 %v1137_v60, %v1122_v56 }
 0xcfc   : > { %9585 = vtanh.f32 %v10345_v61 }
 0xcfe   : > { %v499_v18 = vpop.f32.mrf.mxu0 }
 0xcff   : > { %v500_v30 = vadd.f32 %v10371_v23, %v499_v18 }
 0xd02   : > { %v9586_v1 = vpop.eup %9585 }
 0xd03   : > { %1148 = vrot.lane.b32.xlu1 %v9586_v1, %s9987_s6 }
 0xd31   : > { %v1139_v57 = vpop.permute.xlu2 %1138 }
 0xd32   : > { %v10350_v2 = vadd.f32 %v1139_v57, %v1123_v63  ;;  %v348_v57 = vld [vmem:[%s14571_s2 + $0x40] sm:$0xff] }
 0xd33   : > { %1714 = vmatpush.msra.mxu3 %v348_v57 }
 0xd34   : > { %9587 = vtanh.f32 %v10350_v2 }
 0xd3a   : > { %v9588_v4 = vpop.eup %9587 }
 0xd3b   : > { %1150 = vrot.lane.b32.xlu1 %v9588_v4, %s9987_s6  ;;  %v347_v4 = vld [vmem:[%s14571_s2 + $0x38] sm:$0xff] }
 0xd3c   : > { %1715 = vmatpush.msra.mxu3 %v347_v4 }
 0xd75   : > { %v1149_v58 = vpop.permute.xlu1 %1148 }
 0xd76   : > { %v1154_v0 = vmul.f32 %v1149_v58, %v1103_v39  ;;  %v345_v58 = vld [vmem:[%s14571_s2 + $0x28] sm:$0xff] }
 0xd78   : > { %1158 = vrot.lane.b32.xlu0 %v1154_v0, %s9988_s7  ;;  %v346_v0 = vld [vmem:[%s14571_s2 + $0x30] sm:$0xff] }
 0xd79   : > { %v9154_v7 = vpack.i.bf16 %v345_v58, %v346_v0  ;;  %1716 = vmatpush.msra.mxu3 %v346_v0 }
 0xd7b   : > { %1717 = vmatpush.msra.mxu3 %v345_v58  ;;  %v1641_v58 = vld [vmem:[%s10116_s14 + $0xa0] sm:$0xff] }
 0xdad   : > { %v1151_v10 = vpop.permute.xlu1 %1150 }
 0xdae   : > { %v1155_v13 = vmul.f32 %v1151_v10, %v1118_v54 }
 0xdb0   : > { %1160 = vrot.lane.b32.xlu2 %v1155_v13, %s9988_s7 }
 0xdea   : > { %v10360_v14 = vpop.permute.xlu0 %1158 }
 0xdeb   : > { %8728 = vmatmul.msk.f32.vlgmr.msrb.gmra.mxu1 %vm508_vm9, %v10360_v14 }
 0xe0a   : > { %v10364_v15 = vpop.permute.xlu2 %1160 }
 0xe0b   : > { %8729 = vmatmul.msk.f32.gmra.mxu1 %vm508_vm9, %v10364_v15 }
 0xe68   : > { %v1183_v26 = vpop.f32.mrf.mxu1 }
 0xe69   : > { %v1189_v28 = vadd.f32 %v1183_v26, %v497_v24  ;;  %v9149_v24 = vpack.i.bf16 %v347_v4, %v348_v57  ;;  %v9490_v26 = vld [vmem:[%s14572_s3 + $0x1] ss:$0 sm:$0xff] }
 0xe6b   : > { %9589 = vtanh.f32 %v1189_v28  ;;  %v8730_v22 = vmul.f32 -1.442695, %v1189_v28 }
 0xe71   : > { %v9590_v29 = vpop.eup %9589 }
 0xe72   : > { %1235 = vrot.lane.b32.xlu0 %v9590_v29, %s9987_s6 }
 0xe88   : > { %v1186_v19 = vpop.f32.mrf.mxu1 }
 0xe89   : > { %v1190_v31 = vadd.f32 %v1186_v19, %v500_v30 }
 0xe8b   : > { %9591 = vtanh.f32 %v1190_v31  ;;  %v8731_v32 = vmul.f32 -1.442695, %v1190_v31 }
 0xe8c   : > { %9593 = vpow2.f32 %v8730_v22  ;;  %v1621_v22 = vld [vmem:[%s10116_s14] sm:$0xff] }
 0xe8d   : > { %9595 = vpow2.f32 %v8731_v32  ;;  %v1622_v32 = vld [vmem:[%s10116_s14 + $0x8] sm:$0xff] }
 0xe91   : > { %v9592_v21 = vpop.eup %9591 }
 0xe92   : > { %1237 = vrot.lane.b32.xlu2 %v9592_v21, %s9987_s6  ;;  %v9594_v33 = vpop.eup %9593 }
 0xe93   : > { %v1197_v34 = vadd.f32 1.0, %v9594_v33  ;;  %v9596_v35 = vpop.eup %9595  ;;  %v1623_v33 = vld [vmem:[%s10116_s14 + $0x10] sm:$0xff] }
 0xe94   : > { %v1198_v27 = vadd.f32 1.0, %v9596_v35  ;;  %v1625_v35 = vld [vmem:[%s10116_s14 + $0x20] sm:$0xff] }
 0xe95   : > { %9597 = vrcp.f32 %v1197_v34  ;;  %v1210_v44 = vand.u32 2147483648, %v1197_v34  ;;  %vm1204_vm8 = vweird.f32 %v1197_v34  ;;  %v1208_v45 = vand.u32 2147483647, %v1197_v34 }
 0xe96   : > { %9599 = vrcp.f32 %v1198_v27  ;;  %v1225_v53 = vand.u32 2147483648, %v1198_v27  ;;  %vm1219_vm13 = vweird.f32 %v1198_v27  ;;  %v1223_v54 = vand.u32 2147483647, %v1198_v27 }
 0xe97   : > { %v1211_v48 = vor.u32 1.1754944e-38, %v1210_v44  ;;  %vm1209_vm11 = vcmp.eq.f32.partialorder %v1208_v45, 8.507059e+37  ;;  %v1635_v44 = vld [vmem:[%s10116_s14 + $0x70] sm:$0xff]  ;;  %v1636_v45 = vld [vmem:[%s10116_s14 + $0x78] sm:$0xff] }
 0xe98   : > { %v1226_v56 = vor.u32 1.1754944e-38, %v1225_v53  ;;  %vm1224_vm15 = vcmp.eq.f32.partialorder %v1223_v54, 8.507059e+37 }
 0xe9b   : > { %v9598_v36 = vpop.eup %9597 }
 0xe9c   : > { %v1200_v37 = vmul.f32 %v9598_v36, %v1197_v34  ;;  %v9600_v39 = vpop.eup %9599  ;;  %vm1205_vm7 = vweird.f32 %v9598_v36  ;;  %v1624_v34 = vld [vmem:[%s10116_s14 + $0x18] sm:$0xff] }
 0xe9d   : > { %v1215_v41 = vmul.f32 %v9600_v39, %v1198_v27  ;;  %vm1206_vm10 = vmor %vm1204_vm8, %vm1205_vm7  ;;  %vm1220_vm12 = vweird.f32 %v9600_v39  ;;  %v1626_v27 = vld [vmem:[%s10116_s14 + $0x28] sm:$0xff] }
 0xe9e   : > { %v1201_v38 = vsub.f32 1.0, %v1200_v37  ;;  %vm1221_vm14 = vmor %vm1219_vm13, %vm1220_vm12  ;;  %v1628_v37 = vld [vmem:[%s10116_s14 + $0x38] sm:$0xff] }
 0xe9f   : > { %v1216_v43 = vsub.f32 1.0, %v1215_v41  ;;  %v1632_v41 = vld [vmem:[%s10116_s14 + $0x58] sm:$0xff] }
 0xea0   : > { %v1202_v40 = vmul.f32 %v9598_v36, %v1201_v38  ;;  %v1629_v38 = vld [vmem:[%s10116_s14 + $0x40] sm:$0xff] }
 0xea1   : > { %v1217_v47 = vmul.f32 %v9600_v39, %v1216_v43  ;;  %v1634_v43 = vld [vmem:[%s10116_s14 + $0x68] sm:$0xff] }
 0xea2   : > { %v1203_v42 = vadd.f32 %v9598_v36, %v1202_v40  ;;  %v1631_v40 = vld [vmem:[%s10116_s14 + $0x50] sm:$0xff] }
 0xea3   : > { %v1218_v52 = vadd.f32 %v9600_v39, %v1217_v47 }
 0xea4   : > { %v1207_v46 = vsel %vm1206_vm10, %v9598_v36, %v1203_v42  ;;  %v1627_v36 = vld [vmem:[%s10116_s14 + $0x30] sm:$0xff]  ;;  %v1633_v42 = vld [vmem:[%s10116_s14 + $0x60] sm:$0xff]  ;;  %vm1397_vm10 = vcmask 1047556  }
 0xea5   : > { %v10377_v50 = vsel %vm1209_vm11, %v1211_v48, %v1207_v46  ;;  %v1222_v55 = vsel %vm1221_vm14, %v9600_v39, %v1218_v52  ;;  %v1630_v39 = vld [vmem:[%s10116_s14 + $0x48] sm:$0xff]  ;;  %v1637_v48 = vld [vmem:[%s10116_s14 + $0x80] sm:$0xff]  ;;  %vm4012_vm11 = vcmask 130048  }
 0xea6   : > { %v10381_v1 = vsel %vm1224_vm15, %v1226_v56, %v1222_v55  ;;  %v1231_v10 = vmul.f32 %v10377_v50, %v10345_v61  ;;  %v1638_v52 = vld [vmem:[%s10116_s14 + $0x88] sm:$0xff]  ;;  %v1639_v55 = vld [vmem:[%s10116_s14 + $0x90] sm:$0xff] }
 0xee4   : > { %v1236_v49 = vpop.permute.xlu0 %1235 }
 0xee5   : > { %v1241_v51 = vmul.f32 %v1236_v49, %v10377_v50 }
 0xee7   : > { %1245 = vrot.lane.b32.xlu1 %v1241_v51, %s9988_s7 }
 0xeec   : > { %v1238_v60 = vpop.permute.xlu2 %1237 }
 0xeed   : > { %v1242_v63 = vmul.f32 %v1238_v60, %v10381_v1 }
 0xeef   : > { %1247 = vrot.lane.b32.xlu1 %v1242_v63, %s9988_s7  ;;  %v1640_v63 = vld [vmem:[%s10116_s14 + $0x98] sm:$0xff] }
 0xef7   : > { %9155 = vrot.lane.b32.xlu1 %v9154_v7, %s9989_s26 }
 0xf59   : > { %v1246_v13 = vpop.permute.xlu1 %1245 }
 0xf5a   : > { %v10400_v59 = vadd.f32 %v1246_v13, %v1231_v10  ;;  %v1642_v10 = vld [vmem:[%s10116_s14 + $0xa8] sm:$0xff] }
 0xf5c   : > { %9601 = vtanh.f32 %v10400_v59 }
 0xf61   : > { %v10409_v61 = vpop.permute.xlu1 %1247 }
 0xf62   : > { %v9602_v16 = vpop.eup %9601 }
 0xf63   : > { %1257 = vrot.lane.b32.xlu0 %v9602_v16, %s9987_s6 }
 0xf69   : > { %v9156_v18 = vpop.permute.xlu1 %9155 }
 0xf6a   : > { %v9157_v31 = vunpack.i.l.bf16 %v9156_v18  ;;  %v9158_v21 = vunpack.i.h.bf16 %v9156_v18  ;;  %v1644_v18 = vld [vmem:[%s10116_s14 + $0xb8] sm:$0xff] }
 0xf6b   : > { %9150 = vrot.lane.b32.xlu0 %v9149_v24, %s9989_s26  ;;  %v1643_v24 = vld [vmem:[%s10116_s14 + $0xb0] sm:$0xff] }
 0xf73   : > { %1800 = vrot.lane.b32.xlu0 %v9490_v26, %s9989_s26 }
 0xfd5   : > { %v10411_v28 = vpop.permute.xlu0 %1257 }
 0xfdd   : > { %v9151_v29 = vpop.permute.xlu0 %9150 }
 0xfde   : > { %v9152_v30 = vunpack.i.l.bf16 %v9151_v29  ;;  %v9153_v19 = vunpack.i.h.bf16 %v9151_v29 }
 0xfe0   : > { %1911 = vmatpush.msra.mxu1 %v9152_v30 }
 0xfe2   : > { %1912 = vmatpush.msra.mxu1 %v9153_v19 }
 0xfe4   : > { %1913 = vmatpush.msra.mxu1 %v9157_v31  ;;  %v1645_v31 = vld [vmem:[%s10116_s14 + $0xc0] sm:$0xff] }
 0xfe5   : > { %v10445_v46 = vpop.permute.xlu0 %1800 }
 0xfe6   : > { %1914 = vmatpush.msra.mxu1 %v9158_v21 }
 0xfe7   : > { %8752 = vmatmul.msk.f32.vlgmr.msra.gmra.mxu1 %vm508_vm9, %v1621_v22  ;;  %v1232_v22 = vmul.f32 %v10381_v1, %v10350_v2 }
 0xfef   : > { %8753 = vmatmul.msk.f32.gmra.mxu1 %vm508_vm9, %v1622_v32  ;;  %v10517_v32 = vadd.f32 %v10409_v61, %v1232_v22 }
 0xff1   : > { %9603 = vtanh.f32 %v10517_v32 }
 0xff7   : > { %8754 = vmatmul.msk.f32.gmra.mxu1 %vm508_vm9, %v1623_v33  ;;  %v9604_v61 = vpop.eup %9603 }
 0xfff   : > { %8755 = vmatmul.msk.f32.gmra.mxu1 %vm508_vm9, %v1624_v34  ;;  %v1646_v34 = vld [vmem:[%s10116_s14 + $0xc8] sm:$0xff] }
0x1007   : > { %8756 = vmatmul.msk.f32.gmra.mxu1 %vm508_vm9, %v1625_v35 }
0x100f   : > { %8757 = vmatmul.msk.f32.gmra.mxu1 %vm508_vm9, %v1626_v27 }
0x1017   : > { %8758 = vmatmul.msk.f32.gmra.mxu1 %vm508_vm9, %v1627_v36  ;;  %v1647_v36 = vld [vmem:[%s10116_s14 + $0xd0] sm:$0xff] }
0x101f   : > { %8759 = vmatmul.msk.f32.gmra.mxu1 %vm508_vm9, %v1628_v37 }
0x1027   : > { %8760 = vmatmul.msk.f32.gmra.mxu1 %vm508_vm9, %v1629_v38  ;;  %v1648_v38 = vld [vmem:[%s10116_s14 + $0xd8] sm:$0xff] }
0x102f   : > { %8761 = vmatmul.msk.f32.gmra.mxu1 %vm508_vm9, %v1630_v39 }
0x1037   : > { %8762 = vmatmul.msk.f32.gmra.mxu1 %vm508_vm9, %v1631_v40 }
0x103f   : > { %8763 = vmatmul.msk.f32.gmra.mxu1 %vm508_vm9, %v1632_v41  ;;  %v1649_v41 = vld [vmem:[%s10116_s14 + $0xe0] sm:$0xff] }
0x1047   : > { %8764 = vmatmul.msk.f32.gmra.mxu1 %vm508_vm9, %v1633_v42 }
0x104f   : > { %8765 = vmatmul.msk.f32.gmra.mxu1 %vm508_vm9, %v1634_v43 }
0x1057   : > { %8766 = vmatmul.msk.f32.gmra.mxu1 %vm508_vm9, %v1635_v44  ;;  %v1650_v44 = vld [vmem:[%s10116_s14 + $0xe8] sm:$0xff] }
0x105f   : > { %8767 = vmatmul.msk.f32.gmra.mxu1 %vm508_vm9, %v1636_v45 }
0x1064   : > { %v1916_v47 = vpop.f32.mrf.mxu1 }
0x1065   : > { %v10449_v49 = vadd.f32 %v1916_v47, %v10445_v46 }
0x1067   : > { %8768 = vmatmul.msk.f32.gmra.mxu1 %vm508_vm9, %v1637_v48  ;;  %2478 = vrot.lane.b32.xlu2 %v10449_v49, %s9990_s29  ;;  %v1651_v48 = vld [vmem:[%s10116_s14 + $0xf0] sm:$0xff] }
0x106c   : > { %v1919_v51 = vpop.f32.mrf.mxu1 }
0x106d   : > { %v10456_v53 = vadd.f32 %v1919_v51, %v10445_v46 }
0x106f   : > { %8769 = vmatmul.msk.f32.gmra.mxu1 %vm508_vm9, %v1638_v52  ;;  %8784 = vmatpush.xpose.msk.msrb.mxu2 %vm394_vm0, %v10456_v53 }
0x1070   : > { %2480 = vrot.lane.b32.xlu0 %v10456_v53, %s9990_s29 }
0x1073   : > { %8785 = vmatpush.xpose.msk.msrb.mxu2 %vm394_vm0, %v10449_v49 }
0x1074   : > { %v1922_v54 = vpop.f32.mrf.mxu1 }
0x1075   : > { %v10467_v56 = vadd.f32 %v1922_v54, %v10445_v46  ;;  %v1652_v54 = vld [vmem:[%s10116_s14 + $0xf8] sm:$0xff]  ;;  %s9991_s14 = smov 112  }
0x1077   : > { %8770 = vmatmul.msk.f32.gmra.mxu1 %vm508_vm9, %v1639_v55  ;;  %2510 = vrot.lane.b32.xlu2 %v10467_v56, %s9990_s29 }
0x107c   : > { %v1925_v60 = vpop.f32.mrf.mxu1 }
0x107d   : > { %v10474_v57 = vadd.f32 %v1925_v60, %v10445_v46 }
0x107f   : > { %8771 = vmatmul.msk.f32.gmra.mxu1 %vm508_vm9, %v1640_v63  ;;  %2512 = vrot.lane.b32.xlu0 %v10474_v57, %s9990_s29 }
0x1084   : > { %v1928_v4 = vpop.f32.mrf.mxu1 }
0x1085   : > { %v10481_v0 = vadd.f32 %v1928_v4, %v10445_v46 }
0x1087   : > { %8772 = vmatmul.msk.f32.gmra.mxu1 %vm508_vm9, %v1641_v58  ;;  %2542 = vrot.lane.b32.xlu2 %v10481_v0, %s9990_s29 }
0x108c   : > { %v1931_v7 = vpop.f32.mrf.mxu1 }
0x108d   : > { %v10488_v13 = vadd.f32 %v1931_v7, %v10445_v46 }
0x108f   : > { %8773 = vmatmul.msk.f32.gmra.mxu1 %vm508_vm9, %v1642_v10  ;;  %2544 = vrot.lane.b32.xlu0 %v10488_v13, %s9990_s29 }
0x1094   : > { %v1934_v16 = vpop.f32.mrf.mxu1 }
0x1095   : > { %v10495_v26 = vadd.f32 %v1934_v16, %v10445_v46 }
0x1097   : > { %8774 = vmatmul.msk.f32.gmra.mxu1 %vm508_vm9, %v1643_v24  ;;  %2574 = vrot.lane.b32.xlu2 %v10495_v26, %s9990_s29 }
0x109c   : > { %v1937_v29 = vpop.f32.mrf.mxu1 }
0x109d   : > { %v10502_v30 = vadd.f32 %v1937_v29, %v10445_v46 }
0x109f   : > { %8775 = vmatmul.msk.f32.gmra.mxu1 %vm508_vm9, %v1644_v18  ;;  %2576 = vrot.lane.b32.xlu0 %v10502_v30, %s9990_s29 }
0x10a4   : > { %v1940_v19 = vpop.f32.mrf.mxu1 }
0x10a5   : > { %v10509_v21 = vadd.f32 %v1940_v19, %v10445_v46 }
0x10a7   : > { %8776 = vmatmul.msk.f32.gmra.mxu1 %vm508_vm9, %v1645_v31  ;;  %2606 = vrot.lane.b32.xlu2 %v10509_v21, %s9990_s29 }
0x10ac   : > { %v1943_v33 = vpop.f32.mrf.mxu1 }
0x10ad   : > { %v10521_v35 = vadd.f32 %v1943_v33, %v10445_v46 }
0x10af   : > { %8777 = vmatmul.msk.f32.gmra.mxu1 %vm508_vm9, %v1646_v34  ;;  %2608 = vrot.lane.b32.xlu0 %v10521_v35, %s9990_s29 }
0x10b4   : > { %v1946_v27 = vpop.f32.mrf.mxu1 }
0x10b5   : > { %v10529_v2 = vadd.f32 %v1946_v27, %v10445_v46 }
0x10b7   : > { %8778 = vmatmul.msk.f32.gmra.mxu1 %vm508_vm9, %v1647_v36  ;;  %1259 = vrot.lane.b32.xlu0 %v9604_v61, %s9987_s6 }
0x10b8   : > { %2638 = vrot.lane.b32.xlu2 %v10529_v2, %s9990_s29 }
0x10bc   : > { %v1949_v37 = vpop.f32.mrf.mxu1 }
0x10bd   : > { %v10537_v39 = vadd.f32 %v1949_v37, %v10445_v46 }
0x10bf   : > { %8779 = vmatmul.msk.f32.gmra.mxu1 %vm508_vm9, %v1648_v38  ;;  %2640 = vrot.lane.b32.xlu0 %v10537_v39, %s9990_s29  ;;  %v1263_v38 = vmul.f32 %v10411_v28, %v10377_v50 }
0x10c1   : > { %v10615_v61 = vpop.permute.xlu2 %2478 }
0x10c2   : > { %14738 = vst [vmem:[#allocation19_spill] sm:$0xff] %v10615_v61 }
0x10c4   : > { %v1952_v40 = vpop.f32.mrf.mxu1 }
0x10c5   : > { %v10544_v42 = vadd.f32 %v1952_v40, %v10445_v46 }
0x10c7   : > { %8780 = vmatmul.msk.f32.gmra.mxu1 %vm508_vm9, %v1649_v41  ;;  %2670 = vrot.lane.b32.xlu2 %v10544_v42, %s9990_s29 }
0x10cc   : > { %v1955_v43 = vpop.f32.mrf.mxu1 }
0x10cd   : > { %v10551_v45 = vadd.f32 %v1955_v43, %v10445_v46 }
0x10cf   : > { %8781 = vmatmul.msk.f32.gmra.mxu1 %vm508_vm9, %v1650_v44  ;;  %2672 = vrot.lane.b32.xlu0 %v10551_v45, %s9990_s29 }
0x10d1   : > { %v10627_v43 = vpop.permute.xlu2 %2510 }
0x10d2   : > { %14741 = vst [vmem:[#allocation22_spill] sm:$0xff] %v10627_v43 }
0x10d4   : > { %v1958_v47 = vpop.f32.mrf.mxu1 }
0x10d5   : > { %v10558_v51 = vadd.f32 %v1958_v47, %v10445_v46 }
0x10d7   : > { %8782 = vmatmul.msk.f32.gmra.mxu1 %vm508_vm9, %v1651_v48  ;;  %2702 = vrot.lane.b32.xlu2 %v10558_v51, %s9990_s29 }
0x10dc   : > { %v1961_v52 = vpop.f32.mrf.mxu1 }
0x10dd   : > { %v10565_v55 = vadd.f32 %v1961_v52, %v10445_v46 }
0x10df   : > { %8783 = vmatmul.msk.f32.gmra.mxu1 %vm508_vm9, %v1652_v54  ;;  %2704 = vrot.lane.b32.xlu0 %v10565_v55, %s9990_s29 }
0x10e1   : > { %v10636_v28 = vpop.permute.xlu2 %2542 }
0x10e2   : > { %v10595_v19 = vpop.permute.xlu0 %2480  ;;  %14743 = vst [vmem:[#allocation24_spill] sm:$0xff] %v10636_v28 }
0x10e3   : > { %14733 = vst [vmem:[#allocation14_spill] sm:$0xff] %v10595_v19 }
0x10e4   : > { %v1964_v60 = vpop.f32.mrf.mxu1 }
0x10e5   : > { %v10571_v63 = vadd.f32 %v1964_v60, %v10445_v46 }
0x10e7   : > { %14728 = vst [vmem:[#allocation9_spill] sm:$0xff] %v10571_v63  ;;  %2734 = vrot.lane.b32.xlu2 %v10571_v63, %s9990_s29 }
0x10ec   : > { %v1967_v4 = vpop.f32.mrf.mxu1 }
0x10ed   : > { %v10576_v58 = vadd.f32 %v1967_v4, %v10445_v46 }
0x10ef   : > { %14729 = vst [vmem:[#allocation10_spill] sm:$0xff] %v10576_v58  ;;  %2736 = vrot.lane.b32.xlu0 %v10576_v58, %s9990_s29 }
0x10f1   : > { %v10604_v33 = vpop.permute.xlu0 %2512  ;;  %v10647_v54 = vpop.permute.xlu2 %2574 }
0x10f2   : > { %14735 = vst [vmem:[#allocation16_spill] sm:$0xff] %v10604_v33 }
0x10f3   : > { %14745 = vst [vmem:[#allocation26_spill] sm:$0xff] %v10647_v54 }
0x10f4   : > { %v1970_v7 = vpop.f32.mrf.mxu1 }
0x10f5   : > { %v10581_v10 = vadd.f32 %v1970_v7, %v10445_v46 }
0x10f7   : > { %14730 = vst [vmem:[#allocation11_spill] sm:$0xff] %v10581_v10  ;;  %2766 = vrot.lane.b32.xlu2 %v10581_v10, %s9990_s29 }
0x10fc   : > { %v1973_v16 = vpop.f32.mrf.mxu1 }
0x10fd   : > { %v10586_v24 = vadd.f32 %v1973_v16, %v10445_v46 }
0x10ff   : > { %14731 = vst [vmem:[#allocation12_spill] sm:$0xff] %v10586_v24  ;;  %2768 = vrot.lane.b32.xlu0 %v10586_v24, %s9990_s29 }
0x1101   : > { %v10613_v36 = vpop.permute.xlu0 %2544 }
0x1102   : > { %14737 = vst [vmem:[#allocation18_spill] sm:$0xff] %v10613_v36 }
0x1104   : > { %v1976_v29 = vpop.f32.mrf.mxu1 }
0x1105   : > { %v10591_v18 = vadd.f32 %v1976_v29, %v10445_v46  ;;  %v10658_v29 = vpop.permute.xlu2 %2606 }
0x1107   : > { %14732 = vst [vmem:[#allocation13_spill] sm:$0xff] %v10591_v18  ;;  %2798 = vrot.lane.b32.xlu2 %v10591_v18, %s9990_s29 }
0x110c   : > { %v1979_v31 = vpop.f32.mrf.mxu1 }
0x110d   : > { %v10598_v22 = vadd.f32 %v1979_v31, %v10445_v46 }
0x110f   : > { %14734 = vst [vmem:[#allocation15_spill] sm:$0xff] %v10598_v22  ;;  %8814 = vmatpush.xpose.msk.msrb.mxu3 %vm394_vm0, %v10598_v22  ;;  %2800 = vrot.lane.b32.xlu0 %v10598_v22, %s9990_s29 }
0x1111   : > { %v10625_v41 = vpop.permute.xlu0 %2576 }
0x1112   : > { %14740 = vst [vmem:[#allocation21_spill] sm:$0xff] %v10625_v41  ;;  %v9159_v41 = vpack.i.bf16 %v10456_v53, %v10488_v13 }
0x1113   : > { %8815 = vmatpush.xpose.msk.msrb.mxu3 %vm394_vm0, %v10591_v18 }
0x1114   : > { %v1982_v34 = vpop.f32.mrf.mxu1 }
0x1115   : > { %v10609_v27 = vadd.f32 %v1982_v34, %v10445_v46 }
0x1117   : > { %14736 = vst [vmem:[#allocation17_spill] sm:$0xff] %v10609_v27  ;;  %2830 = vrot.lane.b32.xlu2 %v10609_v27, %s9990_s29 }
0x111c   : > { %v1985_v37 = vpop.f32.mrf.mxu1 }
0x111d   : > { %v10620_v40 = vadd.f32 %v1985_v37, %v10445_v46  ;;  %v10665_v37 = vpop.permute.xlu2 %2638 }
0x111e   : > { %14748 = vst [vmem:[#allocation29_spill] sm:$0xff] %v10665_v37  ;;  %v391_v37 = vld [vmem:[%s10114_s11 + $0x70] sm:$0xff]  ;;  %s9992_s11 = smov 104  }
0x111f   : > { %14739 = vst [vmem:[#allocation20_spill] sm:$0xff] %v10620_v40  ;;  %2832 = vrot.lane.b32.xlu0 %v10620_v40, %s9990_s29  ;;  %1267 = vrot.lane.b32.xlu2 %v1263_v38, %s9988_s7 }
0x1120   : > { %8704 = vmatmul.msk.f32.gmra.mxu0 %vm394_vm0, %v391_v37 }
0x1121   : > { %v10634_v50 = vpop.permute.xlu0 %2608 }
0x1124   : > { %v1988_v44 = vpop.f32.mrf.mxu1 }
0x1125   : > { %v10630_v47 = vadd.f32 %v1988_v44, %v10445_v46  ;;  %v10672_v44 = vpop.permute.xlu2 %2670 }
0x1126   : > { %14750 = vst [vmem:[#allocation31_spill] sm:$0xff] %v10672_v44 }
0x1127   : > { %14742 = vst [vmem:[#allocation23_spill] sm:$0xff] %v10630_v47  ;;  %2862 = vrot.lane.b32.xlu2 %v10630_v47, %s9990_s29 }
0x1129   : > { %v1260_v60 = vpop.permute.xlu0 %1259 }
0x112a   : > { %v1264_v7 = vmul.f32 %v1260_v60, %v10381_v1 }
0x112c   : > { %v1991_v48 = vpop.f32.mrf.mxu1 }
0x112d   : > { %v10639_v52 = vadd.f32 %v1991_v48, %v10445_v46 }
0x112f   : > { %14744 = vst [vmem:[#allocation25_spill] sm:$0xff] %v10639_v52  ;;  %3376 = vrot.lane.b32.xlu1 %v10639_v52, %s9991_s14  ;;  %8820 = vmatpush.xpose.msk.msrb.mxu0 %vm394_vm0, %v10639_v52 }
0x1130   : > { %2864 = vrot.lane.b32.xlu0 %v10639_v52, %s9990_s29 }
0x1133   : > { %8821 = vmatpush.xpose.msk.msrb.mxu0 %vm394_vm0, %v10630_v47 }
0x1134   : > { %v1994_v4 = vpop.f32.mrf.mxu1 }
0x1135   : > { %v10653_v16 = vadd.f32 %v1994_v4, %v10445_v46  ;;  %v10681_v4 = vpop.permute.xlu2 %2702 }
0x1136   : > { %14752 = vst [vmem:[#allocation33_spill] sm:$0xff] %v10681_v4 }
0x1137   : > { %14746 = vst [vmem:[#allocation27_spill] sm:$0xff] %v10653_v16  ;;  %1269 = vrot.lane.b32.xlu1 %v1264_v7, %s9988_s7  ;;  %2894 = vrot.lane.b32.xlu2 %v10653_v16, %s9990_s29 }
0x113c   : > { %v1997_v31 = vpop.f32.mrf.mxu1 }
0x113d   : > { %v10661_v34 = vadd.f32 %v1997_v31, %v10445_v46 }
0x113f   : > { %14747 = vst [vmem:[#allocation28_spill] sm:$0xff] %v10661_v34  ;;  %2896 = vrot.lane.b32.xlu0 %v10661_v34, %s9990_s29 }
0x1144   : > { %v2000_v1 = vpop.f32.mrf.mxu1 }
0x1145   : > { %v10668_v38 = vadd.f32 %v2000_v1, %v10445_v46  ;;  %v10690_v1 = vpop.permute.xlu2 %2734 }
0x1146   : > { %14753 = vst [vmem:[#allocation34_spill] sm:$0xff] %v10690_v1 }
0x1147   : > { %14749 = vst [vmem:[#allocation30_spill] sm:$0xff] %v10668_v38  ;;  %2926 = vrot.lane.b32.xlu2 %v10668_v38, %s9990_s29 }
0x114c   : > { %v2003_v48 = vpop.f32.mrf.mxu1 }
0x114d   : > { %v10675_v60 = vadd.f32 %v2003_v48, %v10445_v46 }
0x114f   : > { %14751 = vst [vmem:[#allocation32_spill] sm:$0xff] %v10675_v60  ;;  %8826 = vmatpush.xpose.msk.msra.mxu0 %vm394_vm0, %v10675_v60  ;;  %2928 = vrot.lane.b32.xlu0 %v10675_v60, %s9990_s29 }
0x1153   : > { %8827 = vmatpush.xpose.msk.msra.mxu0 %vm394_vm0, %v10668_v38 }
0x1154   : > { %v2006_v7 = vpop.f32.mrf.mxu1 }
0x1155   : > { %v10686_v31 = vadd.f32 %v2006_v7, %v10445_v46  ;;  %v10703_v7 = vpop.permute.xlu2 %2766 }
0x1156   : > { %14754 = vst [vmem:[#allocation35_spill] sm:$0xff] %v10703_v7 }
0x1157   : > { %2958 = vrot.lane.b32.xlu2 %v10686_v31, %s9990_s29 }
0x115c   : > { %v2009_v48 = vpop.f32.mrf.mxu1 }
0x115d   : > { %v10693_v44 = vadd.f32 %v2009_v48, %v10445_v46 }
0x115f   : > { %2960 = vrot.lane.b32.xlu0 %v10693_v44, %s9990_s29  ;;  %3472 = vrot.lane.b32.xlu1 %v10693_v44, %s9991_s14 }
0x1160   : > { %2990 = vrot.lane.b32.xlu2 %v10449_v49, %s9991_s14 }
0x1161   : > { %v10711_v46 = vpop.permute.xlu2 %2798 }
0x1162   : > { %14755 = vst [vmem:[#allocation36_spill] sm:$0xff] %v10711_v46 }
0x1167   : > { %2992 = vrot.lane.b32.xlu0 %v10456_v53, %s9991_s14  ;;  %3470 = vrot.lane.b32.xlu1 %v10686_v31, %s9991_s14 }
0x1168   : > { %3022 = vrot.lane.b32.xlu2 %v10467_v56, %s9991_s14 }
0x116f   : > { %3024 = vrot.lane.b32.xlu0 %v10474_v57, %s9991_s14  ;;  %3536 = vrot.lane.b32.xlu1 %v10474_v57, %s9992_s11 }
0x1170   : > { %3054 = vrot.lane.b32.xlu2 %v10481_v0, %s9991_s14 }
0x1171   : > { %v10719_v37 = vpop.permute.xlu2 %2830 }
0x1172   : > { %14756 = vst [vmem:[#allocation37_spill] sm:$0xff] %v10719_v37 }
0x1177   : > { %3056 = vrot.lane.b32.xlu0 %v10488_v13, %s9991_s14  ;;  %3568 = vrot.lane.b32.xlu1 %v10488_v13, %s9992_s11 }
0x1178   : > { %3086 = vrot.lane.b32.xlu2 %v10495_v26, %s9991_s14 }
0x1179   : > { %v10727_v48 = vpop.permute.xlu2 %1267 }
0x117a   : > { %8732 = vmatmul.msk.f32.vlgmr.msra.gmra.mxu2 %vm508_vm9, %v10727_v48 }
0x117b   : > { %8787 = vmatpush.xpose.msk.msra.mxu2 %vm394_vm0, %v10474_v57 }
0x117f   : > { %8788 = vmatpush.xpose.msk.msra.mxu2 %vm394_vm0, %v10467_v56  ;;  %3088 = vrot.lane.b32.xlu0 %v10502_v30, %s9991_s14 }
0x1180   : > { %3566 = vrot.lane.b32.xlu1 %v10481_v0, %s9992_s11  ;;  %3118 = vrot.lane.b32.xlu2 %v10509_v21, %s9991_s14 }
0x1181   : > { %v10759_v37 = vpop.permute.xlu2 %2862 }
0x1182   : > { %14757 = vst [vmem:[#allocation38_spill] sm:$0xff] %v10759_v37 }
0x1187   : > { %3120 = vrot.lane.b32.xlu0 %v10521_v35, %s9991_s14 }
0x1188   : > { %3600 = vrot.lane.b32.xlu1 %v10502_v30, %s9992_s11  ;;  %3150 = vrot.lane.b32.xlu2 %v10529_v2, %s9991_s14 }
0x118f   : > { %3152 = vrot.lane.b32.xlu0 %v10537_v39, %s9991_s14 }
0x1190   : > { %3632 = vrot.lane.b32.xlu1 %v10521_v35, %s9992_s11  ;;  %3182 = vrot.lane.b32.xlu2 %v10544_v42, %s9991_s14 }
0x1191   : > { %v10767_v46 = vpop.permute.xlu2 %2894 }
0x1192   : > { %14758 = vst [vmem:[#allocation39_spill] sm:$0xff] %v10767_v46  ;;  %v10799_v46 = vpop.permute.xlu0 %2640 }
0x1193   : > { %14763 = vst [vmem:[#allocation44_spill] sm:$0xff] %v10799_v46 }
0x1197   : > { %3184 = vrot.lane.b32.xlu0 %v10551_v45, %s9991_s14 }
0x1198   : > { %3664 = vrot.lane.b32.xlu1 %v10537_v39, %s9992_s11  ;;  %3214 = vrot.lane.b32.xlu2 %v10558_v51, %s9991_s14 }
0x119a   : > { %v10809_v54 = vpop.permute.xlu0 %2672 }
0x119b   : > { %14765 = vst [vmem:[#allocation46_spill] sm:$0xff] %v10809_v54 }
0x119f   : > { %3216 = vrot.lane.b32.xlu0 %v10565_v55, %s9991_s14 }
0x11a0   : > { %3696 = vrot.lane.b32.xlu1 %v10551_v45, %s9992_s11  ;;  %3246 = vrot.lane.b32.xlu2 %v10571_v63, %s9991_s14 }
0x11a1   : > { %v10769_v7 = vpop.permute.xlu1 %3376  ;;  %v10777_v37 = vpop.permute.xlu2 %2926 }
0x11a2   : > { %14759 = vst [vmem:[#allocation40_spill] sm:$0xff] %v10769_v7  ;;  %v10819_v46 = vpop.permute.xlu0 %2704 }
0x11a3   : > { %14760 = vst [vmem:[#allocation41_spill] sm:$0xff] %v10777_v37 }
0x11a4   : > { %14767 = vst [vmem:[#allocation48_spill] sm:$0xff] %v10819_v46 }
0x11a7   : > { %3248 = vrot.lane.b32.xlu0 %v10576_v58, %s9991_s14 }
0x11a8   : > { %3726 = vrot.lane.b32.xlu1 %v10558_v51, %s9992_s11  ;;  %3278 = vrot.lane.b32.xlu2 %v10581_v10, %s9991_s14 }
0x11a9   : > { %v10779_v1 = vpop.permute.xlu1 %1269 }
0x11aa   : > { %8733 = vmatmul.msk.f32.gmra.mxu2 %vm508_vm9, %v10779_v1  ;;  %v10829_v54 = vpop.permute.xlu0 %2736 }
0x11ab   : > { %14769 = vst [vmem:[#allocation50_spill] sm:$0xff] %v10829_v54 }
0x11af   : > { %3280 = vrot.lane.b32.xlu0 %v10586_v24, %s9991_s14 }
0x11b0   : > { %3760 = vrot.lane.b32.xlu1 %v10576_v58, %s9992_s11  ;;  %3310 = vrot.lane.b32.xlu2 %v10591_v18, %s9991_s14 }
0x11b1   : > { %v10789_v7 = vpop.permute.xlu2 %2958 }
0x11b2   : > { %14761 = vst [vmem:[#allocation42_spill] sm:$0xff] %v10789_v7  ;;  %v10840_v28 = vpop.permute.xlu0 %2768 }
0x11b3   : > { %14771 = vst [vmem:[#allocation52_spill] sm:$0xff] %v10840_v28 }
0x11b7   : > { %3312 = vrot.lane.b32.xlu0 %v10598_v22, %s9991_s14 }
0x11b8   : > { %3824 = vrot.lane.b32.xlu1 %v10598_v22, %s9992_s11  ;;  %3342 = vrot.lane.b32.xlu2 %v10609_v27, %s9991_s14 }
0x11ba   : > { %v10797_v37 = vpop.permute.xlu2 %2990  ;;  %v10846_v54 = vpop.permute.xlu0 %2800 }
0x11bb   : > { %14762 = vst [vmem:[#allocation43_spill] sm:$0xff] %v10797_v37 }
0x11bc   : > { %14773 = vst [vmem:[#allocation54_spill] sm:$0xff] %v10846_v54 }
0x11bf   : > { %3344 = vrot.lane.b32.xlu0 %v10620_v40, %s9991_s14 }
0x11c0   : > { %3886 = vrot.lane.b32.xlu1 %v10630_v47, %s9992_s11  ;;  %3374 = vrot.lane.b32.xlu2 %v10630_v47, %s9991_s14 }
0x11c2   : > { %v10807_v7 = vpop.permute.xlu2 %3022  ;;  %v10850_v36 = vpop.permute.xlu0 %2832 }
0x11c3   : > { %14764 = vst [vmem:[#allocation45_spill] sm:$0xff] %v10807_v7 }
0x11c4   : > { %14774 = vst [vmem:[#allocation55_spill] sm:$0xff] %v10850_v36 }
0x11c7   : > { %3408 = vrot.lane.b32.xlu0 %v10661_v34, %s9991_s14 }
0x11c8   : > { %3950 = vrot.lane.b32.xlu1 %v10668_v38, %s9992_s11  ;;  %3440 = vrot.lane.b32.xlu2 %v10675_v60, %s9991_s14 }
0x11ca   : > { %v10817_v37 = vpop.permute.xlu2 %3054  ;;  %v10854_v43 = vpop.permute.xlu0 %2864 }
0x11cb   : > { %14766 = vst [vmem:[#allocation47_spill] sm:$0xff] %v10817_v37 }
0x11cc   : > { %14776 = vst [vmem:[#allocation57_spill] sm:$0xff] %v10854_v43 }
0x11cf   : > { %3406 = vrot.lane.b32.xlu0 %v10653_v16, %s9991_s14 }
0x11d0   : > { %3982 = vrot.lane.b32.xlu1 %v10686_v31, %s9992_s11  ;;  %3438 = vrot.lane.b32.xlu2 %v10668_v38, %s9991_s14 }
0x11d2   : > { %v10827_v7 = vpop.permute.xlu2 %3086  ;;  %v10859_v61 = vpop.permute.xlu0 %2896 }
0x11d3   : > { %14768 = vst [vmem:[#allocation49_spill] sm:$0xff] %v10827_v7 }
0x11d4   : > { %14778 = vst [vmem:[#allocation59_spill] sm:$0xff] %v10859_v61 }
0x11d7   : > { %3502 = vrot.lane.b32.xlu0 %v10449_v49, %s9992_s11 }
0x11d8   : > { %9160 = vrot.lane.b32.xlu1 %v9159_v41, %s9989_s26  ;;  %3504 = vrot.lane.b32.xlu2 %v10456_v53, %s9992_s11 }
0x11da   : > { %v10838_v37 = vpop.permute.xlu2 %3118  ;;  %v10863_v54 = vpop.permute.xlu0 %2928 }
0x11db   : > { %14770 = vst [vmem:[#allocation51_spill] sm:$0xff] %v10838_v37  ;;  %v502_v37 = vpop.f32.mrf.mxu0 }
0x11dc   : > { %v503_v28 = vadd.f32 %v10371_v23, %v502_v37  ;;  %14780 = vst [vmem:[#allocation61_spill] sm:$0xff] %v10863_v54 }
0x11e0   : > { %3534 = vrot.lane.b32.xlu2 %v10467_v56, %s9992_s11 }
0x11e2   : > { %v10844_v7 = vpop.permute.xlu2 %3150  ;;  %v10868_v43 = vpop.permute.xlu0 %2960 }
0x11e3   : > { %14772 = vst [vmem:[#allocation53_spill] sm:$0xff] %v10844_v7 }
0x11e4   : > { %14782 = vst [vmem:[#allocation63_spill] sm:$0xff] %v10868_v43 }
0x11e8   : > { %3598 = vrot.lane.b32.xlu2 %v10495_v26, %s9992_s11 }
0x11ea   : > { %v10852_v41 = vpop.permute.xlu2 %3182 }
0x11eb   : > { %14775 = vst [vmem:[#allocation56_spill] sm:$0xff] %v10852_v41 }
0x11f2   : > { %v10856_v33 = vpop.permute.xlu2 %3214 }
0x11f3   : > { %14777 = vst [vmem:[#allocation58_spill] sm:$0xff] %v10856_v33  ;;  %v10874_v33 = vpop.permute.xlu0 %2992 }
0x11f4   : > { %14784 = vst [vmem:[#allocation65_spill] sm:$0xff] %v10874_v33 }
0x11fa   : > { %v10861_v4 = vpop.permute.xlu2 %3246 }
0x11fb   : > { %14779 = vst [vmem:[#allocation60_spill] sm:$0xff] %v10861_v4 }
0x11fd   : > { %v1292_v19 = vpop.f32.mrf.mxu2 }
0x11fe   : > { %v1298_v7 = vadd.f32 %v1292_v19, %v503_v28  ;;  %v10880_v28 = vpop.permute.xlu0 %3024 }
0x11ff   : > { %14786 = vst [vmem:[#allocation67_spill] sm:$0xff] %v10880_v28 }
0x1200   : > { %9605 = vtanh.f32 %v1298_v7  ;;  %v8734_v28 = vmul.f32 -1.442695, %v1298_v7 }
0x1202   : > { %v10866_v41 = vpop.permute.xlu2 %3278 }
0x1203   : > { %14781 = vst [vmem:[#allocation62_spill] sm:$0xff] %v10866_v41 }
0x1206   : > { %v9606_v46 = vpop.eup %9605  ;;  %v10888_v4 = vpop.permute.xlu0 %3056 }
0x1207   : > { %1344 = vrot.lane.b32.xlu2 %v9606_v46, %s9987_s6  ;;  %14788 = vst [vmem:[#allocation69_spill] sm:$0xff] %v10888_v4 }
0x120a   : > { %v10872_v37 = vpop.permute.xlu2 %3310 }
0x120b   : > { %14783 = vst [vmem:[#allocation64_spill] sm:$0xff] %v10872_v37  ;;  %v506_v37 = vadd.f32 %v10371_v23, %v10179_v25 }
0x120f   : > { %3630 = vrot.lane.b32.xlu2 %v10509_v21, %s9992_s11 }
0x1212   : > { %v10878_v19 = vpop.permute.xlu2 %3342 }
0x1213   : > { %14785 = vst [vmem:[#allocation66_spill] sm:$0xff] %v10878_v19  ;;  %v10894_v19 = vpop.permute.xlu0 %3088 }
0x1214   : > { %14790 = vst [vmem:[#allocation71_spill] sm:$0xff] %v10894_v19 }
0x1217   : > { %3662 = vrot.lane.b32.xlu2 %v10529_v2, %s9992_s11 }
0x121a   : > { %v10884_v46 = vpop.permute.xlu2 %3374 }
0x121b   : > { %14787 = vst [vmem:[#allocation68_spill] sm:$0xff] %v10884_v46  ;;  %v10899_v61 = vpop.permute.xlu0 %3120 }
0x121c   : > { %14792 = vst [vmem:[#allocation73_spill] sm:$0xff] %v10899_v61 }
0x121f   : > { %3728 = vrot.lane.b32.xlu2 %v10565_v55, %s9992_s11 }
0x1222   : > { %v10892_v43 = vpop.permute.xlu2 %3440 }
0x1223   : > { %14789 = vst [vmem:[#allocation70_spill] sm:$0xff] %v10892_v43 }
0x1227   : > { %3758 = vrot.lane.b32.xlu2 %v10571_v63, %s9992_s11 }
0x122a   : > { %v10897_v46 = vpop.permute.xlu2 %3438 }
0x122b   : > { %14791 = vst [vmem:[#allocation72_spill] sm:$0xff] %v10897_v46 }
0x122d   : > { %v1295_v41 = vpop.f32.mrf.mxu2 }
0x122e   : > { %v1299_v33 = vadd.f32 %v1295_v41, %v506_v37  ;;  %v10905_v41 = vpop.permute.xlu0 %3152 }
0x122f   : > { %14794 = vst [vmem:[#allocation75_spill] sm:$0xff] %v10905_v41 }
0x1230   : > { %9607 = vtanh.f32 %v1299_v33 }
0x1231   : > { %9609 = vpow2.f32 %v8734_v28 }
0x1232   : > { %v10903_v23 = vpop.permute.xlu2 %3504 }
0x1233   : > { %14793 = vst [vmem:[#allocation74_spill] sm:$0xff] %v10903_v23 }
0x1236   : > { %v9608_v54 = vpop.eup %9607  ;;  %v10913_v28 = vpop.permute.xlu0 %3184 }
0x1237   : > { %1346 = vrot.lane.b32.xlu0 %v9608_v54, %s9987_s6  ;;  %v9610_v4 = vpop.eup %9609  ;;  %14796 = vst [vmem:[#allocation77_spill] sm:$0xff] %v10913_v28 }
0x1238   : > { %v1306_v25 = vadd.f32 1.0, %v9610_v4 }
0x123a   : > { %9611 = vrcp.f32 %v1306_v25  ;;  %v10909_v37 = vpop.permute.xlu2 %3534  ;;  %v1319_v61 = vand.u32 2147483648, %v1306_v25  ;;  %vm1313_vm2 = vweird.f32 %v1306_v25  ;;  %v1317_v19 = vand.u32 2147483647, %v1306_v25 }
0x123b   : > { %14795 = vst [vmem:[#allocation76_spill] sm:$0xff] %v10909_v37 }
0x123c   : > { %v1320_v28 = vor.u32 1.1754944e-38, %v1319_v61  ;;  %vm1318_vm4 = vcmp.eq.f32.partialorder %v1317_v19, 8.507059e+37 }
0x123e   : > { %v10919_v41 = vpop.permute.xlu0 %3216 }
0x123f   : > { %3694 = vrot.lane.b32.xlu0 %v10544_v42, %s9992_s11  ;;  %14798 = vst [vmem:[#allocation79_spill] sm:$0xff] %v10919_v41 }
0x1240   : > { %v9612_v7 = vpop.eup %9611 }
0x1241   : > { %v1309_v54 = vmul.f32 %v9612_v7, %v1306_v25  ;;  %vm1314_vm1 = vweird.f32 %v9612_v7  ;;  %v9164_v25 = vpack.i.bf16 %v10449_v49, %v10481_v0 }
0x1242   : > { %v10917_v4 = vpop.permute.xlu2 %3598  ;;  %vm1315_vm3 = vmor %vm1313_vm2, %vm1314_vm1 }
0x1243   : > { %v1310_v46 = vsub.f32 1.0, %v1309_v54  ;;  %14797 = vst [vmem:[#allocation78_spill] sm:$0xff] %v10917_v4 }
0x1245   : > { %v1311_v43 = vmul.f32 %v9612_v7, %v1310_v46 }
0x1247   : > { %3822 = vrot.lane.b32.xlu0 %v10591_v18, %s9992_s11  ;;  %v1312_v23 = vadd.f32 %v9612_v7, %v1311_v43  ;;  %v10927_v43 = vpop.permute.xlu0 %3248 }
0x1248   : > { %14799 = vst [vmem:[#allocation80_spill] sm:$0xff] %v10927_v43  ;;  %v10965_v43 = vpop.permute.xlu1 %3472 }
0x1249   : > { %v1316_v37 = vsel %vm1315_vm3, %v9612_v7, %v1312_v23  ;;  %v8735_v23 = vmul.f32 -1.442695, %v1299_v33  ;;  %v9169_v33 = vpack.i.bf16 %v10474_v57, %v10537_v39  ;;  %14806 = vst [vmem:[#allocation87_spill] sm:$0xff] %v10965_v43 }
0x124a   : > { %v10923_v46 = vsel %vm1318_vm4, %v1320_v28, %v1316_v37 }
0x124b   : > { %9613 = vpow2.f32 %v8735_v23 }
0x124f   : > { %3856 = vrot.lane.b32.xlu0 %v10620_v40, %s9992_s11  ;;  %v10935_v61 = vpop.permute.xlu0 %3280 }
0x1250   : > { %14800 = vst [vmem:[#allocation81_spill] sm:$0xff] %v10935_v61 }
0x1251   : > { %v9614_v37 = vpop.eup %9613 }
0x1252   : > { %v1307_v28 = vadd.f32 1.0, %v9614_v37 }
0x1254   : > { %9615 = vrcp.f32 %v1307_v28  ;;  %v1334_v20 = vand.u32 2147483648, %v1307_v28  ;;  %vm1328_vm6 = vweird.f32 %v1307_v28  ;;  %v1332_v9 = vand.u32 2147483647, %v1307_v28 }
0x1256   : > { %vm1333_vm8 = vcmp.eq.f32.partialorder %v1332_v9, 8.507059e+37 }
0x1257   : > { %3920 = vrot.lane.b32.xlu0 %v10661_v34, %s9992_s11  ;;  %v10946_v19 = vpop.permute.xlu0 %3312 }
0x1258   : > { %14801 = vst [vmem:[#allocation82_spill] sm:$0xff] %v10946_v19 }
0x125f   : > { %3952 = vrot.lane.b32.xlu0 %v10675_v60, %s9992_s11  ;;  %v10950_v7 = vpop.permute.xlu0 %3344 }
0x1260   : > { %14802 = vst [vmem:[#allocation83_spill] sm:$0xff] %v10950_v7 }
0x1261   : > { %v1345_v54 = vpop.permute.xlu2 %1344 }
0x1262   : > { %v1350_v36 = vmul.f32 %v1345_v54, %v10923_v46 }
0x1264   : > { %1354 = vrot.lane.b32.xlu2 %v1350_v36, %s9988_s7  ;;  %v10942_v36 = vpack.i.bf16 %v10529_v2, %v10502_v30 }
0x1267   : > { %3918 = vrot.lane.b32.xlu0 %v10653_v16, %s9992_s11  ;;  %v10956_v54 = vpop.permute.xlu0 %3408 }
0x1268   : > { %14803 = vst [vmem:[#allocation84_spill] sm:$0xff] %v10956_v54 }
0x1269   : > { %v10963_v7 = vpop.permute.xlu2 %3630 }
0x126a   : > { %14805 = vst [vmem:[#allocation86_spill] sm:$0xff] %v10963_v7 }
0x126c   : > { %3792 = vrot.lane.b32.xlu2 %v10586_v24, %s9992_s11 }
0x126f   : > { %9165 = vrot.lane.b32.xlu0 %v9164_v25, %s9989_s26  ;;  %v9616_v25 = vpop.eup %9615  ;;  %v10961_v4 = vpop.permute.xlu0 %3406 }
0x1270   : > { %v1324_v23 = vmul.f32 %v9616_v25, %v1307_v28  ;;  %14804 = vst [vmem:[#allocation85_spill] sm:$0xff] %v10961_v4  ;;  %vm1329_vm5 = vweird.f32 %v9616_v25  ;;  %v1335_v4 = vor.u32 1.1754944e-38, %v1334_v20  ;;  %v10983_v28 = vpack.i.bf16 %v10571_v63, %v10551_v45 }
0x1271   : > { %v10969_v41 = vpop.permute.xlu2 %3662  ;;  %vm1330_vm7 = vmor %vm1328_vm6, %vm1329_vm5 }
0x1272   : > { %v1325_v19 = vsub.f32 1.0, %v1324_v23  ;;  %14807 = vst [vmem:[#allocation88_spill] sm:$0xff] %v10969_v41 }
0x1274   : > { %3790 = vrot.lane.b32.xlu2 %v10581_v10, %s9992_s11  ;;  %v1326_v37 = vmul.f32 %v9616_v25, %v1325_v19 }
0x1276   : > { %v1327_v54 = vadd.f32 %v9616_v25, %v1326_v37 }
0x1277   : > { %9175 = vrot.lane.b32.xlu0 %v10942_v36, %s9989_s26  ;;  %v10967_v61 = vpop.permute.xlu0 %3502 }
0x1278   : > { %v1331_v11 = vsel %vm1330_vm7, %v9616_v25, %v1327_v54  ;;  %v11001_v25 = vpack.i.bf16 %v10591_v18, %v10558_v51 }
0x1279   : > { %v10973_v23 = vsel %vm1333_vm8, %v1335_v4, %v1331_v11  ;;  %v10976_v43 = vpop.permute.xlu2 %3728  ;;  %v10993_v11 = vpack.i.bf16 %v10630_v47, %v10598_v22  ;;  %v1340_v4 = vmul.f32 %v10923_v46, %v10400_v59  ;;  %v9239_v22 = vpack.i.bf16 %v10521_v35, %v10474_v57 }
0x127a   : > { %14808 = vst [vmem:[#allocation89_spill] sm:$0xff] %v10976_v43 }
0x127c   : > { %3854 = vrot.lane.b32.xlu2 %v10609_v27, %s9992_s11 }
0x1281   : > { %v10987_v20 = vpop.permute.xlu2 %3758 }
0x1282   : > { %14809 = vst [vmem:[#allocation90_spill] sm:$0xff] %v10987_v20  ;;  %v11034_v20 = vpack.i.bf16 %v10620_v40, %v10661_v34 }
0x1284   : > { %3888 = vrot.lane.b32.xlu2 %v10639_v52, %s9992_s11 }
0x128c   : > { %3984 = vrot.lane.b32.xlu2 %v10693_v44, %s9992_s11 }
0x1294   : > { %9170 = vrot.lane.b32.xlu2 %v9169_v33, %s9989_s26  ;;  %v10971_v33 = vpop.permute.xlu1 %3470 }
0x129c   : > { %v10979_v37 = vpop.permute.xlu1 %3536 }
0x12a4   : > { %v10989_v9 = vpop.permute.xlu1 %3568 }
0x12a9   : > { %v1347_v7 = vpop.permute.xlu0 %1346 }
0x12aa   : > { %v1351_v19 = vmul.f32 %v1347_v7, %v10973_v23 }
0x12ac   : > { %1356 = vrot.lane.b32.xlu2 %v1351_v19, %s9988_s7  ;;  %v11003_v19 = vpop.permute.xlu1 %3566 }
0x12b4   : > { %9190 = vrot.lane.b32.xlu2 %v10983_v28, %s9989_s26  ;;  %v11013_v59 = vpop.permute.xlu1 %3600 }
0x12b5   : > { %14811 = vst [vmem:[#allocation92_spill] sm:$0xff] %v11013_v59 }
0x12bc   : > { %9210 = vrot.lane.b32.xlu2 %v10993_v11, %s9989_s26 }
0x12be   : > { %v1355_v7 = vpop.permute.xlu2 %1354 }
0x12bf   : > { %v1360_v54 = vadd.f32 %v1355_v7, %v1340_v4  ;;  %v9259_v4 = vpack.i.bf16 %v10576_v58, %v10537_v39 }
0x12c1   : > { %9617 = vtanh.f32 %v1360_v54  ;;  %v11020_v54 = vpop.permute.xlu1 %3632 }
0x12c2   : > { %14813 = vst [vmem:[#allocation94_spill] sm:$0xff] %v11020_v54 }
0x12c4   : > { %9215 = vrot.lane.b32.xlu2 %v11001_v25, %s9989_s26 }
0x12c6   : > { %v11010_v43 = vpop.permute.xlu2 %3792 }
0x12c7   : > { %v9618_v47 = vpop.eup %9617  ;;  %14810 = vst [vmem:[#allocation91_spill] sm:$0xff] %v11010_v43 }
0x12c8   : > { %1366 = vrot.lane.b32.xlu1 %v9618_v47, %s9987_s6  ;;  %v11024_v47 = vpack.i.bf16 %v10639_v52, %v10586_v24  ;;  %v11042_v52 = vpack.i.bf16 %v10449_v49, %v10456_v53 }
0x12c9   : > { %v11030_v43 = vpop.permute.xlu1 %3664 }
0x12ca   : > { %14815 = vst [vmem:[#allocation96_spill] sm:$0xff] %v11030_v43  ;;  %v11055_v43 = vpack.i.bf16 %v10686_v31, %v10693_v44 }
0x12cc   : > { %9240 = vrot.lane.b32.xlu2 %v9239_v22, %s9993_s30  ;;  %14820 = vst [vmem:[#allocation101_spill] sm:$0xff] %v11055_v43 }
0x12ce   : > { %v11018_v7 = vpop.permute.xlu2 %3790 }
0x12cf   : > { %14812 = vst [vmem:[#allocation93_spill] sm:$0xff] %v11018_v7 }
0x12d1   : > { %v11044_v54 = vpop.permute.xlu1 %3696 }
0x12d2   : > { %14817 = vst [vmem:[#allocation98_spill] sm:$0xff] %v11044_v54 }
0x12d4   : > { %9260 = vrot.lane.b32.xlu2 %v9259_v4, %s9993_s30 }
0x12d6   : > { %v11028_v18 = vpop.permute.xlu2 %3854 }
0x12d7   : > { %14814 = vst [vmem:[#allocation95_spill] sm:$0xff] %v11028_v18 }
0x12d9   : > { %v11051_v41 = vpop.permute.xlu1 %3726 }
0x12da   : > { %14819 = vst [vmem:[#allocation100_spill] sm:$0xff] %v11051_v41 }
0x12dc   : > { %9280 = vrot.lane.b32.xlu2 %v11024_v47, %s9993_s30 }
0x12de   : > { %v11038_v7 = vpop.permute.xlu2 %3888 }
0x12df   : > { %14816 = vst [vmem:[#allocation97_spill] sm:$0xff] %v11038_v7 }
0x12e1   : > { %v11061_v53 = vpop.permute.xlu1 %3760 }
0x12e2   : > { %14822 = vst [vmem:[#allocation103_spill] sm:$0xff] %v11061_v53 }
0x12e4   : > { %9300 = vrot.lane.b32.xlu2 %v11034_v20, %s9993_s30 }
0x12e6   : > { %v11048_v18 = vpop.permute.xlu2 %3984 }
0x12e7   : > { %14818 = vst [vmem:[#allocation99_spill] sm:$0xff] %v11048_v18  ;;  %v1341_v18 = vmul.f32 %v10973_v23, %v10517_v32 }
0x12e9   : > { %v11066_v41 = vpop.permute.xlu1 %3824 }
0x12ea   : > { %14823 = vst [vmem:[#allocation104_spill] sm:$0xff] %v11066_v41 }
0x12ec   : > { %9305 = vrot.lane.b32.xlu2 %v11042_v52, %s9994_s5 }
0x12ee   : > { %v11059_v49 = vpop.permute.xlu2 %9170 }
0x12ef   : > { %14821 = vst [vmem:[#allocation102_spill] sm:$0xff] %v11059_v49  ;;  %v9184_v49 = vpack.i.bf16 %v10521_v35, %v10576_v58 }
0x12f1   : > { %v11069_v59 = vpop.permute.xlu1 %3886 }
0x12f2   : > { %14824 = vst [vmem:[#allocation105_spill] sm:$0xff] %v11069_v59 }
0x12f4   : > { %9320 = vrot.lane.b32.xlu2 %v9239_v22, %s9994_s5 }
0x12f9   : > { %v11074_v53 = vpop.permute.xlu1 %3950 }
0x12fa   : > { %14825 = vst [vmem:[#allocation106_spill] sm:$0xff] %v11074_v53 }
0x12fc   : > { %9325 = vrot.lane.b32.xlu2 %v11055_v43, %s9993_s30 }
0x1301   : > { %v11078_v32 = vpop.permute.xlu1 %3982 }
0x1302   : > { %14826 = vst [vmem:[#allocation107_spill] sm:$0xff] %v11078_v32 }
0x1304   : > { %9340 = vrot.lane.b32.xlu2 %v9259_v4, %s9994_s5 }
0x1306   : > { %v1357_v7 = vpop.permute.xlu2 %1356 }
0x1307   : > { %v1361_v22 = vadd.f32 %v1357_v7, %v1341_v18  ;;  %v11084_v18 = vpack.i.bf16 %v10675_v60, %v10653_v16  ;;  %v9249_v7 = vpack.i.bf16 %v10488_v13, %v10467_v56  ;;  %v9274_v60 = vpack.i.bf16 %v10544_v42, %v10495_v26 }
0x1309   : > { %9619 = vtanh.f32 %v1361_v22  ;;  %v11088_v4 = vpop.permute.xlu1 %9160  ;;  %v9179_v22 = vpack.i.bf16 %v10495_v26, %v10467_v56 }
0x130a   : > { %14827 = vst [vmem:[#allocation108_spill] sm:$0xff] %v11088_v4  ;;  %v9194_v4 = vpack.i.bf16 %v10544_v42, %v10509_v21 }
0x130f   : > { %v9620_v54 = vpop.eup %9619 }
0x1310   : > { %1368 = vrot.lane.b32.xlu1 %v9620_v54, %s9987_s6 }
0x1318   : > { %9185 = vrot.lane.b32.xlu1 %v9184_v49, %s9989_s26 }
0x1320   : > { %9200 = vrot.lane.b32.xlu1 %v11024_v47, %s9989_s26 }
0x1328   : > { %9220 = vrot.lane.b32.xlu1 %v11034_v20, %s9989_s26 }
0x1330   : > { %9230 = vrot.lane.b32.xlu1 %v11084_v18, %s9989_s26 }
0x1338   : > { %9250 = vrot.lane.b32.xlu1 %v9249_v7, %s9993_s30 }
0x133a   : > { %v1367_v54 = vpop.permute.xlu1 %1366 }
0x133b   : > { %v1372_v49 = vmul.f32 %v1367_v54, %v10923_v46  ;;  %v9284_v46 = vpack.i.bf16 %v10581_v10, %v10565_v55  ;;  %v11116_v54 = vpack.i.bf16 %v10668_v38, %v10609_v27  ;;  %v11133_v38 = vpop.permute.xlu2 %9190 }
0x133c   : > { %14830 = vst [vmem:[#allocation111_spill] sm:$0xff] %v11133_v38 }
0x133d   : > { %1376 = vrot.lane.b32.xlu0 %v1372_v49, %s9988_s7  ;;  %v9334_v49 = vpack.i.bf16 %v10481_v0, %v10509_v21 }
0x1340   : > { %9265 = vrot.lane.b32.xlu1 %v10942_v36, %s9993_s30 }
0x1343   : > { %v11140_v53 = vpop.permute.xlu2 %9210 }
0x1344   : > { %14832 = vst [vmem:[#allocation113_spill] sm:$0xff] %v11140_v53 }
0x1345   : > { %9180 = vrot.lane.b32.xlu0 %v9179_v22, %s9989_s26 }
0x1348   : > { %9275 = vrot.lane.b32.xlu1 %v9274_v60, %s9993_s30 }
0x134b   : > { %v11154_v53 = vpop.permute.xlu2 %9215 }
0x134c   : > { %14834 = vst [vmem:[#allocation115_spill] sm:$0xff] %v11154_v53 }
0x134d   : > { %9195 = vrot.lane.b32.xlu0 %v9194_v4, %s9989_s26  ;;  %v11120_v4 = vpop.permute.xlu0 %3694 }
0x134e   : > { %14828 = vst [vmem:[#allocation109_spill] sm:$0xff] %v11120_v4 }
0x1350   : > { %9285 = vrot.lane.b32.xlu1 %v9284_v46, %s9993_s30 }
0x1355   : > { %9205 = vrot.lane.b32.xlu0 %v9284_v46, %s9989_s26  ;;  %v11127_v22 = vpop.permute.xlu0 %3822 }
0x1356   : > { %14829 = vst [vmem:[#allocation110_spill] sm:$0xff] %v11127_v22 }
0x1358   : > { %9295 = vrot.lane.b32.xlu1 %v11001_v25, %s9993_s30 }
0x135d   : > { %9225 = vrot.lane.b32.xlu0 %v11042_v52, %s9993_s30  ;;  %v11135_v32 = vpop.permute.xlu0 %3856 }
0x135e   : > { %14831 = vst [vmem:[#allocation112_spill] sm:$0xff] %v11135_v32 }
0x1360   : > { %9315 = vrot.lane.b32.xlu1 %v11116_v54, %s9993_s30 }
0x1365   : > { %9235 = vrot.lane.b32.xlu0 %v11116_v54, %s9989_s26  ;;  %v11144_v59 = vpop.permute.xlu0 %3920 }
0x1366   : > { %14833 = vst [vmem:[#allocation114_spill] sm:$0xff] %v11144_v59 }
0x1368   : > { %9335 = vrot.lane.b32.xlu1 %v9334_v49, %s9994_s5 }
0x136d   : > { %9245 = vrot.lane.b32.xlu0 %v11055_v43, %s9989_s26  ;;  %v11157_v59 = vpop.permute.xlu0 %3952 }
0x136e   : > { %14835 = vst [vmem:[#allocation116_spill] sm:$0xff] %v11157_v59 }
0x1370   : > { %9345 = vrot.lane.b32.xlu1 %v10942_v36, %s9994_s5 }
0x1375   : > { %9255 = vrot.lane.b32.xlu0 %v9334_v49, %s9993_s30  ;;  %v9414_v49 = vpack.i.bf16 %v10495_v26, %v10502_v30 }
0x1378   : > { %9370 = vrot.lane.b32.xlu1 %v10993_v11, %s9994_s5 }
0x137d   : > { %9270 = vrot.lane.b32.xlu0 %v10983_v28, %s9993_s30 }
0x1380   : > { %9380 = vrot.lane.b32.xlu1 %v11034_v20, %s9994_s5 }
0x1382   : > { %v1369_v36 = vpop.permute.xlu1 %1368 }
0x1383   : > { %v1373_v38 = vmul.f32 %v1369_v36, %v10973_v23  ;;  %v11167_v23 = vpop.permute.xlu2 %9240 }
0x1384   : > { %14837 = vst [vmem:[#allocation118_spill] sm:$0xff] %v11167_v23 }
0x1385   : > { %9290 = vrot.lane.b32.xlu0 %v10993_v11, %s9993_s30  ;;  %1378 = vrot.lane.b32.xlu2 %v1373_v38, %s9988_s7  ;;  %v9429_v38 = vpack.i.bf16 %v10544_v42, %v10551_v45  ;;  %v11171_v11 = vpop.permute.xlu0 %3918 }
0x1386   : > { %14839 = vst [vmem:[#allocation120_spill] sm:$0xff] %v11171_v11 }
0x1388   : > { %9415 = vrot.lane.b32.xlu1 %v9414_v49, %s9995_s8  ;;  %v9434_v49 = vpack.i.bf16 %v10558_v51, %v10565_v55 }
0x138a   : > { %v11159_v22 = vpop.permute.xlu1 %9185 }
0x138b   : > { %14836 = vst [vmem:[#allocation117_spill] sm:$0xff] %v11159_v22 }
0x138d   : > { %9310 = vrot.lane.b32.xlu0 %v11084_v18, %s9993_s30  ;;  %9365 = vrot.lane.b32.xlu2 %v9284_v46, %s9994_s5  ;;  %v11177_v46 = vpop.permute.xlu2 %9260 }
0x138e   : > { %14840 = vst [vmem:[#allocation121_spill] sm:$0xff] %v11177_v46 }
0x1390   : > { %9430 = vrot.lane.b32.xlu1 %v9429_v38, %s9995_s8  ;;  %v11181_v38 = vpop.permute.xlu0 %9165 }
0x1391   : > { %14841 = vst [vmem:[#allocation122_spill] sm:$0xff] %v11181_v38 }
0x1392   : > { %v11169_v20 = vpop.permute.xlu1 %9200 }
0x1393   : > { %14838 = vst [vmem:[#allocation119_spill] sm:$0xff] %v11169_v20  ;;  %v9202_v36 = vunpack.i.l.bf16 %v11169_v20 }
0x1395   : > { %9330 = vrot.lane.b32.xlu0 %v9249_v7, %s9994_s5  ;;  %9405 = vrot.lane.b32.xlu2 %v11055_v43, %s9994_s5  ;;  %v11186_v53 = vpop.permute.xlu2 %9280  ;;  %v9996_v43 = vmov 1983009808  }
0x1396   : > { %5833 = vmatpush.msrb.mxu1 %v9202_v36  ;;  %14842 = vst [vmem:[#allocation123_spill] sm:$0xff] %v11186_v53  ;;  %v1409_v36 = vrot.slane %v10298_v6, 4  ;;  %v1402_v46 = vunpack.c.l.s4 %v9996_v43 }
0x1398   : > { %v11189_v7 = vpop.permute.xlu0 %9175  ;;  %v1410_v20 = vsel %vm1397_vm10, %v1409_v36, %v10238_v5  ;;  %v11194_v23 = vunpack.c.0.s8 %v1402_v46 }
0x1399   : > { %14843 = vst [vmem:[#allocation124_spill] sm:$0xff] %v11189_v7 }
0x139d   : > { %9350 = vrot.lane.b32.xlu0 %v10983_v28, %s9994_s5  ;;  %9435 = vrot.lane.b32.xlu2 %v9434_v49, %s9995_s8  ;;  %v1396_v28 = vrot.slane %v10270_v8, 4  ;;  %v1421_v49 = vrot.slane %v10727_v48, 4  ;;  %v11201_v53 = vpop.permute.xlu2 %9300 }
0x139e   : > { %14844 = vst [vmem:[#allocation125_spill] sm:$0xff] %v11201_v53 }
0x139f   : > { %v1398_v43 = vsel %vm1397_vm10, %v1396_v28, %v10206_v17  ;;  %v1422_v46 = vsel %vm1397_vm10, %v1421_v49, %v10328_v62 }
0x13a0   : > { %v1428_v53 = vperm.slane %v1422_v46, %v11194_v23 }
0x13a5   : > { %9355 = vrot.lane.b32.xlu0 %v9274_v60, %s9994_s5  ;;  %v1416_v60 = vperm.slane %v1410_v20, %v11194_v23  ;;  %v1404_v20 = vperm.slane %v1398_v43, %v11194_v23  ;;  %v11221_v4 = vpop.permute.xlu2 %9305 }
0x13a6   : > { %14845 = vst [vmem:[#allocation126_spill] sm:$0xff] %v11221_v4 }
0x13a7   : > { %v1445_v11 = vrot.slane %v1416_v60, 4 }
0x13a9   : > { %v1446_v49 = vsel %vm1397_vm10, %v1445_v11, %v1404_v20 }
0x13ad   : > { %9360 = vrot.lane.b32.xlu0 %v11024_v47, %s9994_s5  ;;  %v9997_v47 = vmov 1934713408  }
0x13ae   : > { %v1450_v22 = vunpack.c.l.s4 %v9997_v47 }
0x13af   : > { %v1377_v7 = vpop.permute.xlu0 %1376 }
0x13b0   : > { %v1433_v38 = vrot.slane %v1377_v7, 4  ;;  %v11214_v28 = vunpack.c.0.s8 %v1450_v22 }
0x13b2   : > { %v1434_v36 = vsel %vm1397_vm10, %v1433_v38, %v10360_v14  ;;  %v1452_v43 = vperm.slane %v1446_v49, %v11214_v28 }
0x13b3   : > { %v1440_v59 = vperm.slane %v1434_v36, %v11194_v23 }
0x13b4   : > { %v1495_v49 = vrot.slane %v1452_v43, 4 }
0x13b5   : > { %v1469_v41 = vrot.slane %v1440_v59, 4  ;;  %9375 = vrot.lane.b32.xlu0 %v11001_v25, %s9994_s5  ;;  %v11233_v25 = vpop.permute.xlu1 %9220 }
0x13b6   : > { %14847 = vst [vmem:[#allocation128_spill] sm:$0xff] %v11233_v25 }
0x13b7   : > { %v11216_v32 = vpop.permute.xlu0 %9180  ;;  %v1470_v38 = vsel %vm1397_vm10, %v1469_v41, %v1428_v53  ;;  %v1471_v41 = vrot.slane %v1428_v53, 4 }
0x13b8   : > { %v1476_v47 = vperm.slane %v1470_v38, %v11214_v28  ;;  %v11240_v38 = vpop.permute.xlu2 %9320 }
0x13b9   : > { %v1472_v11 = vsel %vm1397_vm10, %v1440_v59, %v1471_v41  ;;  %14848 = vst [vmem:[#allocation129_spill] sm:$0xff] %v11240_v38  ;;  %v1447_v59 = vrot.slane %v1404_v20, 4 }
0x13ba   : > { %v1493_v36 = vrot.slane %v1476_v47, 4 }
0x13bc   : > { %v11225_v46 = vsel %vm1397_vm10, %v1493_v36, %v1452_v43  ;;  %v11244_v36 = vsel %vm1397_vm10, %v1476_v47, %v1495_v49  ;;  %v1448_v43 = vsel %vm1397_vm10, %v1416_v60, %v1447_v59  ;;  %v9222_v47 = vunpack.i.l.bf16 %v11233_v25 }
0x13bd   : > { %14846 = vst [vmem:[#allocation127_spill] sm:$0xff] %v11225_v46  ;;  %9385 = vrot.lane.b32.xlu0 %v11042_v52, %s9995_s8  ;;  %8736 = vmatmul.msk.f32.vlgmr.msra.gmra.mxu3 %vm508_vm9, %v11225_v46  ;;  %v1435_v52 = vrot.slane %v10360_v14, 4  ;;  %v11257_v49 = vpop.permute.xlu1 %9230 }
0x13be   : > { %8844 = vmatpush.xpose.msk.msra.mxu3 %vm394_vm0, %v10634_v50  ;;  %14849 = vst [vmem:[#allocation130_spill] sm:$0xff] %v11244_v36  ;;  %v1480_v50 = vperm.slane %v1472_v11, %v11214_v28 }
0x13bf   : > { %v11235_v22 = vpop.permute.xlu0 %9195  ;;  %v1436_v53 = vsel %vm1397_vm10, %v1377_v7, %v1435_v52  ;;  %14851 = vst [vmem:[#allocation132_spill] sm:$0xff] %v11257_v49  ;;  %v1456_v7 = vperm.slane %v1448_v43, %v11214_v28  ;;  %v9232_v52 = vunpack.i.l.bf16 %v11257_v49 }
0x13c0   : > { %v1497_v41 = vrot.slane %v1480_v50, 4  ;;  %v1444_v11 = vperm.slane %v1436_v53, %v11194_v23  ;;  %v11271_v53 = vpop.permute.xlu2 %9325 }
0x13c1   : > { %14853 = vst [vmem:[#allocation134_spill] sm:$0xff] %v11271_v53  ;;  %v14931_v53 = vld [vmem:[#allocation41_spill] sm:$0xff] }
0x13c2   : > { %8845 = vmatpush.xpose.msk.msra.mxu3 %vm394_vm0, %v10658_v29  ;;  %v11269_v59 = vsel %vm1397_vm10, %v1497_v41, %v1456_v7 }
0x13c3   : > { %14852 = vst [vmem:[#allocation133_spill] sm:$0xff] %v11269_v59 }
0x13c5   : > { %9390 = vrot.lane.b32.xlu0 %v11084_v18, %s9994_s5  ;;  %8737 = vmatmul.msk.f32.gmra.mxu3 %vm508_vm9, %v11244_v36  ;;  %v1411_v18 = vrot.slane %v10238_v5, 4  ;;  %v1423_v36 = vrot.slane %v10328_v62, 4  ;;  %v1481_v5 = vrot.slane %v1444_v11, 4 }
0x13c7   : > { %v11252_v29 = vpop.permute.xlu0 %9205  ;;  %v1412_v60 = vsel %vm1397_vm10, %v10298_v6, %v1411_v18  ;;  %v1424_v20 = vsel %vm1397_vm10, %v10727_v48, %v1423_v36  ;;  %v1399_v48 = vrot.slane %v10206_v17, 4 }
0x13c8   : > { %14850 = vst [vmem:[#allocation131_spill] sm:$0xff] %v11252_v29  ;;  %v9208_v14 = vunpack.i.h.bf16 %v11252_v29  ;;  %v1420_v6 = vperm.slane %v1412_v60, %v11194_v23  ;;  %v1432_v62 = vperm.slane %v1424_v20, %v11194_v23  ;;  %v11293_v17 = vpop.permute.xlu2 %9340  ;;  %v14940_v29 = vld [vmem:[#allocation45_spill] sm:$0xff] }
0x13c9   : > { %v1400_v43 = vsel %vm1397_vm10, %v10270_v8, %v1399_v48  ;;  %14855 = vst [vmem:[#allocation136_spill] sm:$0xff] %v11293_v17 }
0x13ca   : > { %5834 = vmatpush.msrb.mxu1 %v9208_v14  ;;  %v1482_v36 = vsel %vm1397_vm10, %v1481_v5, %v1432_v62  ;;  %v1499_v14 = vrot.slane %v1456_v7, 4  ;;  %v1457_v41 = vrot.slane %v1420_v6, 4  ;;  %v1408_v60 = vperm.slane %v1400_v43, %v11194_v23 }
0x13cb   : > { %v1488_v18 = vperm.slane %v1482_v36, %v11214_v28  ;;  %v9419_v43 = vpack.i.bf16 %v10509_v21, %v10521_v35 }
0x13cc   : > { %5949 = vmatpush.msra.mxu1 %v9222_v47  ;;  %v11286_v47 = vsel %vm1397_vm10, %v1480_v50, %v1499_v14  ;;  %v1458_v8 = vsel %vm1397_vm10, %v1457_v41, %v1408_v60  ;;  %v1483_v50 = vrot.slane %v1432_v62, 4 }
0x13cd   : > { %9395 = vrot.lane.b32.xlu0 %v11116_v54, %s9994_s5  ;;  %8738 = vmatmul.msk.f32.gmra.mxu3 %vm508_vm9, %v11269_v59  ;;  %v9399_v54 = vpack.i.bf16 %v10467_v56, %v10474_v57  ;;  %14854 = vst [vmem:[#allocation135_spill] sm:$0xff] %v11286_v47  ;;  %v1501_v7 = vrot.slane %v1488_v18, 4  ;;  %v1464_v20 = vperm.slane %v1458_v8, %v11214_v28  ;;  %v1521_v8 = vrot.slane %v10304_v3, 4 }
0x13ce   : > { %5950 = vmatpush.msra.mxu1 %v9232_v52  ;;  %v9409_v56 = vpack.i.bf16 %v10481_v0, %v10488_v13  ;;  %v1484_v5 = vsel %vm1397_vm10, %v1444_v11, %v1483_v50 }
0x13cf   : > { %v11300_v57 = vsel %vm1397_vm10, %v1501_v7, %v1464_v20  ;;  %v1503_v36 = vrot.slane %v1464_v20, 4  ;;  %v1492_v41 = vperm.slane %v1484_v5, %v11214_v28  ;;  %v1533_v7 = vrot.slane %v10779_v1, 4  ;;  %v14858_v5 = vld [vmem:[#allocation8_spill] sm:$0xff] }
0x13d0   : > { %14856 = vst [vmem:[#allocation137_spill] sm:$0xff] %v11300_v57  ;;  %v1522_v50 = vsel %vm1397_vm10, %v1521_v8, %v10244_v12 }
0x13d1   : > { %v11309_v14 = vsel %vm1397_vm10, %v1488_v18, %v1503_v36  ;;  %v1505_v20 = vrot.slane %v1492_v41, 4 }
0x13d2   : > { %14857 = vst [vmem:[#allocation138_spill] sm:$0xff] %v11309_v14 }
0x13d5   : > { %9400 = vrot.lane.b32.xlu0 %v9399_v54, %s9995_s8  ;;  %8739 = vmatmul.msk.f32.gmra.mxu3 %vm508_vm9, %v11286_v47  ;;  %v1459_v54 = vrot.slane %v1408_v60, 4  ;;  %v9424_v60 = vpack.i.bf16 %v10529_v2, %v10537_v39 }
0x13d7   : > { %v1460_v11 = vsel %vm1397_vm10, %v1420_v6, %v1459_v54 }
0x13dd   : > { %9410 = vrot.lane.b32.xlu0 %v9409_v56, %s9995_s8  ;;  %8740 = vmatmul.msk.f32.gmra.mxu3 %vm508_vm9, %v11300_v57  ;;  %v1468_v56 = vperm.slane %v1460_v11, %v11214_v28 }
0x13df   : > { %v1379_v52 = vpop.permute.xlu2 %1378  ;;  %v11329_v6 = vsel %vm1397_vm10, %v1505_v20, %v1468_v56  ;;  %v1507_v57 = vrot.slane %v1468_v56, 4 }
0x13e0   : > { %v1545_v48 = vrot.slane %v1379_v52, 4  ;;  %14859 = vst [vmem:[#allocation8_spill] sm:$0xff] %v11329_v6 }
0x13e1   : > { %v11341_v47 = vsel %vm1397_vm10, %v1492_v41, %v1507_v57 }
0x13e2   : > { %v1546_v62 = vsel %vm1397_vm10, %v1545_v48, %v10364_v15  ;;  %v1534_v48 = vsel %vm1397_vm10, %v1533_v7, %v14858_v5 }
0x13e3   : > { %v1552_v18 = vperm.slane %v1546_v62, %v11194_v23  ;;  %v1528_v62 = vperm.slane %v1522_v50, %v11194_v23  ;;  %v1540_v11 = vperm.slane %v1534_v48, %v11194_v23 }
0x13e5   : > { %9420 = vrot.lane.b32.xlu0 %v9419_v43, %s9995_s8  ;;  %8741 = vmatmul.msk.f32.gmra.mxu3 %vm508_vm9, %v11309_v14  ;;  %v1581_v36 = vrot.slane %v1552_v18, 4  ;;  %v14860_v43 = vld [vmem:[#allocation7_spill] sm:$0xff]  ;;  %v14861_v14 = vld [vmem:[#allocation6_spill] sm:$0xff]  ;;  %v1557_v20 = vrot.slane %v1528_v62, 4  ;;  %v1583_v57 = vrot.slane %v1540_v11, 4 }
0x13e6   : > { %v1509_v54 = vrot.slane %v14860_v43, 4  ;;  %14862 = vst [vmem:[#allocation7_spill] sm:$0xff] %v11341_v47 }
0x13e7   : > { %v1582_v8 = vsel %vm1397_vm10, %v1581_v36, %v1540_v11  ;;  %v1584_v41 = vsel %vm1397_vm10, %v1552_v18, %v1583_v57  ;;  %v1523_v18 = vrot.slane %v10244_v12, 4 }
0x13e8   : > { %v1510_v7 = vsel %vm1397_vm10, %v1509_v54, %v14861_v14  ;;  %v1547_v54 = vrot.slane %v10364_v15, 4  ;;  %v1535_v15 = vrot.slane %v14858_v5, 4  ;;  %v1511_v5 = vrot.slane %v14861_v14, 4 }
0x13ea   : > { %v1536_v57 = vsel %vm1397_vm10, %v10779_v1, %v1535_v15 }
0x13eb   : > { %v1544_v12 = vperm.slane %v1536_v57, %v11194_v23 }
0x13ed   : > { %9425 = vrot.lane.b32.xlu0 %v9424_v60, %s9995_s8  ;;  %8742 = vmatmul.msk.f32.gmra.mxu3 %vm508_vm9, %v11329_v6  ;;  %v1588_v60 = vperm.slane %v1582_v8, %v11214_v28  ;;  %v1516_v6 = vperm.slane %v1510_v7, %v11194_v23  ;;  %v1592_v7 = vperm.slane %v1584_v41, %v11214_v28 }
0x13ef   : > { %v1558_v50 = vsel %vm1397_vm10, %v1557_v20, %v1516_v6  ;;  %v1605_v48 = vrot.slane %v1588_v60, 4  ;;  %v1559_v20 = vrot.slane %v1516_v6, 4 }
0x13f0   : > { %v1564_v36 = vperm.slane %v1558_v50, %v11214_v28  ;;  %v1548_v50 = vsel %vm1397_vm10, %v1379_v52, %v1547_v54 }
0x13f1   : > { %v1556_v11 = vperm.slane %v1548_v50, %v11194_v23 }
0x13f2   : > { %v11350_v59 = vsel %vm1397_vm10, %v1605_v48, %v1564_v36  ;;  %v1607_v56 = vrot.slane %v1564_v36, 4  ;;  %v1560_v48 = vsel %vm1397_vm10, %v1528_v62, %v1559_v20  ;;  %v1524_v36 = vsel %vm1397_vm10, %v10304_v3, %v1523_v18 }
0x13f3   : > { %14863 = vst [vmem:[#allocation6_spill] sm:$0xff] %v11350_v59  ;;  %v1593_v52 = vrot.slane %v1556_v11, 4  ;;  %v1532_v62 = vperm.slane %v1524_v36, %v11194_v23  ;;  %v1512_v3 = vsel %vm1397_vm10, %v14860_v43, %v1511_v5  ;;  %v1595_v43 = vrot.slane %v1544_v12, 4 }
0x13f4   : > { %v11357_v8 = vsel %vm1397_vm10, %v1588_v60, %v1607_v56  ;;  %v1568_v60 = vperm.slane %v1560_v48, %v11214_v28  ;;  %v1520_v20 = vperm.slane %v1512_v3, %v11194_v23  ;;  %v11416_v3 = vpop.permute.xlu0 %9225 }
0x13f5   : > { %8743 = vmatmul.msk.f32.gmra.mxu3 %vm508_vm9, %v11341_v47  ;;  %14864 = vst [vmem:[#allocation139_spill] sm:$0xff] %v11357_v8  ;;  %v1594_v41 = vsel %vm1397_vm10, %v1593_v52, %v1544_v12  ;;  %v1569_v1 = vrot.slane %v1532_v62, 4  ;;  %v14904_v47 = vld [vmem:[#allocation24_spill] sm:$0xff] }
0x13f6   : > { %v1611_v56 = vrot.slane %v1568_v60, 4  ;;  %v1600_v54 = vperm.slane %v1594_v41, %v11214_v28  ;;  %v1571_v36 = vrot.slane %v1520_v20, 4  ;;  %14871 = vst [vmem:[#allocation146_spill] sm:$0xff] %v11416_v3 }
0x13f7   : > { %v1570_v50 = vsel %vm1397_vm10, %v1569_v1, %v1520_v20 }
0x13f8   : > { %v1613_v14 = vrot.slane %v1600_v54, 4  ;;  %v1576_v48 = vperm.slane %v1570_v50, %v11214_v28  ;;  %v1572_v57 = vsel %vm1397_vm10, %v1532_v62, %v1571_v36  ;;  %v11418_v62 = vpop.permute.xlu1 %9250 }
0x13f9   : > { %v1580_v5 = vperm.slane %v1572_v57, %v11214_v28  ;;  %14872 = vst [vmem:[#allocation147_spill] sm:$0xff] %v11418_v62 }
0x13fa   : > { %v11393_v18 = vsel %vm1397_vm10, %v1613_v14, %v1576_v48  ;;  %v1615_v15 = vrot.slane %v1576_v48, 4 }
0x13fb   : > { %14867 = vst [vmem:[#allocation142_spill] sm:$0xff] %v11393_v18 }
0x13fc   : > { %v11399_v23 = vsel %vm1397_vm10, %v1600_v54, %v1615_v15  ;;  %v11420_v1 = vpop.permute.xlu0 %9235 }
0x13fd   : > { %8744 = vmatmul.msk.f32.gmra.mxu3 %vm508_vm9, %v11350_v59  ;;  %v1609_v59 = vrot.slane %v1592_v7, 4  ;;  %14868 = vst [vmem:[#allocation143_spill] sm:$0xff] %v11399_v23 }
0x13fe   : > { %14873 = vst [vmem:[#allocation148_spill] sm:$0xff] %v11420_v1 }
0x13ff   : > { %v11373_v6 = vsel %vm1397_vm10, %v1609_v59, %v1568_v60  ;;  %v11384_v59 = vsel %vm1397_vm10, %v1592_v7, %v1611_v56  ;;  %v1596_v7 = vsel %vm1397_vm10, %v1556_v11, %v1595_v43  ;;  %v1619_v11 = vrot.slane %v1580_v5, 4 }
0x1400   : > { %14865 = vst [vmem:[#allocation140_spill] sm:$0xff] %v11373_v6  ;;  %v1604_v60 = vperm.slane %v1596_v7, %v11214_v28  ;;  %v11425_v28 = vld [vmem:[%s14572_s3 + $0x1] ss:$0 sm:$0xff]  ;;  %v11434_v48 = vpop.permute.xlu1 %9265 }
0x1401   : > { %14866 = vst [vmem:[#allocation141_spill] sm:$0xff] %v11384_v59 }
0x1402   : > { %v1617_v52 = vrot.slane %v1604_v60, 4  ;;  %v11412_v12 = vsel %vm1397_vm10, %v1604_v60, %v1619_v11  ;;  %14874 = vst [vmem:[#allocation149_spill] sm:$0xff] %v11434_v48 }
0x1403   : > { %14870 = vst [vmem:[#allocation145_spill] sm:$0xff] %v11412_v12 }
0x1404   : > { %v11407_v41 = vsel %vm1397_vm10, %v1617_v52, %v1580_v5  ;;  %v11436_v43 = vpop.permute.xlu0 %9245 }
0x1405   : > { %8745 = vmatmul.msk.f32.gmra.mxu3 %vm508_vm9, %v11357_v8  ;;  %14869 = vst [vmem:[#allocation144_spill] sm:$0xff] %v11407_v41 }
0x1406   : > { %14875 = vst [vmem:[#allocation150_spill] sm:$0xff] %v11436_v43 }
0x1408   : > { %v11448_v36 = vpop.permute.xlu1 %9275 }
0x1409   : > { %14876 = vst [vmem:[#allocation151_spill] sm:$0xff] %v11448_v36 }
0x140c   : > { %v11450_v57 = vpop.permute.xlu0 %9255 }
0x140d   : > { %8746 = vmatmul.msk.f32.gmra.mxu3 %vm508_vm9, %v11373_v6  ;;  %14877 = vst [vmem:[#allocation152_spill] sm:$0xff] %v11450_v57  ;;  %v14902_v6 = vld [vmem:[#allocation18_spill] sm:$0xff]  ;;  %v14938_v57 = vld [vmem:[#allocation43_spill] sm:$0xff] }
0x1414   : > { %v11465_v5 = vpop.permute.xlu0 %9270 }
0x1415   : > { %8747 = vmatmul.msk.f32.gmra.mxu3 %vm508_vm9, %v11384_v59  ;;  %14879 = vst [vmem:[#allocation154_spill] sm:$0xff] %v11465_v5  ;;  %v14901_v59 = vld [vmem:[#allocation22_spill] sm:$0xff] }
0x141d   : > { %8748 = vmatmul.msk.f32.gmra.mxu3 %vm508_vm9, %v11393_v18 }
0x1425   : > { %8749 = vmatmul.msk.f32.gmra.mxu3 %vm508_vm9, %v11399_v23  ;;  %v14897_v23 = vld [vmem:[#allocation19_spill] sm:$0xff] }
0x142d   : > { %8750 = vmatmul.msk.f32.gmra.mxu3 %vm508_vm9, %v11407_v41 }
0x1435   : > { %8751 = vmatmul.msk.f32.gmra.mxu3 %vm508_vm9, %v11412_v12  ;;  %v14891_v12 = vld [vmem:[#allocation33_spill] sm:$0xff] }
0x1440   : > { %v1719_v56 = vpop.f32.mrf.mxu3 }
0x1441   : > { %v1720_v54 = vadd.f32 %v11425_v28, %v1719_v56 }
0x1443   : > { %v1767_v20 = vmul.f32 0.35355338, %v1720_v54 }
0x1445   : > { %3500 = vrot.lane.b32.xlu0 %v1767_v20, %s9992_s11  ;;  %2476 = vrot.lane.b32.xlu1 %v1767_v20, %s9990_s29 }
0x1446   : > { %8786 = vmatmul.msk.f32.vlgmr.msrb.gmra.mxu2 %vm394_vm0, %v1767_v20 }
0x1447   : > { %8790 = vmatpush.xpose.msk.msrb.mxu2 %vm394_vm0, %v10488_v13 }
0x1448   : > { %v1722_v50 = vpop.f32.mrf.mxu3 }
0x1449   : > { %v1723_v14 = vadd.f32 %v11425_v28, %v1722_v50 }
0x144b   : > { %v1768_v7 = vmul.f32 0.35355338, %v1723_v14  ;;  %8791 = vmatpush.xpose.msk.msrb.mxu2 %vm394_vm0, %v10481_v0 }
0x144d   : > { %2988 = vrot.lane.b32.xlu1 %v1767_v20, %s9991_s14  ;;  %3532 = vrot.lane.b32.xlu2 %v1768_v7, %s9992_s11 }
0x144e   : > { %8789 = vmatmul.msk.f32.vlgmr.msra.gmra.mxu2 %vm394_vm0, %v1768_v7 }
0x144f   : > { %8793 = vmatpush.xpose.msk.msra.mxu2 %vm394_vm0, %v10502_v30 }
0x1450   : > { %v1725_v13 = vpop.f32.mrf.mxu3 }
0x1451   : > { %v1726_v15 = vadd.f32 %v11425_v28, %v1725_v13 }
0x1453   : > { %v1769_v60 = vmul.f32 0.35355338, %v1726_v15  ;;  %8794 = vmatpush.xpose.msk.msra.mxu2 %vm394_vm0, %v10495_v26  ;;  %v11463_v26 = vpop.permute.xlu1 %9285 }
0x1454   : > { %14878 = vst [vmem:[#allocation153_spill] sm:$0xff] %v11463_v26 }
0x1455   : > { %3564 = vrot.lane.b32.xlu0 %v1769_v60, %s9992_s11  ;;  %2508 = vrot.lane.b32.xlu1 %v1768_v7, %s9990_s29 }
0x1456   : > { %8792 = vmatmul.msk.f32.vlgmr.msrb.gmra.mxu2 %vm394_vm0, %v1769_v60 }
0x1457   : > { %8796 = vmatpush.xpose.msk.msrb.mxu2 %vm394_vm0, %v10521_v35 }
0x1458   : > { %v1728_v0 = vpop.f32.mrf.mxu3 }
0x1459   : > { %v1729_v30 = vadd.f32 %v11425_v28, %v1728_v0 }
0x145b   : > { %v1770_v52 = vmul.f32 0.35355338, %v1729_v30  ;;  %8797 = vmatpush.xpose.msk.msrb.mxu2 %vm394_vm0, %v10509_v21  ;;  %v11477_v54 = vpop.permute.xlu1 %9295 }
0x145c   : > { %14880 = vst [vmem:[#allocation155_spill] sm:$0xff] %v11477_v54 }
0x145d   : > { %3596 = vrot.lane.b32.xlu0 %v1770_v52, %s9992_s11  ;;  %3020 = vrot.lane.b32.xlu1 %v1768_v7, %s9991_s14 }
0x145e   : > { %8795 = vmatmul.msk.f32.vlgmr.msra.gmra.mxu2 %vm394_vm0, %v1770_v52 }
0x145f   : > { %8799 = vmatpush.xpose.msk.msra.mxu2 %vm394_vm0, %v10537_v39  ;;  %v11479_v39 = vpop.permute.xlu0 %9290 }
0x1460   : > { %v1731_v35 = vpop.f32.mrf.mxu3  ;;  %14881 = vst [vmem:[#allocation156_spill] sm:$0xff] %v11479_v39 }
0x1461   : > { %v1732_v11 = vadd.f32 %v11425_v28, %v1731_v35 }
0x1463   : > { %v1771_v56 = vmul.f32 0.35355338, %v1732_v11  ;;  %8800 = vmatpush.xpose.msk.msra.mxu2 %vm394_vm0, %v10529_v2  ;;  %v11490_v14 = vpop.permute.xlu1 %9315 }
0x1464   : > { %14882 = vst [vmem:[#allocation157_spill] sm:$0xff] %v11490_v14 }
0x1465   : > { %3628 = vrot.lane.b32.xlu0 %v1771_v56, %s9992_s11  ;;  %2540 = vrot.lane.b32.xlu1 %v1769_v60, %s9990_s29 }
0x1466   : > { %8798 = vmatmul.msk.f32.vlgmr.msrb.gmra.mxu2 %vm394_vm0, %v1771_v56 }
0x1467   : > { %8802 = vmatpush.xpose.msk.msrb.mxu2 %vm394_vm0, %v10551_v45  ;;  %v11492_v7 = vpop.permute.xlu0 %9310 }
0x1468   : > { %v1734_v21 = vpop.f32.mrf.mxu3  ;;  %14883 = vst [vmem:[#allocation158_spill] sm:$0xff] %v11492_v7 }
0x1469   : > { %v1735_v20 = vadd.f32 %v11425_v28, %v1734_v21 }
0x146b   : > { %v1772_v50 = vmul.f32 0.35355338, %v1735_v20  ;;  %8803 = vmatpush.xpose.msk.msrb.mxu2 %vm394_vm0, %v10544_v42 }
0x146d   : > { %3660 = vrot.lane.b32.xlu0 %v1772_v50, %s9992_s11  ;;  %3052 = vrot.lane.b32.xlu1 %v1769_v60, %s9991_s14 }
0x146e   : > { %8801 = vmatmul.msk.f32.vlgmr.msra.gmra.mxu2 %vm394_vm0, %v1772_v50 }
0x146f   : > { %8805 = vmatpush.xpose.msk.msra.mxu2 %vm394_vm0, %v10565_v55  ;;  %v11512_v60 = vpop.permute.xlu0 %9330 }
0x1470   : > { %v1737_v2 = vpop.f32.mrf.mxu3  ;;  %14885 = vst [vmem:[#allocation160_spill] sm:$0xff] %v11512_v60 }
0x1471   : > { %v1738_v45 = vadd.f32 %v11425_v28, %v1737_v2 }
0x1473   : > { %v11494_v13 = vmul.f32 0.35355338, %v1738_v45  ;;  %8806 = vmatpush.xpose.msk.msra.mxu2 %vm394_vm0, %v10558_v51  ;;  %v11510_v51 = vpop.permute.xlu1 %9335 }
0x1474   : > { %14884 = vst [vmem:[#allocation159_spill] sm:$0xff] %v11510_v51  ;;  %v14922_v51 = vld [vmem:[#allocation55_spill] sm:$0xff] }
0x1475   : > { %2572 = vrot.lane.b32.xlu1 %v1770_v52, %s9990_s29  ;;  %3692 = vrot.lane.b32.xlu2 %v11494_v13, %s9992_s11 }
0x1476   : > { %8804 = vmatmul.msk.f32.vlgmr.msrb.gmra.mxu2 %vm394_vm0, %v11494_v13 }
0x1477   : > { %8808 = vmatpush.xpose.msk.msrb.mxu2 %vm394_vm0, %v10576_v58  ;;  %v11533_v11 = vpop.permute.xlu0 %9350 }
0x1478   : > { %v1740_v42 = vpop.f32.mrf.mxu3  ;;  %14887 = vst [vmem:[#allocation162_spill] sm:$0xff] %v11533_v11 }
0x1479   : > { %v1741_v55 = vadd.f32 %v11425_v28, %v1740_v42 }
0x147b   : > { %v11506_v15 = vmul.f32 0.35355338, %v1741_v55  ;;  %8809 = vmatpush.xpose.msk.msrb.mxu2 %vm394_vm0, %v10571_v63 }
0x147d   : > { %3724 = vrot.lane.b32.xlu0 %v11506_v15, %s9992_s11  ;;  %3084 = vrot.lane.b32.xlu1 %v1770_v52, %s9991_s14  ;;  %v11531_v52 = vpop.permute.xlu1 %9345 }
0x147e   : > { %8807 = vmatmul.msk.f32.vlgmr.msra.gmra.mxu2 %vm394_vm0, %v11506_v15  ;;  %14886 = vst [vmem:[#allocation161_spill] sm:$0xff] %v11531_v52 }
0x147f   : > { %8811 = vmatpush.xpose.msk.msra.mxu2 %vm394_vm0, %v10586_v24  ;;  %v11551_v55 = vpop.permute.xlu0 %9355  ;;  %v14928_v24 = vld [vmem:[#allocation39_spill] sm:$0xff] }
0x1480   : > { %v1743_v0 = vpop.f32.mrf.mxu3  ;;  %14889 = vst [vmem:[#allocation164_spill] sm:$0xff] %v11551_v55 }
0x1481   : > { %v1744_v30 = vadd.f32 %v11425_v28, %v1743_v0 }
0x1483   : > { %v11522_v35 = vmul.f32 0.35355338, %v1744_v30  ;;  %8812 = vmatpush.xpose.msk.msra.mxu2 %vm394_vm0, %v10581_v10 }
0x1485   : > { %2604 = vrot.lane.b32.xlu1 %v1771_v56, %s9990_s29  ;;  %3756 = vrot.lane.b32.xlu0 %v11522_v35, %s9992_s11  ;;  %v11549_v42 = vpop.permute.xlu1 %9370 }
0x1486   : > { %8810 = vmatmul.msk.f32.vlgmr.msrb.gmra.mxu2 %vm394_vm0, %v11522_v35  ;;  %14888 = vst [vmem:[#allocation163_spill] sm:$0xff] %v11549_v42 }
0x1487   : > { %8817 = vmatpush.xpose.msk.msrb.mxu2 %vm394_vm0, %v10620_v40  ;;  %v14925_v40 = vld [vmem:[#allocation38_spill] sm:$0xff] }
0x1488   : > { %v1746_v21 = vpop.f32.mrf.mxu3 }
0x1489   : > { %v1747_v20 = vadd.f32 %v11425_v28, %v1746_v21 }
0x148b   : > { %v11538_v2 = vmul.f32 0.35355338, %v1747_v20  ;;  %8818 = vmatpush.xpose.msk.msrb.mxu2 %vm394_vm0, %v10609_v27 }
0x148d   : > { %3116 = vrot.lane.b32.xlu1 %v1771_v56, %s9991_s14  ;;  %3788 = vrot.lane.b32.xlu2 %v11538_v2, %s9992_s11  ;;  %v14890_v56 = vld [vmem:[#allocation48_spill] sm:$0xff] }
0x148e   : > { %8813 = vmatmul.msk.f32.vlgmr.msra.gmra.mxu2 %vm394_vm0, %v11538_v2 }
0x148f   : > { %8823 = vmatpush.xpose.msk.msra.mxu2 %vm394_vm0, %v10661_v34  ;;  %v14924_v34 = vld [vmem:[#allocation57_spill] sm:$0xff] }
0x1490   : > { %v1749_v45 = vpop.f32.mrf.mxu3 }
0x1491   : > { %v1750_v0 = vadd.f32 %v11425_v28, %v1749_v45  ;;  %v11566_v45 = vpop.permute.xlu1 %9380 }
0x1492   : > { %14892 = vst [vmem:[#allocation48_spill] sm:$0xff] %v11566_v45  ;;  %v14921_v45 = vld [vmem:[#allocation36_spill] sm:$0xff] }
0x1493   : > { %v11554_v30 = vmul.f32 0.35355338, %v1750_v0  ;;  %8824 = vmatpush.xpose.msk.msra.mxu2 %vm394_vm0, %v10653_v16  ;;  %v11568_v0 = vpop.permute.xlu0 %9360 }
0x1494   : > { %14893 = vst [vmem:[#allocation33_spill] sm:$0xff] %v11568_v0 }
0x1495   : > { %2636 = vrot.lane.b32.xlu1 %v1772_v50, %s9990_s29  ;;  %8816 = vmatmul.msk.f32.vlgmr.msrb.gmra.mxu3 %vm394_vm0, %v11554_v30 }
0x1496   : > { %8853 = vmatpush.xpose.msk.msrb.mxu3 %vm394_vm0, %v14890_v56 }
0x1498   : > { %v1752_v21 = vpop.f32.mrf.mxu3 }
0x1499   : > { %v1753_v20 = vadd.f32 %v11425_v28, %v1752_v21 }
0x149a   : > { %8854 = vmatpush.xpose.msk.msrb.mxu3 %vm394_vm0, %v14891_v12 }
0x149b   : > { %v11570_v41 = vmul.f32 0.35355338, %v1753_v20  ;;  %v11584_v20 = vpop.permute.xlu1 %9415 }
0x149c   : > { %14894 = vst [vmem:[#allocation165_spill] sm:$0xff] %v11584_v20 }
0x149d   : > { %3148 = vrot.lane.b32.xlu1 %v1772_v50, %s9991_s14  ;;  %3852 = vrot.lane.b32.xlu2 %v11570_v41, %s9992_s11  ;;  %v11586_v50 = vpop.permute.xlu0 %9375 }
0x149e   : > { %8819 = vmatmul.msk.f32.vlgmr.msrb.gmra.mxu2 %vm394_vm0, %v11570_v41  ;;  %14895 = vst [vmem:[#allocation166_spill] sm:$0xff] %v11586_v50 }
0x149f   : > { %8829 = vmatpush.xpose.msk.msrb.mxu2 %vm394_vm0, %v10693_v44  ;;  %v14896_v44 = vld [vmem:[#allocation14_spill] sm:$0xff] }
0x14a0   : > { %v1755_v56 = vpop.f32.mrf.mxu3 }
0x14a1   : > { %v1756_v12 = vadd.f32 %v11425_v28, %v1755_v56 }
0x14a3   : > { %v11580_v21 = vmul.f32 0.35355338, %v1756_v12  ;;  %8830 = vmatpush.xpose.msk.msrb.mxu2 %vm394_vm0, %v10686_v31 }
0x14a5   : > { %2668 = vrot.lane.b32.xlu1 %v11494_v13, %s9990_s29  ;;  %3884 = vrot.lane.b32.xlu0 %v11580_v21, %s9992_s11 }
0x14a6   : > { %8822 = vmatmul.msk.f32.vlgmr.msrb.gmra.mxu0 %vm394_vm0, %v11580_v21 }
0x14a7   : > { %8832 = vmatpush.xpose.msk.msrb.mxu0 %vm394_vm0, %v14896_v44  ;;  %v11609_v44 = vpop.permute.xlu1 %9430 }
0x14a8   : > { %v1758_v56 = vpop.f32.mrf.mxu3  ;;  %14898 = vst [vmem:[#allocation14_spill] sm:$0xff] %v11609_v44 }
0x14a9   : > { %v1759_v12 = vadd.f32 %v11425_v28, %v1758_v56  ;;  %v11611_v56 = vpop.permute.xlu0 %9385 }
0x14aa   : > { %14899 = vst [vmem:[#allocation19_spill] sm:$0xff] %v11611_v56 }
0x14ab   : > { %v11597_v31 = vmul.f32 0.35355338, %v1759_v12  ;;  %8833 = vmatpush.xpose.msk.msrb.mxu0 %vm394_vm0, %v14897_v23  ;;  %v14900_v12 = vld [vmem:[#allocation16_spill] sm:$0xff] }
0x14ad   : > { %3180 = vrot.lane.b32.xlu1 %v11494_v13, %s9991_s14  ;;  %3916 = vrot.lane.b32.xlu2 %v11597_v31, %s9992_s11 }
0x14ae   : > { %8825 = vmatmul.msk.f32.vlgmr.msra.gmra.mxu2 %vm394_vm0, %v11597_v31  ;;  %3404 = vrot.lane.b32.xlu0 %v11597_v31, %s9991_s14 }
0x14af   : > { %8835 = vmatpush.xpose.msk.msra.mxu2 %vm394_vm0, %v14900_v12 }
0x14b0   : > { %v1761_v23 = vpop.f32.mrf.mxu3 }
0x14b1   : > { %v1762_v18 = vadd.f32 %v11425_v28, %v1761_v23  ;;  %v11628_v23 = vpop.permute.xlu0 %9390 }
0x14b2   : > { %14903 = vst [vmem:[#allocation16_spill] sm:$0xff] %v11628_v23 }
0x14b3   : > { %v11616_v13 = vmul.f32 0.35355338, %v1762_v18  ;;  %8836 = vmatpush.xpose.msk.msra.mxu2 %vm394_vm0, %v14901_v59 }
0x14b5   : > { %2700 = vrot.lane.b32.xlu1 %v11506_v15, %s9990_s29  ;;  %8828 = vmatmul.msk.f32.vlgmr.msra.gmra.mxu0 %vm394_vm0, %v11616_v13 }
0x14b6   : > { %3436 = vrot.lane.b32.xlu0 %v11616_v13, %s9991_s14  ;;  %8838 = vmatpush.xpose.msk.msra.mxu0 %vm394_vm0, %v14902_v6  ;;  %v14905_v6 = vld [vmem:[#allocation21_spill] sm:$0xff] }
0x14b7   : > { %v2477_v12 = vpop.permute.xlu1 %2476 }
0x14b8   : > { %v1764_v8 = vpop.f32.mrf.mxu3 }
0x14b9   : > { %v1765_v18 = vadd.f32 %v11425_v28, %v1764_v8  ;;  %v14906_v8 = vld [vmem:[#allocation44_spill] sm:$0xff]  ;;  %v11650_v28 = vpop.permute.xlu0 %9395 }
0x14ba   : > { %8839 = vmatpush.xpose.msk.msra.mxu0 %vm394_vm0, %v14904_v47  ;;  %14907 = vst [vmem:[#allocation22_spill] sm:$0xff] %v11650_v28 }
0x14bb   : > { %v11633_v59 = vmul.f32 0.35355338, %v1765_v18  ;;  %v14909_v18 = vld [vmem:[#allocation29_spill] sm:$0xff] }
0x14bd   : > { %3212 = vrot.lane.b32.xlu1 %v11506_v15, %s9991_s14  ;;  %3468 = vrot.lane.b32.xlu2 %v11633_v59, %s9991_s14  ;;  %v14908_v15 = vld [vmem:[#allocation26_spill] sm:$0xff] }
0x14be   : > { %8831 = vmatmul.msk.f32.vlgmr.msrb.gmra.mxu2 %vm394_vm0, %v11633_v59  ;;  %3948 = vrot.lane.b32.xlu0 %v11616_v13, %s9992_s11 }
0x14bf   : > { %8841 = vmatpush.xpose.msk.msrb.mxu2 %vm394_vm0, %v14905_v6  ;;  %8834 = vmatmul.msk.f32.vlgmr.msrb.gmra.mxu0 %vm394_vm0, %v2477_v12  ;;  %v11646_v47 = vpop.permute.xlu1 %2988 }
0x14c0   : > { %8847 = vmatpush.xpose.msk.msrb.mxu0 %vm394_vm0, %v14906_v8  ;;  %v14910_v8 = vld [vmem:[#allocation46_spill] sm:$0xff] }
0x14c1   : > { %v11665_v46 = vpop.permute.xlu0 %9400 }
0x14c2   : > { %14911 = vst [vmem:[#allocation18_spill] sm:$0xff] %v11665_v46  ;;  %v14914_v46 = vld [vmem:[#allocation50_spill] sm:$0xff] }
0x14c3   : > { %8842 = vmatpush.xpose.msk.msrb.mxu2 %vm394_vm0, %v14908_v15  ;;  %v14912_v15 = vld [vmem:[#allocation31_spill] sm:$0xff] }
0x14c4   : > { %8848 = vmatpush.xpose.msk.msrb.mxu0 %vm394_vm0, %v14909_v18 }
0x14c5   : > { %2732 = vrot.lane.b32.xlu1 %v11522_v35, %s9990_s29 }
0x14c6   : > { %3980 = vrot.lane.b32.xlu0 %v11633_v59, %s9992_s11 }
0x14c7   : > { %v2509_v12 = vpop.permute.xlu1 %2508 }
0x14c8   : > { %8837 = vmatmul.msk.f32.vlgmr.msra.gmra.mxu2 %vm394_vm0, %v2509_v12 }
0x14c9   : > { %v11661_v6 = vpop.f32.mrf.mxu2  ;;  %8850 = vmatpush.xpose.msk.msra.mxu2 %vm394_vm0, %v14910_v8  ;;  %v11677_v12 = vpop.permute.xlu0 %9410 }
0x14ca   : > { %14913 = vst [vmem:[#allocation24_spill] sm:$0xff] %v11677_v12  ;;  %v4013_v50 = vsel %vm4012_vm11, %v11661_v6, -inf }
0x14cd   : > { %8851 = vmatpush.xpose.msk.msra.mxu2 %vm394_vm0, %v14912_v15  ;;  %3244 = vrot.lane.b32.xlu1 %v11522_v35, %s9991_s14  ;;  %v14915_v15 = vld [vmem:[#allocation34_spill] sm:$0xff] }
0x14cf   : > { %v11671_v18 = vpop.permute.xlu1 %3020 }
0x14d1   : > { %v11673_v44 = vpop.f32.mrf.mxu2  ;;  %v11690_v23 = vpop.permute.xlu0 %9420 }
0x14d2   : > { %14916 = vst [vmem:[#allocation21_spill] sm:$0xff] %v11690_v23  ;;  %v4025_v54 = vsel %vm4012_vm11, %v11673_v44, -inf }
0x14d5   : > { %2764 = vrot.lane.b32.xlu1 %v11538_v2, %s9990_s29 }
0x14d7   : > { %v2541_v28 = vpop.permute.xlu1 %2540 }
0x14d8   : > { %8840 = vmatmul.msk.f32.vlgmr.msra.gmra.mxu0 %vm394_vm0, %v2541_v28 }
0x14d9   : > { %v11680_v8 = vpop.f32.mrf.mxu2  ;;  %8856 = vmatpush.xpose.msk.msra.mxu0 %vm394_vm0, %v14914_v46  ;;  %v14917_v46 = vld [vmem:[#allocation52_spill] sm:$0xff] }
0x14da   : > { %v4037_v36 = vsel %vm4012_vm11, %v11680_v8, -inf }
0x14dd   : > { %8857 = vmatpush.xpose.msk.msra.mxu0 %vm394_vm0, %v14915_v15  ;;  %3276 = vrot.lane.b32.xlu1 %v11538_v2, %s9991_s14  ;;  %v11701_v15 = vpop.permute.xlu0 %9425  ;;  %v14919_v2 = vld [vmem:[#allocation35_spill] sm:$0xff] }
0x14de   : > { %14918 = vst [vmem:[#allocation44_spill] sm:$0xff] %v11701_v15 }
0x14df   : > { %v11688_v35 = vpop.permute.xlu1 %3052 }
0x14e1   : > { %v11692_v56 = vpop.f32.mrf.mxu2 }
0x14e2   : > { %v4049_v15 = vsel %vm4012_vm11, %v11692_v56, -inf }
0x14e5   : > { %2796 = vrot.lane.b32.xlu1 %v11554_v30, %s9990_s29  ;;  %v11715_v0 = vpop.permute.xlu0 %3500 }
0x14e7   : > { %v2573_v28 = vpop.permute.xlu1 %2572 }
0x14e8   : > { %8843 = vmatmul.msk.f32.vlgmr.msrb.gmra.mxu2 %vm394_vm0, %v2573_v28 }
0x14e9   : > { %v11697_v12 = vpop.f32.mrf.mxu2  ;;  %8859 = vmatpush.xpose.msk.msrb.mxu2 %vm394_vm0, %v14917_v46 }
0x14ed   : > { %8860 = vmatpush.xpose.msk.msrb.mxu2 %vm394_vm0, %v14919_v2  ;;  %3308 = vrot.lane.b32.xlu1 %v11554_v30, %s9991_s14  ;;  %v11726_v20 = vpop.permute.xlu0 %3564 }
0x14ef   : > { %v11707_v23 = vpop.permute.xlu1 %3084 }
0x14f0   : > { %4014 = vmax.xlane.f32.xlu0 %v4013_v50  ;;  %v14920_v50 = vld [vmem:[#allocation54_spill] sm:$0xff] }
0x14f1   : > { %v11711_v28 = vpop.f32.mrf.mxu2 }
0x14f2   : > { %v4073_v46 = vsel %vm4012_vm11, %v11711_v28, -inf }
0x14f3   : > { %4074 = vmax.xlane.f32.xlu2 %v4073_v46 }
0x14f5   : > { %3820 = vrot.lane.b32.xlu1 %v11554_v30, %s9992_s11  ;;  %s338_s11 = scalar_lea.vmem %s14573_s4, %s8689_s28 }
0x14f7   : > { %v2605_v2 = vpop.permute.xlu1 %2604 }
0x14f8   : > { %4050 = vmax.xlane.f32.xlu0 %v4049_v15  ;;  %8846 = vmatmul.msk.f32.vlgmr.msra.gmra.mxu3 %vm394_vm0, %v2605_v2  ;;  %v4061_v15 = vsel %vm4012_vm11, %v11697_v12, -inf  ;;  %v11738_v2 = vpop.permute.xlu0 %3596 }
0x14f9   : > { %v11722_v11 = vpop.f32.mrf.mxu2  ;;  %8862 = vmatpush.xpose.msk.msra.mxu3 %vm394_vm0, %v14920_v50 }
0x14fd   : > { %8863 = vmatpush.xpose.msk.msra.mxu3 %vm394_vm0, %v14921_v45  ;;  %2828 = vrot.lane.b32.xlu1 %v11570_v41, %s9990_s29 }
0x14ff   : > { %v11732_v30 = vpop.permute.xlu1 %3116 }
0x1500   : > { %4062 = vmax.xlane.f32.xlu0 %v4061_v15  ;;  %v14923_v15 = vld [vmem:[#allocation37_spill] sm:$0xff]  ;;  %v11753_v17 = vpop.permute.xlu0 %3628 }
0x1501   : > { %v11736_v46 = vpop.f32.mrf.mxu2 }
0x1502   : > { %v4097_v45 = vsel %vm4012_vm11, %v11736_v46, -inf }
0x1505   : > { %3340 = vrot.lane.b32.xlu1 %v11570_v41, %s9991_s14 }
0x1507   : > { %v2637_v50 = vpop.permute.xlu1 %2636 }
0x1508   : > { %4098 = vmax.xlane.f32.xlu0 %v4097_v45  ;;  %8849 = vmatmul.msk.f32.vlgmr.msrb.gmra.mxu0 %vm394_vm0, %v2637_v50 }
0x1509   : > { %v11745_v42 = vpop.f32.mrf.mxu2  ;;  %8865 = vmatpush.xpose.msk.msrb.mxu0 %vm394_vm0, %v14922_v51 }
0x150d   : > { %8866 = vmatpush.xpose.msk.msrb.mxu0 %vm394_vm0, %v14923_v15  ;;  %2860 = vrot.lane.b32.xlu1 %v11580_v21, %s9990_s29  ;;  %v11766_v15 = vpop.permute.xlu0 %3660 }
0x150f   : > { %v11755_v41 = vpop.permute.xlu1 %3148 }
0x1511   : > { %v11757_v16 = vpop.f32.mrf.mxu2 }
0x1512   : > { %v4121_v50 = vsel %vm4012_vm11, %v11757_v16, -inf }
0x1513   : > { %4122 = vmax.xlane.f32.xlu2 %v4121_v50 }
0x1515   : > { %3372 = vrot.lane.b32.xlu1 %v11580_v21, %s9991_s14  ;;  %v11778_v50 = vpop.permute.xlu0 %3724  ;;  %s10000_s14 = smov 24  }
0x1517   : > { %v2669_v51 = vpop.permute.xlu1 %2668 }
0x1518   : > { %v11763_v45 = vpop.f32.mrf.mxu3  ;;  %8852 = vmatmul.msk.f32.vlgmr.msra.gmra.mxu2 %vm394_vm0, %v2669_v51 }
0x1519   : > { %8868 = vmatpush.xpose.msk.msra.mxu2 %vm394_vm0, %v14924_v34  ;;  %v4133_v27 = vsel %vm4012_vm11, %v11763_v45, -inf }
0x151b   : > { %4134 = vmax.xlane.f32.xlu2 %v4133_v27 }
0x151d   : > { %8869 = vmatpush.xpose.msk.msra.mxu2 %vm394_vm0, %v14925_v40  ;;  %2892 = vrot.lane.b32.xlu1 %v11597_v31, %s9990_s29  ;;  %v14926_v40 = vld [vmem:[#allocation59_spill] sm:$0xff]  ;;  %v11789_v34 = vpop.permute.xlu0 %3756  ;;  %v11791_v31 = vpop.permute.xlu2 %9365 }
0x151e   : > { %14927 = vst [vmem:[#allocation26_spill] sm:$0xff] %v11791_v31  ;;  %v14930_v31 = vld [vmem:[#allocation61_spill] sm:$0xff] }
0x151f   : > { %v11776_v21 = vpop.permute.xlu1 %3180 }
0x1521   : > { %v11780_v51 = vpop.f32.mrf.mxu2 }
0x1522   : > { %v4145_v10 = vsel %vm4012_vm11, %v11780_v51, -inf }
0x1523   : > { %4146 = vmax.xlane.f32.xlu0 %v4145_v10 }
0x1525   : > { %2924 = vrot.lane.b32.xlu1 %v11616_v13, %s9990_s29 }
0x1527   : > { %v2701_v27 = vpop.permute.xlu1 %2700 }
0x1528   : > { %8855 = vmatmul.msk.f32.vlgmr.msrb.gmra.mxu3 %vm394_vm0, %v2701_v27  ;;  %v11803_v27 = vpop.permute.xlu0 %3884 }
0x1529   : > { %8871 = vmatpush.xpose.msk.msrb.mxu3 %vm394_vm0, %v14926_v40  ;;  %v11805_v40 = vpop.permute.xlu2 %9405 }
0x152a   : > { %14929 = vst [vmem:[#allocation29_spill] sm:$0xff] %v11805_v40 }
0x152d   : > { %8872 = vmatpush.xpose.msk.msrb.mxu3 %vm394_vm0, %v14928_v24  ;;  %2956 = vrot.lane.b32.xlu1 %v11633_v59, %s9990_s29  ;;  %v11810_v24 = vpop.f32.mrf.mxu0  ;;  %s9999_s29 = smov 16  }
0x152f   : > { %v11797_v10 = vpop.permute.xlu1 %3212 }
0x1530   : > { %v11812_v59 = vpop.permute.xlu0 %3404 }
0x1531   : > { %v11799_v55 = vpop.f32.mrf.mxu2  ;;  %v11818_v63 = vpop.permute.xlu2 %9435 }
0x1532   : > { %v4169_v13 = vsel %vm4012_vm11, %v11799_v55, -inf  ;;  %14932 = vst [vmem:[#allocation46_spill] sm:$0xff] %v11818_v63  ;;  %v14935_v63 = vld [vmem:[#allocation42_spill] sm:$0xff] }
0x1533   : > { %4170 = vmax.xlane.f32.xlu2 %v4169_v13 }
0x1537   : > { %v2733_v52 = vpop.permute.xlu1 %2732 }
0x1538   : > { %8858 = vmatmul.msk.f32.vlgmr.msra.gmra.mxu0 %vm394_vm0, %v2733_v52  ;;  %v11824_v52 = vpop.f32.mrf.mxu0 }
0x1539   : > { %8874 = vmatpush.xpose.msk.msra.mxu0 %vm394_vm0, %v14930_v31  ;;  %v11826_v31 = vpop.permute.xlu0 %3436  ;;  %v11828_v38 = vpop.permute.xlu2 %3532 }
0x153d   : > { %8875 = vmatpush.xpose.msk.msra.mxu0 %vm394_vm0, %v14931_v53  ;;  %v14934_v53 = vld [vmem:[#allocation63_spill] sm:$0xff] }
0x153f   : > { %v11816_v60 = vpop.permute.xlu1 %3244 }
0x1540   : > { %v11833_v7 = vpop.f32.mrf.mxu0 }
0x1541   : > { %v11820_v13 = vpop.f32.mrf.mxu2  ;;  %v11839_v4 = vpop.permute.xlu2 %3692 }
0x1542   : > { %14933 = vst [vmem:[#allocation31_spill] sm:$0xff] %v11820_v13  ;;  %v4193_v40 = vsel %vm4012_vm11, %v11820_v13, -inf }
0x1543   : > { %4194 = vmax.xlane.f32.xlu2 %v4193_v40  ;;  %v11841_v40 = vpop.permute.xlu0 %3948 }
0x1547   : > { %v2765_v58 = vpop.permute.xlu1 %2764 }
0x1548   : > { %8861 = vmatmul.msk.f32.vlgmr.msrb.gmra.mxu2 %vm394_vm0, %v2765_v58 }
0x1549   : > { %8877 = vmatpush.xpose.msk.msrb.mxu2 %vm394_vm0, %v14934_v53  ;;  %v11849_v26 = vpop.permute.xlu2 %3788 }
0x154b   : > { %v11854_v5 = vpop.permute.xlu0 %3980 }
0x154d   : > { %8878 = vmatpush.xpose.msk.msrb.mxu2 %vm394_vm0, %v14935_v63  ;;  %v14937_v63 = vld [vmem:[#allocation65_spill] sm:$0xff] }
0x154f   : > { %v11837_v14 = vpop.permute.xlu1 %3276 }
0x1555   : > { %v11843_v39 = vpop.f32.mrf.mxu0 }
0x1556   : > { %14936 = vst [vmem:[#allocation50_spill] sm:$0xff] %v11843_v39  ;;  %v4040_v58 = vsel %vm4012_vm11, %v11843_v39, -inf  ;;  %v4157_v39 = vsel %vm4012_vm11, %v11810_v24, -inf }
0x1557   : > { %v2797_v53 = vpop.permute.xlu1 %2796  ;;  %4026 = vmax.xlane.f32.xlu1 %v4025_v54  ;;  %4041 = vmax.xlane.f32.xlu0 %v4040_v58  ;;  %v11862_v54 = vpop.permute.xlu2 %3852 }
0x1558   : > { %8864 = vmatmul.msk.f32.vlgmr.msra.gmra.mxu3 %vm394_vm0, %v2797_v53 }
0x1559   : > { %8880 = vmatpush.xpose.msk.msra.mxu3 %vm394_vm0, %v14937_v63  ;;  %v4085_v63 = vsel %vm4012_vm11, %v11722_v11, -inf }
0x155d   : > { %8881 = vmatpush.xpose.msk.msra.mxu3 %vm394_vm0, %v14938_v57 }
0x155f   : > { %v11860_v48 = vpop.permute.xlu1 %3308  ;;  %4038 = vmax.xlane.f32.xlu1 %v4037_v36  ;;  %v11869_v49 = vpop.permute.xlu2 %3916  ;;  %v4109_v36 = vsel %vm4012_vm11, %v11745_v42, -inf }
0x1563   : > { %v4015_v58 = vpop.xlane.xlu0 %4014 }
0x1564   : > { %v4205_v3 = vsub.f32 %v11661_v6, %v4015_v58  ;;  %v14939_v58 = vld [vmem:[#allocation67_spill] sm:$0xff] }
0x1566   : > { %v4269_v53 = vmul.f32 1.442695, %v4205_v3 }
0x1567   : > { %v11867_v43 = vpop.permute.xlu1 %3820  ;;  %4086 = vmax.xlane.f32.xlu1 %v4085_v63  ;;  %v11879_v6 = vpop.permute.xlu2 %3468 }
0x1568   : > { %9621 = vpow2.f32 %v4269_v53 }
0x156b   : > { %v11871_v57 = vpop.xlane.xlu0 %4050 }
0x156e   : > { %v11873_v1 = vpop.eup %9621 }
0x156f   : > { %v2829_v25 = vpop.permute.xlu1 %2828  ;;  %v4397_v3 = vsel %vm4012_vm11, %v11873_v1, 0.0  ;;  %4110 = vmax.xlane.f32.xlu1 %v4109_v36  ;;  %v4075_v36 = vpop.xlane.xlu2 %4074 }
0x1570   : > { %4398 = vadd.xlane.f32.xlu2 %v4397_v3  ;;  %8867 = vmatmul.msk.f32.vlgmr.msrb.gmra.mxu0 %vm394_vm0, %v2829_v25  ;;  %v4225_v3 = vsub.f32 %v11711_v28, %v4075_v36  ;;  %v14942_v28 = vld [vmem:[#allocation47_spill] sm:$0xff]  ;;  %v4016_v36 = vsel %vm4012_vm11, %v11833_v7, -inf }
0x1571   : > { %8883 = vmatpush.xpose.msk.msrb.mxu0 %vm394_vm0, %v14939_v58 }
0x1573   : > { %v4063_v53 = vpop.xlane.xlu0 %4062 }
0x1574   : > { %v4221_v63 = vsub.f32 %v11697_v12, %v4063_v53  ;;  %v4309_v12 = vmul.f32 1.442695, %v4225_v3 }
0x1575   : > { %8884 = vmatpush.xpose.msk.msrb.mxu0 %vm394_vm0, %v14940_v29  ;;  %v4181_v29 = vsel %vm4012_vm11, %v11824_v52, -inf }
0x1576   : > { %v4301_v62 = vmul.f32 1.442695, %v4221_v63 }
0x1577   : > { %v11889_v13 = vpop.permute.xlu1 %3340  ;;  %4158 = vmax.xlane.f32.xlu1 %v4157_v39  ;;  %v14941_v39 = vld [vmem:[#allocation69_spill] sm:$0xff] }
0x1578   : > { %9623 = vpow2.f32 %v4301_v62 }
0x1579   : > { %9625 = vpow2.f32 %v4309_v12 }
0x157b   : > { %v11892_v25 = vpop.f32.mrf.mxu3 }
0x157c   : > { %v4064_v58 = vsel %vm4012_vm11, %v11892_v25, -inf }
0x157d   : > { %4065 = vmax.xlane.f32.xlu0 %v4064_v58 }
0x157e   : > { %v11899_v63 = vpop.eup %9623 }
0x157f   : > { %v2861_v53 = vpop.permute.xlu1 %2860  ;;  %4182 = vmax.xlane.f32.xlu1 %v4181_v29  ;;  %v4445_v62 = vsel %vm4012_vm11, %v11899_v63, 0.0  ;;  %v11909_v58 = vpop.eup %9625 }
0x1580   : > { %8870 = vmatmul.msk.f32.vlgmr.msra.gmra.mxu2 %vm394_vm0, %v2861_v53  ;;  %14943 = vst [vmem:[#allocation34_spill] sm:$0xff] %v11909_v58  ;;  %v11911_v29 = vpop.f32.mrf.mxu2  ;;  %v4457_v53 = vsel %vm4012_vm11, %v11909_v58, 0.0  ;;  %v14947_v58 = vld [vmem:[#allocation77_spill] sm:$0xff] }
0x1581   : > { %8886 = vmatpush.xpose.msk.msra.mxu2 %vm394_vm0, %v14941_v39  ;;  %v4028_v12 = vsel %vm4012_vm11, %v11911_v29, -inf }
0x1585   : > { %8887 = vmatpush.xpose.msk.msra.mxu2 %vm394_vm0, %v14942_v28  ;;  %4446 = vadd.xlane.f32.xlu0 %v4445_v62  ;;  %v14944_v62 = vld [vmem:[#allocation71_spill] sm:$0xff]  ;;  %v14945_v28 = vld [vmem:[#allocation49_spill] sm:$0xff] }
0x1587   : > { %v3373_v3 = vpop.permute.xlu1 %3372  ;;  %4017 = vmax.xlane.f32.xlu1 %v4016_v36 }
0x158d   : > { %4458 = vadd.xlane.f32.xlu0 %v4457_v53  ;;  %v14946_v53 = vld [vmem:[#allocation73_spill] sm:$0xff] }
0x158f   : > { %v2893_v39 = vpop.permute.xlu1 %2892  ;;  %4029 = vmax.xlane.f32.xlu1 %v4028_v12  ;;  %v14948_v12 = vld [vmem:[#allocation51_spill] sm:$0xff] }
0x1590   : > { %8873 = vmatmul.msk.f32.vlgmr.msrb.gmra.mxu3 %vm394_vm0, %v2893_v39  ;;  %v14949_v39 = vld [vmem:[#allocation56_spill] sm:$0xff] }
0x1591   : > { %8889 = vmatpush.xpose.msk.msrb.mxu3 %vm394_vm0, %v14944_v62 }
0x1595   : > { %8890 = vmatpush.xpose.msk.msrb.mxu3 %vm394_vm0, %v14945_v28  ;;  %v14951_v28 = vld [vmem:[#allocation79_spill] sm:$0xff] }
0x1597   : > { %v2925_v36 = vpop.permute.xlu1 %2924 }
0x1598   : > { %8876 = vmatmul.msk.f32.vlgmr.msra.gmra.mxu0 %vm394_vm0, %v2925_v36  ;;  %8882 = vmatmul.msk.f32.vlgmr.msra.gmra.mxu3 %vm394_vm0, %v11646_v47  ;;  %v14950_v47 = vld [vmem:[#allocation75_spill] sm:$0xff]  ;;  %v14953_v36 = vld [vmem:[#allocation53_spill] sm:$0xff] }
0x1599   : > { %8892 = vmatpush.xpose.msk.msra.mxu0 %vm394_vm0, %v14946_v53  ;;  %8898 = vmatpush.xpose.msk.msra.mxu3 %vm394_vm0, %v14947_v58  ;;  %v14952_v58 = vld [vmem:[#allocation81_spill] sm:$0xff]  ;;  %v14954_v53 = vld [vmem:[#allocation58_spill] sm:$0xff] }
0x159d   : > { %8893 = vmatpush.xpose.msk.msra.mxu0 %vm394_vm0, %v14948_v12  ;;  %8899 = vmatpush.xpose.msk.msra.mxu3 %vm394_vm0, %v14949_v39  ;;  %v14955_v12 = vld [vmem:[#allocation62_spill] sm:$0xff] }
0x159e   : > { %v14957_v39 = vld [vmem:[#allocation82_spill] sm:$0xff] }
0x159f   : > { %v2957_v62 = vpop.permute.xlu1 %2956 }
0x15a0   : > { %8879 = vmatmul.msk.f32.vlgmr.msrb.gmra.mxu2 %vm394_vm0, %v2957_v62  ;;  %8885 = vmatmul.msk.f32.vlgmr.msrb.gmra.mxu0 %vm394_vm0, %v11671_v18  ;;  %v4123_v18 = vpop.xlane.xlu2 %4122  ;;  %v14958_v62 = vld [vmem:[#allocation40_spill] sm:$0xff] }
0x15a1   : > { %8891 = vmatmul.msk.f32.vlgmr.msrb.gmra.mxu3 %vm394_vm0, %v11707_v23  ;;  %8895 = vmatpush.xpose.msk.msrb.mxu2 %vm394_vm0, %v14950_v47  ;;  %v14956_v23 = vld [vmem:[#allocation80_spill] sm:$0xff]  ;;  %v4241_v47 = vsub.f32 %v11757_v16, %v4123_v18  ;;  %v14962_v16 = vld [vmem:[#allocation83_spill] sm:$0xff]  ;;  %v14968_v18 = vld [vmem:[#allocation74_spill] sm:$0xff] }
0x15a2   : > { %8901 = vmatpush.xpose.msk.msrb.mxu0 %vm394_vm0, %v14951_v28  ;;  %8907 = vmatpush.xpose.msk.msrb.mxu3 %vm394_vm0, %v14952_v58  ;;  %v11963_v28 = vpop.f32.mrf.mxu0 }
0x15a3   : > { %v4341_v58 = vmul.f32 1.442695, %v4241_v47 }
0x15a5   : > { %8896 = vmatpush.xpose.msk.msrb.mxu2 %vm394_vm0, %v14953_v36  ;;  %v14963_v36 = vld [vmem:[#allocation84_spill] sm:$0xff]  ;;  %9627 = vpow2.f32 %v4341_v58 }
0x15a6   : > { %8902 = vmatpush.xpose.msk.msrb.mxu0 %vm394_vm0, %v14954_v53  ;;  %8908 = vmatpush.xpose.msk.msrb.mxu3 %vm394_vm0, %v14955_v12  ;;  %v14964_v53 = vld [vmem:[#allocation87_spill] sm:$0xff]  ;;  %v14965_v12 = vld [vmem:[#allocation66_spill] sm:$0xff] }
0x15a8   : > { %8888 = vmatmul.msk.f32.vlgmr.msra.gmra.mxu2 %vm394_vm0, %v11688_v35  ;;  %8894 = vmatmul.msk.f32.vlgmr.msra.gmra.mxu0 %vm394_vm0, %v11732_v30  ;;  %v14959_v35 = vld [vmem:[#allocation60_spill] sm:$0xff] }
0x15a9   : > { %8900 = vmatmul.msk.f32.vlgmr.msra.gmra.mxu3 %vm394_vm0, %v11776_v21  ;;  %8904 = vmatpush.xpose.msk.msra.mxu2 %vm394_vm0, %v14956_v23  ;;  %v14960_v30 = vld [vmem:[#allocation64_spill] sm:$0xff]  ;;  %v14967_v23 = vld [vmem:[#allocation70_spill] sm:$0xff] }
0x15aa   : > { %8910 = vmatpush.xpose.msk.msra.mxu0 %vm394_vm0, %v14957_v39  ;;  %8916 = vmatpush.xpose.msk.msra.mxu3 %vm394_vm0, %v14958_v62  ;;  %v14961_v21 = vld [vmem:[#allocation68_spill] sm:$0xff]  ;;  %v12044_v62 = vpop.xlane.xlu2 %4134 }
0x15ab   : > { %v14969_v39 = vld [vmem:[#allocation72_spill] sm:$0xff] }
0x15ad   : > { %8905 = vmatpush.xpose.msk.msra.mxu2 %vm394_vm0, %v14959_v35  ;;  %v14978_v35 = vld [vmem:[#allocation86_spill] sm:$0xff] }
0x15ae   : > { %8911 = vmatpush.xpose.msk.msra.mxu0 %vm394_vm0, %v14960_v30  ;;  %8917 = vmatpush.xpose.msk.msra.mxu3 %vm394_vm0, %v14961_v21  ;;  %v14982_v30 = vld [vmem:[#allocation91_spill] sm:$0xff]  ;;  %v14983_v21 = vld [vmem:[#allocation112_spill] sm:$0xff] }
0x15b0   : > { %8897 = vmatmul.msk.f32.vlgmr.msrb.gmra.mxu2 %vm394_vm0, %v11755_v41  ;;  %8903 = vmatmul.msk.f32.vlgmr.msrb.gmra.mxu0 %vm394_vm0, %v11797_v10  ;;  %v14966_v10 = vld [vmem:[#allocation85_spill] sm:$0xff] }
0x15b1   : > { %8909 = vmatmul.msk.f32.vlgmr.msrb.gmra.mxu3 %vm394_vm0, %v11837_v14  ;;  %8913 = vmatpush.xpose.msk.msrb.mxu2 %vm394_vm0, %v14962_v16 }
0x15b2   : > { %8919 = vmatpush.xpose.msk.msrb.mxu0 %vm394_vm0, %v14963_v36  ;;  %8925 = vmatpush.xpose.msk.msrb.mxu3 %vm394_vm0, %v14964_v53  ;;  %v12065_v16 = vpop.xlane.xlu2 %4170  ;;  %v14984_v53 = vld [vmem:[#allocation100_spill] sm:$0xff] }
0x15b5   : > { %8914 = vmatpush.xpose.msk.msrb.mxu2 %vm394_vm0, %v14965_v12  ;;  %v11985_v41 = vpop.f32.mrf.mxu0  ;;  %v14986_v12 = vld [vmem:[#allocation95_spill] sm:$0xff] }
0x15b6   : > { %8920 = vmatpush.xpose.msk.msrb.mxu0 %vm394_vm0, %v14966_v10  ;;  %8926 = vmatpush.xpose.msk.msrb.mxu3 %vm394_vm0, %v10971_v33  ;;  %v4112_v14 = vsel %vm4012_vm11, %v11985_v41, -inf  ;;  %v12004_v33 = vpop.eup %9627 }
0x15b7   : > { %4113 = vmax.xlane.f32.xlu0 %v4112_v14  ;;  %v14988_v14 = vld [vmem:[#allocation97_spill] sm:$0xff] }
0x15b8   : > { %8906 = vmatmul.msk.f32.vlgmr.msra.gmra.mxu2 %vm394_vm0, %v11816_v60  ;;  %8912 = vmatmul.msk.f32.vlgmr.msra.gmra.mxu0 %vm394_vm0, %v11860_v48  ;;  %v4505_v48 = vsel %vm4012_vm11, %v12004_v33, 0.0  ;;  %v14973_v60 = vld [vmem:[#allocation78_spill] sm:$0xff] }
0x15b9   : > { %8918 = vmatmul.msk.f32.vlgmr.msra.gmra.mxu3 %vm394_vm0, %v3373_v3  ;;  %8922 = vmatpush.xpose.msk.msra.mxu2 %vm394_vm0, %v14967_v23  ;;  %v14989_v23 = vld [vmem:[#allocation116_spill] sm:$0xff] }
0x15ba   : > { %8928 = vmatpush.xpose.msk.msra.mxu0 %vm394_vm0, %v14968_v18  ;;  %8934 = vmatpush.xpose.msk.msra.mxu3 %vm394_vm0, %v10989_v9  ;;  %v14971_v9 = vld [vmem:[#allocation96_spill] sm:$0xff]  ;;  %v12090_v18 = vpop.f32.mrf.mxu2 }
0x15bd   : > { %8923 = vmatpush.xpose.msk.msra.mxu2 %vm394_vm0, %v14969_v39  ;;  %v12092_v39 = vpop.xlane.xlu2 %4194 }
0x15be   : > { %8929 = vmatpush.xpose.msk.msra.mxu0 %vm394_vm0, %v10967_v61  ;;  %8935 = vmatpush.xpose.msk.msra.mxu3 %vm394_vm0, %v11003_v19  ;;  %v14970_v61 = vld [vmem:[#allocation92_spill] sm:$0xff] }
0x15bf   : > { %4506 = vadd.xlane.f32.xlu0 %v4505_v48  ;;  %v14972_v19 = vld [vmem:[#allocation76_spill] sm:$0xff]  ;;  %v14990_v48 = vld [vmem:[#allocation110_spill] sm:$0xff] }
0x15c0   : > { %8915 = vmatmul.msk.f32.vlgmr.msrb.gmra.mxu2 %vm394_vm0, %v11889_v13  ;;  %8921 = vmatmul.msk.f32.vlgmr.msrb.gmra.mxu0 %vm394_vm0, %v11812_v59  ;;  %v14974_v13 = vld [vmem:[#allocation88_spill] sm:$0xff]  ;;  %v14976_v59 = vld [vmem:[#allocation98_spill] sm:$0xff] }
0x15c1   : > { %8927 = vmatmul.msk.f32.vlgmr.msrb.gmra.mxu3 %vm394_vm0, %v11879_v6  ;;  %8931 = vmatpush.xpose.msk.msrb.mxu2 %vm394_vm0, %v10979_v37  ;;  %v14975_v37 = vld [vmem:[#allocation94_spill] sm:$0xff]  ;;  %v14977_v6 = vld [vmem:[#allocation103_spill] sm:$0xff] }
0x15c2   : > { %8937 = vmatpush.xpose.msk.msrb.mxu0 %vm394_vm0, %v14970_v61  ;;  %8943 = vmatpush.xpose.msk.msrb.mxu3 %vm394_vm0, %v14971_v9  ;;  %v14992_v61 = vld [vmem:[#allocation106_spill] sm:$0xff]  ;;  %v4052_v9 = vsel %vm4012_vm11, %v12090_v18, -inf }
0x15c5   : > { %8932 = vmatpush.xpose.msk.msrb.mxu2 %vm394_vm0, %v14972_v19 }
0x15c6   : > { %8938 = vmatpush.xpose.msk.msrb.mxu0 %vm394_vm0, %v14973_v60  ;;  %8944 = vmatpush.xpose.msk.msrb.mxu3 %vm394_vm0, %v14974_v13  ;;  %v14993_v60 = vld [vmem:[#allocation102_spill] sm:$0xff] }
0x15c7   : > { %v9173_v13 = vunpack.i.h.bf16 %v14993_v60 }
0x15c8   : > { %8924 = vmatmul.msk.f32.vlgmr.msra.gmra.mxu2 %vm394_vm0, %v11826_v31  ;;  %8930 = vmatmul.msk.f32.vlgmr.msra.gmra.mxu0 %vm394_vm0, %v11715_v0  ;;  %v14979_v0 = vld [vmem:[#allocation109_spill] sm:$0xff] }
0x15c9   : > { %8936 = vmatmul.msk.f32.vlgmr.msra.gmra.mxu3 %vm394_vm0, %v11726_v20  ;;  %8940 = vmatpush.xpose.msk.msra.mxu2 %vm394_vm0, %v14975_v37  ;;  %v14980_v20 = vld [vmem:[#allocation90_spill] sm:$0xff]  ;;  %v9182_v37 = vunpack.i.l.bf16 %v11216_v32 }
0x15ca   : > { %8946 = vmatpush.xpose.msk.msra.mxu0 %vm394_vm0, %v14976_v59  ;;  %8952 = vmatpush.xpose.msk.msra.mxu3 %vm394_vm0, %v14977_v6  ;;  %v4027_v3 = vpop.xlane.xlu1 %4026  ;;  %v14995_v6 = vld [vmem:[#allocation99_spill] sm:$0xff] }
0x15cb   : > { %v4209_v31 = vsub.f32 %v11673_v44, %v4027_v3  ;;  %v14981_v44 = vld [vmem:[#allocation89_spill] sm:$0xff]  ;;  %v12120_v3 = vpop.f32.mrf.mxu2 }
0x15cd   : > { %v4277_v47 = vmul.f32 1.442695, %v4209_v31  ;;  %8941 = vmatpush.xpose.msk.msra.mxu2 %vm394_vm0, %v14978_v35  ;;  %v14996_v31 = vld [vmem:[#allocation120_spill] sm:$0xff]  ;;  %v4076_v35 = vsel %vm4012_vm11, %v11963_v28, -inf }
0x15ce   : > { %8947 = vmatpush.xpose.msk.msra.mxu0 %vm394_vm0, %v14979_v0  ;;  %8953 = vmatpush.xpose.msk.msra.mxu3 %vm394_vm0, %v14980_v20  ;;  %v14998_v0 = vld [vmem:[#allocation108_spill] sm:$0xff] }
0x15cf   : > { %9629 = vpow2.f32 %v4277_v47  ;;  %v4088_v47 = vsel %vm4012_vm11, %v12120_v3, -inf  ;;  %v9163_v20 = vunpack.i.h.bf16 %v14998_v0 }
0x15d0   : > { %8933 = vmatmul.msk.f32.vlgmr.msrb.gmra.mxu2 %vm394_vm0, %v11828_v38  ;;  %8939 = vmatmul.msk.f32.vlgmr.msrb.gmra.mxu0 %vm394_vm0, %v11738_v2 }
0x15d1   : > { %8945 = vmatmul.msk.f32.vlgmr.msrb.gmra.mxu3 %vm394_vm0, %v11766_v15  ;;  %8949 = vmatpush.xpose.msk.msrb.mxu2 %vm394_vm0, %v14981_v44  ;;  %v14985_v15 = vld [vmem:[#allocation93_spill] sm:$0xff]  ;;  %v9162_v44 = vunpack.i.l.bf16 %v14998_v0 }
0x15d2   : > { %8955 = vmatpush.xpose.msk.msrb.mxu0 %vm394_vm0, %v14982_v30  ;;  %8961 = vmatpush.xpose.msk.msrb.mxu3 %vm394_vm0, %v14983_v21  ;;  %v4039_v58 = vpop.xlane.xlu1 %4038  ;;  %v14999_v30 = vld [vmem:[#allocation117_spill] sm:$0xff]  ;;  %v15000_v21 = vld [vmem:[#allocation122_spill] sm:$0xff] }
0x15d3   : > { %v4213_v38 = vsub.f32 %v11680_v8, %v4039_v58  ;;  %v14987_v8 = vld [vmem:[#allocation104_spill] sm:$0xff]  ;;  %v9168_v58 = vunpack.i.h.bf16 %v15000_v21 }
0x15d5   : > { %v12068_v36 = vpop.eup %9629  ;;  %v4285_v2 = vmul.f32 1.442695, %v4213_v38  ;;  %8950 = vmatpush.xpose.msk.msrb.mxu2 %vm394_vm0, %v14984_v53  ;;  %v9167_v53 = vunpack.i.l.bf16 %v15000_v21 }
0x15d6   : > { %8956 = vmatpush.xpose.msk.msrb.mxu0 %vm394_vm0, %v14985_v15  ;;  %8962 = vmatpush.xpose.msk.msrb.mxu3 %vm394_vm0, %v14986_v12  ;;  %v4409_v10 = vsel %vm4012_vm11, %v12068_v36, 0.0  ;;  %v9197_v15 = vunpack.i.l.bf16 %v11235_v22  ;;  %v4099_v12 = vpop.xlane.xlu0 %4098 }
0x15d7   : > { %9631 = vpow2.f32 %v4285_v2  ;;  %4410 = vadd.xlane.f32.xlu2 %v4409_v10 }
0x15d8   : > { %8942 = vmatmul.msk.f32.vlgmr.msra.gmra.mxu2 %vm394_vm0, %v11753_v17  ;;  %8948 = vmatmul.msk.f32.vlgmr.msra.gmra.mxu0 %vm394_vm0, %v11839_v4  ;;  %v4217_v4 = vsub.f32 %v11692_v56, %v11871_v57  ;;  %v14994_v57 = vld [vmem:[#allocation114_spill] sm:$0xff] }
0x15d9   : > { %8954 = vmatmul.msk.f32.vlgmr.msra.gmra.mxu3 %vm394_vm0, %v11789_v34  ;;  %8958 = vmatpush.xpose.msk.msra.mxu2 %vm394_vm0, %v14987_v8  ;;  %v14991_v34 = vld [vmem:[#allocation105_spill] sm:$0xff]  ;;  %v4233_v8 = vsub.f32 %v11736_v46, %v4099_v12 }
0x15da   : > { %8964 = vmatpush.xpose.msk.msra.mxu0 %vm394_vm0, %v14988_v14  ;;  %8970 = vmatpush.xpose.msk.msra.mxu3 %vm394_vm0, %v14989_v23  ;;  %v4293_v56 = vmul.f32 1.442695, %v4217_v4  ;;  %v4087_v59 = vpop.xlane.xlu1 %4086  ;;  %v15001_v14 = vld [vmem:[#allocation124_spill] sm:$0xff] }
0x15db   : > { %v9177_v23 = vunpack.i.l.bf16 %v15001_v14  ;;  %v9178_v46 = vunpack.i.h.bf16 %v15001_v14 }
0x15dd   : > { %v12094_v17 = vpop.eup %9631  ;;  %8959 = vmatpush.xpose.msk.msra.mxu2 %vm394_vm0, %v14990_v48 }
0x15de   : > { %8965 = vmatpush.xpose.msk.msra.mxu0 %vm394_vm0, %v14991_v34  ;;  %8971 = vmatpush.xpose.msk.msra.mxu3 %vm394_vm0, %v14992_v61  ;;  %v4421_v19 = vsel %vm4012_vm11, %v12094_v17, 0.0  ;;  %v9172_v61 = vunpack.i.l.bf16 %v14993_v60 }
0x15df   : > { %4053 = vmax.xlane.f32.xlu2 %v4052_v9  ;;  %4422 = vadd.xlane.f32.xlu1 %v4421_v19 }
0x15e0   : > { %8951 = vmatmul.msk.f32.vlgmr.msrb.gmra.mxu2 %vm394_vm0, %v11778_v50  ;;  %8957 = vmatmul.msk.f32.vlgmr.msrb.gmra.mxu0 %vm394_vm0, %v11849_v26  ;;  %v4229_v26 = vsub.f32 %v11722_v11, %v4087_v59  ;;  %v9188_v11 = vunpack.i.h.bf16 %v14999_v30 }
0x15e1   : > { %8963 = vmatmul.msk.f32.vlgmr.msrb.gmra.mxu3 %vm394_vm0, %v11862_v54  ;;  %8967 = vmatpush.xpose.msk.msrb.mxu2 %vm394_vm0, %v14994_v57  ;;  %v14997_v54 = vld [vmem:[#allocation107_spill] sm:$0xff] }
0x15e2   : > { %8973 = vmatpush.xpose.msk.msrb.mxu0 %vm394_vm0, %v14995_v6  ;;  %5601 = vmatpush.msrb.mxu3 %v9173_v13  ;;  %v4317_v38 = vmul.f32 1.442695, %v4229_v26  ;;  %v9183_v13 = vunpack.i.h.bf16 %v11216_v32  ;;  %v12162_v6 = vpop.f32.mrf.mxu2 }
0x15e3   : > { %v4399_v50 = vpop.xlane.xlu2 %4398 }
0x15e4   : > { %9633 = vrcp.f32 %v4399_v50  ;;  %5602 = vmatpush.msrb.mxu3 %v9182_v37  ;;  %v4600_v4 = vand.u32 2147483648, %v4399_v50  ;;  %v4598_v19 = vand.u32 2147483647, %v4399_v50  ;;  %vm4594_vm13 = vweird.f32 %v4399_v50  ;;  %v4111_v37 = vpop.xlane.xlu1 %4110 }
0x15e5   : > { %9635 = vpow2.f32 %v4293_v56  ;;  %8968 = vmatpush.xpose.msk.msrb.mxu2 %vm394_vm0, %v14996_v31  ;;  %v4325_v56 = vmul.f32 1.442695, %v4233_v8  ;;  %v4237_v32 = vsub.f32 %v11745_v42, %v4111_v37  ;;  %v4124_v31 = vsel %vm4012_vm11, %v12162_v6, -inf }
0x15e6   : > { %8974 = vmatpush.xpose.msk.msrb.mxu0 %vm394_vm0, %v14997_v54  ;;  %9637 = vpow2.f32 %v4317_v38  ;;  %v4601_v60 = vor.u32 1.1754944e-38, %v4600_v4  ;;  %vm4599_vm15 = vcmp.eq.f32.partialorder %v4598_v19, 8.507059e+37  ;;  %v15002_v54 = vld [vmem:[#allocation111_spill] sm:$0xff] }
0x15e7   : > { %4089 = vmax.xlane.f32.xlu2 %v4088_v47  ;;  %4077 = vmax.xlane.f32.xlu1 %v4076_v35  ;;  %9639 = vpow2.f32 %v4325_v56  ;;  %v9192_v47 = vunpack.i.l.bf16 %v15002_v54  ;;  %v9198_v35 = vunpack.i.h.bf16 %v11235_v22  ;;  %v4333_v0 = vmul.f32 1.442695, %v4237_v32 }
0x15e8   : > { %8960 = vmatmul.msk.f32.vlgmr.msra.gmra.mxu2 %vm394_vm0, %v11867_v43  ;;  %8966 = vmatmul.msk.f32.vlgmr.msra.gmra.mxu0 %vm394_vm0, %v11803_v27  ;;  %v12145_v43 = vpop.f32.mrf.mxu3 }
0x15e9   : > { %8972 = vmatmul.msk.f32.vlgmr.msra.gmra.mxu3 %vm394_vm0, %v11841_v40  ;;  %5572 = vmatpush.msra.mxu2 %v9163_v20  ;;  %v4100_v48 = vsel %vm4012_vm11, %v12145_v43, -inf  ;;  %v4147_v20 = vpop.xlane.xlu0 %4146  ;;  %9641 = vpow2.f32 %v4333_v0 }
0x15ea   : > { %v9634_v2 = vpop.eup %9633  ;;  %5630 = vmatpush.msra.mxu0 %v9162_v44  ;;  %5688 = vmatpush.msra.mxu3 %v9188_v11  ;;  %v4245_v44 = vsub.f32 %v11763_v45, %v12044_v62  ;;  %v4249_v11 = vsub.f32 %v11780_v51, %v4147_v20 }
0x15eb   : > { %v12143_v10 = vpop.eup %9635  ;;  %v4590_v27 = vmul.f32 %v9634_v2, %v4399_v50  ;;  %5573 = vmatpush.msra.mxu2 %v9168_v58  ;;  %vm4595_vm12 = vweird.f32 %v9634_v2 }
0x15ec   : > { %5631 = vmatpush.msra.mxu0 %v9167_v53  ;;  %5689 = vmatpush.msra.mxu3 %v9197_v15  ;;  %v4433_v34 = vsel %vm4012_vm11, %v12143_v10, 0.0  ;;  %vm4596_vm14 = vmor %vm4594_vm13, %vm4595_vm12  ;;  %v12160_v59 = vpop.eup %9637  ;;  %v4349_v58 = vmul.f32 1.442695, %v4245_v44  ;;  %v4357_v38 = vmul.f32 1.442695, %v4249_v11 }
0x15ed   : > { %v4591_v40 = vsub.f32 1.0, %v4590_v27  ;;  %v4469_v50 = vsel %vm4012_vm11, %v12160_v59, 0.0  ;;  %v12173_v42 = vpop.eup %9639  ;;  %v12186_v15 = vpop.f32.mrf.mxu0 }
0x15ee   : > { %v4481_v21 = vsel %vm4012_vm11, %v12173_v42, 0.0  ;;  %9643 = vpow2.f32 %v4349_v58  ;;  %v4148_v8 = vsel %vm4012_vm11, %v12186_v15, -inf }
0x15ef   : > { %v4592_v9 = vmul.f32 %v9634_v2, %v4591_v40  ;;  %4101 = vmax.xlane.f32.xlu2 %v4100_v48  ;;  %4434 = vadd.xlane.f32.xlu1 %v4433_v34  ;;  %v12184_v53 = vpop.eup %9641  ;;  %9645 = vpow2.f32 %v4357_v38 }
0x15f0   : > { %8969 = vmatmul.msk.f32.vlgmr.msrb.gmra.mxu2 %vm394_vm0, %v11869_v49  ;;  %8975 = vmatmul.msk.f32.vlgmr.msrb.gmra.mxu0 %vm394_vm0, %v11854_v5  ;;  %v4493_v27 = vsel %vm4012_vm11, %v12184_v53, 0.0 }
0x15f1   : > { %v4593_v57 = vadd.f32 %v9634_v2, %v4592_v9  ;;  %5659 = vmatpush.msrb.mxu2 %v9177_v23  ;;  %5717 = vmatpush.msrb.mxu0 %v9172_v61  ;;  %v12193_v62 = vpop.xlane.xlu0 %4041 }
0x15f3   : > { %v4597_v26 = vsel %vm4596_vm14, %v9634_v2, %v4593_v57  ;;  %5660 = vmatpush.msrb.mxu2 %v9183_v13  ;;  %5718 = vmatpush.msrb.mxu0 %v9178_v46  ;;  %v4159_v2 = vpop.xlane.xlu1 %4158 }
0x15f4   : > { %v4602_v49 = vsel %vm4599_vm15, %v4601_v60, %v4597_v26  ;;  %v4253_v51 = vsub.f32 %v11810_v24, %v4159_v2  ;;  %v12199_v14 = vpop.eup %9643  ;;  %v4257_v26 = vsub.f32 %v11799_v55, %v12065_v16 }
0x15f5   : > { %v4603_v5 = vmul.f32 %v11873_v1, %v4602_v49  ;;  %v12175_v1 = vpop.f32.mrf.mxu3  ;;  %v12201_v23 = vpop.eup %9645  ;;  %v4517_v48 = vsel %vm4012_vm11, %v12199_v14, 0.0 }
0x15f6   : > { %v4136_v22 = vsel %vm4012_vm11, %v12175_v1, -inf  ;;  %v4365_v40 = vmul.f32 1.442695, %v4253_v51  ;;  %v4529_v24 = vsel %vm4012_vm11, %v12201_v23, 0.0 }
0x15f7   : > { %4470 = vadd.xlane.f32.xlu2 %v4469_v50  ;;  %4125 = vmax.xlane.f32.xlu1 %v4124_v31  ;;  %v4373_v31 = vmul.f32 1.442695, %v4257_v26 }
0x15f8   : > { %8976 = vmatmul.msk.f32.vlgmr.msra.gmra.mxu2 %vm4012_vm11, %v4603_v5  ;;  %9647 = vpow2.f32 %v4365_v40 }
0x15f9   : > { %5746 = vmatpush.msra.mxu2 %v9192_v47  ;;  %v12203_v4 = vpop.xlane.xlu0 %4065 }
0x15fb   : > { %5747 = vmatpush.msra.mxu2 %v9198_v35  ;;  %v4183_v34 = vpop.xlane.xlu1 %4182 }
0x15fc   : > { %v4261_v55 = vsub.f32 %v11824_v52, %v4183_v34 }
0x15fe   : > { %v12209_v61 = vpop.eup %9647  ;;  %v4381_v44 = vmul.f32 1.442695, %v4261_v55 }
0x15ff   : > { %4482 = vadd.xlane.f32.xlu2 %v4481_v21  ;;  %4137 = vmax.xlane.f32.xlu1 %v4136_v22  ;;  %v4541_v46 = vsel %vm4012_vm11, %v12209_v61, 0.0 }
0x1601   : > { %v12219_v56 = vpop.xlane.xlu0 %4446 }
0x1602   : > { %vm4834_vm12 = vweird.f32 %v12219_v56 }
0x1603   : > { %v12188_v12 = vpop.f32.mrf.mxu2  ;;  %v4018_v57 = vpop.xlane.xlu1 %4017 }
0x1604   : > { %15003 = vst [vmem:[#allocation52_spill] sm:$0xff] %v12188_v12  ;;  %v4160_v45 = vsel %vm4012_vm11, %v12188_v12, -inf  ;;  %v4206_v37 = vsub.f32 %v11833_v7, %v4018_v57 }
0x1605   : > { %4161 = vmax.xlane.f32.xlu0 %v4160_v45 }
0x1606   : > { %v4271_v50 = vmul.f32 1.442695, %v4206_v37 }
0x1607   : > { %4494 = vadd.xlane.f32.xlu2 %v4493_v27  ;;  %4149 = vmax.xlane.f32.xlu1 %v4148_v8 }
0x1608   : > { %9649 = vpow2.f32 %v4271_v50 }
0x1609   : > { %v12232_v47 = vpop.xlane.xlu0 %4458  ;;  %9651 = vpow2.f32 %v4373_v31 }
0x160a   : > { %9653 = vpow2.f32 %v4381_v44 }
0x160b   : > { %v4030_v37 = vpop.xlane.xlu1 %4029 }
0x160e   : > { %v12245_v11 = vpop.eup %9649 }
0x160f   : > { %4530 = vadd.xlane.f32.xlu2 %v4529_v24  ;;  %4518 = vadd.xlane.f32.xlu1 %v4517_v48  ;;  %v12249_v22 = vpop.eup %9651  ;;  %v4400_v38 = vsel %vm4012_vm11, %v12245_v11, 0.0 }
0x1610   : > { %v4553_v51 = vsel %vm4012_vm11, %v12249_v22, 0.0  ;;  %v12263_v8 = vpop.eup %9653 }
0x1611   : > { %15009 = vst [vmem:[#allocation57_spill] sm:$0xff] %v12263_v8 }
0x1613   : > { %v12211_v9 = vpop.f32.mrf.mxu3 }
0x1614   : > { %15004 = vst [vmem:[#allocation35_spill] sm:$0xff] %v12211_v9  ;;  %v4172_v32 = vsel %vm4012_vm11, %v12211_v9, -inf }
0x1615   : > { %v12213_v19 = vpop.f32.mrf.mxu0 }
0x1616   : > { %15005 = vst [vmem:[#allocation54_spill] sm:$0xff] %v12213_v19  ;;  %v4184_v13 = vsel %vm4012_vm11, %v12213_v19, -inf }
0x1617   : > { %4542 = vadd.xlane.f32.xlu2 %v4541_v46  ;;  %4185 = vmax.xlane.f32.xlu0 %v4184_v13  ;;  %v4565_v46 = vsel %vm4012_vm11, %v12263_v8, 0.0  ;;  %v15024_v8 = vld [vmem:[#allocation131_spill] sm:$0xff] }
0x161b   : > { %v12221_v60 = vpop.f32.mrf.mxu3 }
0x161c   : > { %v4019_v5 = vsel %vm4012_vm11, %v12221_v60, -inf }
0x161d   : > { %v12226_v49 = vpop.f32.mrf.mxu0 }
0x161e   : > { %v4031_v20 = vsel %vm4012_vm11, %v12226_v49, -inf }
0x161f   : > { %4173 = vmax.xlane.f32.xlu2 %v4172_v32  ;;  %4020 = vmax.xlane.f32.xlu0 %v4019_v5  ;;  %v4210_v5 = vsub.f32 %v11911_v29, %v4030_v37 }
0x1621   : > { %v4279_v29 = vmul.f32 1.442695, %v4210_v5  ;;  %v15017_v5 = vld [vmem:[#allocation118_spill] sm:$0xff] }
0x1623   : > { %v12234_v35 = vpop.f32.mrf.mxu2 }
0x1624   : > { %v12236_v7 = vpop.f32.mrf.mxu3  ;;  %v4196_v44 = vsel %vm4012_vm11, %v12234_v35, -inf }
0x1625   : > { %v4055_v16 = vsel %vm4012_vm11, %v12236_v7, -inf  ;;  %v12241_v0 = vpop.f32.mrf.mxu0 }
0x1626   : > { %4056 = vmax.xlane.f32.xlu1 %v4055_v16 }
0x1627   : > { %4032 = vmax.xlane.f32.xlu2 %v4031_v20 }
0x162a   : > { %v12247_v21 = vpop.xlane.xlu0 %4113 }
0x162b   : > { %v12251_v58 = vpop.f32.mrf.mxu2 }
0x162c   : > { %15006 = vst [vmem:[#allocation36_spill] sm:$0xff] %v12251_v58  ;;  %v12253_v52 = vpop.f32.mrf.mxu3  ;;  %v4043_v48 = vsel %vm4012_vm11, %v12251_v58, -inf }
0x162d   : > { %15007 = vst [vmem:[#allocation55_spill] sm:$0xff] %v12253_v52  ;;  %v4091_v2 = vsel %vm4012_vm11, %v12253_v52, -inf  ;;  %v12259_v45 = vpop.f32.mrf.mxu0 }
0x162e   : > { %15008 = vst [vmem:[#allocation37_spill] sm:$0xff] %v12259_v45  ;;  %4401 = vadd.xlane.f32.xlu1 %v4400_v38  ;;  %4092 = vmax.xlane.f32.xlu0 %v4091_v2 }
0x162f   : > { %4554 = vadd.xlane.f32.xlu2 %v4553_v51 }
0x1632   : > { %v4507_v27 = vpop.xlane.xlu0 %4506 }
0x1633   : > { %9655 = vrcp.f32 %v4507_v27  ;;  %v12265_v40 = vpop.f32.mrf.mxu2  ;;  %v5140_v55 = vand.u32 2147483648, %v4507_v27  ;;  %v5138_v2 = vand.u32 2147483647, %v4507_v27  ;;  %vm5134_vm2 = vweird.f32 %v4507_v27 }
0x1634   : > { %15010 = vst [vmem:[#allocation38_spill] sm:$0xff] %v12265_v40  ;;  %v12267_v24 = vpop.f32.mrf.mxu3  ;;  %v4079_v16 = vsel %vm4012_vm11, %v12265_v40, -inf  ;;  %9657 = vrcp.f32 %v12219_v56 }
0x1635   : > { %15011 = vst [vmem:[#allocation59_spill] sm:$0xff] %v12267_v24  ;;  %v12271_v34 = vpop.f32.mrf.mxu0  ;;  %vm5139_vm4 = vcmp.eq.f32.partialorder %v5138_v2, 8.507059e+37  ;;  %9659 = vpow2.f32 %v4279_v29  ;;  %v15018_v2 = vld [vmem:[#allocation147_spill] sm:$0xff] }
0x1636   : > { %15012 = vst [vmem:[#allocation39_spill] sm:$0xff] %v12271_v34  ;;  %4044 = vmax.xlane.f32.xlu1 %v4043_v48  ;;  %v4139_v13 = vsel %vm4012_vm11, %v12271_v34, -inf }
0x1637   : > { %4566 = vadd.xlane.f32.xlu2 %v4565_v46  ;;  %4140 = vmax.xlane.f32.xlu0 %v4139_v13  ;;  %v5141_v46 = vor.u32 1.1754944e-38, %v5140_v55  ;;  %v15016_v13 = vld [vmem:[#allocation31_spill] sm:$0xff] }
0x1638   : > { %v4265_v37 = vsub.f32 %v15016_v13, %v12092_v39 }
0x1639   : > { %v9656_v57 = vpop.eup %9655 }
0x163a   : > { %v5130_v26 = vmul.f32 %v9656_v57, %v4507_v27  ;;  %vm5135_vm1 = vweird.f32 %v9656_v57  ;;  %v4127_v27 = vsel %vm4012_vm11, %v12267_v24, -inf  ;;  %v4389_v39 = vmul.f32 1.442695, %v4265_v37  ;;  %v12309_v29 = vpop.eup %9657 }
0x163b   : > { %v12277_v32 = vpop.f32.mrf.mxu2  ;;  %vm5136_vm3 = vmor %vm5134_vm2, %vm5135_vm1  ;;  %vm4835_vm7 = vweird.f32 %v12309_v29 }
0x163c   : > { %15013 = vst [vmem:[#allocation61_spill] sm:$0xff] %v12277_v32  ;;  %v5131_v50 = vsub.f32 1.0, %v5130_v26  ;;  %v12280_v31 = vpop.f32.mrf.mxu3  ;;  %9661 = vpow2.f32 %v4389_v39  ;;  %vm12372_vm13 = vmor %vm4834_vm12, %vm4835_vm7 }
0x163d   : > { %15014 = vst [vmem:[#allocation41_spill] sm:$0xff] %v12280_v31  ;;  %v12284_v20 = vpop.f32.mrf.mxu0  ;;  %v4163_v51 = vsel %vm4012_vm11, %v12280_v31, -inf }
0x163e   : > { %15015 = vst [vmem:[#allocation63_spill] sm:$0xff] %v12284_v20  ;;  %v5132_v38 = vmul.f32 %v9656_v57, %v5131_v50  ;;  %4080 = vmax.xlane.f32.xlu1 %v4079_v16 }
0x163f   : > { %4197 = vmax.xlane.f32.xlu2 %v4196_v44  ;;  %4164 = vmax.xlane.f32.xlu0 %v4163_v51  ;;  %v9252_v51 = vunpack.i.l.bf16 %v15018_v2 }
0x1640   : > { %v5133_v48 = vadd.f32 %v9656_v57, %v5132_v38  ;;  %v9242_v38 = vunpack.i.l.bf16 %v15017_v5 }
0x1642   : > { %v5137_v26 = vsel %vm5136_vm3, %v9656_v57, %v5133_v48  ;;  %v4067_v57 = vsel %vm4012_vm11, %v12241_v0, -inf  ;;  %v12311_v48 = vpop.eup %9659 }
0x1643   : > { %v5142_v50 = vsel %vm5139_vm4, %v5141_v46, %v5137_v26  ;;  %v12293_v40 = vpop.f32.mrf.mxu2  ;;  %15019 = vst [vmem:[#allocation42_spill] sm:$0xff] %v12311_v48  ;;  %v15020_v46 = vld [vmem:[#allocation50_spill] sm:$0xff] }
0x1644   : > { %v5143_v16 = vmul.f32 %v12004_v33, %v5142_v50  ;;  %v12296_v44 = vpop.f32.mrf.mxu3  ;;  %v4175_v33 = vsel %vm4012_vm11, %v12284_v20, -inf  ;;  %v4214_v13 = vsub.f32 %v15020_v46, %v12193_v62  ;;  %v4103_v62 = vsel %vm4012_vm11, %v12259_v45, -inf }
0x1645   : > { %v12301_v55 = vpop.f32.mrf.mxu0  ;;  %v4115_v20 = vsel %vm4012_vm11, %v12277_v32, -inf }
0x1646   : > { %4128 = vmax.xlane.f32.xlu1 %v4127_v27  ;;  %8985 = vmatmul.msk.f32.vlgmr.msrb.gmra.mxu1 %vm4012_vm11, %v5143_v16  ;;  %v4830_v16 = vmul.f32 %v12309_v29, %v12219_v56  ;;  %v4287_v39 = vmul.f32 1.442695, %v4214_v13 }
0x1647   : > { %6065 = vmatpush.msrb.mxu1 %v9242_v38  ;;  %4068 = vmax.xlane.f32.xlu2 %v4067_v57  ;;  %v4412_v38 = vsel %vm4012_vm11, %v12311_v48, 0.0 }
0x1648   : > { %4176 = vmax.xlane.f32.xlu0 %v4175_v33  ;;  %v4831_v46 = vsub.f32 1.0, %v4830_v16 }
0x1649   : > { %6066 = vmatpush.msrb.mxu1 %v9252_v51  ;;  %v12330_v51 = vpop.eup %9661 }
0x164a   : > { %v4411_v37 = vpop.xlane.xlu2 %4410  ;;  %15022 = vst [vmem:[#allocation43_spill] sm:$0xff] %v12330_v51  ;;  %v4577_v16 = vsel %vm4012_vm11, %v12330_v51, 0.0 }
0x164b   : > { %9663 = vrcp.f32 %v4411_v37  ;;  %v12315_v26 = vpop.f32.mrf.mxu2  ;;  %v4660_v19 = vand.u32 2147483648, %v4411_v37  ;;  %vm4654_vm6 = vweird.f32 %v4411_v37 }
0x164c   : > { %9665 = vrcp.f32 %v12232_v47  ;;  %v12318_v50 = vpop.f32.mrf.mxu3 }
0x164d   : > { %v12324_v27 = vpop.f32.mrf.mxu0  ;;  %9667 = vpow2.f32 %v4287_v39  ;;  %v4832_v39 = vmul.f32 %v12309_v29, %v4831_v46 }
0x164e   : > { %15021 = vst [vmem:[#allocation65_spill] sm:$0xff] %v12324_v27  ;;  %4413 = vadd.xlane.f32.xlu1 %v4412_v38  ;;  %v4058_v57 = vsel %vm4012_vm11, %v12324_v27, -inf }
0x164f   : > { %4104 = vmax.xlane.f32.xlu2 %v4103_v62  ;;  %v4222_v62 = vsub.f32 %v11892_v25, %v12203_v4  ;;  %v4658_v25 = vand.u32 2147483647, %v4411_v37  ;;  %v4833_v24 = vadd.f32 %v12309_v29, %v4832_v39 }
0x1650   : > { %4059 = vmax.xlane.f32.xlu0 %v4058_v57 }
0x1651   : > { %v9664_v33 = vpop.eup %9663  ;;  %v4303_v46 = vmul.f32 1.442695, %v4222_v62  ;;  %vm4659_vm10 = vcmp.eq.f32.partialorder %v4658_v25, 8.507059e+37 }
0x1652   : > { %v12332_v31 = vpop.eup %9665  ;;  %v4650_v52 = vmul.f32 %v9664_v33, %v4411_v37  ;;  %v12334_v58 = vpop.xlane.xlu2 %4053  ;;  %vm4655_vm5 = vweird.f32 %v9664_v33 }
0x1653   : > { %v12336_v13 = vpop.xlane.xlu1 %4422  ;;  %v12339_v38 = vpop.f32.mrf.mxu2  ;;  %v4890_v57 = vmul.f32 %v12332_v31, %v12232_v47  ;;  %vm4656_vm8 = vmor %vm4654_vm6, %vm4655_vm5  ;;  %vm4895_vm2 = vweird.f32 %v12332_v31  ;;  %vm4894_vm5 = vweird.f32 %v12232_v47 }
0x1654   : > { %9669 = vrcp.f32 %v12336_v13  ;;  %v4651_v27 = vsub.f32 1.0, %v4650_v52  ;;  %v12343_v48 = vpop.f32.mrf.mxu3  ;;  %v12356_v52 = vpop.eup %9667  ;;  %vm4714_vm1 = vweird.f32 %v12336_v13  ;;  %vm12417_vm6 = vmor %vm4894_vm5, %vm4895_vm2 }
0x1655   : > { %v12352_v9 = vpop.f32.mrf.mxu0  ;;  %v4891_v32 = vsub.f32 1.0, %v4890_v57  ;;  %v4424_v39 = vsel %vm4012_vm11, %v12356_v52, 0.0  ;;  %9671 = vpow2.f32 %v4303_v46  ;;  %v4720_v46 = vand.u32 2147483648, %v12336_v13 }
0x1656   : > { %15023 = vst [vmem:[#allocation67_spill] sm:$0xff] %v12352_v9  ;;  %v4652_v34 = vmul.f32 %v9664_v33, %v4651_v27  ;;  %4116 = vmax.xlane.f32.xlu1 %v4115_v20  ;;  %v4094_v4 = vsel %vm4012_vm11, %v12352_v9, -inf  ;;  %v4661_v27 = vor.u32 1.1754944e-38, %v4660_v19  ;;  %v9207_v20 = vunpack.i.l.bf16 %v15024_v8 }
0x1657   : > { %4578 = vadd.xlane.f32.xlu2 %v4577_v16  ;;  %v4838_v8 = vand.u32 2147483647, %v12219_v56 }
0x1658   : > { %v4653_v51 = vadd.f32 %v9664_v33, %v4652_v34  ;;  %4095 = vmax.xlane.f32.xlu0 %v4094_v4  ;;  %v4840_v34 = vand.u32 2147483648, %v12219_v56  ;;  %v4892_v4 = vmul.f32 %v12332_v31, %v4891_v32  ;;  %v4218_v56 = vsub.f32 %v12090_v18, %v12334_v58 }
0x1659   : > { %v4238_v32 = vsub.f32 %v11985_v41, %v12247_v21  ;;  %vm4839_vm15 = vcmp.eq.f32.partialorder %v4838_v8, 8.507059e+37 }
0x165a   : > { %v9670_v45 = vpop.eup %9669  ;;  %v4657_v12 = vsel %vm4656_vm8, %v9664_v33, %v4653_v51  ;;  %v12362_v9 = vpop.xlane.xlu2 %4089  ;;  %v4893_v41 = vadd.f32 %v12332_v31, %v4892_v4  ;;  %v4295_v21 = vmul.f32 1.442695, %v4218_v56  ;;  %v9187_v4 = vunpack.i.l.bf16 %v14999_v30 }
0x165b   : > { %v4710_v16 = vmul.f32 %v9670_v45, %v12336_v13  ;;  %v12364_v62 = vpop.xlane.xlu1 %4077  ;;  %v4662_v37 = vsel %vm4659_vm10, %v4661_v27, %v4657_v12  ;;  %v12378_v57 = vpop.f32.mrf.mxu2  ;;  %v4837_v12 = vsel %vm12372_vm13, %v12309_v29, %v4833_v24  ;;  %v4022_v27 = vsel %vm4012_vm11, %v12301_v55, -inf }
0x165c   : > { %v4663_v51 = vmul.f32 %v12068_v36, %v4662_v37  ;;  %v12380_v25 = vpop.f32.mrf.mxu3  ;;  %vm4715_vm14 = vweird.f32 %v9670_v45  ;;  %v15027_v37 = vld [vmem:[#allocation115_spill] sm:$0xff]  ;;  %v4841_v24 = vor.u32 1.1754944e-38, %v4840_v34  ;;  %v4070_v29 = vsel %vm4012_vm11, %v12378_v57, -inf  ;;  %v12401_v34 = vpop.eup %9671 }
0x165d   : > { %v4711_v33 = vsub.f32 1.0, %v4710_v16  ;;  %v4718_v16 = vand.u32 2147483647, %v12336_v13  ;;  %v9217_v19 = vunpack.i.l.bf16 %v15027_v37  ;;  %vm4716_vm3 = vmor %vm4714_vm1, %vm4715_vm14  ;;  %v4900_v13 = vand.u32 2147483648, %v12232_v47 }
0x165e   : > { %4023 = vmax.xlane.f32.xlu1 %v4022_v27  ;;  %8977 = vmatmul.msk.f32.vlgmr.msrb.gmra.mxu3 %vm4012_vm11, %v4663_v51  ;;  %v4842_v58 = vsel %vm4839_vm15, %v4841_v24, %v4837_v12  ;;  %v4721_v51 = vor.u32 1.1754944e-38, %v4720_v46  ;;  %v4898_v46 = vand.u32 2147483647, %v12232_v47  ;;  %v4151_v47 = vsel %vm4012_vm11, %v12293_v40, -inf }
0x165f   : > { %v4712_v36 = vmul.f32 %v9670_v45, %v4711_v33  ;;  %5775 = vmatpush.msrb.mxu3 %v9207_v20  ;;  %4425 = vadd.xlane.f32.xlu2 %v4424_v39  ;;  %vm4719_vm4 = vcmp.eq.f32.partialorder %v4718_v16, 8.507059e+37  ;;  %v4335_v33 = vmul.f32 1.442695, %v4238_v32  ;;  %v4448_v16 = vsel %vm4012_vm11, %v12401_v34, 0.0  ;;  %v15031_v32 = vld [vmem:[#allocation148_spill] sm:$0xff] }
0x1660   : > { %4071 = vmax.xlane.f32.xlu0 %v4070_v29  ;;  %v4901_v30 = vor.u32 1.1754944e-38, %v4900_v13  ;;  %v9237_v29 = vunpack.i.l.bf16 %v15031_v32  ;;  %vm4899_vm7 = vcmp.eq.f32.partialorder %v4898_v46, 8.507059e+37  ;;  %v15032_v13 = vld [vmem:[#allocation34_spill] sm:$0xff] }
0x1661   : > { %v4713_v18 = vadd.f32 %v9670_v45, %v4712_v36  ;;  %5776 = vmatpush.msrb.mxu3 %v9217_v19  ;;  %v15030_v19 = vld [vmem:[#allocation128_spill] sm:$0xff] }
0x1662   : > { %v12404_v39 = vpop.xlane.xlu2 %4101  ;;  %v9223_v24 = vunpack.i.h.bf16 %v15030_v19 }
0x1663   : > { %v4717_v20 = vsel %vm4716_vm3, %v9670_v45, %v4713_v18  ;;  %v12406_v8 = vpop.xlane.xlu1 %4434  ;;  %v4843_v45 = vmul.f32 %v11899_v63, %v4842_v58  ;;  %v9193_v63 = vunpack.i.h.bf16 %v15002_v54 }
0x1664   : > { %v4722_v12 = vsel %vm4719_vm4, %v4721_v51, %v4717_v20  ;;  %9673 = vrcp.f32 %v12406_v8  ;;  %v12421_v36 = vpop.f32.mrf.mxu3  ;;  %v4780_v56 = vand.u32 2147483648, %v12406_v8  ;;  %vm4774_vm10 = vweird.f32 %v12406_v8 }
0x1665   : > { %v4723_v27 = vmul.f32 %v12094_v17, %v4722_v12  ;;  %v4897_v17 = vsel %vm12417_vm6, %v12332_v31, %v4893_v41  ;;  %9675 = vpow2.f32 %v4295_v21  ;;  %v4154_v31 = vsel %vm4012_vm11, %v12421_v36, -inf  ;;  %v12440_v21 = vpop.f32.mrf.mxu0 }
0x1666   : > { %4449 = vadd.xlane.f32.xlu1 %v4448_v16  ;;  %9677 = vpow2.f32 %v4335_v33  ;;  %8980 = vmatmul.msk.f32.vlgmr.msra.gmra.mxu3 %vm4012_vm11, %v4843_v45  ;;  %v4902_v58 = vsel %vm4899_vm7, %v4901_v30, %v4897_v17  ;;  %v4226_v12 = vsub.f32 %v11963_v28, %v12364_v62  ;;  %v4187_v16 = vsel %vm4012_vm11, %v12315_v26, -inf  ;;  %v15034_v17 = vld [vmem:[#allocation113_spill] sm:$0xff] }
0x1667   : > { %8978 = vmatmul.msk.f32.vlgmr.msra.gmra.mxu0 %vm4012_vm11, %v4723_v27  ;;  %5891 = vmatpush.msra.mxu3 %v9223_v24  ;;  %v4903_v33 = vmul.f32 %v15032_v13, %v4902_v58  ;;  %v4778_v24 = vand.u32 2147483647, %v12406_v8  ;;  %v4781_v58 = vor.u32 1.1754944e-38, %v4780_v56 }
0x1668   : > { %5804 = vmatpush.msra.mxu0 %v9187_v4  ;;  %4152 = vmax.xlane.f32.xlu2 %v4151_v47  ;;  %v15033_v4 = vld [vmem:[#allocation119_spill] sm:$0xff]  ;;  %v4311_v30 = vmul.f32 1.442695, %v4226_v12 }
0x1669   : > { %4155 = vmax.xlane.f32.xlu0 %v4154_v31  ;;  %5892 = vmatpush.msra.mxu3 %v9237_v29  ;;  %v9203_v45 = vunpack.i.h.bf16 %v15033_v4  ;;  %vm4779_vm13 = vcmp.eq.f32.partialorder %v4778_v24, 8.507059e+37  ;;  %v9212_v4 = vunpack.i.l.bf16 %v15034_v17 }
0x166a   : > { %v9674_v18 = vpop.eup %9673  ;;  %5805 = vmatpush.msra.mxu0 %v9193_v63  ;;  %v12438_v51 = vpop.xlane.xlu2 %4470  ;;  %v9213_v63 = vunpack.i.h.bf16 %v15034_v17 }
0x166b   : > { %v4770_v54 = vmul.f32 %v9674_v18, %v12406_v8  ;;  %v4126_v41 = vpop.xlane.xlu1 %4125  ;;  %9679 = vrcp.f32 %v12438_v51  ;;  %v12443_v20 = vpop.eup %9675  ;;  %vm4775_vm8 = vweird.f32 %v9674_v18  ;;  %v4960_v56 = vand.u32 2147483648, %v12438_v51 }
0x166c   : > { %v12448_v27 = vpop.eup %9677  ;;  %v4242_v28 = vsub.f32 %v12162_v6, %v4126_v41  ;;  %v4436_v62 = vsel %vm4012_vm11, %v12443_v20, 0.0  ;;  %vm4776_vm12 = vmor %vm4774_vm10, %vm4775_vm8  ;;  %v4958_v24 = vand.u32 2147483647, %v12438_v51  ;;  %vm4954_vm15 = vweird.f32 %v12438_v51 }
0x166d   : > { %v4771_v46 = vsub.f32 1.0, %v4770_v54  ;;  %v4496_v29 = vsel %vm4012_vm11, %v12448_v27, 0.0 }
0x166e   : > { %4188 = vmax.xlane.f32.xlu1 %v4187_v16  ;;  %v4343_v12 = vmul.f32 1.442695, %v4242_v28  ;;  %v4046_v16 = vsel %vm4012_vm11, %v12318_v50, -inf  ;;  %vm4959_vm2 = vcmp.eq.f32.partialorder %v4958_v24, 8.507059e+37 }
0x166f   : > { %v4772_v19 = vmul.f32 %v9674_v18, %v4771_v46  ;;  %8981 = vmatmul.msk.f32.vlgmr.msrb.gmra.mxu0 %vm4012_vm11, %v4903_v33 }
0x1670   : > { %5920 = vmatpush.msrb.mxu0 %v9203_v45  ;;  %4437 = vadd.xlane.f32.xlu2 %v4436_v62  ;;  %v12473_v45 = vpop.f32.mrf.mxu0  ;;  %v4961_v62 = vor.u32 1.1754944e-38, %v4960_v56 }
0x1671   : > { %v4773_v47 = vadd.f32 %v9674_v18, %v4772_v19  ;;  %v9680_v31 = vpop.eup %9679  ;;  %4497 = vadd.xlane.f32.xlu0 %v4496_v29  ;;  %v4166_v17 = vsel %vm4012_vm11, %v12473_v45, -inf }
0x1672   : > { %5921 = vmatpush.msrb.mxu0 %v9213_v63  ;;  %v4950_v6 = vmul.f32 %v9680_v31, %v12438_v51  ;;  %v12464_v41 = vpop.xlane.xlu2 %4482  ;;  %vm4955_vm14 = vweird.f32 %v9680_v31 }
0x1673   : > { %v4777_v54 = vsel %vm4776_vm12, %v9674_v18, %v4773_v47  ;;  %v12466_v13 = vpop.xlane.xlu1 %4137  ;;  %9681 = vrcp.f32 %v12464_v41  ;;  %v4230_v18 = vsub.f32 %v12120_v3, %v12362_v9  ;;  %v4199_v3 = vsel %vm4012_vm11, %v12296_v44, -inf  ;;  %vm4956_vm1 = vmor %vm4954_vm15, %vm4955_vm14 }
0x1674   : > { %v4782_v33 = vsel %vm4779_vm13, %v4781_v58, %v4777_v54  ;;  %9683 = vpow2.f32 %v4311_v30  ;;  %v4951_v46 = vsub.f32 1.0, %v4950_v6  ;;  %v15035_v6 = vld [vmem:[#allocation132_spill] sm:$0xff]  ;;  %v5018_v56 = vand.u32 2147483647, %v12464_v41 }
0x1675   : > { %v4783_v8 = vmul.f32 %v12143_v10, %v4782_v33  ;;  %v9218_v10 = vunpack.i.h.bf16 %v15027_v37  ;;  %9685 = vpow2.f32 %v4343_v12  ;;  %v4319_v28 = vmul.f32 1.442695, %v4230_v18 }
0x1676   : > { %v4952_v19 = vmul.f32 %v9680_v31, %v4951_v46  ;;  %4047 = vmax.xlane.f32.xlu1 %v4046_v16  ;;  %v4234_v37 = vsub.f32 %v12145_v43, %v12404_v39  ;;  %v9233_v33 = vunpack.i.h.bf16 %v15035_v6  ;;  %v5020_v43 = vand.u32 2147483648, %v12464_v41 }
0x1677   : > { %8979 = vmatmul.msk.f32.vlgmr.msrb.gmra.mxu2 %vm4012_vm11, %v4783_v8  ;;  %vm5014_vm4 = vweird.f32 %v12464_v41  ;;  %vm5019_vm6 = vcmp.eq.f32.partialorder %v5018_v56, 8.507059e+37  ;;  %v4082_v6 = vsel %vm4012_vm11, %v12343_v48, -inf }
0x1678   : > { %5862 = vmatpush.msrb.mxu2 %v9212_v4  ;;  %v4953_v9 = vadd.f32 %v9680_v31, %v4952_v19  ;;  %4200 = vmax.xlane.f32.xlu2 %v4199_v3  ;;  %v4327_v4 = vmul.f32 1.442695, %v4234_v37  ;;  %v4034_v19 = vsel %vm4012_vm11, %v12339_v38, -inf  ;;  %v5021_v3 = vor.u32 1.1754944e-38, %v5020_v43 }
0x1679   : > { %v9682_v63 = vpop.eup %9681  ;;  %4167 = vmax.xlane.f32.xlu0 %v4166_v17 }
0x167a   : > { %5863 = vmatpush.msrb.mxu2 %v9218_v10  ;;  %v12486_v30 = vpop.eup %9683  ;;  %v4957_v47 = vsel %vm4956_vm1, %v9680_v31, %v4953_v9  ;;  %v5010_v29 = vmul.f32 %v9682_v63, %v12464_v41  ;;  %v12491_v51 = vpop.xlane.xlu2 %4494  ;;  %vm5015_vm3 = vweird.f32 %v9682_v63 }
0x167b   : > { %v4150_v58 = vpop.xlane.xlu1 %4149  ;;  %v4962_v54 = vsel %vm4959_vm2, %v4961_v62, %v4957_v47  ;;  %9687 = vrcp.f32 %v12491_v51  ;;  %v12496_v46 = vpop.eup %9685  ;;  %v4460_v31 = vsel %vm4012_vm11, %v12486_v30, 0.0  ;;  %vm5016_vm5 = vmor %vm5014_vm4, %vm5015_vm3  ;;  %vm5074_vm8 = vweird.f32 %v12491_v51 }
0x167c   : > { %v4963_v12 = vmul.f32 %v12160_v59, %v4962_v54  ;;  %v5011_v8 = vsub.f32 1.0, %v5010_v29  ;;  %9689 = vpow2.f32 %v4319_v28  ;;  %v4250_v39 = vsub.f32 %v12186_v15, %v4150_v58  ;;  %v12510_v9 = vpop.xlane.xlu0 %4161  ;;  %v15036_v58 = vld [vmem:[#allocation150_spill] sm:$0xff] }
0x167d   : > { %v9238_v59 = vunpack.i.h.bf16 %v15031_v32  ;;  %v4508_v15 = vsel %vm4012_vm11, %v12496_v46, 0.0  ;;  %v9247_v54 = vunpack.i.l.bf16 %v15036_v58 }
0x167e   : > { %v5012_v18 = vmul.f32 %v9682_v63, %v5011_v8  ;;  %4461 = vadd.xlane.f32.xlu1 %v4460_v31  ;;  %v4359_v16 = vmul.f32 1.442695, %v4250_v39 }
0x167f   : > { %8982 = vmatmul.msk.f32.vlgmr.msra.gmra.mxu2 %vm4012_vm11, %v4963_v12  ;;  %v5078_v12 = vand.u32 2147483647, %v12491_v51 }
0x1680   : > { %5978 = vmatpush.msra.mxu2 %v9233_v33  ;;  %v5013_v24 = vadd.f32 %v9682_v63, %v5012_v18  ;;  %4035 = vmax.xlane.f32.xlu2 %v4034_v19  ;;  %9691 = vpow2.f32 %v4359_v16 }
0x1681   : > { %v9688_v10 = vpop.eup %9687  ;;  %4509 = vadd.xlane.f32.xlu0 %v4508_v15  ;;  %9693 = vpow2.f32 %v4327_v4  ;;  %vm5079_vm12 = vcmp.eq.f32.partialorder %v5078_v12, 8.507059e+37 }
0x1682   : > { %5979 = vmatpush.msra.mxu2 %v9238_v59  ;;  %v5017_v32 = vsel %vm5016_vm5, %v9682_v63, %v5013_v24  ;;  %v5070_v17 = vmul.f32 %v9688_v10, %v12491_v51  ;;  %v12513_v28 = vpop.xlane.xlu2 %4530  ;;  %v12517_v62 = vpop.eup %9689  ;;  %v5080_v63 = vand.u32 2147483648, %v12491_v51  ;;  %vm5075_vm7 = vweird.f32 %v9688_v10 }
0x1683   : > { %v12515_v41 = vpop.xlane.xlu1 %4518  ;;  %v5022_v37 = vsel %vm5019_vm6, %v5021_v3, %v5017_v32  ;;  %9695 = vrcp.f32 %v12513_v28  ;;  %v4472_v43 = vsel %vm4012_vm11, %v12517_v62, 0.0  ;;  %vm5076_vm10 = vmor %vm5074_vm8, %vm5075_vm7  ;;  %v15037_v32 = vld [vmem:[#allocation146_spill] sm:$0xff]  ;;  %vm5254_vm15 = vweird.f32 %v12513_v28 }
0x1684   : > { %v5023_v47 = vmul.f32 %v12173_v42, %v5022_v37  ;;  %v5071_v29 = vsub.f32 1.0, %v5070_v17  ;;  %9697 = vrcp.f32 %v12515_v41  ;;  %v9248_v42 = vunpack.i.h.bf16 %v15036_v58 }
0x1685   : > { %v5081_v56 = vor.u32 1.1754944e-38, %v5080_v63  ;;  %v9228_v17 = vunpack.i.h.bf16 %v15037_v32  ;;  %vm5194_vm2 = vweird.f32 %v12515_v41 }
0x1686   : > { %v5072_v33 = vmul.f32 %v9688_v10, %v5071_v29  ;;  %4083 = vmax.xlane.f32.xlu1 %v4082_v6  ;;  %8983 = vmatmul.msk.f32.vlgmr.msrb.gmra.mxu3 %vm4012_vm11, %v5023_v47  ;;  %v12528_v8 = vpop.eup %9691  ;;  %v9227_v29 = vunpack.i.l.bf16 %v15037_v32  ;;  %v5258_v6 = vand.u32 2147483647, %v12513_v28 }
0x1687   : > { %6007 = vmatpush.msrb.mxu3 %v9247_v54  ;;  %v12533_v39 = vpop.eup %9693  ;;  %v4532_v4 = vsel %vm4012_vm11, %v12528_v8, 0.0 }
0x1688   : > { %v5073_v31 = vadd.f32 %v9688_v10, %v5072_v33  ;;  %4473 = vadd.xlane.f32.xlu2 %v4472_v43  ;;  %v4484_v54 = vsel %vm4012_vm11, %v12533_v39, 0.0  ;;  %v5200_v33 = vand.u32 2147483648, %v12515_v41  ;;  %vm5259_vm3 = vcmp.eq.f32.partialorder %v5258_v6, 8.507059e+37 }
0x1689   : > { %v9696_v18 = vpop.eup %9695  ;;  %4533 = vadd.xlane.f32.xlu0 %v4532_v4  ;;  %6008 = vmatpush.msrb.mxu3 %v9248_v42  ;;  %v4118_v42 = vsel %vm4012_vm11, %v12380_v25, -inf  ;;  %v9253_v6 = vunpack.i.h.bf16 %v15018_v2 }
0x168a   : > { %v9698_v59 = vpop.eup %9697  ;;  %v5077_v16 = vsel %vm5076_vm10, %v9688_v10, %v5073_v31  ;;  %v5250_v19 = vmul.f32 %v9696_v18, %v12513_v28  ;;  %v12539_v24 = vpop.xlane.xlu2 %4542  ;;  %v5260_v10 = vand.u32 2147483648, %v12513_v28  ;;  %vm5255_vm13 = vweird.f32 %v9696_v18 }
0x168b   : > { %v12541_v15 = vpop.xlane.xlu0 %4185  ;;  %v5082_v3 = vsel %vm5079_vm12, %v5081_v56, %v5077_v16  ;;  %v5190_v51 = vmul.f32 %v9698_v59, %v12515_v41  ;;  %9699 = vrcp.f32 %v12539_v24  ;;  %vm5195_vm14 = vweird.f32 %v9698_v59  ;;  %vm5256_vm1 = vmor %vm5254_vm15, %vm5255_vm13 }
0x168c   : > { %v5083_v37 = vmul.f32 %v12184_v53, %v5082_v3  ;;  %v5251_v47 = vsub.f32 1.0, %v5250_v19  ;;  %v5198_v53 = vand.u32 2147483647, %v12515_v41  ;;  %v5261_v4 = vor.u32 1.1754944e-38, %v5260_v10  ;;  %vm5196_vm4 = vmor %vm5194_vm2, %vm5195_vm14 }
0x168d   : > { %v5191_v58 = vsub.f32 1.0, %v5190_v51  ;;  %v5201_v19 = vor.u32 1.1754944e-38, %v5200_v33  ;;  %vm5314_vm7 = vweird.f32 %v12539_v24 }
0x168e   : > { %v5252_v63 = vmul.f32 %v9696_v18, %v5251_v47  ;;  %4485 = vadd.xlane.f32.xlu1 %v4484_v54  ;;  %8984 = vmatmul.msk.f32.vlgmr.msra.gmra.mxu0 %vm4012_vm11, %v5083_v37  ;;  %vm5199_vm5 = vcmp.eq.f32.partialorder %v5198_v53, 8.507059e+37  ;;  %v5320_v54 = vand.u32 2147483648, %v12539_v24 }
0x168f   : > { %v5192_v12 = vmul.f32 %v9698_v59, %v5191_v58  ;;  %6036 = vmatpush.msra.mxu0 %v9227_v29 }
0x1690   : > { %v5253_v43 = vadd.f32 %v9696_v18, %v5252_v63  ;;  %4119 = vmax.xlane.f32.xlu2 %v4118_v42  ;;  %v5321_v2 = vor.u32 1.1754944e-38, %v5320_v54 }
0x1691   : > { %v9700_v31 = vpop.eup %9699  ;;  %v5193_v56 = vadd.f32 %v9698_v59, %v5192_v12  ;;  %6037 = vmatpush.msra.mxu0 %v9228_v17  ;;  %v15038_v17 = vld [vmem:[#allocation149_spill] sm:$0xff] }
0x1692   : > { %v5257_v16 = vsel %vm5256_vm1, %v9696_v18, %v5253_v43  ;;  %v5310_v3 = vmul.f32 %v9700_v31, %v12539_v24  ;;  %v12561_v51 = vpop.xlane.xlu2 %4173  ;;  %v9267_v18 = vunpack.i.l.bf16 %v15038_v17  ;;  %vm5315_vm6 = vweird.f32 %v9700_v31 }
0x1693   : > { %v4021_v32 = vpop.xlane.xlu0 %4020  ;;  %v5262_v37 = vsel %vm5259_vm3, %v5261_v4, %v5257_v16  ;;  %v5197_v28 = vsel %vm5196_vm4, %v9698_v59, %v5193_v56  ;;  %v5318_v59 = vand.u32 2147483647, %v12539_v24  ;;  %vm5316_vm8 = vmor %vm5314_vm7, %vm5315_vm6  ;;  %v12579_v4 = vpop.f32.mrf.mxu2  ;;  %v9243_v24 = vunpack.i.h.bf16 %v15017_v5 }
0x1694   : > { %v4207_v47 = vsub.f32 %v12221_v60, %v4021_v32  ;;  %v5263_v29 = vmul.f32 %v12201_v23, %v5262_v37  ;;  %v5202_v10 = vsel %vm5199_vm5, %v5201_v19, %v5197_v28  ;;  %v5311_v41 = vsub.f32 1.0, %v5310_v3  ;;  %v15039_v60 = vld [vmem:[#allocation151_spill] sm:$0xff] }
0x1695   : > { %v5203_v58 = vmul.f32 %v12199_v14, %v5202_v10  ;;  %v9277_v12 = vunpack.i.l.bf16 %v15039_v60  ;;  %v4130_v23 = vsel %vm4012_vm11, %v12440_v21, -inf  ;;  %v15040_v14 = vld [vmem:[#allocation152_spill] sm:$0xff]  ;;  %vm5319_vm10 = vcmp.eq.f32.partialorder %v5318_v59, 8.507059e+37 }
0x1696   : > { %v4273_v63 = vmul.f32 1.442695, %v4207_v47  ;;  %v5312_v33 = vmul.f32 %v9700_v31, %v5311_v41  ;;  %8987 = vmatmul.msk.f32.vlgmr.msra.gmra.mxu3 %vm4012_vm11, %v5263_v29  ;;  %v9258_v53 = vunpack.i.h.bf16 %v15040_v14  ;;  %v9257_v47 = vunpack.i.l.bf16 %v15040_v14 }
0x1697   : > { %8986 = vmatmul.msk.f32.vlgmr.msrb.gmra.mxu2 %vm4012_vm11, %v5203_v58  ;;  %6123 = vmatpush.msra.mxu3 %v9267_v18  ;;  %v4106_v29 = vsel %vm4012_vm11, %v12579_v4, -inf }
0x1698   : > { %v5313_v42 = vadd.f32 %v9700_v31, %v5312_v33  ;;  %9701 = vpow2.f32 %v4273_v63  ;;  %6094 = vmatpush.msrb.mxu2 %v9253_v6  ;;  %4131 = vmax.xlane.f32.xlu2 %v4130_v23 }
0x1699   : > { %6124 = vmatpush.msra.mxu3 %v9277_v12  ;;  %v12577_v43 = vpop.xlane.xlu1 %4056 }
0x169a   : > { %v5317_v56 = vsel %vm5316_vm8, %v9700_v31, %v5313_v42  ;;  %6095 = vmatpush.msrb.mxu2 %v9258_v53  ;;  %v4033_v16 = vpop.xlane.xlu2 %4032  ;;  %v12609_v53 = vpop.f32.mrf.mxu3 }
0x169b   : > { %v5322_v19 = vsel %vm5319_vm10, %v5321_v2, %v5317_v56  ;;  %v4211_v3 = vsub.f32 %v12226_v49, %v4033_v16  ;;  %v12594_v10 = vpop.f32.mrf.mxu2 }
0x169c   : > { %v5323_v32 = vmul.f32 %v12209_v61, %v5322_v19  ;;  %v4142_v58 = vsel %vm4012_vm11, %v12594_v10, -inf }
0x169d   : > { %v4281_v37 = vmul.f32 1.442695, %v4211_v3 }
0x169e   : > { %v12584_v28 = vpop.eup %9701  ;;  %8988 = vmatmul.msk.f32.vlgmr.msrb.gmra.mxu0 %vm4012_vm11, %v5323_v32 }
0x169f   : > { %9703 = vpow2.f32 %v4281_v37  ;;  %6152 = vmatpush.msrb.mxu0 %v9243_v24  ;;  %v4403_v31 = vsel %vm4012_vm11, %v12584_v28, 0.0  ;;  %v4190_v37 = vsel %vm4012_vm11, %v12609_v53, -inf }
0x16a0   : > { %4404 = vadd.xlane.f32.xlu1 %v4403_v31  ;;  %4107 = vmax.xlane.f32.xlu2 %v4106_v29 }
0x16a1   : > { %6153 = vmatpush.msrb.mxu0 %v9257_v47  ;;  %v4402_v61 = vpop.xlane.xlu1 %4401  ;;  %v12592_v49 = vpop.xlane.xlu0 %4092 }
0x16a2   : > { %9705 = vrcp.f32 %v4402_v61  ;;  %v4555_v5 = vpop.xlane.xlu2 %4554  ;;  %v4615_v42 = vand.u32 2147483648, %v4402_v61  ;;  %v4613_v16 = vand.u32 2147483647, %v4402_v61  ;;  %vm4609_vm14 = vweird.f32 %v4402_v61 }
0x16a3   : > { %9707 = vrcp.f32 %v4555_v5  ;;  %v5380_v19 = vand.u32 2147483648, %v4555_v5  ;;  %v5378_v32 = vand.u32 2147483647, %v4555_v5  ;;  %vm5374_vm1 = vweird.f32 %v4555_v5 }
0x16a4   : > { %v4616_v47 = vor.u32 1.1754944e-38, %v4615_v42  ;;  %vm4614_vm2 = vcmp.eq.f32.partialorder %v4613_v16, 8.507059e+37 }
0x16a5   : > { %v12596_v41 = vpop.eup %9703  ;;  %vm5379_vm4 = vcmp.eq.f32.partialorder %v5378_v32, 8.507059e+37  ;;  %v15042_v32 = vld [vmem:[#allocation154_spill] sm:$0xff] }
0x16a6   : > { %v4415_v18 = vsel %vm4012_vm11, %v12596_v41, 0.0 }
0x16a7   : > { %4416 = vadd.xlane.f32.xlu0 %v4415_v18 }
0x16a8   : > { %v9706_v54 = vpop.eup %9705  ;;  %4143 = vmax.xlane.f32.xlu2 %v4142_v58  ;;  %v5381_v58 = vor.u32 1.1754944e-38, %v5380_v19  ;;  %v12622_v19 = vpop.f32.mrf.mxu0 }
0x16a9   : > { %v9708_v63 = vpop.eup %9707  ;;  %v4605_v6 = vmul.f32 %v9706_v54, %v4402_v61  ;;  %v12602_v33 = vpop.xlane.xlu1 %4044  ;;  %vm4610_vm12 = vweird.f32 %v9706_v54 }
0x16aa   : > { %v5370_v59 = vmul.f32 %v9708_v63, %v4555_v5  ;;  %v12604_v12 = vpop.xlane.xlu2 %4566  ;;  %v12606_v23 = vpop.xlane.xlu0 %4140  ;;  %vm5375_vm13 = vweird.f32 %v9708_v63  ;;  %vm4611_vm15 = vmor %vm4609_vm14, %vm4610_vm12 }
0x16ab   : > { %v4606_v14 = vsub.f32 1.0, %v4605_v6  ;;  %9709 = vrcp.f32 %v12604_v12  ;;  %vm5376_vm3 = vmor %vm5374_vm1, %vm5375_vm13  ;;  %vm5434_vm6 = vweird.f32 %v12604_v12 }
0x16ac   : > { %v5371_v2 = vsub.f32 1.0, %v5370_v59 }
0x16ad   : > { %v4607_v56 = vmul.f32 %v9706_v54, %v4606_v14 }
0x16ae   : > { %v5372_v3 = vmul.f32 %v9708_v63, %v5371_v2 }
0x16af   : > { %v4608_v24 = vadd.f32 %v9706_v54, %v4607_v56 }
0x16b0   : > { %v5373_v31 = vadd.f32 %v9708_v63, %v5372_v3  ;;  %4191 = vmax.xlane.f32.xlu2 %v4190_v37  ;;  %v15041_v37 = vld [vmem:[#allocation121_spill] sm:$0xff] }
0x16b1   : > { %v9710_v29 = vpop.eup %9709  ;;  %v4612_v18 = vsel %vm4611_vm15, %v9706_v54, %v4608_v24  ;;  %v12613_v6 = vpop.xlane.xlu1 %4080  ;;  %v9263_v54 = vunpack.i.h.bf16 %v15041_v37  ;;  %v9262_v16 = vunpack.i.l.bf16 %v15041_v37 }
0x16b2   : > { %v4617_v59 = vsel %vm4614_vm2, %v4616_v47, %v4612_v18  ;;  %v5377_v14 = vsel %vm5376_vm3, %v9708_v63, %v5373_v31  ;;  %v5430_v61 = vmul.f32 %v9710_v29, %v12604_v12  ;;  %v4198_v2 = vpop.xlane.xlu2 %4197  ;;  %v12616_v56 = vpop.xlane.xlu0 %4164  ;;  %v9273_v47 = vunpack.i.h.bf16 %v15042_v32 }
0x16b3   : > { %v4618_v42 = vmul.f32 %v12245_v11, %v4617_v59  ;;  %v5382_v3 = vsel %vm5379_vm4, %v5381_v58, %v5377_v14  ;;  %v4266_v5 = vsub.f32 %v12234_v35, %v4198_v2  ;;  %v4246_v31 = vsub.f32 %v12175_v1, %v12466_v13  ;;  %v12641_v37 = vpop.f32.mrf.mxu2 }
0x16b4   : > { %v5383_v24 = vmul.f32 %v12249_v22, %v5382_v3  ;;  %v5431_v63 = vsub.f32 1.0, %v5430_v61  ;;  %v5440_v18 = vand.u32 2147483648, %v12604_v12  ;;  %v4219_v35 = vsub.f32 %v12236_v7, %v12577_v43 }
0x16b5   : > { %v4391_v11 = vmul.f32 1.442695, %v4266_v5  ;;  %8992 = vmatmul.msk.f32.vlgmr.msra.gmra.mxu0 %vm4012_vm11, %v4618_v42  ;;  %vm5435_vm5 = vweird.f32 %v9710_v29  ;;  %v5438_v59 = vand.u32 2147483647, %v12604_v12  ;;  %v9268_v22 = vunpack.i.h.bf16 %v15038_v17  ;;  %v15043_v12 = vld [vmem:[#allocation52_spill] sm:$0xff] }
0x16b6   : > { %v5432_v58 = vmul.f32 %v9710_v29, %v5431_v63  ;;  %6268 = vmatpush.msra.mxu0 %v9263_v54  ;;  %8989 = vmatmul.msk.f32.vlgmr.msra.gmra.mxu1 %vm4012_vm11, %v5383_v24  ;;  %v4202_v1 = vsel %vm4012_vm11, %v12622_v19, -inf  ;;  %v4351_v7 = vmul.f32 1.442695, %v4246_v31  ;;  %vm5436_vm7 = vmor %vm5434_vm6, %vm5435_vm5  ;;  %v5441_v43 = vor.u32 1.1754944e-38, %v5440_v18 }
0x16b7   : > { %6181 = vmatpush.msra.mxu1 %v9262_v16  ;;  %9711 = vpow2.f32 %v4391_v11  ;;  %v4297_v61 = vmul.f32 1.442695, %v4219_v35  ;;  %vm5439_vm8 = vcmp.eq.f32.partialorder %v5438_v59, 8.507059e+37  ;;  %v4254_v54 = vsub.f32 %v15043_v12, %v12510_v9  ;;  %v15044_v16 = vld [vmem:[#allocation57_spill] sm:$0xff] }
0x16b8   : > { %v5433_v13 = vadd.f32 %v9710_v29, %v5432_v58  ;;  %6269 = vmatpush.msra.mxu0 %v9273_v47  ;;  %4203 = vmax.xlane.f32.xlu2 %v4202_v1  ;;  %v9272_v63 = vunpack.i.l.bf16 %v15042_v32  ;;  %9713 = vpow2.f32 %v4351_v7  ;;  %v15045_v47 = vld [vmem:[#allocation59_spill] sm:$0xff]  ;;  %v4178_v11 = vsel %vm4012_vm11, %v12641_v37, -inf  ;;  %v15046_v1 = vld [vmem:[#allocation37_spill] sm:$0xff] }
0x16b9   : > { %v4129_v14 = vpop.xlane.xlu1 %4128  ;;  %6182 = vmatpush.msra.mxu1 %v9268_v22  ;;  %9715 = vpow2.f32 %v4297_v61  ;;  %v4367_v32 = vmul.f32 1.442695, %v4254_v54 }
0x16ba   : > { %v5437_v2 = vsel %vm5436_vm7, %v9710_v29, %v5433_v13  ;;  %v4069_v42 = vpop.xlane.xlu2 %4068  ;;  %v4243_v31 = vsub.f32 %v15045_v47, %v4129_v14  ;;  %v15048_v14 = vld [vmem:[#allocation39_spill] sm:$0xff] }
0x16bb   : > { %v5442_v17 = vsel %vm5439_vm8, %v5441_v43, %v5437_v2  ;;  %v4223_v3 = vsub.f32 %v12241_v0, %v4069_v42  ;;  %v12639_v5 = vpop.xlane.xlu0 %4176  ;;  %v9278_v0 = vunpack.i.h.bf16 %v15039_v60  ;;  %v4247_v61 = vsub.f32 %v15048_v14, %v12606_v23 }
0x16bc   : > { %v5443_v24 = vmul.f32 %v15044_v16, %v5442_v17  ;;  %v4345_v35 = vmul.f32 1.442695, %v4243_v31  ;;  %v15049_v17 = vld [vmem:[#allocation35_spill] sm:$0xff]  ;;  %v15050_v31 = vld [vmem:[#allocation61_spill] sm:$0xff] }
0x16bd   : > { %v4305_v29 = vmul.f32 1.442695, %v4223_v3  ;;  %v12648_v18 = vpop.eup %9711  ;;  %v4258_v3 = vsub.f32 %v15049_v17, %v12561_v51  ;;  %v4353_v23 = vmul.f32 1.442695, %v4247_v61 }
0x16be   : > { %8990 = vmatmul.msk.f32.vlgmr.msra.gmra.mxu2 %vm4012_vm11, %v5443_v24  ;;  %v4580_v9 = vsel %vm4012_vm11, %v12648_v18, 0.0  ;;  %v12656_v22 = vpop.eup %9713 }
0x16bf   : > { %9717 = vpow2.f32 %v4305_v29  ;;  %6210 = vmatpush.msra.mxu2 %v9272_v63  ;;  %4581 = vadd.xlane.f32.xlu0 %v4580_v9  ;;  %v12661_v7 = vpop.eup %9715  ;;  %v4520_v54 = vsel %vm4012_vm11, %v12656_v22, 0.0  ;;  %v4375_v9 = vmul.f32 1.442695, %v4258_v3 }
0x16c0   : > { %4179 = vmax.xlane.f32.xlu2 %v4178_v11  ;;  %v4439_v12 = vsel %vm4012_vm11, %v12661_v7, 0.0 }
0x16c1   : > { %v4414_v58 = vpop.xlane.xlu1 %4413  ;;  %6211 = vmatpush.msra.mxu2 %v9278_v0 }
0x16c2   : > { %9719 = vrcp.f32 %v4414_v58  ;;  %v4105_v59 = vpop.xlane.xlu2 %4104  ;;  %vm4669_vm12 = vweird.f32 %v4414_v58 }
0x16c3   : > { %v4235_v60 = vsub.f32 %v15046_v1, %v4105_v59  ;;  %v12659_v13 = vpop.xlane.xlu0 %4059  ;;  %9721 = vpow2.f32 %v4367_v32  ;;  %v4675_v1 = vand.u32 2147483648, %v4414_v58 }
0x16c4   : > { %9723 = vpow2.f32 %v4345_v35  ;;  %v15052_v35 = vld [vmem:[#allocation63_spill] sm:$0xff] }
0x16c5   : > { %v12663_v43 = vpop.eup %9717  ;;  %v4329_v2 = vmul.f32 1.442695, %v4235_v60  ;;  %v4259_v59 = vsub.f32 %v15052_v35, %v12639_v5  ;;  %v15053_v5 = vld [vmem:[#allocation54_spill] sm:$0xff] }
0x16c6   : > { %15047 = vst [vmem:[#allocation45_spill] sm:$0xff] %v12663_v43  ;;  %v4451_v42 = vsel %vm4012_vm11, %v12663_v43, 0.0 }
0x16c7   : > { %9725 = vpow2.f32 %v4329_v2  ;;  %4452 = vadd.xlane.f32.xlu1 %v4451_v42  ;;  %4440 = vadd.xlane.f32.xlu0 %v4439_v12  ;;  %v4673_v2 = vand.u32 2147483647, %v4414_v58  ;;  %v4262_v12 = vsub.f32 %v15053_v5, %v12541_v15 }
0x16c8   : > { %v9720_v16 = vpop.eup %9719  ;;  %4521 = vadd.xlane.f32.xlu2 %v4520_v54 }
0x16c9   : > { %v4665_v24 = vmul.f32 %v9720_v16, %v4414_v58  ;;  %v4117_v63 = vpop.xlane.xlu1 %4116  ;;  %v12675_v47 = vpop.eup %9721  ;;  %vm4670_vm10 = vweird.f32 %v9720_v16  ;;  %vm4674_vm14 = vcmp.eq.f32.partialorder %v4673_v2, 8.507059e+37  ;;  %v15055_v58 = vld [vmem:[#allocation42_spill] sm:$0xff] }
0x16ca   : > { %v4239_v29 = vsub.f32 %v15050_v31, %v4117_v63  ;;  %v12678_v0 = vpop.xlane.xlu2 %4578  ;;  %v12680_v51 = vpop.eup %9723  ;;  %v4544_v3 = vsel %vm4012_vm11, %v12675_v47, 0.0  ;;  %vm4671_vm13 = vmor %vm4669_vm12, %vm4670_vm10 }
0x16cb   : > { %15051 = vst [vmem:[#allocation69_spill] sm:$0xff] %v12680_v51  ;;  %v4666_v11 = vsub.f32 1.0, %v4665_v24  ;;  %9727 = vrcp.f32 %v12678_v0  ;;  %v12683_v32 = vpop.xlane.xlu0 %4095  ;;  %v4511_v42 = vsel %vm4012_vm11, %v12680_v51, 0.0  ;;  %v4676_v24 = vor.u32 1.1754944e-38, %v4675_v1 }
0x16cc   : > { %v4337_v60 = vmul.f32 1.442695, %v4239_v29  ;;  %9729 = vpow2.f32 %v4353_v23  ;;  %v4377_v23 = vmul.f32 1.442695, %v4259_v59  ;;  %vm5494_vm1 = vweird.f32 %v12678_v0 }
0x16cd   : > { %v12687_v14 = vpop.eup %9725  ;;  %v4667_v61 = vmul.f32 %v9720_v16, %v4666_v11 }
0x16ce   : > { %9731 = vpow2.f32 %v4337_v60  ;;  %v4487_v17 = vsel %vm4012_vm11, %v12687_v14, 0.0 }
0x16cf   : > { %9733 = vpow2.f32 %v4375_v9  ;;  %v4668_v54 = vadd.f32 %v9720_v16, %v4667_v61  ;;  %4512 = vadd.xlane.f32.xlu1 %v4511_v42  ;;  %4488 = vadd.xlane.f32.xlu0 %v4487_v17  ;;  %v4383_v9 = vmul.f32 1.442695, %v4262_v12  ;;  %v5500_v12 = vand.u32 2147483648, %v12678_v0 }
0x16d0   : > { %4545 = vadd.xlane.f32.xlu2 %v4544_v3  ;;  %v15058_v3 = vld [vmem:[#allocation153_spill] sm:$0xff] }
0x16d1   : > { %v9728_v63 = vpop.eup %9727  ;;  %v4672_v31 = vsel %vm4671_vm13, %v9720_v16, %v4668_v54  ;;  %v12697_v29 = vpop.xlane.xlu1 %4023  ;;  %v15057_v16 = vld [vmem:[#allocation123_spill] sm:$0xff]  ;;  %v9288_v5 = vunpack.i.h.bf16 %v15058_v3  ;;  %v15059_v54 = vld [vmem:[#allocation65_spill] sm:$0xff] }
0x16d2   : > { %v4677_v11 = vsel %vm4674_vm14, %v4676_v24, %v4672_v31  ;;  %v5490_v35 = vmul.f32 %v9728_v63, %v12678_v0  ;;  %v12700_v60 = vpop.xlane.xlu2 %4425  ;;  %v12702_v15 = vpop.eup %9729  ;;  %v9282_v2 = vunpack.i.l.bf16 %v15057_v16  ;;  %v4220_v24 = vsub.f32 %v15059_v54, %v12659_v13 }
0x16d3   : > { %15054 = vst [vmem:[#allocation47_spill] sm:$0xff] %v12702_v15  ;;  %v4678_v61 = vmul.f32 %v15055_v58, %v4677_v11  ;;  %9735 = vrcp.f32 %v12700_v60  ;;  %v12706_v59 = vpop.xlane.xlu0 %4071  ;;  %vm5495_vm15 = vweird.f32 %v9728_v63  ;;  %v5498_v11 = vand.u32 2147483647, %v12678_v0 }
0x16d4   : > { %v12708_v1 = vpop.eup %9731  ;;  %9737 = vpow2.f32 %v4377_v23  ;;  %v5491_v42 = vsub.f32 1.0, %v5490_v35  ;;  %v15060_v35 = vld [vmem:[#allocation36_spill] sm:$0xff]  ;;  %v4523_v13 = vsel %vm4012_vm11, %v12702_v15, 0.0  ;;  %vm5496_vm2 = vmor %vm5494_vm1, %vm5495_vm15  ;;  %vm4729_vm5 = vweird.f32 %v12700_v60 }
0x16d5   : > { %15056 = vst [vmem:[#allocation71_spill] sm:$0xff] %v12708_v1  ;;  %v12711_v17 = vpop.eup %9733  ;;  %8993 = vmatmul.msk.f32.vlgmr.msrb.gmra.mxu1 %vm4012_vm11, %v4678_v61  ;;  %v4499_v23 = vsel %vm4012_vm11, %v12708_v1, 0.0  ;;  %9739 = vpow2.f32 %v4383_v9  ;;  %v4215_v58 = vsub.f32 %v15060_v35, %v12602_v33  ;;  %v4299_v9 = vmul.f32 1.442695, %v4220_v24 }
0x16d6   : > { %v5492_v31 = vmul.f32 %v9728_v63, %v5491_v42  ;;  %6297 = vmatpush.msrb.mxu1 %v9282_v2  ;;  %v4556_v61 = vsel %vm4012_vm11, %v12711_v17, 0.0  ;;  %v15061_v42 = vld [vmem:[#allocation55_spill] sm:$0xff]  ;;  %v5501_v33 = vor.u32 1.1754944e-38, %v5500_v12  ;;  %vm5499_vm3 = vcmp.eq.f32.partialorder %v5498_v11, 8.507059e+37 }
0x16d7   : > { %4500 = vadd.xlane.f32.xlu1 %v4499_v23  ;;  %4524 = vadd.xlane.f32.xlu0 %v4523_v13  ;;  %v4231_v1 = vsub.f32 %v15061_v42, %v12592_v49  ;;  %v4208_v49 = vsub.f32 %v12301_v55, %v12697_v29  ;;  %v9287_v42 = vunpack.i.l.bf16 %v15058_v3  ;;  %v15063_v12 = vld [vmem:[#allocation43_spill] sm:$0xff]  ;;  %v4733_v29 = vand.u32 2147483647, %v12700_v60 }
0x16d8   : > { %v5493_v54 = vadd.f32 %v9728_v63, %v5492_v31  ;;  %6298 = vmatpush.msrb.mxu1 %v9288_v5  ;;  %4557 = vadd.xlane.f32.xlu2 %v4556_v61  ;;  %v4289_v5 = vmul.f32 1.442695, %v4215_v58  ;;  %v4735_v58 = vand.u32 2147483648, %v12700_v60 }
0x16d9   : > { %v9736_v2 = vpop.eup %9735  ;;  %v12731_v23 = vpop.xlane.xlu1 %4449  ;;  %v4321_v11 = vmul.f32 1.442695, %v4231_v1  ;;  %vm4734_vm7 = vcmp.eq.f32.partialorder %v4733_v29, 8.507059e+37 }
0x16da   : > { %v12733_v35 = vpop.eup %9737  ;;  %v5497_v31 = vsel %vm5496_vm2, %v9728_v63, %v5493_v54  ;;  %v4725_v0 = vmul.f32 %v9736_v2, %v12700_v60  ;;  %9741 = vrcp.f32 %v12731_v23  ;;  %vm4730_vm4 = vweird.f32 %v9736_v2 }
0x16db   : > { %15062 = vst [vmem:[#allocation49_spill] sm:$0xff] %v12733_v35  ;;  %v5502_v13 = vsel %vm5499_vm3, %v5501_v33, %v5497_v31  ;;  %v4153_v24 = vpop.xlane.xlu2 %4152  ;;  %v12744_v63 = vpop.eup %9739  ;;  %9743 = vpow2.f32 %v4299_v9  ;;  %v4559_v54 = vsel %vm4012_vm11, %v12733_v35, 0.0  ;;  %v15064_v33 = vld [vmem:[#allocation155_spill] sm:$0xff]  ;;  %v4275_v31 = vmul.f32 1.442695, %v4208_v49  ;;  %vm4731_vm6 = vmor %vm4729_vm5, %vm4730_vm4 }
0x16dc   : > { %v5503_v61 = vmul.f32 %v15063_v12, %v5502_v13  ;;  %v4726_v15 = vsub.f32 1.0, %v4725_v0  ;;  %v4251_v51 = vsub.f32 %v12293_v40, %v4153_v24  ;;  %v12742_v43 = vpop.xlane.xlu0 %4155  ;;  %v9297_v40 = vunpack.i.l.bf16 %v15064_v33  ;;  %v15066_v12 = vld [vmem:[#allocation156_spill] sm:$0xff] }
0x16dd   : > { %9745 = vpow2.f32 %v4289_v5  ;;  %v4736_v0 = vor.u32 1.1754944e-38, %v4735_v58  ;;  %v4853_v29 = vand.u32 2147483647, %v12731_v23  ;;  %vm4849_vm10 = vweird.f32 %v12731_v23 }
0x16de   : > { %v4727_v55 = vmul.f32 %v9736_v2, %v4726_v15  ;;  %v4361_v3 = vmul.f32 1.442695, %v4251_v51  ;;  %8991 = vmatmul.msk.f32.vlgmr.msrb.gmra.mxu3 %vm4012_vm11, %v5503_v61  ;;  %v4568_v15 = vsel %vm4012_vm11, %v12744_v63, 0.0  ;;  %v9292_v61 = vunpack.i.l.bf16 %v15066_v12 }
0x16df   : > { %6239 = vmatpush.msrb.mxu3 %v9287_v42  ;;  %4560 = vadd.xlane.f32.xlu1 %v4559_v54  ;;  %v4855_v54 = vand.u32 2147483648, %v12731_v23  ;;  %vm4854_vm13 = vcmp.eq.f32.partialorder %v4853_v29, 8.507059e+37 }
0x16e0   : > { %v9742_v1 = vpop.eup %9741  ;;  %v4728_v9 = vadd.f32 %v9736_v2, %v4727_v55  ;;  %9747 = vpow2.f32 %v4361_v3  ;;  %4569 = vadd.xlane.f32.xlu2 %v4568_v15 }
0x16e1   : > { %v4845_v51 = vmul.f32 %v9742_v1, %v12731_v23  ;;  %6240 = vmatpush.msrb.mxu3 %v9297_v40  ;;  %v12756_v13 = vpop.xlane.xlu1 %4188  ;;  %9749 = vpow2.f32 %v4321_v11  ;;  %v12758_v49 = vpop.eup %9743  ;;  %vm4850_vm8 = vweird.f32 %v9742_v1  ;;  %v9298_v40 = vunpack.i.h.bf16 %v15064_v33 }
0x16e2   : > { %v4732_v5 = vsel %vm4731_vm6, %v9736_v2, %v4728_v9  ;;  %15065 = vst [vmem:[#allocation73_spill] sm:$0xff] %v12758_v49  ;;  %9751 = vpow2.f32 %v4275_v31  ;;  %vm4851_vm12 = vmor %vm4849_vm10, %vm4850_vm8 }
0x16e3   : > { %v4737_v24 = vsel %vm4734_vm7, %v4736_v0, %v4732_v5  ;;  %v4846_v60 = vsub.f32 1.0, %v4845_v51  ;;  %v12760_v42 = vpop.xlane.xlu2 %4437  ;;  %v12768_v11 = vpop.eup %9745  ;;  %v15070_v0 = vld [vmem:[#allocation38_spill] sm:$0xff]  ;;  %v4856_v5 = vor.u32 1.1754944e-38, %v4855_v54 }
0x16e4   : > { %v4738_v58 = vmul.f32 %v12356_v52, %v4737_v24  ;;  %9753 = vrcp.f32 %v12760_v42  ;;  %v12766_v55 = vpop.xlane.xlu0 %4497  ;;  %15067 = vst [vmem:[#allocation77_spill] sm:$0xff] %v12768_v11  ;;  %v4442_v52 = vsel %vm4012_vm11, %v12758_v49, 0.0  ;;  %v4227_v51 = vsub.f32 %v15070_v0, %v12613_v6 }
0x16e5   : > { %v4847_v2 = vmul.f32 %v9742_v1, %v4846_v60  ;;  %9755 = vrcp.f32 %v12766_v55  ;;  %v4427_v24 = vsel %vm4012_vm11, %v12768_v11, 0.0  ;;  %v9283_v0 = vunpack.i.h.bf16 %v15057_v16 }
0x16e6   : > { %v12772_v3 = vpop.eup %9747  ;;  %8994 = vmatmul.msk.f32.vlgmr.msrb.gmra.mxu2 %vm4012_vm11, %v4738_v58  ;;  %v4313_v49 = vmul.f32 1.442695, %v4227_v51  ;;  %v4795_v16 = vand.u32 2147483648, %v12760_v42  ;;  %vm4789_vm1 = vweird.f32 %v12760_v42  ;;  %vm5089_vm3 = vweird.f32 %v12766_v55 }
0x16e7   : > { %15068 = vst [vmem:[#allocation51_spill] sm:$0xff] %v12772_v3  ;;  %v4848_v31 = vadd.f32 %v9742_v1, %v4847_v2  ;;  %6326 = vmatpush.msrb.mxu2 %v9292_v61  ;;  %4443 = vadd.xlane.f32.xlu1 %v4442_v52  ;;  %v4535_v9 = vsel %vm4012_vm11, %v12772_v3, 0.0  ;;  %v12781_v15 = vpop.eup %9749 }
0x16e8   : > { %15069 = vst [vmem:[#allocation56_spill] sm:$0xff] %v12781_v15  ;;  %4536 = vadd.xlane.f32.xlu0 %v4535_v9  ;;  %v12787_v33 = vpop.eup %9751  ;;  %4428 = vadd.xlane.f32.xlu2 %v4427_v24 }
0x16e9   : > { %15071 = vst [vmem:[#allocation75_spill] sm:$0xff] %v12787_v33  ;;  %v4852_v60 = vsel %vm4851_vm12, %v9742_v1, %v4848_v31  ;;  %6327 = vmatpush.msrb.mxu2 %v9298_v40  ;;  %v4048_v23 = vpop.xlane.xlu1 %4047  ;;  %v9293_v40 = vunpack.i.h.bf16 %v15066_v12  ;;  %v5095_v12 = vand.u32 2147483648, %v12766_v55 }
0x16ea   : > { %v9754_v61 = vpop.eup %9753  ;;  %v4857_v58 = vsel %vm4854_vm13, %v4856_v5, %v4852_v60  ;;  %v4216_v2 = vsub.f32 %v12318_v50, %v4048_v23  ;;  %v15072_v5 = vld [vmem:[#allocation41_spill] sm:$0xff]  ;;  %v4793_v60 = vand.u32 2147483647, %v12760_v42  ;;  %v4406_v23 = vsel %vm4012_vm11, %v12787_v33, 0.0 }
0x16eb   : > { %v9756_v52 = vpop.eup %9755  ;;  %v4858_v6 = vmul.f32 %v12401_v34, %v4857_v58  ;;  %v4785_v54 = vmul.f32 %v9754_v61, %v12760_v42  ;;  %v12792_v9 = vpop.xlane.xlu2 %4200  ;;  %v4255_v50 = vsub.f32 %v15072_v5, %v12616_v56  ;;  %v4475_v34 = vsel %vm4012_vm11, %v12781_v15, 0.0 }
0x16ec   : > { %v5085_v1 = vmul.f32 %v9756_v52, %v12766_v55  ;;  %v4291_v29 = vmul.f32 1.442695, %v4216_v2  ;;  %v12796_v31 = vpop.xlane.xlu0 %4167  ;;  %vm4790_vm14 = vweird.f32 %v9754_v61  ;;  %vm5090_vm15 = vweird.f32 %v9756_v52 }
0x16ed   : > { %v4786_v24 = vsub.f32 1.0, %v4785_v54  ;;  %8996 = vmatmul.msk.f32.vlgmr.msrb.gmra.mxu0 %vm4012_vm11, %v4858_v6  ;;  %v5093_v2 = vand.u32 2147483647, %v12766_v55  ;;  %v4369_v6 = vmul.f32 1.442695, %v4255_v50  ;;  %vm4791_vm2 = vmor %vm4789_vm1, %vm4790_vm14  ;;  %vm4794_vm4 = vcmp.eq.f32.partialorder %v4793_v60, 8.507059e+37 }
0x16ee   : > { %v5086_v51 = vsub.f32 1.0, %v5085_v1  ;;  %6384 = vmatpush.msrb.mxu0 %v9283_v0  ;;  %9757 = vpow2.f32 %v4291_v29  ;;  %v4796_v1 = vor.u32 1.1754944e-38, %v4795_v16  ;;  %vm5091_vm5 = vmor %vm5089_vm3, %vm5090_vm15  ;;  %v15075_v55 = vld [vmem:[#allocation125_spill] sm:$0xff] }
0x16ef   : > { %v4787_v58 = vmul.f32 %v9754_v61, %v4786_v24  ;;  %9759 = vpow2.f32 %v4313_v49  ;;  %v15073_v49 = vld [vmem:[#allocation67_spill] sm:$0xff]  ;;  %vm5094_vm6 = vcmp.eq.f32.partialorder %v5093_v2, 8.507059e+37 }
0x16f0   : > { %v5087_v56 = vmul.f32 %v9756_v52, %v5086_v51  ;;  %6385 = vmatpush.msrb.mxu0 %v9293_v40  ;;  %4407 = vadd.xlane.f32.xlu0 %v4406_v23  ;;  %v4232_v29 = vsub.f32 %v15073_v49, %v12683_v32  ;;  %v5096_v40 = vor.u32 1.1754944e-38, %v5095_v12  ;;  %v15077_v12 = vld [vmem:[#allocation126_spill] sm:$0xff] }
0x16f1   : > { %v4788_v54 = vadd.f32 %v9754_v61, %v4787_v58  ;;  %4476 = vadd.xlane.f32.xlu2 %v4475_v34  ;;  %v12811_v0 = vpop.xlane.xlu1 %4461  ;;  %v9303_v58 = vunpack.i.h.bf16 %v15075_v55  ;;  %v9307_v2 = vunpack.i.l.bf16 %v15077_v12 }
0x16f2   : > { %v5088_v5 = vadd.f32 %v9756_v52, %v5087_v56  ;;  %9761 = vrcp.f32 %v12811_v0  ;;  %vm4909_vm8 = vweird.f32 %v12811_v0 }
0x16f3   : > { %v4792_v24 = vsel %vm4791_vm2, %v9754_v61, %v4788_v54  ;;  %v4036_v50 = vpop.xlane.xlu2 %4035  ;;  %v4323_v54 = vmul.f32 1.442695, %v4232_v29 }
0x16f4   : > { %v4797_v42 = vsel %vm4794_vm4, %v4796_v1, %v4792_v24  ;;  %v5092_v34 = vsel %vm5091_vm5, %v9756_v52, %v5088_v5  ;;  %v4212_v51 = vsub.f32 %v12339_v38, %v4036_v50  ;;  %v12819_v16 = vpop.xlane.xlu0 %4509  ;;  %v12821_v23 = vpop.eup %9757  ;;  %v4267_v52 = vsub.f32 %v12296_v44, %v12792_v9  ;;  %v15078_v5 = vld [vmem:[#allocation157_spill] sm:$0xff] }
0x16f5   : > { %15074 = vst [vmem:[#allocation79_spill] sm:$0xff] %v12821_v23  ;;  %v4798_v56 = vmul.f32 %v12443_v20, %v4797_v42  ;;  %v5097_v32 = vsel %vm5094_vm6, %v5096_v40, %v5092_v34  ;;  %9763 = vrcp.f32 %v12819_v16  ;;  %v12826_v61 = vpop.eup %9759  ;;  %v9317_v20 = vunpack.i.l.bf16 %v15078_v5 }
0x16f6   : > { %15076 = vst [vmem:[#allocation81_spill] sm:$0xff] %v12826_v61  ;;  %9765 = vpow2.f32 %v4369_v6  ;;  %v5098_v60 = vmul.f32 %v12448_v27, %v5097_v32  ;;  %v4283_v38 = vmul.f32 1.442695, %v4212_v51  ;;  %v4430_v6 = vsel %vm4012_vm11, %v12821_v23, 0.0 }
0x16f7   : > { %8995 = vmatmul.msk.f32.vlgmr.msra.gmra.mxu3 %vm4012_vm11, %v4798_v56  ;;  %v9308_v27 = vunpack.i.h.bf16 %v15077_v12  ;;  %v4463_v9 = vsel %vm4012_vm11, %v12826_v61, 0.0  ;;  %v4393_v29 = vmul.f32 1.442695, %v4267_v52  ;;  %v4224_v34 = vsub.f32 %v12378_v57, %v12706_v59 }
0x16f8   : > { %v9762_v1 = vpop.eup %9761  ;;  %9767 = vpow2.f32 %v4283_v38  ;;  %9000 = vmatmul.msk.f32.vlgmr.msra.gmra.mxu0 %vm4012_vm11, %v5098_v60  ;;  %6355 = vmatpush.msra.mxu3 %v9303_v58  ;;  %v4915_v51 = vand.u32 2147483648, %v12811_v0  ;;  %v4263_v32 = vsub.f32 %v12315_v26, %v12756_v13  ;;  %v4913_v52 = vand.u32 2147483647, %v12811_v0 }
0x16f9   : > { %v4905_v44 = vmul.f32 %v9762_v1, %v12811_v0  ;;  %6500 = vmatpush.msra.mxu0 %v9307_v2  ;;  %4431 = vadd.xlane.f32.xlu0 %v4430_v6  ;;  %v12841_v49 = vpop.xlane.xlu1 %4083  ;;  %9769 = vpow2.f32 %v4323_v54  ;;  %vm4910_vm7 = vweird.f32 %v9762_v1  ;;  %v4307_v2 = vmul.f32 1.442695, %v4224_v34 }
0x16fa   : > { %4464 = vadd.xlane.f32.xlu2 %v4463_v9  ;;  %6356 = vmatpush.msra.mxu3 %v9317_v20  ;;  %vm4911_vm10 = vmor %vm4909_vm8, %vm4910_vm7  ;;  %v4916_v54 = vor.u32 1.1754944e-38, %v4915_v51  ;;  %v4385_v6 = vmul.f32 1.442695, %v4263_v32  ;;  %vm4914_vm12 = vcmp.eq.f32.partialorder %v4913_v52, 8.507059e+37  ;;  %vm5149_vm14 = vweird.f32 %v12819_v16 }
0x16fb   : > { %v12843_v24 = vpop.eup %9763  ;;  %v4906_v40 = vsub.f32 1.0, %v4905_v44  ;;  %6501 = vmatpush.msra.mxu0 %v9308_v27  ;;  %v12845_v50 = vpop.xlane.xlu2 %4473 }
0x16fc   : > { %v12847_v42 = vpop.eup %9765  ;;  %v5145_v58 = vmul.f32 %v12843_v24, %v12819_v16  ;;  %9771 = vrcp.f32 %v12845_v50  ;;  %v12855_v56 = vpop.xlane.xlu0 %4533  ;;  %vm5150_vm13 = vweird.f32 %v12843_v24  ;;  %vm4969_vm3 = vweird.f32 %v12845_v50 }
0x16fd   : > { %15079 = vst [vmem:[#allocation53_spill] sm:$0xff] %v12847_v42  ;;  %v4907_v60 = vmul.f32 %v9762_v1, %v4906_v40  ;;  %9773 = vpow2.f32 %v4393_v29  ;;  %v4547_v12 = vsel %vm4012_vm11, %v12847_v42, 0.0  ;;  %v5155_v40 = vand.u32 2147483648, %v12819_v16  ;;  %vm12888_vm15 = vmor %vm5149_vm14, %vm5150_vm13 }
0x16fe   : > { %v12860_v38 = vpop.eup %9767  ;;  %v5146_v57 = vsub.f32 1.0, %v5145_v58  ;;  %9775 = vrcp.f32 %v12855_v56  ;;  %vm5269_vm13 = vweird.f32 %v12855_v56 }
0x16ff   : > { %15080 = vst [vmem:[#allocation58_spill] sm:$0xff] %v12860_v38  ;;  %v4908_v59 = vadd.f32 %v9762_v1, %v4907_v60  ;;  %v4418_v13 = vsel %vm4012_vm11, %v12860_v38, 0.0  ;;  %v12869_v20 = vpop.eup %9769  ;;  %v9302_v60 = vunpack.i.l.bf16 %v15075_v55  ;;  %v5156_v55 = vor.u32 1.1754944e-38, %v5155_v40  ;;  %v15115_v38 = vld [vmem:[#allocation162_spill] sm:$0xff] }
0x1700   : > { %v5147_v26 = vmul.f32 %v12843_v24, %v5146_v57  ;;  %15081 = vst [vmem:[#allocation62_spill] sm:$0xff] %v12869_v20  ;;  %4419 = vadd.xlane.f32.xlu1 %v4418_v13 }
0x1701   : > { %v4912_v27 = vsel %vm4911_vm10, %v9762_v1, %v4908_v59  ;;  %v12872_v0 = vpop.xlane.xlu1 %4485  ;;  %v5153_v1 = vand.u32 2147483647, %v12819_v16 }
0x1702   : > { %v9772_v44 = vpop.eup %9771  ;;  %v4917_v9 = vsel %vm4914_vm12, %v4916_v54, %v4912_v27  ;;  %v5148_v29 = vadd.f32 %v12843_v24, %v5147_v26  ;;  %4548 = vadd.xlane.f32.xlu2 %v4547_v12  ;;  %9777 = vrcp.f32 %v12872_v0  ;;  %v4975_v54 = vand.u32 2147483648, %v12845_v50 }
0x1703   : > { %v4918_v34 = vmul.f32 %v12486_v30, %v4917_v9  ;;  %v4965_v51 = vmul.f32 %v9772_v44, %v12845_v50  ;;  %v12881_v58 = vpop.xlane.xlu2 %4119  ;;  %v12883_v32 = vpop.eup %9773  ;;  %v15085_v30 = vld [vmem:[#allocation158_spill] sm:$0xff]  ;;  %9779 = vpow2.f32 %v4307_v2  ;;  %vm5154_vm1 = vcmp.eq.f32.partialorder %v5153_v1, 8.507059e+37 }
0x1704   : > { %15082 = vst [vmem:[#allocation80_spill] sm:$0xff] %v12883_v32  ;;  %v12892_v57 = vpop.eup %9775  ;;  %v9312_v59 = vunpack.i.l.bf16 %v15085_v30  ;;  %v5152_v16 = vsel %vm12888_vm15, %v12843_v24, %v5148_v29  ;;  %9781 = vpow2.f32 %v4385_v6  ;;  %vm4970_vm2 = vweird.f32 %v9772_v44 }
0x1705   : > { %v4966_v12 = vsub.f32 1.0, %v4965_v51  ;;  %8997 = vmatmul.msk.f32.vlgmr.msra.gmra.mxu1 %vm4012_vm11, %v4918_v34  ;;  %v5265_v26 = vmul.f32 %v12892_v57, %v12855_v56  ;;  %v4973_v2 = vand.u32 2147483647, %v12845_v50  ;;  %v5157_v9 = vsel %vm5154_vm1, %v5156_v55, %v5152_v16  ;;  %v15086_v51 = vld [vmem:[#allocation129_spill] sm:$0xff]  ;;  %vm4971_vm4 = vmor %vm4969_vm3, %vm4970_vm2 }
0x1706   : > { %6413 = vmatpush.msra.mxu1 %v9302_v60  ;;  %v4228_v24 = vsub.f32 %v12343_v48, %v12841_v49  ;;  %v4478_v6 = vsel %vm4012_vm11, %v12869_v20, 0.0  ;;  %v4583_v29 = vsel %vm4012_vm11, %v12883_v32, 0.0  ;;  %v9322_v60 = vunpack.i.l.bf16 %v15086_v51  ;;  %v15087_v48 = vld [vmem:[#allocation10_spill] sm:$0xff]  ;;  %v15088_v49 = vld [vmem:[#allocation9_spill] sm:$0xff] }
0x1707   : > { %v4967_v13 = vmul.f32 %v9772_v44, %v4966_v12  ;;  %v5266_v34 = vsub.f32 1.0, %v5265_v26  ;;  %v4976_v52 = vor.u32 1.1754944e-38, %v4975_v54  ;;  %v5158_v12 = vmul.f32 %v12496_v46, %v5157_v9 }
0x1708   : > { %v9778_v27 = vpop.eup %9777  ;;  %6414 = vmatpush.msra.mxu1 %v9312_v59  ;;  %4479 = vadd.xlane.f32.xlu1 %v4478_v6  ;;  %v9439_v59 = vpack.i.bf16 %v15088_v49, %v15087_v48  ;;  %vm4974_vm5 = vcmp.eq.f32.partialorder %v4973_v2, 8.507059e+37  ;;  %v4315_v6 = vmul.f32 1.442695, %v4228_v24  ;;  %v5033_v23 = vand.u32 2147483647, %v12872_v0 }
0x1709   : > { %v4968_v40 = vadd.f32 %v9772_v44, %v4967_v13  ;;  %v5025_v1 = vmul.f32 %v9778_v27, %v12872_v0  ;;  %v12914_v16 = vpop.eup %9779  ;;  %v5035_v54 = vand.u32 2147483648, %v12872_v0  ;;  %v5267_v48 = vmul.f32 %v12892_v57, %v5266_v34 }
0x170a   : > { %4584 = vadd.xlane.f32.xlu2 %v4583_v29  ;;  %15089 = vst [vmem:[#allocation82_spill] sm:$0xff] %v12914_v16  ;;  %v12919_v26 = vpop.eup %9781  ;;  %vm5030_vm6 = vweird.f32 %v9778_v27  ;;  %v9313_v46 = vunpack.i.h.bf16 %v15085_v30  ;;  %v9318_v9 = vunpack.i.h.bf16 %v15078_v5  ;;  %vm5029_vm7 = vweird.f32 %v12872_v0 }
0x170b   : > { %v4972_v55 = vsel %vm4971_vm4, %v9772_v44, %v4968_v40  ;;  %v5026_v13 = vsub.f32 1.0, %v5025_v1  ;;  %v12917_v50 = vpop.xlane.xlu2 %4131  ;;  %15090 = vst [vmem:[#allocation40_spill] sm:$0xff] %v12919_v26  ;;  %v15091_v44 = vld [vmem:[#allocation160_spill] sm:$0xff]  ;;  %9783 = vpow2.f32 %v4315_v6  ;;  %vm5031_vm8 = vmor %vm5029_vm7, %vm5030_vm6  ;;  %v4571_v30 = vsel %vm4012_vm11, %v12919_v26, 0.0 }
0x170c   : > { %v4977_v20 = vsel %vm4974_vm5, %v4976_v52, %v4972_v55  ;;  %v9332_v2 = vunpack.i.l.bf16 %v15091_v44  ;;  %v5268_v40 = vadd.f32 %v12892_v57, %v5267_v48  ;;  %vm5270_vm10 = vweird.f32 %v12892_v57  ;;  %v15095_v48 = vld [vmem:[#allocation164_spill] sm:$0xff] }
0x170d   : > { %v4978_v29 = vmul.f32 %v12517_v62, %v4977_v20  ;;  %v5027_v49 = vmul.f32 %v9778_v27, %v5026_v13  ;;  %9440 = vrot.lane.b32.xlu0 %v9439_v59, %s9995_s8  ;;  %9001 = vmatmul.msk.f32.vlgmr.msrb.gmra.mxu1 %vm4012_vm11, %v5158_v12  ;;  %v5036_v62 = vor.u32 1.1754944e-38, %v5035_v54  ;;  %v4454_v20 = vsel %vm4012_vm11, %v12914_v16, 0.0  ;;  %v15092_v59 = vld [vmem:[#allocation134_spill] sm:$0xff]  ;;  %vm5271_vm14 = vmor %vm5269_vm13, %vm5270_vm10 }
0x170e   : > { %6529 = vmatpush.msrb.mxu1 %v9322_v60  ;;  %vm5034_vm12 = vcmp.eq.f32.partialorder %v5033_v23, 8.507059e+37  ;;  %v5275_v0 = vand.u32 2147483648, %v12855_v56  ;;  %v5273_v1 = vand.u32 2147483647, %v12855_v56  ;;  %v9327_v12 = vunpack.i.l.bf16 %v15092_v59 }
0x170f   : > { %v5028_v24 = vadd.f32 %v9778_v27, %v5027_v49  ;;  %8998 = vmatmul.msk.f32.vlgmr.msra.gmra.mxu2 %vm4012_vm11, %v4978_v29  ;;  %v9328_v55 = vunpack.i.h.bf16 %v15092_v59  ;;  %v9357_v49 = vunpack.i.l.bf16 %v15095_v48  ;;  %v15102_v59 = vld [vmem:[#allocation25_spill] sm:$0xff] }
0x1710   : > { %6442 = vmatpush.msra.mxu2 %v9313_v46  ;;  %6530 = vmatpush.msrb.mxu1 %v9332_v2  ;;  %v5276_v13 = vor.u32 1.1754944e-38, %v5275_v0  ;;  %vm5274_vm15 = vcmp.eq.f32.partialorder %v5273_v1, 8.507059e+37  ;;  %v4240_v2 = vsub.f32 %v12380_v25, %v12881_v58  ;;  %v15099_v0 = vld [vmem:[#allocation13_spill] sm:$0xff]  ;;  %v15109_v25 = vld [vmem:[#allocation163_spill] sm:$0xff] }
0x1711   : > { %v5032_v5 = vsel %vm5031_vm8, %v9778_v27, %v5028_v24  ;;  %4455 = vadd.xlane.f32.xlu1 %v4454_v20  ;;  %v5272_v27 = vsel %vm5271_vm14, %v12892_v57, %v5268_v40  ;;  %v12947_v23 = vpop.eup %9783  ;;  %v15094_v57 = vld [vmem:[#allocation161_spill] sm:$0xff]  ;;  %v15097_v24 = vld [vmem:[#allocation11_spill] sm:$0xff]  ;;  %v4252_v40 = vsub.f32 %v12421_v36, %v12742_v43 }
0x1712   : > { %v5037_v34 = vsel %vm5034_vm12, %v5036_v62, %v5032_v5  ;;  %4572 = vadd.xlane.f32.xlu2 %v4571_v30  ;;  %6443 = vmatpush.msra.mxu2 %v9318_v9  ;;  %15093 = vst [vmem:[#allocation60_spill] sm:$0xff] %v12947_v23  ;;  %v5277_v6 = vsel %vm5274_vm15, %v5276_v13, %v5272_v27  ;;  %v9347_v29 = vunpack.i.l.bf16 %v15094_v57  ;;  %v15096_v9 = vld [vmem:[#allocation12_spill] sm:$0xff]  ;;  %v4339_v20 = vmul.f32 1.442695, %v4240_v2  ;;  %v15098_v5 = vld [vmem:[#allocation15_spill] sm:$0xff] }
0x1713   : > { %v5038_v60 = vmul.f32 %v12533_v39, %v5037_v34  ;;  %v12942_v52 = vpop.xlane.xlu2 %4107  ;;  %v4466_v39 = vsel %vm4012_vm11, %v12947_v23, 0.0  ;;  %v5278_v56 = vmul.f32 %v12528_v8, %v5277_v6  ;;  %v9444_v62 = vpack.i.bf16 %v15097_v24, %v15096_v9  ;;  %v15107_v36 = vld [vmem:[#allocation159_spill] sm:$0xff]  ;;  %v12985_v2 = vpop.xlane.xlu1 %4404 }
0x1714   : > { %9785 = vpow2.f32 %v4339_v20  ;;  %v9449_v34 = vpack.i.bf16 %v15099_v0, %v15098_v5  ;;  %v4244_v20 = vsub.f32 %v12440_v21, %v12917_v50  ;;  %v15108_v5 = vld [vmem:[#allocation26_spill] sm:$0xff]  ;;  %v4630_v42 = vand.u32 2147483648, %v12985_v2 }
0x1715   : > { %8999 = vmatmul.msk.f32.vlgmr.msrb.gmra.mxu3 %vm4012_vm11, %v5038_v60  ;;  %v15101_v60 = vld [vmem:[#allocation17_spill] sm:$0xff]  ;;  %9787 = vrcp.f32 %v12985_v2  ;;  %vm4624_vm6 = vweird.f32 %v12985_v2 }
0x1716   : > { %6471 = vmatpush.msrb.mxu3 %v9327_v12  ;;  %v15103_v12 = vld [vmem:[#allocation23_spill] sm:$0xff]  ;;  %v4347_v9 = vmul.f32 1.442695, %v4244_v20  ;;  %v15121_v20 = vld [vmem:[#allocation22_spill] sm:$0xff]  ;;  %v13072_v26 = vor.u32 1.1754944e-38, %v4630_v42 }
0x1718   : > { %6472 = vmatpush.msrb.mxu3 %v9328_v55 }
0x171a   : > { %4467 = vadd.xlane.f32.xlu2 %v4466_v39  ;;  %v12965_v8 = vpop.xlane.xlu0 %4416  ;;  %v15106_v39 = vld [vmem:[#allocation136_spill] sm:$0xff] }
0x171b   : > { %v12953_v54 = vpop.xlane.xlu2 %4143 }
0x171d   : > { %9003 = vmatmul.msk.f32.vlgmr.msra.gmra.mxu3 %vm4012_vm11, %v5278_v56 }
0x171e   : > { %6587 = vmatpush.msra.mxu3 %v9347_v29 }
0x1720   : > { %6588 = vmatpush.msra.mxu3 %v9357_v49  ;;  %v4256_v49 = vsub.f32 %v12473_v45, %v12796_v31  ;;  %v12996_v45 = vpop.eup %9785  ;;  %v15111_v31 = vld [vmem:[#allocation29_spill] sm:$0xff] }
0x1721   : > { %15110 = vst [vmem:[#allocation64_spill] sm:$0xff] %v12996_v45  ;;  %v4502_v0 = vsel %vm4012_vm11, %v12996_v45, 0.0  ;;  %v13020_v6 = vpop.eup %9787  ;;  %v15129_v45 = vunpack.i.l.bf16 %v15108_v5 }
0x1722   : > { %v4371_v56 = vmul.f32 1.442695, %v4256_v49  ;;  %vm4625_vm5 = vweird.f32 %v13020_v6 }
0x1723   : > { %v12958_v46 = vpop.xlane.xlu2 %4191 }
0x172a   : > { %9445 = vrot.lane.b32.xlu1 %v9444_v62, %s9995_s8  ;;  %v4363_v62 = vmul.f32 1.442695, %v4252_v40  ;;  %v15112_v40 = vld [vmem:[#allocation48_spill] sm:$0xff] }
0x172b   : > { %v12967_v30 = vpop.xlane.xlu2 %4203 }
0x1732   : > { %9450 = vrot.lane.b32.xlu2 %v9449_v34, %s9995_s8  ;;  %v13002_v21 = vpop.xlane.xlu0 %4581 }
0x1733   : > { %v4180_v50 = vpop.xlane.xlu2 %4179  ;;  %9789 = vrcp.f32 %v13002_v21  ;;  %v5515_v29 = vand.u32 2147483648, %v13002_v21  ;;  %vm5509_vm2 = vweird.f32 %v13002_v21 }
0x1734   : > { %9791 = vpow2.f32 %v4363_v62  ;;  %v4260_v24 = vsub.f32 %v12641_v37, %v4180_v50  ;;  %v15116_v62 = vld [vmem:[#allocation33_spill] sm:$0xff]  ;;  %v15117_v50 = vld [vmem:[#allocation166_spill] sm:$0xff]  ;;  %v4236_v37 = vsub.f32 %v12579_v4, %v12942_v52  ;;  %v4620_v52 = vmul.f32 %v13020_v6, %v12985_v2 }
0x1735   : > { %9793 = vpow2.f32 %v4371_v56 }
0x1736   : > { %v4379_v34 = vmul.f32 1.442695, %v4260_v24  ;;  %9795 = vpow2.f32 %v4347_v9  ;;  %v4331_v35 = vmul.f32 1.442695, %v4236_v37  ;;  %v4621_v43 = vsub.f32 1.0, %v4620_v52 }
0x1737   : > { %4503 = vadd.xlane.f32.xlu0 %v4502_v0  ;;  %9797 = vrcp.f32 %v12965_v8  ;;  %v5516_v37 = vor.u32 1.1754944e-38, %v5515_v29 }
0x1738   : > { %9799 = vpow2.f32 %v4379_v34 }
0x1739   : > { %v9790_v49 = vpop.eup %9789 }
0x173a   : > { %v13030_v56 = vpop.xlane.xlu1 %4452  ;;  %v13032_v58 = vpop.eup %9791  ;;  %v5505_v9 = vmul.f32 %v9790_v49, %v13002_v21  ;;  %vm5510_vm1 = vweird.f32 %v9790_v49 }
0x173b   : > { %15120 = vst [vmem:[#allocation68_spill] sm:$0xff] %v13032_v58  ;;  %v13037_v27 = vpop.xlane.xlu0 %4440  ;;  %v13039_v24 = vpop.xlane.xlu2 %4521  ;;  %v4538_v4 = vsel %vm4012_vm11, %v13032_v58, 0.0  ;;  %vm5511_vm3 = vmor %vm5509_vm2, %vm5510_vm1  ;;  %vm4684_vm2 = vweird.f32 %v12965_v8 }
0x173c   : > { %9801 = vrcp.f32 %v13037_v27  ;;  %v5506_v33 = vsub.f32 1.0, %v5505_v9  ;;  %v13049_v34 = vpop.eup %9793  ;;  %v5513_v9 = vand.u32 2147483647, %v13002_v21  ;;  %v4808_v29 = vand.u32 2147483647, %v13037_v27 }
0x173d   : > { %9803 = vrcp.f32 %v13039_v24  ;;  %15124 = vst [vmem:[#allocation83_spill] sm:$0xff] %v13049_v34  ;;  %v13055_v0 = vpop.eup %9795  ;;  %v5215_v61 = vand.u32 2147483648, %v13039_v24  ;;  %vm4804_vm10 = vweird.f32 %v13037_v27  ;;  %vm5209_vm13 = vweird.f32 %v13039_v24 }
0x173e   : > { %15125 = vst [vmem:[#allocation84_spill] sm:$0xff] %v13055_v0  ;;  %v5507_v23 = vmul.f32 %v9790_v49, %v5506_v33  ;;  %v13059_v16 = vpop.eup %9797  ;;  %v13070_v33 = vsel %vm4012_vm11, %v13049_v34, 0.0  ;;  %9805 = vpow2.f32 %v4331_v35  ;;  %v13077_v52 = vsel %vm4012_vm11, %v13055_v0, 0.0 }
0x173f   : > { %4539 = vadd.xlane.f32.xlu0 %v4538_v4  ;;  %v13064_v55 = vpop.eup %9799  ;;  %vm5514_vm4 = vcmp.eq.f32.partialorder %v5513_v9, 8.507059e+37  ;;  %v4622_v35 = vmul.f32 %v13020_v6, %v4621_v43  ;;  %9807 = vrcp.f32 %v13030_v56  ;;  %v4810_v43 = vand.u32 2147483648, %v13037_v27 }
0x1740   : > { %15128 = vst [vmem:[#allocation87_spill] sm:$0xff] %v13064_v55  ;;  %v5508_v13 = vadd.f32 %v9790_v49, %v5507_v23  ;;  %vm4809_vm14 = vcmp.eq.f32.partialorder %v4808_v29, 8.507059e+37 }
0x1742   : > { %v9802_v4 = vpop.eup %9801  ;;  %v5512_v21 = vsel %vm5511_vm3, %v9790_v49, %v5508_v13  ;;  %v13090_v15 = vpop.xlane.xlu1 %4512  ;;  %v4680_v13 = vmul.f32 %v13059_v16, %v12965_v8  ;;  %vm13142_vm3 = vmor %vm4624_vm6, %vm4625_vm5  ;;  %vm4685_vm5 = vweird.f32 %v13059_v16 }
0x1743   : > { %v9804_v11 = vpop.eup %9803  ;;  %v4800_v32 = vmul.f32 %v9802_v4, %v13037_v27  ;;  %v13082_v58 = vpop.xlane.xlu0 %4488  ;;  %v5517_v34 = vsel %vm5514_vm4, %v5516_v37, %v5512_v21  ;;  %v4562_v37 = vsel %vm4012_vm11, %v13064_v55, 0.0  ;;  %vm4805_vm7 = vweird.f32 %v9802_v4 }
0x1744   : > { %v13084_v42 = vpop.xlane.xlu2 %4545  ;;  %v5205_v0 = vmul.f32 %v9804_v11, %v13039_v24  ;;  %v5518_v49 = vmul.f32 %v12648_v18, %v5517_v34  ;;  %9809 = vrcp.f32 %v13082_v58  ;;  %v13104_v18 = vpop.eup %9805  ;;  %vm5210_vm8 = vweird.f32 %v9804_v11  ;;  %vm4806_vm12 = vmor %vm4804_vm10, %vm4805_vm7 }
0x1745   : > { %v4801_v9 = vsub.f32 1.0, %v4800_v32  ;;  %v4690_v32 = vand.u32 2147483648, %v12965_v8  ;;  %9811 = vrcp.f32 %v13084_v42  ;;  %v13118_v1 = vpop.eup %9807  ;;  %vm5211_vm15 = vmor %vm5209_vm13, %vm5210_vm8  ;;  %vm5044_vm8 = vweird.f32 %v13082_v58 }
0x1746   : > { %v5206_v23 = vsub.f32 1.0, %v5205_v0  ;;  %9007 = vmatmul.msk.f32.vlgmr.msrb.gmra.mxu3 %vm4012_vm11, %v5518_v49  ;;  %v5213_v0 = vand.u32 2147483647, %v13039_v24  ;;  %v4268_v49 = vsub.f32 %v12622_v19, %v12967_v30  ;;  %9813 = vrcp.f32 %v13090_v15  ;;  %vm13200_vm13 = vmor %vm4684_vm2, %vm4685_vm5 }
0x1747   : > { %v4802_v21 = vmul.f32 %v9802_v4, %v4801_v9  ;;  %4563 = vadd.xlane.f32.xlu0 %v4562_v37  ;;  %6703 = vmatpush.msrb.mxu3 %v15129_v45  ;;  %v4681_v9 = vsub.f32 1.0, %v4680_v13  ;;  %v4811_v37 = vor.u32 1.1754944e-38, %v4810_v43  ;;  %v13121_v45 = vadd.f32 %v13020_v6, %v4622_v35 }
0x1748   : > { %v5207_v34 = vmul.f32 %v9804_v11, %v5206_v23  ;;  %v15130_v23 = vunpack.i.l.bf16 %v15117_v50  ;;  %v5216_v13 = vor.u32 1.1754944e-38, %v5215_v61  ;;  %vm5214_vm1 = vcmp.eq.f32.partialorder %v5213_v0, 8.507059e+37 }
0x1749   : > { %v4803_v55 = vadd.f32 %v9802_v4, %v4802_v21  ;;  %v4860_v61 = vmul.f32 %v13118_v1, %v13030_v56  ;;  %v15133_v0 = vand.u32 2147483647, %v12985_v2  ;;  %v15137_v2 = vand.u32 2147483647, %v12965_v8 }
0x174a   : > { %v5208_v3 = vadd.f32 %v9804_v11, %v5207_v34  ;;  %6704 = vmatpush.msrb.mxu3 %v15130_v23  ;;  %v9810_v19 = vpop.eup %9809 }
0x174b   : > { %v4807_v27 = vsel %vm4806_vm12, %v9802_v4, %v4803_v55  ;;  %v5040_v35 = vmul.f32 %v9810_v19, %v13082_v58  ;;  %v4682_v55 = vmul.f32 %v13059_v16, %v4681_v9  ;;  %v4395_v4 = vmul.f32 1.442695, %v4268_v49  ;;  %v13136_v29 = vpop.eup %9811 }
0x174c   : > { %v4812_v30 = vsel %vm4809_vm14, %v4811_v37, %v4807_v27  ;;  %v5212_v21 = vsel %vm5211_vm15, %v9804_v11, %v5208_v3  ;;  %v13125_v24 = vpop.xlane.xlu2 %4557  ;;  %v13134_v3 = vpop.xlane.xlu1 %4500  ;;  %vm13148_vm4 = vcmp.eq.f32.partialorder %v15133_v0, 8.507059e+37  ;;  %v4691_v37 = vor.u32 1.1754944e-38, %v4690_v32 }
0x174d   : > { %v4813_v43 = vmul.f32 %v12661_v7, %v4812_v30  ;;  %v5217_v34 = vsel %vm5214_vm1, %v5216_v13, %v5212_v21  ;;  %v5041_v23 = vsub.f32 1.0, %v5040_v35  ;;  %v5050_v27 = vand.u32 2147483648, %v13082_v58 }
0x174e   : > { %v5218_v11 = vmul.f32 %v12656_v22, %v5217_v34  ;;  %v15136_v22 = vsub.f32 %v12594_v10, %v12953_v54  ;;  %v4627_v13 = vsel %vm13142_vm3, %v13020_v6, %v13121_v45  ;;  %vm13164_vm6 = vcmp.eq.f32.partialorder %v15137_v2, 8.507059e+37 }
0x174f   : > { %9011 = vmatmul.msk.f32.vlgmr.msra.gmra.mxu3 %vm4012_vm11, %v4813_v43  ;;  %v4264_v10 = vsub.f32 %v12609_v53, %v12958_v46  ;;  %v5325_v54 = vmul.f32 %v13136_v29, %v13084_v42  ;;  %v15140_v32 = vunpack.i.h.bf16 %v15112_v40  ;;  %v5042_v6 = vmul.f32 %v9810_v19, %v5041_v23  ;;  %v13179_v43 = vpop.eup %9813 }
0x1750   : > { %v4355_v49 = vmul.f32 1.442695, %v15136_v22  ;;  %9002 = vmatmul.msk.f32.vlgmr.msrb.gmra.mxu2 %vm4012_vm11, %v5218_v11  ;;  %vm5045_vm7 = vweird.f32 %v9810_v19  ;;  %v5048_v45 = vand.u32 2147483647, %v13082_v58  ;;  %9815 = vrcp.f32 %v13134_v3 }
0x1751   : > { %6819 = vmatpush.msra.mxu3 %v15140_v32  ;;  %v15141_v21 = vunpack.i.h.bf16 %v15091_v44  ;;  %v4683_v53 = vadd.f32 %v13059_v16, %v4682_v55  ;;  %9817 = vpow2.f32 %v4395_v4  ;;  %v4861_v46 = vsub.f32 1.0, %v4860_v61  ;;  %vm5046_vm10 = vmor %vm5044_vm8, %vm5045_vm7 }
0x1752   : > { %v5326_v34 = vsub.f32 1.0, %v5325_v54  ;;  %v15142_v35 = vunpack.i.l.bf16 %v15121_v20  ;;  %v5043_v11 = vadd.f32 %v9810_v19, %v5042_v6  ;;  %v5051_v7 = vor.u32 1.1754944e-38, %v5050_v27 }
0x1753   : > { %6558 = vmatpush.msrb.mxu2 %v15141_v21  ;;  %v5335_v0 = vand.u32 2147483648, %v13084_v42  ;;  %v15143_v22 = vunpack.i.h.bf16 %v15107_v36  ;;  %vm5330_vm12 = vweird.f32 %v13136_v29  ;;  %v5333_v55 = vand.u32 2147483647, %v13084_v42 }
0x1754   : > { %6820 = vmatpush.msra.mxu3 %v15142_v35  ;;  %v5327_v44 = vmul.f32 %v13136_v29, %v5326_v34  ;;  %9819 = vrcp.f32 %v13125_v24  ;;  %4515 = vadd.xlane.f32.xlu1 %v13077_v52  ;;  %v13194_v4 = vpop.xlane.xlu2 %4569  ;;  %v4387_v61 = vmul.f32 1.442695, %v4264_v10  ;;  %v5160_v23 = vmul.f32 %v13179_v43, %v13090_v15 }
0x1755   : > { %6559 = vmatpush.msrb.mxu2 %v15143_v22  ;;  %v5047_v27 = vsel %vm5046_vm10, %v9810_v19, %v5043_v11  ;;  %vm5049_vm14 = vcmp.eq.f32.partialorder %v5048_v45, 8.507059e+37  ;;  %v4687_v52 = vsel %vm13200_vm13, %v13059_v16, %v4683_v53  ;;  %vm5329_vm15 = vweird.f32 %v13084_v42  ;;  %v13216_v19 = vpop.xlane.xlu0 %4524 }
0x1756   : > { %v5052_v2 = vsel %vm5049_vm14, %v5051_v7, %v5047_v27  ;;  %v5328_v54 = vadd.f32 %v13136_v29, %v5327_v44  ;;  %v13211_v8 = vpop.eup %9815  ;;  %9821 = vpow2.f32 %v4355_v49  ;;  %vm5331_vm1 = vmor %vm5329_vm15, %vm5330_vm12  ;;  %v5336_v10 = vor.u32 1.1754944e-38, %v5335_v0  ;;  %v13252_v7 = vpop.xlane.xlu1 %4560 }
0x1757   : > { %v5053_v32 = vmul.f32 %v12687_v14, %v5052_v2  ;;  %v4490_v6 = vsel %vm4012_vm11, %v13104_v18, 0.0  ;;  %v13220_v16 = vpop.eup %9817  ;;  %v4632_v42 = vsel %vm13148_vm4, %v13072_v26, %v4627_v13  ;;  %v4862_v45 = vmul.f32 %v13118_v1, %v4861_v46 }
0x1758   : > { %v5332_v49 = vsel %vm5331_vm1, %v13136_v29, %v5328_v54  ;;  %vm5334_vm2 = vcmp.eq.f32.partialorder %v5333_v55, 8.507059e+37  ;;  %v4692_v14 = vsel %vm13164_vm6, %v4691_v37, %v4687_v52  ;;  %9823 = vpow2.f32 %v4387_v61 }
0x1759   : > { %v5161_v21 = vsub.f32 1.0, %v5160_v23  ;;  %v5337_v53 = vsel %vm5334_vm2, %v5336_v10, %v5332_v49  ;;  %9015 = vmatmul.msk.f32.vlgmr.msrb.gmra.mxu3 %vm4012_vm11, %v5053_v32  ;;  %v4868_v35 = vand.u32 2147483647, %v13030_v56  ;;  %v5100_v26 = vmul.f32 %v13211_v8, %v13134_v3 }
0x175a   : > { %v13230_v34 = vpop.eup %9819  ;;  %v5338_v9 = vmul.f32 %v12675_v47, %v5337_v53  ;;  %9825 = vrcp.f32 %v13216_v19  ;;  %v15146_v29 = vunpack.i.l.bf16 %v15111_v31  ;;  %v4633_v37 = vmul.f32 %v12584_v28, %v4632_v42 }
0x175b   : > { %v4870_v13 = vand.u32 2147483648, %v13030_v56  ;;  %v5385_v30 = vmul.f32 %v13230_v34, %v13125_v24  ;;  %9827 = vrcp.f32 %v13194_v4  ;;  %4491 = vadd.xlane.f32.xlu2 %v4490_v6  ;;  %v15147_v47 = vpack.i.bf16 %v15103_v12, %v15102_v59 }
0x175c   : > { %6935 = vmatpush.msrb.mxu3 %v15146_v29  ;;  %v4863_v46 = vadd.f32 %v13118_v1, %v4862_v45  ;;  %vm4865_vm3 = vweird.f32 %v13118_v1  ;;  %v5168_v11 = vand.u32 2147483647, %v13090_v15  ;;  %v5170_v28 = vand.u32 2147483648, %v13090_v15  ;;  %9004 = vmatmul.msk.f32.vlgmr.msrb.gmra.mxu0 %vm4012_vm11, %v5338_v9  ;;  %v13257_v22 = vpop.xlane.xlu2 %4428  ;;  %v13259_v44 = vpop.eup %9821 }
0x175d   : > { %9460 = vrot.lane.b32.xlu0 %v15147_v47, %s9995_s8  ;;  %v15148_v0 = vunpack.i.h.bf16 %v15111_v31  ;;  %v13262_v59 = vmul.f32 %v12596_v41, %v4692_v14  ;;  %v5162_v12 = vmul.f32 %v13179_v43, %v5161_v21  ;;  %v5386_v55 = vsub.f32 1.0, %v5385_v30  ;;  %4551 = vadd.xlane.f32.xlu1 %v13070_v33  ;;  %v13291_v54 = vpop.xlane.xlu0 %4536 }
0x175e   : > { %v15149_v58 = vunpack.i.h.bf16 %v15086_v51  ;;  %v13270_v61 = vsel %vm4012_vm11, %v13220_v16, 0.0  ;;  %vm4864_vm4 = vweird.f32 %v13030_v56  ;;  %vm13273_vm5 = vcmp.eq.f32.partialorder %v4868_v35, 8.507059e+37  ;;  %v13278_v27 = vpop.eup %9823 }
0x175f   : > { %6936 = vmatpush.msrb.mxu3 %v15148_v0  ;;  %v5101_v41 = vsub.f32 1.0, %v5100_v26  ;;  %v5395_v23 = vand.u32 2147483648, %v13125_v24  ;;  %vm13282_vm6 = vmor %vm4864_vm4, %vm4865_vm3  ;;  %v4871_v33 = vor.u32 1.1754944e-38, %v4870_v13  ;;  %v5387_v52 = vmul.f32 %v13230_v34, %v5386_v55  ;;  %v13338_v0 = vpop.xlane.xlu1 %4443 }
0x1760   : > { %6616 = vmatpush.msrb.mxu0 %v15149_v58  ;;  %vm5390_vm7 = vweird.f32 %v13230_v34  ;;  %v5393_v56 = vand.u32 2147483647, %v13125_v24  ;;  %v15154_v2 = vunpack.i.l.bf16 %v15107_v36  ;;  %v13293_v32 = vpop.eup %9825  ;;  %v4867_v10 = vsel %vm13282_vm6, %v13118_v1, %v4863_v46  ;;  %v15161_v58 = vld [vmem:[#allocation45_spill] sm:$0xff] }
0x1761   : > { %vm5164_vm8 = vweird.f32 %v13090_v15  ;;  %vm13299_vm10 = vcmp.eq.f32.partialorder %v5168_v11, 8.507059e+37  ;;  %v5171_v42 = vor.u32 1.1754944e-38, %v5170_v28  ;;  %v9828_v45 = vpop.eup %9827  ;;  %v5163_v49 = vadd.f32 %v13179_v43, %v5162_v12 }
0x1762   : > { %6617 = vmatpush.msrb.mxu0 %v15154_v2  ;;  %vm5165_vm12 = vweird.f32 %v13179_v43  ;;  %v5388_v36 = vadd.f32 %v13230_v34, %v5387_v52  ;;  %vm5389_vm13 = vweird.f32 %v13125_v24  ;;  %v5102_v14 = vmul.f32 %v13211_v8, %v5101_v41 }
0x1763   : > { %vm5391_vm14 = vmor %vm5389_vm13, %vm5390_vm7  ;;  %v5396_v1 = vor.u32 1.1754944e-38, %v5395_v23  ;;  %9829 = vrcp.f32 %v13252_v7  ;;  %v5445_v21 = vmul.f32 %v9828_v45, %v13194_v4  ;;  %v5220_v53 = vmul.f32 %v13293_v32, %v13216_v19 }
0x1764   : > { %v5392_v35 = vsel %vm5391_vm14, %v13230_v34, %v5388_v36  ;;  %vm5394_vm15 = vcmp.eq.f32.partialorder %v5393_v56, 8.507059e+37  ;;  %9831 = vrcp.f32 %v13291_v54  ;;  %v4872_v24 = vsel %vm13273_vm5, %v4871_v33, %v4867_v10  ;;  %vm13320_vm1 = vmor %vm5164_vm8, %vm5165_vm12  ;;  %9008 = vmatmul.msk.f32.vlgmr.msra.gmra.mxu0 %vm4012_vm11, %v4633_v37  ;;  %v13326_v30 = vpop.xlane.xlu2 %4476 }
0x1765   : > { %v5108_v26 = vand.u32 2147483647, %v13134_v3  ;;  %v5397_v29 = vsel %vm5394_vm15, %v5396_v1, %v5392_v35  ;;  %v5446_v13 = vsub.f32 1.0, %v5445_v21  ;;  %v5167_v34 = vsel %vm13320_vm1, %v13179_v43, %v5163_v49  ;;  %v13369_v10 = vpop.xlane.xlu0 %4407 }
0x1766   : > { %vm5105_vm2 = vweird.f32 %v13211_v8  ;;  %v5398_v15 = vmul.f32 %v12711_v17, %v5397_v29  ;;  %v5455_v47 = vand.u32 2147483648, %v13194_v4  ;;  %v15159_v46 = vunpack.i.h.bf16 %v15106_v39 }
0x1767   : > { %v5103_v11 = vadd.f32 %v13211_v8, %v5102_v14  ;;  %v5447_v28 = vmul.f32 %v9828_v45, %v5446_v13  ;;  %vm5450_vm3 = vweird.f32 %v9828_v45  ;;  %v5453_v37 = vand.u32 2147483647, %v13194_v4 }
0x1768   : > { %6732 = vmatpush.msra.mxu0 %v15159_v46  ;;  %vm5104_vm4 = vweird.f32 %v13134_v3  ;;  %v5110_v43 = vand.u32 2147483648, %v13134_v3  ;;  %v5221_v12 = vsub.f32 1.0, %v5220_v53  ;;  %9833 = vrcp.f32 %v13257_v22  ;;  %9005 = vmatmul.msk.f32.vlgmr.msra.gmra.mxu1 %vm4012_vm11, %v5398_v15 }
0x1769   : > { %v15160_v17 = vunpack.i.h.bf16 %v15115_v38  ;;  %v13346_v55 = vpop.eup %9829  ;;  %v4873_v31 = vmul.f32 %v15161_v58, %v4872_v24  ;;  %vm13351_vm5 = vmor %vm5104_vm4, %vm5105_vm2  ;;  %vm13355_vm6 = vcmp.eq.f32.partialorder %v5108_v26, 8.507059e+37  ;;  %v5448_v23 = vadd.f32 %v9828_v45, %v5447_v28  ;;  %v15169_v26 = vld [vmem:[#allocation69_spill] sm:$0xff] }
0x176a   : > { %vm5449_vm7 = vweird.f32 %v13194_v4  ;;  %v15166_v51 = vunpack.i.l.bf16 %v15106_v39  ;;  %v13362_v33 = vpop.eup %9831  ;;  %v5172_v52 = vsel %vm13299_vm10, %v5171_v42, %v5167_v34  ;;  %v5228_v56 = vand.u32 2147483647, %v13216_v19 }
0x176b   : > { %6733 = vmatpush.msra.mxu0 %v15160_v17  ;;  %vm5451_vm8 = vmor %vm5449_vm7, %vm5450_vm3  ;;  %v5456_v2 = vor.u32 1.1754944e-38, %v5455_v47  ;;  %9835 = vrcp.f32 %v13338_v0  ;;  %v5107_v4 = vsel %vm13351_vm5, %v13211_v8, %v5103_v11  ;;  %vm5454_vm12 = vcmp.eq.f32.partialorder %v5453_v37, 8.507059e+37  ;;  %v15171_v37 = vld [vmem:[#allocation71_spill] sm:$0xff] }
0x176c   : > { %6645 = vmatpush.msra.mxu1 %v15166_v51  ;;  %v5452_v39 = vsel %vm5451_vm8, %v9828_v45, %v5448_v23  ;;  %v5280_v49 = vmul.f32 %v13362_v33, %v13291_v54  ;;  %v15167_v6 = vunpack.i.h.bf16 %v15094_v57  ;;  %v5111_v42 = vor.u32 1.1754944e-38, %v5110_v43  ;;  %9012 = vmatmul.msk.f32.vlgmr.msrb.gmra.mxu0 %vm4012_vm11, %v4873_v31 }
0x176d   : > { %v5222_v36 = vmul.f32 %v13293_v32, %v5221_v12  ;;  %vm5224_vm10 = vweird.f32 %v13216_v19  ;;  %v5230_v14 = vand.u32 2147483648, %v13216_v19  ;;  %v5457_v1 = vsel %vm5454_vm12, %v5456_v2, %v5452_v39 }
0x176e   : > { %6646 = vmatpush.msra.mxu1 %v15167_v6  ;;  %v5400_v21 = vmul.f32 %v13346_v55, %v13252_v7  ;;  %v5458_v8 = vmul.f32 %v12744_v63, %v5457_v1  ;;  %v5281_v45 = vsub.f32 1.0, %v5280_v49  ;;  %9837 = vrcp.f32 %v13369_v10  ;;  %v13386_v57 = vpop.eup %9833  ;;  %v13395_v63 = vpop.xlane.xlu2 %4464  ;;  %v15182_v6 = vld [vmem:[#allocation51_spill] sm:$0xff] }
0x176f   : > { %v5112_v53 = vsel %vm13355_vm6, %v5111_v42, %v5107_v4  ;;  %v5288_v35 = vand.u32 2147483647, %v13291_v54  ;;  %v5290_v24 = vand.u32 2147483648, %v13291_v54  ;;  %9839 = vrcp.f32 %v13326_v30 }
0x1770   : > { %v15168_v9 = vunpack.i.h.bf16 %v15116_v62  ;;  %v13398_v29 = vmul.f32 %v15169_v26, %v5172_v52  ;;  %v5282_v13 = vmul.f32 %v13362_v33, %v5281_v45  ;;  %vm5285_vm13 = vweird.f32 %v13362_v33  ;;  %9006 = vmatmul.msk.f32.vlgmr.msra.gmra.mxu2 %vm4012_vm11, %v5458_v8  ;;  %9009 = vmatmul.msk.f32.vlgmr.msrb.gmra.mxu1 %vm4012_vm11, %v13262_v59  ;;  %v15183_v8 = vld [vmem:[#allocation19_spill] sm:$0xff]  ;;  %v15186_v26 = vld [vmem:[#allocation28_spill] sm:$0xff] }
0x1771   : > { %v4740_v34 = vmul.f32 %v13386_v57, %v13257_v22  ;;  %v13405_v15 = vpop.eup %9835  ;;  %v13408_v47 = vadd.f32 %v13293_v32, %v5222_v36  ;;  %vm5225_vm14 = vweird.f32 %v13293_v32  ;;  %v5231_v46 = vor.u32 1.1754944e-38, %v5230_v14 }
0x1772   : > { %6848 = vmatpush.msrb.mxu0 %v15168_v9  ;;  %v5408_v11 = vand.u32 2147483647, %v13252_v7  ;;  %v15170_v28 = vunpack.i.l.bf16 %v15115_v38  ;;  %v5113_v43 = vmul.f32 %v15171_v37, %v5112_v53  ;;  %vm13417_vm15 = vcmp.eq.f32.partialorder %v5228_v56, 8.507059e+37  ;;  %vm13454_vm5 = vmor %vm5224_vm10, %vm5225_vm14  ;;  %v15185_v9 = vld [vmem:[#allocation27_spill] sm:$0xff] }
0x1773   : > { %v5283_v17 = vadd.f32 %v13362_v33, %v5282_v13  ;;  %vm5284_vm1 = vweird.f32 %v13291_v54  ;;  %v4741_v58 = vsub.f32 1.0, %v4740_v34  ;;  %v15174_v31 = vunpack.i.l.bf16 %v15116_v62 }
0x1774   : > { %6674 = vmatpush.msra.mxu2 %v15170_v28  ;;  %v15175_v41 = vunpack.i.h.bf16 %v15109_v25  ;;  %v5401_v59 = vsub.f32 1.0, %v5400_v21  ;;  %vm5286_vm2 = vmor %vm5284_vm1, %vm5285_vm13  ;;  %vm5289_vm3 = vcmp.eq.f32.partialorder %v5288_v35, 8.507059e+37  ;;  %v5291_v38 = vor.u32 1.1754944e-38, %v5290_v24  ;;  %v13432_v51 = vpop.eup %9837  ;;  %9016 = vmatmul.msk.f32.vlgmr.msra.gmra.mxu0 %vm4012_vm11, %v5113_v43 }
0x1775   : > { %6761 = vmatpush.msrb.mxu1 %v15174_v31  ;;  %v4750_v3 = vand.u32 2147483648, %v13257_v22  ;;  %v15176_v23 = vunpack.i.h.bf16 %v15095_v48  ;;  %v5287_v54 = vsel %vm5286_vm2, %v13362_v33, %v5283_v17  ;;  %v4742_v62 = vmul.f32 %v13386_v57, %v4741_v58  ;;  %v13440_v2 = vpop.eup %9839  ;;  %v15178_v33 = vld [vmem:[#allocation20_spill] sm:$0xff]  ;;  %v15188_v17 = vld [vmem:[#allocation165_spill] sm:$0xff] }
0x1776   : > { %6849 = vmatpush.msrb.mxu0 %v15175_v41  ;;  %vm4745_vm4 = vweird.f32 %v13386_v57  ;;  %v4748_v52 = vand.u32 2147483647, %v13257_v22  ;;  %v15177_v56 = vunpack.i.h.bf16 %v15108_v5  ;;  %v5410_v4 = vand.u32 2147483648, %v13252_v7  ;;  %v13474_v45 = vpop.xlane.xlu2 %4548 }
0x1777   : > { %6675 = vmatpush.msra.mxu2 %v15176_v23  ;;  %v4815_v48 = vmul.f32 %v13405_v15, %v13338_v0  ;;  %v5292_v39 = vsel %vm5289_vm3, %v5291_v38, %v5287_v54  ;;  %9841 = vrcp.f32 %v13395_v63  ;;  %v15179_v49 = vpack.i.bf16 %v15101_v60, %v15178_v33  ;;  %v13464_v60 = vpop.xlane.xlu1 %4419  ;;  %v13503_v54 = vpop.xlane.xlu0 %4431 }
0x1778   : > { %6762 = vmatpush.msrb.mxu1 %v15177_v56  ;;  %v5293_v42 = vmul.f32 %v15182_v6, %v5292_v39  ;;  %v4743_v36 = vadd.f32 %v13386_v57, %v4742_v62  ;;  %vm4744_vm6 = vweird.f32 %v13257_v22  ;;  %v4980_v14 = vmul.f32 %v13440_v2, %v13326_v30 }
0x1779   : > { %9455 = vrot.lane.b32.xlu2 %v15179_v49, %s9995_s8  ;;  %v5402_v1 = vmul.f32 %v13346_v55, %v5401_v59  ;;  %vm5404_vm7 = vweird.f32 %v13252_v7  ;;  %vm4746_vm8 = vmor %vm4744_vm6, %vm4745_vm4  ;;  %v4751_v19 = vor.u32 1.1754944e-38, %v4750_v3  ;;  %v4635_v21 = vmul.f32 %v13432_v51, %v13369_v10 }
0x177a   : > { %v15184_v22 = vunpack.i.l.bf16 %v15183_v8  ;;  %v5227_v53 = vsel %vm13454_vm5, %v13293_v32, %v13408_v47  ;;  %v4747_v35 = vsel %vm4746_vm8, %v13386_v57, %v4743_v36  ;;  %vm4749_vm12 = vcmp.eq.f32.partialorder %v4748_v52, 8.507059e+37  ;;  %9019 = vmatmul.msk.f32.vlgmr.msra.gmra.mxu3 %vm4012_vm11, %v5293_v42  ;;  %v15193_v47 = vld [vmem:[#allocation77_spill] sm:$0xff]  ;;  %v15206_v57 = vld [vmem:[#allocation16_spill] sm:$0xff] }
0x177b   : > { %v4981_v24 = vsub.f32 1.0, %v4980_v14  ;;  %v15187_v13 = vpack.i.bf16 %v15185_v9, %v15186_v26  ;;  %v5411_v34 = vor.u32 1.1754944e-38, %v5410_v4  ;;  %v4816_v28 = vsub.f32 1.0, %v4815_v48 }
0x177c   : > { %6964 = vmatpush.msra.mxu0 %v15184_v22  ;;  %v4752_v37 = vsel %vm4749_vm12, %v4751_v19, %v4747_v35  ;;  %v4990_v43 = vand.u32 2147483648, %v13326_v30  ;;  %v15189_v58 = vunpack.i.l.bf16 %v15188_v17  ;;  %v15190_v32 = vunpack.i.h.bf16 %v15183_v8 }
0x177d   : > { %9465 = vrot.lane.b32.xlu1 %v15187_v13, %s9995_s8  ;;  %vm13491_vm10 = vcmp.eq.f32.partialorder %v5408_v11, 8.507059e+37  ;;  %v4753_v31 = vmul.f32 %v15193_v47, %v4752_v37  ;;  %v4982_v41 = vmul.f32 %v13440_v2, %v4981_v24  ;;  %vm4985_vm13 = vweird.f32 %v13440_v2  ;;  %v9842_v38 = vpop.eup %9841 }
0x177e   : > { %7051 = vmatpush.msra.mxu3 %v15189_v58  ;;  %6965 = vmatpush.msra.mxu0 %v15190_v32  ;;  %v4988_v59 = vand.u32 2147483647, %v13326_v30  ;;  %v5232_v3 = vsel %vm13417_vm15, %v5231_v46, %v5227_v53  ;;  %v5403_v23 = vadd.f32 %v13346_v55, %v5402_v1  ;;  %vm5405_vm14 = vweird.f32 %v13346_v55  ;;  %v13538_v36 = vpop.xlane.xlu2 %4584 }
0x177f   : > { %v4636_v11 = vsub.f32 1.0, %v4635_v21  ;;  %v15194_v62 = vunpack.i.h.bf16 %v15188_v17  ;;  %v4983_v52 = vadd.f32 %v13440_v2, %v4982_v41  ;;  %vm4984_vm1 = vweird.f32 %v13326_v30  ;;  %9010 = vmatmul.msk.f32.vlgmr.msrb.gmra.mxu2 %vm4012_vm11, %v4753_v31  ;;  %vm13523_vm2 = vmor %vm5404_vm7, %vm5405_vm14  ;;  %v13529_v49 = vpop.xlane.xlu1 %4479  ;;  %v15200_v21 = vld [vmem:[#allocation101_spill] sm:$0xff] }
0x1780   : > { %v4920_v56 = vmul.f32 %v9842_v38, %v13395_v63  ;;  %9843 = vrcp.f32 %v13464_v60  ;;  %v4817_v46 = vmul.f32 %v13405_v15, %v4816_v28  ;;  %v4823_v12 = vand.u32 2147483647, %v13338_v0  ;;  %vm4986_vm15 = vmor %vm4984_vm1, %vm4985_vm13  ;;  %v15208_v41 = vld [vmem:[#allocation81_spill] sm:$0xff] }
0x1781   : > { %7052 = vmatpush.msra.mxu3 %v15194_v62  ;;  %v4991_v4 = vor.u32 1.1754944e-38, %v4990_v43  ;;  %v15195_v48 = vunpack.i.l.bf16 %v15109_v25  ;;  %9845 = vrcp.f32 %v13474_v45  ;;  %v4987_v39 = vsel %vm4986_vm15, %v13440_v2, %v4983_v52  ;;  %v15199_v2 = vld [vmem:[#allocation56_spill] sm:$0xff] }
0x1782   : > { %vm4989_vm3 = vcmp.eq.f32.partialorder %v4988_v59, 8.507059e+37  ;;  %9847 = vrcp.f32 %v13503_v54  ;;  %v4921_v33 = vsub.f32 1.0, %v4920_v56  ;;  %v5407_v25 = vsel %vm13523_vm2, %v13346_v55, %v5403_v23  ;;  %v15201_v55 = vld [vmem:[#allocation47_spill] sm:$0xff]  ;;  %v15209_v23 = vld [vmem:[#allocation49_spill] sm:$0xff] }
0x1783   : > { %6790 = vmatpush.msrb.mxu2 %v15195_v48  ;;  %v4637_v5 = vmul.f32 %v13432_v51, %v4636_v11  ;;  %v4992_v6 = vsel %vm4989_vm3, %v4991_v4, %v4987_v39  ;;  %v4930_v7 = vand.u32 2147483648, %v13395_v63  ;;  %v15198_v42 = vunpack.i.h.bf16 %v15117_v50 }
0x1784   : > { %v4993_v14 = vmul.f32 %v15199_v2, %v4992_v6  ;;  %v4922_v1 = vmul.f32 %v9842_v38, %v4921_v33  ;;  %vm4925_vm4 = vweird.f32 %v9842_v38  ;;  %v4928_v19 = vand.u32 2147483647, %v13395_v63 }
0x1785   : > { %6791 = vmatpush.msrb.mxu2 %v15198_v42  ;;  %9475 = vrot.lane.b32.xlu1 %v15200_v21, %s9995_s8  ;;  %v13545_v8 = vmul.f32 %v15201_v55, %v5232_v3  ;;  %vm4819_vm5 = vweird.f32 %v13338_v0  ;;  %vm13548_vm6 = vcmp.eq.f32.partialorder %v4823_v12, 8.507059e+37  ;;  %v4825_v50 = vand.u32 2147483648, %v13338_v0  ;;  %v15215_v21 = vld [vmem:[#allocation24_spill] sm:$0xff] }
0x1786   : > { %v13553_v53 = vpop.eup %9843  ;;  %v4818_v35 = vadd.f32 %v13405_v15, %v4817_v46  ;;  %vm4820_vm7 = vweird.f32 %v13405_v15  ;;  %v4923_v24 = vadd.f32 %v9842_v38, %v4922_v1  ;;  %vm4924_vm8 = vweird.f32 %v13395_v63  ;;  %v13603_v46 = vpop.xlane.xlu2 %4572 }
0x1787   : > { %v9846_v9 = vpop.eup %9845  ;;  %v5412_v26 = vsel %vm13491_vm10, %v5411_v34, %v5407_v25  ;;  %vm4640_vm12 = vweird.f32 %v13432_v51  ;;  %vm4926_vm13 = vmor %vm4924_vm8, %vm4925_vm4  ;;  %v4931_v13 = vor.u32 1.1754944e-38, %v4930_v7  ;;  %9849 = vrcp.f32 %v13538_v36  ;;  %9014 = vmatmul.msk.f32.vlgmr.msra.gmra.mxu2 %vm4012_vm11, %v4993_v14  ;;  %v13587_v3 = vpop.xlane.xlu1 %4455  ;;  %4587 = vadd.xlane.f32.xlu0 %v13270_v61 }
0x1788   : > { %v13563_v28 = vpop.eup %9847  ;;  %v4638_v37 = vadd.f32 %v13432_v51, %v4637_v5  ;;  %v4927_v43 = vsel %vm4926_vm13, %v9842_v38, %v4923_v24  ;;  %vm4929_vm14 = vcmp.eq.f32.partialorder %v4928_v19, 8.507059e+37  ;;  %v5340_v17 = vmul.f32 %v9846_v9, %v13474_v45  ;;  %vm13572_vm10 = vmor %vm4819_vm5, %vm4820_vm7 }
0x1789   : > { %vm4639_vm1 = vweird.f32 %v13369_v10  ;;  %v4643_v34 = vand.u32 2147483647, %v13369_v10  ;;  %v4645_v58 = vand.u32 2147483648, %v13369_v10  ;;  %v4932_v32 = vsel %vm4929_vm14, %v4931_v13, %v4927_v43  ;;  %v15219_v13 = vld [vmem:[#allocation75_spill] sm:$0xff] }
0x178a   : > { %v15207_v47 = vunpack.i.h.bf16 %v15206_v57  ;;  %v4822_v31 = vsel %vm13572_vm10, %v13405_v15, %v4818_v35  ;;  %v4933_v0 = vmul.f32 %v15208_v41, %v4932_v32  ;;  %v4695_v59 = vmul.f32 %v13553_v53, %v13464_v60  ;;  %vm13594_vm15 = vmor %vm4639_vm1, %vm4640_vm12 }
0x178b   : > { %v5341_v38 = vsub.f32 1.0, %v5340_v17  ;;  %v13590_v11 = vmul.f32 %v15209_v23, %v5412_v26  ;;  %v4826_v10 = vor.u32 1.1754944e-38, %v4825_v50  ;;  %v4755_v15 = vmul.f32 %v13563_v28, %v13503_v54  ;;  %v15217_v50 = vld [vmem:[#allocation53_spill] sm:$0xff] }
0x178c   : > { %6906 = vmatpush.msra.mxu2 %v15207_v47  ;;  %v5350_v52 = vand.u32 2147483648, %v13474_v45  ;;  %v15212_v56 = vunpack.i.h.bf16 %v15121_v20  ;;  %v4642_v12 = vsel %vm13594_vm15, %v13432_v51, %v4638_v37  ;;  %vm5345_vm2 = vweird.f32 %v9846_v9  ;;  %9013 = vmatmul.msk.f32.vlgmr.msra.gmra.mxu1 %vm4012_vm11, %v4933_v0  ;;  %v15225_v0 = vld [vmem:[#allocation21_spill] sm:$0xff] }
0x178d   : > { %v5342_v4 = vmul.f32 %v9846_v9, %v5341_v38  ;;  %v5348_v48 = vand.u32 2147483647, %v13474_v45  ;;  %v9850_v30 = vpop.eup %9849  ;;  %v4827_v39 = vsel %vm13548_vm6, %v4826_v10, %v4822_v31  ;;  %vm4644_vm3 = vcmp.eq.f32.partialorder %v4643_v34, 8.507059e+37  ;;  %v9441_v10 = vpop.permute.xlu0 %9440 }
0x178e   : > { %6907 = vmatpush.msra.mxu2 %v15212_v56  ;;  %v4646_v20 = vor.u32 1.1754944e-38, %v4645_v58  ;;  %v15213_v33 = vunpack.i.l.bf16 %v15112_v40  ;;  %9851 = vrcp.f32 %v13587_v3  ;;  %v4696_v61 = vsub.f32 1.0, %v4695_v59  ;;  %v13642_v63 = vpop.xlane.xlu2 %4467 }
0x178f   : > { %v5343_v25 = vadd.f32 %v9846_v9, %v5342_v4  ;;  %vm5344_vm4 = vweird.f32 %v13474_v45  ;;  %v5520_v51 = vmul.f32 %v9850_v30, %v13538_v36  ;;  %v4756_v6 = vsub.f32 1.0, %v4755_v15  ;;  %9018 = vmatmul.msk.f32.vlgmr.msrb.gmra.mxu2 %vm4012_vm11, %v13545_v8  ;;  %v15218_v8 = vld [vmem:[#allocation73_spill] sm:$0xff] }
0x1790   : > { %6877 = vmatpush.msra.mxu1 %v15213_v33  ;;  %v4647_v5 = vsel %vm4644_vm3, %v4646_v20, %v4642_v12  ;;  %vm5346_vm5 = vmor %vm5344_vm4, %vm5345_vm2  ;;  %v5351_v7 = vor.u32 1.1754944e-38, %v5350_v52  ;;  %9853 = vrcp.f32 %v13529_v49  ;;  %v15214_v42 = vunpack.i.l.bf16 %v15206_v57 }
0x1791   : > { %v5347_v40 = vsel %vm5346_vm5, %v9846_v9, %v5343_v25  ;;  %vm5349_vm6 = vcmp.eq.f32.partialorder %v5348_v48, 8.507059e+37  ;;  %v5521_v2 = vsub.f32 1.0, %v5520_v51  ;;  %9855 = vrcp.f32 %v13603_v46 }
0x1792   : > { %6878 = vmatpush.msra.mxu1 %v15214_v42  ;;  %v4703_v45 = vand.u32 2147483647, %v13464_v60  ;;  %v5352_v14 = vsel %vm5349_vm6, %v5351_v7, %v5347_v40  ;;  %v5528_v1 = vand.u32 2147483647, %v13538_v36  ;;  %v5530_v19 = vand.u32 2147483648, %v13538_v36 }
0x1793   : > { %v15216_v55 = vunpack.i.l.bf16 %v15215_v21  ;;  %v4697_v22 = vmul.f32 %v13553_v53, %v4696_v61  ;;  %v5353_v35 = vmul.f32 %v15217_v50, %v5352_v14  ;;  %v5522_v24 = vmul.f32 %v9850_v30, %v5521_v2 }
0x1794   : > { %vm5525_vm7 = vweird.f32 %v9850_v30  ;;  %v13632_v9 = vpop.eup %9851  ;;  %v13635_v26 = vmul.f32 %v15218_v8, %v4827_v39  ;;  %v4648_v37 = vmul.f32 %v15219_v13, %v4647_v5  ;;  %v4765_v43 = vand.u32 2147483648, %v13503_v54  ;;  %9017 = vmatmul.msk.f32.vlgmr.msrb.gmra.mxu1 %vm4012_vm11, %v13398_v29  ;;  %v15229_v39 = vld [vmem:[#allocation80_spill] sm:$0xff] }
0x1795   : > { %7022 = vmatpush.msrb.mxu2 %v15216_v55  ;;  %vm4699_vm8 = vweird.f32 %v13464_v60  ;;  %v15220_v17 = vunpack.i.h.bf16 %v15215_v21  ;;  %v4757_v34 = vmul.f32 %v13563_v28, %v4756_v6  ;;  %v5523_v58 = vadd.f32 %v9850_v30, %v5522_v24  ;;  %9020 = vmatmul.msk.f32.vlgmr.msrb.gmra.mxu0 %vm4012_vm11, %v5353_v35  ;;  %v15234_v35 = vld [vmem:[#allocation44_spill] sm:$0xff] }
0x1796   : > { %vm5524_vm12 = vweird.f32 %v13538_v36  ;;  %v4875_v32 = vmul.f32 %v13632_v9, %v13587_v3  ;;  %v13651_v57 = vpop.eup %9853  ;;  %vm4700_vm13 = vweird.f32 %v13553_v53  ;;  %vm13654_vm14 = vcmp.eq.f32.partialorder %v4703_v45, 8.507059e+37  ;;  %v15223_v36 = vld [vmem:[#allocation18_spill] sm:$0xff] }
0x1797   : > { %7023 = vmatpush.msrb.mxu2 %v15220_v17  ;;  %vm5526_vm10 = vmor %vm5524_vm12, %vm5525_vm7  ;;  %v5531_v31 = vor.u32 1.1754944e-38, %v5530_v19  ;;  %v15224_v41 = vunpack.i.l.bf16 %v15223_v36  ;;  %v15226_v59 = vunpack.i.l.bf16 %v15225_v0  ;;  %9857 = vrcp.f32 %v13642_v63  ;;  %v9856_v29 = vpop.eup %9855 }
0x1798   : > { %v4698_v38 = vadd.f32 %v13553_v53, %v4697_v22  ;;  %v5527_v23 = vsel %vm5526_vm10, %v9850_v30, %v5523_v58  ;;  %vm5529_vm1 = vcmp.eq.f32.partialorder %v5528_v1, 8.507059e+37  ;;  %v4876_v62 = vsub.f32 1.0, %v4875_v32  ;;  %vm13684_vm3 = vmor %vm4699_vm8, %vm4700_vm13  ;;  %v15232_v1 = vld [vmem:[#allocation46_spill] sm:$0xff] }
0x1799   : > { %6993 = vmatpush.msrb.mxu1 %v15224_v41  ;;  %7080 = vmatpush.msrb.mxu0 %v15226_v59  ;;  %vm4760_vm15 = vweird.f32 %v13563_v28  ;;  %v4705_v15 = vand.u32 2147483648, %v13464_v60  ;;  %v5532_v52 = vsel %vm5529_vm1, %v5531_v31, %v5527_v23  ;;  %v4885_v56 = vand.u32 2147483648, %v13587_v3  ;;  %v15238_v32 = vld [vmem:[#allocation82_spill] sm:$0xff] }
0x179a   : > { %v5460_v12 = vmul.f32 %v9856_v29, %v13603_v46  ;;  %v15227_v4 = vunpack.i.h.bf16 %v15223_v36  ;;  %v15228_v48 = vunpack.i.h.bf16 %v15225_v0  ;;  %v5533_v30 = vmul.f32 %v15229_v39, %v5532_v52  ;;  %v15239_v0 = vld [vmem:[#allocation40_spill] sm:$0xff] }
0x179b   : > { %v4877_v20 = vmul.f32 %v13632_v9, %v4876_v62  ;;  %vm4880_vm2 = vweird.f32 %v13632_v9  ;;  %v4883_v33 = vand.u32 2147483647, %v13587_v3  ;;  %v13678_v61 = vadd.f32 %v13563_v28, %v4757_v34  ;;  %v15243_v62 = vld [vmem:[#allocation58_spill] sm:$0xff] }
0x179c   : > { %6994 = vmatpush.msrb.mxu1 %v15227_v4  ;;  %7081 = vmatpush.msrb.mxu0 %v15228_v48  ;;  %v4995_v51 = vmul.f32 %v13651_v57, %v13529_v49  ;;  %v9442_v5 = vunpack.i.l.bf16 %v9441_v10  ;;  %v5461_v6 = vsub.f32 1.0, %v5460_v12  ;;  %v4702_v7 = vsel %vm13684_vm3, %v13553_v53, %v4698_v38  ;;  %v15240_v38 = vld [vmem:[#allocation14_spill] sm:$0xff] }
0x179d   : > { %v4878_v42 = vadd.f32 %v13632_v9, %v4877_v20  ;;  %vm4879_vm4 = vweird.f32 %v13587_v3  ;;  %v5470_v40 = vand.u32 2147483648, %v13603_v46  ;;  %9023 = vmatmul.msk.f32.vlgmr.msrb.gmra.mxu3 %vm4012_vm11, %v5533_v30  ;;  %v13697_v60 = vpop.eup %9857  ;;  %v4886_v2 = vor.u32 1.1754944e-38, %v4885_v56  ;;  %9021 = vmatmul.msk.f32.vlgmr.msra.gmra.mxu1 %vm4012_vm11, %v13590_v11  ;;  %v9446_v56 = vpop.permute.xlu1 %9445 }
0x179e   : > { %vm4881_vm5 = vmor %vm4879_vm4, %vm4880_vm2  ;;  %v5462_v45 = vmul.f32 %v9856_v29, %v5461_v6  ;;  %vm5465_vm6 = vweird.f32 %v9856_v29  ;;  %v5468_v14 = vand.u32 2147483647, %v13603_v46  ;;  %v15233_v19 = vunpack.i.l.bf16 %v15232_v1  ;;  %9024 = vmatmul.msk.f32.vlgmr.msra.gmra.mxu0 %vm4012_vm11, %v4648_v37  ;;  %v13754_v30 = vpop.f32.mrf.mxu0  ;;  %v15245_v6 = vld [vmem:[#allocation79_spill] sm:$0xff] }
0x179f   : > { %v4706_v53 = vor.u32 1.1754944e-38, %v4705_v15  ;;  %v4882_v21 = vsel %vm4881_vm5, %v13632_v9, %v4878_v42  ;;  %vm4884_vm7 = vcmp.eq.f32.partialorder %v4883_v33, 8.507059e+37  ;;  %v4935_v3 = vmul.f32 %v13697_v60, %v13642_v63  ;;  %7196 = vmatpush.msra.mxu0 %v9442_v5 }
0x17a0   : > { %7167 = vmatpush.msrb.mxu3 %v15233_v19  ;;  %v9443_v55 = vunpack.i.h.bf16 %v9441_v10  ;;  %v4887_v22 = vsel %vm4884_vm7, %v4886_v2, %v4882_v21  ;;  %v5463_v50 = vadd.f32 %v9856_v29, %v5462_v45  ;;  %vm5464_vm8 = vweird.f32 %v13603_v46 }
0x17a1   : > { %v15235_v24 = vunpack.i.l.bf16 %v15234_v35  ;;  %v4707_v9 = vsel %vm13654_vm14, %v4706_v53, %v4702_v7  ;;  %v4996_v8 = vsub.f32 1.0, %v4995_v51  ;;  %vm5466_vm12 = vmor %vm5464_vm8, %vm5465_vm6  ;;  %v5471_v13 = vor.u32 1.1754944e-38, %v5470_v40  ;;  %v15244_v51 = vld [vmem:[#allocation60_spill] sm:$0xff]  ;;  %v15246_v53 = vld [vmem:[#allocation62_spill] sm:$0xff] }
0x17a2   : > { %v4936_v17 = vsub.f32 1.0, %v4935_v3  ;;  %v15236_v11 = vunpack.i.h.bf16 %v15232_v1  ;;  %v5467_v37 = vsel %vm5466_vm12, %v9856_v29, %v5463_v50  ;;  %vm5469_vm13 = vcmp.eq.f32.partialorder %v5468_v14, 8.507059e+37  ;;  %7197 = vmatpush.msra.mxu0 %v9443_v55 }
0x17a3   : > { %7109 = vmatpush.msra.mxu1 %v15235_v24  ;;  %v4943_v34 = vand.u32 2147483647, %v13642_v63  ;;  %v4945_v46 = vand.u32 2147483648, %v13642_v63  ;;  %v15237_v58 = vunpack.i.h.bf16 %v15234_v35  ;;  %v4888_v47 = vmul.f32 %v15238_v32, %v4887_v22 }
0x17a4   : > { %7168 = vmatpush.msrb.mxu3 %v15236_v11  ;;  %v5472_v31 = vsel %vm5469_vm13, %v5471_v13, %v5467_v37  ;;  %v4937_v36 = vmul.f32 %v13697_v60, %v4936_v17  ;;  %vm4940_vm14 = vweird.f32 %v13697_v60  ;;  %vm4759_vm10 = vweird.f32 %v13503_v54 }
0x17a5   : > { %7110 = vmatpush.msra.mxu1 %v15237_v58  ;;  %v4763_v41 = vand.u32 2147483647, %v13503_v54  ;;  %v5473_v59 = vmul.f32 %v15239_v0, %v5472_v31  ;;  %v4526_v29 = vsel %vm4012_vm11, %v13259_v44, 0.0  ;;  %v9432_v23 = vunpack.i.l.bf16 %v15240_v38  ;;  %vm13731_vm1 = vmor %vm4759_vm10, %vm4760_vm15  ;;  %9027 = vmatmul.msk.f32.vlgmr.msra.gmra.mxu3 %vm4012_vm11, %v13635_v26  ;;  %v15248_v58 = vld [vmem:[#allocation30_spill] sm:$0xff] }
0x17a6   : > { %v4708_v15 = vmul.f32 %v15243_v62, %v4707_v9  ;;  %v4938_v52 = vadd.f32 %v13697_v60, %v4937_v36  ;;  %vm4939_vm2 = vweird.f32 %v13642_v63  ;;  %4527 = vadd.xlane.f32.xlu2 %v4526_v29  ;;  %v4762_v12 = vsel %vm13731_vm1, %v13563_v28, %v13678_v61  ;;  %9028 = vmatmul.msk.f32.vlgmr.msrb.gmra.mxu0 %vm4012_vm11, %v4888_v47  ;;  %v13768_v19 = vpop.f32.mrf.mxu0  ;;  %v15249_v36 = vld [vmem:[#allocation64_spill] sm:$0xff]  ;;  %v9915_v0 = vld [vmem:[%s14571_s2 + $0x40] sm:$0xff] }
0x17a7   : > { %v4997_v4 = vmul.f32 %v13651_v57, %v4996_v8  ;;  %vm4941_vm15 = vmor %vm4939_vm2, %vm4940_vm14  ;;  %v4946_v48 = vor.u32 1.1754944e-38, %v4945_v46  ;;  %9022 = vmatmul.msk.f32.vlgmr.msra.gmra.mxu2 %vm4012_vm11, %v5473_v59  ;;  %v9447_v39 = vunpack.i.l.bf16 %v9446_v56  ;;  %v4766_v63 = vor.u32 1.1754944e-38, %v4765_v43  ;;  %v9451_v43 = vpop.permute.xlu2 %9450  ;;  %v13776_v8 = vpop.f32.mrf.mxu3  ;;  %v15247_v46 = vld [vmem:[#allocation32_spill] sm:$0xff]  ;;  %v9916_v59 = vld [vmem:[%s14571_s2 + $0x38] sm:$0xff] }
0x17a8   : > { %v4942_v26 = vsel %vm4941_vm15, %v13697_v60, %v4938_v52  ;;  %vm4944_vm3 = vcmp.eq.f32.partialorder %v4943_v34, 8.507059e+37  ;;  %9025 = vmatmul.msk.f32.vlgmr.msrb.gmra.mxu1 %vm4012_vm11, %v4708_v15  ;;  %v9433_v28 = vunpack.i.h.bf16 %v15240_v38  ;;  %vm4764_vm4 = vcmp.eq.f32.partialorder %v4763_v41, 8.507059e+37  ;;  %7138 = vmatpush.msra.mxu2 %v9432_v23  ;;  %v13803_v15 = vpop.f32.mrf.mxu1 }
0x17a9   : > { %v4947_v20 = vsel %vm4944_vm3, %v4946_v48, %v4942_v26  ;;  %v9448_v33 = vunpack.i.h.bf16 %v9446_v56  ;;  %7225 = vmatpush.msrb.mxu1 %v9447_v39  ;;  %v4767_v61 = vsel %vm4764_vm4, %v4766_v63, %v4762_v12  ;;  %v4998_v54 = vadd.f32 %v13651_v57, %v4997_v4 }
0x17aa   : > { %vm5000_vm5 = vweird.f32 %v13651_v57  ;;  %7139 = vmatpush.msra.mxu2 %v9433_v28  ;;  %v5005_v25 = vand.u32 2147483648, %v13529_v49  ;;  %v4948_v5 = vmul.f32 %v15244_v51, %v4947_v20  ;;  %v4768_v7 = vmul.f32 %v15245_v6, %v4767_v61 }
0x17ab   : > { %7226 = vmatpush.msrb.mxu1 %v9448_v33  ;;  %vm4999_vm6 = vweird.f32 %v13529_v49  ;;  %v5003_v42 = vand.u32 2147483647, %v13529_v49  ;;  %v4574_v40 = vsel %vm4012_vm11, %v13278_v27, 0.0  ;;  %v9452_v60 = vunpack.i.l.bf16 %v9451_v43  ;;  %v4504_v49 = vpop.xlane.xlu0 %4503 }
0x17ac   : > { %vm5001_vm7 = vmor %vm4999_vm6, %vm5000_vm5  ;;  %v5006_v45 = vor.u32 1.1754944e-38, %v5005_v25  ;;  %v9453_v14 = vunpack.i.h.bf16 %v9451_v43  ;;  %9859 = vrcp.f32 %v4504_v49  ;;  %v5125_v35 = vand.u32 2147483648, %v4504_v49 }
0x17ad   : > { %v5002_v2 = vsel %vm5001_vm7, %v13651_v57, %v4998_v54  ;;  %vm5004_vm8 = vcmp.eq.f32.partialorder %v5003_v42, 8.507059e+37  ;;  %v13772_v57 = vpop.f32.mrf.mxu2  ;;  %v5123_v9 = vand.u32 2147483647, %v4504_v49  ;;  %vm5119_vm13 = vweird.f32 %v4504_v49  ;;  %v9917_v42 = vld [vmem:[%s14571_s2 + $0x28] sm:$0xff] }
0x17ae   : > { %4575 = vadd.xlane.f32.xlu2 %v4574_v40  ;;  %v5007_v1 = vsel %vm5004_vm8, %v5006_v45, %v5002_v2  ;;  %v13774_v55 = vpop.f32.mrf.mxu0  ;;  %v5126_v37 = vor.u32 1.1754944e-38, %v5125_v35  ;;  %v9469_v32 = vpack.i.bf16 %v15248_v58, %v15247_v46  ;;  %v9479_v29 = vpack.i.bf16 %v9916_v59, %v9915_v0  ;;  %v9918_v40 = vld [vmem:[%s14571_s2 + $0x30] sm:$0xff] }
0x17af   : > { %9026 = vmatmul.msk.f32.vlgmr.msrb.gmra.mxu2 %vm4012_vm11, %v4768_v7  ;;  %v5008_v21 = vmul.f32 %v15246_v53, %v5007_v1  ;;  %vm5124_vm10 = vcmp.eq.f32.partialorder %v5123_v9, 8.507059e+37  ;;  %v13795_v38 = vpop.f32.mrf.mxu3 }
0x17b0   : > { %9029 = vmatmul.msk.f32.vlgmr.msra.gmra.mxu1 %vm4012_vm11, %v4948_v5  ;;  %7254 = vmatpush.msrb.mxu2 %v9452_v60  ;;  %v13817_v20 = vpop.f32.mrf.mxu1  ;;  %v9484_v60 = vpack.i.bf16 %v9917_v42, %v9918_v40 }
0x17b1   : > { %9480 = vrot.lane.b32.xlu1 %v9479_v29, %s9988_s7 }
0x17b2   : > { %7255 = vmatpush.msrb.mxu2 %v9453_v14  ;;  %v9860_v3 = vpop.eup %9859  ;;  %9485 = vrot.lane.b32.xlu0 %v9484_v60, %s9988_s7 }
0x17b3   : > { %v5115_v22 = vmul.f32 %v9860_v3, %v4504_v49  ;;  %vm5120_vm12 = vweird.f32 %v9860_v3  ;;  %v13784_v31 = vpop.xlane.xlu0 %4539 }
0x17b4   : > { %vm5121_vm14 = vmor %vm5119_vm13, %vm5120_vm12  ;;  %9861 = vrcp.f32 %v13784_v31 }
0x17b5   : > { %v5116_v50 = vsub.f32 1.0, %v5115_v22  ;;  %v13778_v17 = vpop.f32.mrf.mxu2 }
0x17b6   : > { %v13780_v11 = vpop.f32.mrf.mxu0 }
0x17b7   : > { %9030 = vmatmul.msk.f32.vlgmr.msra.gmra.mxu2 %vm4012_vm11, %v5008_v21  ;;  %v5117_v24 = vmul.f32 %v9860_v3, %v5116_v50  ;;  %v13806_v56 = vpop.f32.mrf.mxu3 }
0x17b9   : > { %v5118_v13 = vadd.f32 %v9860_v3, %v5117_v24  ;;  %v13843_v24 = vpop.f32.mrf.mxu1 }
0x17ba   : > { %v13813_v48 = vpop.eup %9861 }
0x17bb   : > { %v5122_v34 = vsel %vm5121_vm14, %v9860_v3, %v5118_v13  ;;  %v13801_v62 = vpop.xlane.xlu0 %4563  ;;  %v5295_v61 = vmul.f32 %v13813_v48, %v13784_v31  ;;  %vm5300_vm7 = vweird.f32 %v13813_v48  ;;  %vm5299_vm14 = vweird.f32 %v13784_v31 }
0x17bc   : > { %v5127_v47 = vsel %vm5124_vm10, %v5126_v37, %v5122_v34 }
0x17bd   : > { %v5128_v41 = vmul.f32 %v15249_v36, %v5127_v47  ;;  %v13798_v10 = vpop.f32.mrf.mxu2  ;;  %v5296_v1 = vsub.f32 1.0, %v5295_v61  ;;  %v15250_v36 = vld [vmem:[#allocation84_spill] sm:$0xff] }
0x17be   : > { %v6039_v23 = vpop.f32.mrf.mxu0 }
0x17bf   : > { %9032 = vmatmul.msk.f32.vlgmr.msra.gmra.mxu0 %vm4012_vm11, %v5128_v41  ;;  %v13824_v25 = vpop.f32.mrf.mxu3  ;;  %v5297_v37 = vmul.f32 %v13813_v48, %v5296_v1 }
0x17c1   : > { %v13865_v60 = vpop.f32.mrf.mxu1 }
0x17c5   : > { %v13810_v4 = vpop.f32.mrf.mxu2 }
0x17c6   : > { %9470 = vrot.lane.b32.xlu2 %v9469_v32, %s9995_s8  ;;  %v13808_v12 = vpop.f32.mrf.mxu0 }
0x17c7   : > { %v4516_v52 = vpop.xlane.xlu1 %4515  ;;  %v13847_v32 = vpop.f32.mrf.mxu3 }
0x17c8   : > { %9863 = vrcp.f32 %v4516_v52  ;;  %v5185_v7 = vand.u32 2147483648, %v4516_v52  ;;  %v5183_v14 = vand.u32 2147483647, %v4516_v52  ;;  %vm5179_vm2 = vweird.f32 %v4516_v52 }
0x17c9   : > { %9865 = vrcp.f32 %v13801_v62 }
0x17ca   : > { %v5186_v3 = vor.u32 1.1754944e-38, %v5185_v7  ;;  %vm5184_vm3 = vcmp.eq.f32.partialorder %v5183_v14, 8.507059e+37 }
0x17cd   : > { %v13837_v2 = vpop.f32.mrf.mxu2 }
0x17ce   : > { %7421 = vrot.lane.b32.xlu2 %v6039_v23, %s9998_s21  ;;  %v9864_v63 = vpop.eup %9863  ;;  %v13815_v28 = vpop.xlane.xlu2 %4491 }
0x17cf   : > { %v9461_v39 = vpop.permute.xlu0 %9460  ;;  %v5175_v33 = vmul.f32 %v9864_v63, %v4516_v52  ;;  %9867 = vrcp.f32 %v13815_v28  ;;  %v13826_v51 = vpop.f32.mrf.mxu0  ;;  %vm5180_vm1 = vweird.f32 %v9864_v63  ;;  %v5065_v0 = vand.u32 2147483648, %v13815_v28 }
0x17d0   : > { %v9462_v26 = vunpack.i.l.bf16 %v9461_v39  ;;  %v9463_v54 = vunpack.i.h.bf16 %v9461_v39  ;;  %v13822_v43 = vpop.xlane.xlu1 %4551  ;;  %v13829_v6 = vpop.eup %9865  ;;  %vm5181_vm15 = vmor %vm5179_vm2, %vm5180_vm1  ;;  %v5063_v52 = vand.u32 2147483647, %v13815_v28  ;;  %vm5059_vm5 = vweird.f32 %v13815_v28 }
0x17d1   : > { %v5176_v5 = vsub.f32 1.0, %v5175_v33  ;;  %9869 = vrcp.f32 %v13822_v43  ;;  %v5415_v53 = vmul.f32 %v13829_v6, %v13801_v62  ;;  %v5066_v42 = vor.u32 1.1754944e-38, %v5065_v0  ;;  %vm13876_vm2 = vmor %vm5299_vm14, %vm5300_vm7 }
0x17d2   : > { %7312 = vmatpush.msrb.mxu0 %v9462_v26  ;;  %v5365_v26 = vand.u32 2147483648, %v13822_v43  ;;  %vm5064_vm12 = vcmp.eq.f32.partialorder %v5063_v52, 8.507059e+37  ;;  %vm5359_vm13 = vweird.f32 %v13822_v43 }
0x17d3   : > { %v5177_v45 = vmul.f32 %v9864_v63, %v5176_v5  ;;  %v5416_v47 = vsub.f32 1.0, %v5415_v53  ;;  %v5298_v5 = vadd.f32 %v13813_v48, %v5297_v37  ;;  %v5303_v53 = vand.u32 2147483647, %v13784_v31 }
0x17d4   : > { %7313 = vmatpush.msrb.mxu0 %v9463_v54  ;;  %v5363_v54 = vand.u32 2147483647, %v13822_v43  ;;  %v5366_v1 = vor.u32 1.1754944e-38, %v5365_v26 }
0x17d5   : > { %v9868_v49 = vpop.eup %9867  ;;  %v5178_v21 = vadd.f32 %v9864_v63, %v5177_v45  ;;  %v5417_v7 = vmul.f32 %v13829_v6, %v5416_v47  ;;  %v5305_v45 = vand.u32 2147483648, %v13784_v31 }
0x17d6   : > { %v5055_v22 = vmul.f32 %v9868_v49, %v13815_v28  ;;  %v9456_v50 = vpop.permute.xlu2 %9455  ;;  %vm5060_vm4 = vweird.f32 %v9868_v49  ;;  %vm5364_vm1 = vcmp.eq.f32.partialorder %v5363_v54, 8.507059e+37 }
0x17d7   : > { %v9870_v35 = vpop.eup %9869  ;;  %v5182_v9 = vsel %vm5181_vm15, %v9864_v63, %v5178_v21  ;;  %v9457_v13 = vunpack.i.l.bf16 %v9456_v50  ;;  %v9458_v29 = vunpack.i.h.bf16 %v9456_v50  ;;  %v13854_v63 = vpop.f32.mrf.mxu2  ;;  %vm5061_vm8 = vmor %vm5059_vm5, %vm5060_vm4  ;;  %v5418_v31 = vadd.f32 %v13829_v6, %v5417_v7 }
0x17d8   : > { %v5187_v34 = vsel %vm5184_vm3, %v5186_v3, %v5182_v9  ;;  %v5056_v46 = vsub.f32 1.0, %v5055_v22  ;;  %v5355_v58 = vmul.f32 %v9870_v35, %v13822_v43  ;;  %vm5360_vm6 = vweird.f32 %v9870_v35 }
0x17d9   : > { %v5188_v41 = vmul.f32 %v15250_v36, %v5187_v34  ;;  %v13851_v59 = vpop.f32.mrf.mxu0  ;;  %7283 = vmatpush.msra.mxu3 %v9457_v13  ;;  %vm5361_vm10 = vmor %vm5359_vm13, %vm5360_vm6  ;;  %v5302_v9 = vsel %vm13876_vm2, %v13813_v48, %v5298_v5  ;;  %vm5420_vm15 = vweird.f32 %v13829_v6  ;;  %v5306_v37 = vor.u32 1.1754944e-38, %v5305_v45  ;;  %v15254_v36 = vld [vmem:[#allocation68_spill] sm:$0xff] }
0x17da   : > { %v5057_v23 = vmul.f32 %v9868_v49, %v5056_v46  ;;  %v5356_v39 = vsub.f32 1.0, %v5355_v58  ;;  %v5425_v34 = vand.u32 2147483648, %v13801_v62  ;;  %vm5304_vm3 = vcmp.eq.f32.partialorder %v5303_v53, 8.507059e+37 }
0x17db   : > { %7284 = vmatpush.msra.mxu3 %v9458_v29  ;;  %9033 = vmatmul.msk.f32.vlgmr.msrb.gmra.mxu1 %vm4012_vm11, %v5188_v41  ;;  %vm5419_vm4 = vweird.f32 %v13801_v62  ;;  %v5423_v48 = vand.u32 2147483647, %v13801_v62  ;;  %v5307_v46 = vsel %vm5304_vm3, %v5306_v37, %v5302_v9  ;;  %v13896_v29 = vpop.f32.mrf.mxu1 }
0x17dc   : > { %v5058_v33 = vadd.f32 %v9868_v49, %v5057_v23  ;;  %v5357_v61 = vmul.f32 %v9870_v35, %v5356_v39  ;;  %vm5421_vm5 = vmor %vm5419_vm4, %vm5420_vm15  ;;  %v5426_v47 = vor.u32 1.1754944e-38, %v5425_v34  ;;  %v5308_v41 = vmul.f32 %v15254_v36, %v5307_v46 }
0x17dd   : > { %v5422_v58 = vsel %vm5421_vm5, %v13829_v6, %v5418_v31  ;;  %vm5424_vm6 = vcmp.eq.f32.partialorder %v5423_v48, 8.507059e+37  ;;  %v15255_v6 = vld [vmem:[#allocation87_spill] sm:$0xff] }
0x17de   : > { %v5062_v28 = vsel %vm5061_vm8, %v9868_v49, %v5058_v33  ;;  %v5358_v40 = vadd.f32 %v9870_v35, %v5357_v61  ;;  %v13872_v49 = vpop.f32.mrf.mxu3  ;;  %v5427_v52 = vsel %vm5424_vm6, %v5426_v47, %v5422_v58  ;;  %vm7629_vm6 = vcmask 195584  }
0x17df   : > { %v5067_v14 = vsel %vm5064_vm12, %v5066_v42, %v5062_v28  ;;  %v13888_v13 = vpop.f32.mrf.mxu2  ;;  %v5428_v33 = vmul.f32 %v15255_v6, %v5427_v52 }
0x17e0   : > { %v5068_v21 = vmul.f32 %v13104_v18, %v5067_v14  ;;  %v5362_v3 = vsel %vm5361_vm10, %v9870_v35, %v5358_v40  ;;  %v15253_v18 = vld [vmem:[#allocation83_spill] sm:$0xff] }
0x17e1   : > { %v5367_v22 = vsel %vm5364_vm1, %v5366_v1, %v5362_v3  ;;  %v6503_v50 = vpop.f32.mrf.mxu0 }
0x17e2   : > { %v5368_v35 = vmul.f32 %v15253_v18, %v5367_v22  ;;  %7485 = vrot.lane.b32.xlu1 %v6503_v50, %s9999_s29  ;;  %9031 = vmatmul.msk.f32.vlgmr.msrb.gmra.mxu3 %vm4012_vm11, %v5068_v21 }
0x17e4   : > { %9036 = vmatmul.msk.f32.vlgmr.msrb.gmra.mxu0 %vm4012_vm11, %v5368_v35 }
0x17e5   : > { %v13907_v54 = vpop.f32.mrf.mxu1 }
0x17e6   : > { %v13898_v23 = vpop.f32.mrf.mxu3 }
0x17e7   : > { %v13903_v62 = vpop.f32.mrf.mxu2 }
0x17e9   : > { %v6619_v40 = vpop.f32.mrf.mxu0 }
0x17ea   : > { %7423 = vrot.lane.b32.xlu1 %v13843_v24, %s9998_s21  ;;  %9035 = vmatmul.msk.f32.vlgmr.msra.gmra.mxu3 %vm4012_vm11, %v5308_v41 }
0x17ed   : > { %v6532_v14 = vpop.f32.mrf.mxu1 }
0x17ee   : > { %v13909_v7 = vpop.f32.mrf.mxu3 }
0x17ef   : > { %v9466_v0 = vpop.permute.xlu1 %9465 }
0x17f0   : > { %v9467_v39 = vunpack.i.l.bf16 %v9466_v0  ;;  %v9468_v26 = vunpack.i.h.bf16 %v9466_v0 }
0x17f1   : > { %v13916_v43 = vpop.f32.mrf.mxu0 }
0x17f2   : > { %7341 = vmatpush.msra.mxu1 %v9467_v39 }
0x17f3   : > { %v13911_v42 = vpop.f32.mrf.mxu2 }
0x17f4   : > { %7342 = vmatpush.msra.mxu1 %v9468_v26 }
0x17f5   : > { %9037 = vmatmul.msk.f32.vlgmr.msra.gmra.mxu1 %vm4012_vm11, %v5428_v33 }
0x17f6   : > { %v13913_v45 = vpop.f32.mrf.mxu3 }
0x17f7   : > { %v9476_v61 = vpop.permute.xlu1 %9475 }
0x17f8   : > { %v9477_v5 = vunpack.i.l.bf16 %v9476_v61  ;;  %v9478_v24 = vunpack.i.h.bf16 %v9476_v61 }
0x17fa   : > { %7399 = vmatpush.msrb.mxu3 %v9477_v5  ;;  %v4588_v28 = vpop.xlane.xlu0 %4587 }
0x17fb   : > { %9871 = vrcp.f32 %v4588_v28  ;;  %v5545_v22 = vand.u32 2147483648, %v4588_v28  ;;  %v5543_v31 = vand.u32 2147483647, %v4588_v28  ;;  %vm5539_vm8 = vweird.f32 %v4588_v28 }
0x17fc   : > { %7400 = vmatpush.msrb.mxu3 %v9478_v24 }
0x17fd   : > { %v5546_v37 = vor.u32 1.1754944e-38, %v5545_v22  ;;  %vm5544_vm13 = vcmp.eq.f32.partialorder %v5543_v31, 8.507059e+37 }
0x17fe   : > { %v6590_v18 = vpop.f32.mrf.mxu3 }
0x1801   : > { %v9872_v53 = vpop.eup %9871 }
0x1802   : > { %v6561_v1 = vpop.f32.mrf.mxu2  ;;  %v5535_v21 = vmul.f32 %v9872_v53, %v4588_v28  ;;  %vm5540_vm7 = vweird.f32 %v9872_v53 }
0x1803   : > { %7489 = vrot.lane.b32.xlu0 %v6561_v1, %s9999_s29  ;;  %vm5541_vm12 = vmor %vm5539_vm8, %vm5540_vm7 }
0x1804   : > { %v5536_v3 = vsub.f32 1.0, %v5535_v21 }
0x1806   : > { %v5537_v9 = vmul.f32 %v9872_v53, %v5536_v3  ;;  %v6706_v26 = vpop.f32.mrf.mxu3 }
0x1808   : > { %v5538_v35 = vadd.f32 %v9872_v53, %v5537_v9 }
0x1809   : > { %v6648_v50 = vpop.f32.mrf.mxu1 }
0x180a   : > { %v5542_v34 = vsel %vm5541_vm12, %v9872_v53, %v5538_v35  ;;  %v6677_v36 = vpop.f32.mrf.mxu2 }
0x180b   : > { %7491 = vrot.lane.b32.xlu0 %v6590_v18, %s9999_s29  ;;  %v5547_v48 = vsel %vm5544_vm13, %v5546_v37, %v5542_v34 }
0x180c   : > { %v5548_v46 = vmul.f32 %v13220_v16, %v5547_v48 }
0x180e   : > { %9039 = vmatmul.msk.f32.vlgmr.msrb.gmra.mxu3 %vm4012_vm11, %v5548_v46  ;;  %v6822_v21 = vpop.f32.mrf.mxu3 }
0x1811   : > { %v13920_v58 = vpop.f32.mrf.mxu1 }
0x1812   : > { %v13922_v47 = vpop.f32.mrf.mxu0  ;;  %v6793_v33 = vpop.f32.mrf.mxu2 }
0x1813   : > { %7493 = vrot.lane.b32.xlu0 %v6619_v40, %s9999_s29 }
0x1819   : > { %v4528_v41 = vpop.xlane.xlu2 %4527 }
0x181a   : > { %9873 = vrcp.f32 %v4528_v41  ;;  %v13926_v0 = vpop.f32.mrf.mxu1  ;;  %v5245_v5 = vand.u32 2147483648, %v4528_v41  ;;  %v5243_v28 = vand.u32 2147483647, %v4528_v41  ;;  %vm5239_vm10 = vweird.f32 %v4528_v41 }
0x181b   : > { %v6967_v52 = vpop.f32.mrf.mxu0  ;;  %7495 = vrot.lane.b32.xlu0 %v6648_v50, %s9999_s29 }
0x181c   : > { %7549 = vrot.lane.b32.xlu2 %v6967_v52, %s10000_s14  ;;  %v5246_v3 = vor.u32 1.1754944e-38, %v5245_v5  ;;  %vm5244_vm2 = vcmp.eq.f32.partialorder %v5243_v28, 8.507059e+37 }
0x1820   : > { %v9874_v39 = vpop.eup %9873  ;;  %v6938_v52 = vpop.f32.mrf.mxu3 }
0x1821   : > { %v5235_v16 = vmul.f32 %v9874_v39, %v4528_v41  ;;  %v4576_v6 = vpop.xlane.xlu2 %4575  ;;  %vm5240_vm14 = vweird.f32 %v9874_v39 }
0x1822   : > { %9875 = vrcp.f32 %v4576_v6  ;;  %vm5241_vm1 = vmor %vm5239_vm10, %vm5240_vm14  ;;  %v5485_v48 = vand.u32 2147483648, %v4576_v6  ;;  %v5483_v41 = vand.u32 2147483647, %v4576_v6  ;;  %vm5479_vm3 = vweird.f32 %v4576_v6 }
0x1823   : > { %v5236_v61 = vsub.f32 1.0, %v5235_v16  ;;  %7497 = vrot.lane.b32.xlu0 %v6677_v36, %s9999_s29 }
0x1824   : > { %7487 = vrot.lane.b32.xlu2 %v6532_v14, %s9999_s29  ;;  %vm5484_vm5 = vcmp.eq.f32.partialorder %v5483_v41, 8.507059e+37 }
0x1825   : > { %v5237_v24 = vmul.f32 %v9874_v39, %v5236_v61  ;;  %v6996_v40 = vpop.f32.mrf.mxu1 }
0x1826   : > { %7551 = vrot.lane.b32.xlu1 %v6996_v40, %s10000_s14 }
0x1827   : > { %v5238_v1 = vadd.f32 %v9874_v39, %v5237_v24 }
0x1828   : > { %v9876_v53 = vpop.eup %9875 }
0x1829   : > { %v5242_v22 = vsel %vm5241_vm1, %v9874_v39, %v5238_v1  ;;  %v5475_v50 = vmul.f32 %v9876_v53, %v4576_v6  ;;  %v9471_v9 = vpop.permute.xlu2 %9470  ;;  %vm5480_vm15 = vweird.f32 %v9876_v53  ;;  %v5486_v39 = vor.u32 1.1754944e-38, %v5485_v48 }
0x182a   : > { %v5247_v31 = vsel %vm5244_vm2, %v5246_v3, %v5242_v22  ;;  %v6909_v18 = vpop.f32.mrf.mxu2  ;;  %v9472_v35 = vunpack.i.l.bf16 %v9471_v9  ;;  %v9473_v14 = vunpack.i.h.bf16 %v9471_v9  ;;  %vm5481_vm4 = vmor %vm5479_vm3, %vm5480_vm15 }
0x182b   : > { %v5248_v37 = vmul.f32 %v13259_v44, %v5247_v31  ;;  %v5476_v34 = vsub.f32 1.0, %v5475_v50  ;;  %7499 = vrot.lane.b32.xlu0 %v6706_v26, %s9999_s29  ;;  %v9481_v26 = vpop.permute.xlu1 %9480 }
0x182c   : > { %7370 = vmatpush.msra.mxu2 %v9472_v35  ;;  %7425 = vrot.lane.b32.xlu2 %v13854_v63, %s9998_s21  ;;  %v7054_v63 = vpop.f32.mrf.mxu3  ;;  %v9483_v6 = vunpack.i.h.bf16 %v9481_v26  ;;  %v9482_v24 = vunpack.i.l.bf16 %v9481_v26 }
0x182d   : > { %v5477_v46 = vmul.f32 %v9876_v53, %v5476_v34  ;;  %9034 = vmatmul.msk.f32.vlgmr.msrb.gmra.mxu2 %vm4012_vm11, %v5248_v37 }
0x182e   : > { %7371 = vmatpush.msra.mxu2 %v9473_v14  ;;  %7721 = vmatpush.msra.mxu0 %v9482_v24 }
0x182f   : > { %v5478_v36 = vadd.f32 %v9876_v53, %v5477_v46 }
0x1830   : > { %7722 = vmatpush.msra.mxu0 %v9483_v6 }
0x1831   : > { %v5482_v44 = vsel %vm5481_vm4, %v9876_v53, %v5478_v36 }
0x1832   : > { %v5487_v16 = vsel %vm5484_vm5, %v5486_v39, %v5482_v44  ;;  %v7025_v61 = vpop.f32.mrf.mxu2 }
0x1833   : > { %v5488_v5 = vmul.f32 %v13278_v27, %v5487_v16  ;;  %7553 = vrot.lane.b32.xlu1 %v7025_v61, %s10000_s14  ;;  %7501 = vrot.lane.b32.xlu0 %v13916_v43, %s9999_s29  ;;  %v7083_v27 = vpop.f32.mrf.mxu0 }
0x1834   : > { %7427 = vrot.lane.b32.xlu2 %v13872_v49, %s9998_s21  ;;  %v7112_v49 = vpop.f32.mrf.mxu1 }
0x1835   : > { %9038 = vmatmul.msk.f32.vlgmr.msra.gmra.mxu2 %vm4012_vm11, %v5488_v5 }
0x183a   : > { %v7141_v28 = vpop.f32.mrf.mxu2 }
0x183b   : > { %7555 = vrot.lane.b32.xlu1 %v7054_v63, %s10000_s14  ;;  %7503 = vrot.lane.b32.xlu0 %v13920_v58, %s9999_s29 }
0x183c   : > { %7429 = vrot.lane.b32.xlu2 %v13808_v12, %s9998_s21  ;;  %v9486_v12 = vpop.permute.xlu0 %9485 }
0x183d   : > { %v9488_v43 = vunpack.i.h.bf16 %v9486_v12  ;;  %v9487_v58 = vunpack.i.l.bf16 %v9486_v12 }
0x183f   : > { %7723 = vmatpush.msra.mxu0 %v9487_v58 }
0x1841   : > { %7724 = vmatpush.msra.mxu0 %v9488_v43 }
0x1843   : > { %7557 = vrot.lane.b32.xlu1 %v7083_v27, %s10000_s14  ;;  %7505 = vrot.lane.b32.xlu0 %v6793_v33, %s9999_s29 }
0x1844   : > { %7431 = vrot.lane.b32.xlu2 %v13865_v60, %s9998_s21 }
0x184b   : > { %7559 = vrot.lane.b32.xlu1 %v7112_v49, %s10000_s14  ;;  %7507 = vrot.lane.b32.xlu0 %v6822_v21, %s9999_s29 }
0x184c   : > { %7433 = vrot.lane.b32.xlu2 %v13888_v13, %s9998_s21  ;;  %v7422_v13 = vpop.permute.xlu2 %7421 }
0x1853   : > { %7561 = vrot.lane.b32.xlu1 %v7141_v28, %s10000_s14  ;;  %7509 = vrot.lane.b32.xlu0 %v13922_v47, %s9999_s29 }
0x1854   : > { %7435 = vrot.lane.b32.xlu2 %v13898_v23, %s9998_s21  ;;  %v7486_v23 = vpop.permute.xlu1 %7485 }
0x1858   : > { %v7228_v33 = vpop.f32.mrf.mxu1 }
0x185b   : > { %7511 = vrot.lane.b32.xlu0 %v13926_v0, %s9999_s29 }
0x185c   : > { %7437 = vrot.lane.b32.xlu2 %v13826_v51, %s9998_s21  ;;  %v7597_v51 = vsel %vm394_vm0, %v13772_v57, %v7422_v13 }
0x185d   : > { %v7613_v47 = vsel %vm4012_vm11, %v7597_v51, %v7486_v23 }
0x1863   : > { %7513 = vrot.lane.b32.xlu0 %v6909_v18, %s9999_s29 }
0x1864   : > { %7439 = vrot.lane.b32.xlu2 %v13896_v29, %s9998_s21  ;;  %v7199_v29 = vpop.f32.mrf.mxu0 }
0x1865   : > { %v7170_v60 = vpop.f32.mrf.mxu3 }
0x1866   : > { %7563 = vrot.lane.b32.xlu1 %v7170_v60, %s10000_s14 }
0x186b   : > { %7515 = vrot.lane.b32.xlu0 %v6938_v52, %s9999_s29 }
0x186c   : > { %7441 = vrot.lane.b32.xlu2 %v13903_v62, %s9998_s21  ;;  %v7315_v6 = vpop.f32.mrf.mxu0 }
0x186d   : > { %v7286_v44 = vpop.f32.mrf.mxu3 }
0x186e   : > { %7565 = vrot.lane.b32.xlu1 %v7199_v29, %s10000_s14 }
0x1872   : > { %v7344_v58 = vpop.f32.mrf.mxu1 }
0x1874   : > { %7443 = vrot.lane.b32.xlu2 %v13909_v7, %s9998_s21  ;;  %v7424_v7 = vpop.permute.xlu1 %7423 }
0x1875   : > { %v7598_v53 = vsel %vm394_vm0, %v13776_v8, %v7424_v7 }
0x1876   : > { %v7550_v0 = vpop.permute.xlu2 %7549  ;;  %7567 = vrot.lane.b32.xlu1 %v7228_v33, %s10000_s14 }
0x1877   : > { %v7630_v62 = vsel %vm7629_vm6, %v7613_v47, %v7550_v0 }
0x1878   : > { %9040 = vmatmul.msk.f32.vlgmr.msra.gmra.mxu0 %vm508_vm9, %v7630_v62 }
0x187c   : > { %7445 = vrot.lane.b32.xlu2 %v13851_v59, %s9998_s21 }
0x187e   : > { %v7488_v40 = vpop.permute.xlu2 %7487 }
0x187f   : > { %v7614_v59 = vsel %vm4012_vm11, %v7598_v53, %v7488_v40 }
0x1884   : > { %7447 = vrot.lane.b32.xlu2 %v13907_v54, %s9998_s21  ;;  %v7490_v54 = vpop.permute.xlu0 %7489 }
0x1886   : > { %v7426_v57 = vpop.permute.xlu2 %7425 }
0x188c   : > { %7449 = vrot.lane.b32.xlu2 %v13911_v42, %s9998_s21  ;;  %v9919_v42 = vld [vmem:[%s14572_s3 + $0x1] ss:$0 sm:$0xff]  ;;  %v7492_v8 = vpop.permute.xlu0 %7491 }
0x188e   : > { %v7428_v1 = vpop.permute.xlu2 %7427 }
0x188f   : > { %v7600_v37 = vsel %vm394_vm0, %v13778_v17, %v7428_v1 }
0x1890   : > { %v7616_v48 = vsel %vm4012_vm11, %v7600_v37, %v7492_v8  ;;  %v15256_v8 = vld [vmem:[#allocation127_spill] sm:$0xff]  ;;  %v15257_v37 = vld [vmem:[#allocation130_spill] sm:$0xff] }
0x1891   : > { %v7402_v23 = vpop.f32.mrf.mxu3 }
0x1894   : > { %7451 = vrot.lane.b32.xlu2 %v13913_v45, %s9998_s21  ;;  %v7599_v45 = vsel %vm394_vm0, %v13754_v30, %v7426_v57  ;;  %v7494_v46 = vpop.permute.xlu0 %7493 }
0x1895   : > { %v7615_v31 = vsel %vm4012_vm11, %v7599_v45, %v7490_v54 }
0x1896   : > { %v7430_v3 = vpop.permute.xlu2 %7429 }
0x1897   : > { %v7601_v36 = vsel %vm394_vm0, %v13795_v38, %v7430_v3 }
0x1898   : > { %v7552_v21 = vpop.permute.xlu1 %7551  ;;  %v7617_v39 = vsel %vm4012_vm11, %v7601_v36, %v7494_v46 }
0x1899   : > { %v7631_v22 = vsel %vm7629_vm6, %v7614_v59, %v7552_v21 }
0x189a   : > { %9041 = vmatmul.msk.f32.gmra.mxu0 %vm508_vm9, %v7631_v22 }
0x189c   : > { %7658 = vrot.lane.b32.xlu2 %v9919_v42, %s9988_s7  ;;  %v7496_v61 = vpop.permute.xlu0 %7495 }
0x189e   : > { %v7432_v50 = vpop.permute.xlu2 %7431 }
0x189f   : > { %v7602_v5 = vsel %vm394_vm0, %v13768_v19, %v7432_v50 }
0x18a0   : > { %v7618_v26 = vsel %vm4012_vm11, %v7602_v5, %v7496_v61 }
0x18a4   : > { %v7498_v49 = vpop.permute.xlu0 %7497 }
0x18a5   : > { %v7554_v9 = vpop.permute.xlu1 %7553 }
0x18a6   : > { %v7632_v18 = vsel %vm7629_vm6, %v7615_v31, %v7554_v9  ;;  %v7434_v35 = vpop.permute.xlu2 %7433 }
0x18a7   : > { %9042 = vmatmul.msk.f32.gmra.mxu0 %vm508_vm9, %v7632_v18  ;;  %v7603_v27 = vsel %vm394_vm0, %v13798_v10, %v7434_v35 }
0x18a8   : > { %v7619_v43 = vsel %vm4012_vm11, %v7603_v27, %v7498_v49 }
0x18ac   : > { %v7500_v10 = vpop.permute.xlu0 %7499 }
0x18ad   : > { %v7556_v34 = vpop.permute.xlu1 %7555 }
0x18ae   : > { %v7633_v14 = vsel %vm7629_vm6, %v7616_v48, %v7556_v34  ;;  %v7436_v30 = vpop.permute.xlu2 %7435 }
0x18af   : > { %9043 = vmatmul.msk.f32.gmra.mxu0 %vm508_vm9, %v7633_v14  ;;  %v7604_v29 = vsel %vm394_vm0, %v13806_v56, %v7436_v30 }
0x18b0   : > { %v7257_v41 = vpop.f32.mrf.mxu2  ;;  %v7620_v62 = vsel %vm4012_vm11, %v7604_v29, %v7500_v10 }
0x18b1   : > { %7569 = vrot.lane.b32.xlu1 %v7257_v41, %s10000_s14 }
0x18b4   : > { %v7502_v40 = vpop.permute.xlu0 %7501 }
0x18b5   : > { %v7558_v52 = vpop.permute.xlu1 %7557 }
0x18b6   : > { %v7634_v17 = vsel %vm7629_vm6, %v7617_v39, %v7558_v52  ;;  %v7438_v16 = vpop.permute.xlu2 %7437 }
0x18b7   : > { %9044 = vmatmul.msk.f32.gmra.mxu0 %vm508_vm9, %v7634_v17  ;;  %v7605_v57 = vsel %vm394_vm0, %v13774_v55, %v7438_v16  ;;  %v15258_v17 = vld [vmem:[#allocation133_spill] sm:$0xff] }
0x18b8   : > { %v7373_v60 = vpop.f32.mrf.mxu2  ;;  %v7621_v53 = vsel %vm4012_vm11, %v7605_v57, %v7502_v40  ;;  %v15261_v40 = vld [vmem:[#allocation138_spill] sm:$0xff] }
0x18b9   : > { %7571 = vrot.lane.b32.xlu1 %v7286_v44, %s10000_s14 }
0x18bc   : > { %v7504_v3 = vpop.permute.xlu0 %7503 }
0x18bd   : > { %v7560_v63 = vpop.permute.xlu1 %7559 }
0x18be   : > { %v7635_v38 = vsel %vm7629_vm6, %v7618_v26, %v7560_v63  ;;  %v7440_v24 = vpop.permute.xlu2 %7439 }
0x18bf   : > { %9045 = vmatmul.msk.f32.gmra.mxu0 %vm508_vm9, %v7635_v38  ;;  %v7606_v59 = vsel %vm394_vm0, %v13803_v15, %v7440_v24  ;;  %v15259_v24 = vld [vmem:[#allocation135_spill] sm:$0xff] }
0x18c0   : > { %v7622_v54 = vsel %vm4012_vm11, %v7606_v59, %v7504_v3 }
0x18c1   : > { %7573 = vrot.lane.b32.xlu1 %v7315_v6, %s10000_s14 }
0x18c4   : > { %v7506_v18 = vpop.permute.xlu0 %7505 }
0x18c5   : > { %v7562_v12 = vpop.permute.xlu1 %7561 }
0x18c6   : > { %v7636_v19 = vsel %vm7629_vm6, %v7619_v43, %v7562_v12  ;;  %v7442_v28 = vpop.permute.xlu2 %7441 }
0x18c7   : > { %9046 = vmatmul.msk.f32.gmra.mxu0 %vm508_vm9, %v7636_v19  ;;  %v7607_v14 = vsel %vm394_vm0, %v13810_v4, %v7442_v28 }
0x18c8   : > { %v7623_v30 = vsel %vm4012_vm11, %v7607_v14, %v7506_v18 }
0x18c9   : > { %7575 = vrot.lane.b32.xlu1 %v7344_v58, %s10000_s14 }
0x18cc   : > { %v7508_v46 = vpop.permute.xlu0 %7507 }
0x18ce   : > { %v7444_v13 = vpop.permute.xlu2 %7443 }
0x18cf   : > { %v7608_v16 = vsel %vm394_vm0, %v13824_v25, %v7444_v13  ;;  %v15260_v13 = vld [vmem:[#allocation137_spill] sm:$0xff] }
0x18d0   : > { %v7624_v61 = vsel %vm4012_vm11, %v7608_v16, %v7508_v46 }
0x18d1   : > { %7577 = vrot.lane.b32.xlu1 %v7373_v60, %s10000_s14 }
0x18d4   : > { %v7510_v63 = vpop.permute.xlu0 %7509 }
0x18d6   : > { %v7446_v51 = vpop.permute.xlu2 %7445 }
0x18d7   : > { %v7609_v25 = vsel %vm394_vm0, %v13780_v11, %v7446_v51 }
0x18d8   : > { %v7564_v0 = vpop.permute.xlu1 %7563  ;;  %v7625_v12 = vsel %vm4012_vm11, %v7609_v25, %v7510_v63  ;;  %v15264_v25 = vld [vmem:[#allocation6_spill] sm:$0xff] }
0x18d9   : > { %7579 = vrot.lane.b32.xlu1 %v7402_v23, %s10000_s14  ;;  %v7637_v33 = vsel %vm7629_vm6, %v7620_v62, %v7564_v0 }
0x18da   : > { %9047 = vmatmul.msk.f32.gmra.mxu0 %vm508_vm9, %v7637_v33 }
0x18dc   : > { %v7512_v60 = vpop.permute.xlu0 %7511 }
0x18de   : > { %v14033_v47 = vpop.permute.xlu2 %7447 }
0x18df   : > { %v7610_v11 = vsel %vm394_vm0, %v13817_v20, %v14033_v47 }
0x18e0   : > { %v7566_v1 = vpop.permute.xlu1 %7565  ;;  %v7626_v10 = vsel %vm4012_vm11, %v7610_v11, %v7512_v60 }
0x18e1   : > { %v7638_v56 = vsel %vm7629_vm6, %v7621_v53, %v7566_v1 }
0x18e2   : > { %9048 = vmatmul.msk.f32.gmra.mxu0 %vm508_vm9, %v7638_v56 }
0x18e4   : > { %v7514_v1 = vpop.permute.xlu0 %7513 }
0x18e6   : > { %v14040_v7 = vpop.permute.xlu2 %7449 }
0x18e7   : > { %v7611_v20 = vsel %vm394_vm0, %v13837_v2, %v14040_v7 }
0x18e8   : > { %v7568_v22 = vpop.permute.xlu1 %7567  ;;  %v7627_v53 = vsel %vm4012_vm11, %v7611_v20, %v7514_v1 }
0x18e9   : > { %v7639_v55 = vsel %vm7629_vm6, %v7622_v54, %v7568_v22  ;;  %v15262_v54 = vld [vmem:[#allocation8_spill] sm:$0xff] }
0x18ea   : > { %9049 = vmatmul.msk.f32.gmra.mxu0 %vm508_vm9, %v7639_v55 }
0x18ee   : > { %v14047_v21 = vpop.permute.xlu2 %7451 }
0x18ef   : > { %v7612_v2 = vsel %vm394_vm0, %v13847_v32, %v14047_v21 }
0x18f5   : > { %v7726_v42 = vpop.f32.mrf.mxu0 }
0x18f6   : > { %v14052_v50 = vpop.permute.xlu2 %7658 }
0x18f7   : > { %v7727_v45 = vadd.f32 %v7726_v42, %v14052_v50  ;;  %v7516_v42 = vpop.permute.xlu0 %7515 }
0x18f9   : > { %v14056_v9 = vadd.f32 %v7727_v45, %v15256_v8  ;;  %v7628_v45 = vsel %vm4012_vm11, %v7612_v2, %v7516_v42 }
0x18fb   : > { %v7790_v15 = vsel %vm508_vm9, %v14056_v9, 0.0 }
0x18fc   : > { %7791 = vadd.xlane.f32.xlu0 %v7790_v15 }
0x1917   : > { %v7729_v31 = vpop.f32.mrf.mxu0 }
0x1918   : > { %v7730_v35 = vadd.f32 %v7729_v31, %v14052_v50  ;;  %v10001_v31 = vmov 32.0  }
0x1919   : > { %9877 = vrcp.f32 %v10001_v31 }
0x191a   : > { %v14062_v34 = vadd.f32 %v7730_v35, %v15257_v37 }
0x191c   : > { %v7793_v48 = vsel %vm508_vm9, %v14062_v34, 0.0 }
0x191d   : > { %7794 = vadd.xlane.f32.xlu1 %v7793_v48 }
0x191f   : > { %v9878_v18 = vpop.eup %9877 }
0x1920   : > { %v7839_v35 = vmul.f32 32.0, %v9878_v18  ;;  %vm7843_vm0 = vweird.f32 %v9878_v18 }
0x1922   : > { %v7840_v37 = vsub.f32 1.0, %v7839_v35 }
0x1923   : > { %v7570_v41 = vpop.permute.xlu1 %7569 }
0x1924   : > { %v7732_v36 = vpop.f32.mrf.mxu0  ;;  %v7640_v52 = vsel %vm7629_vm6, %v7623_v30, %v7570_v41  ;;  %v7841_v48 = vmul.f32 %v9878_v18, %v7840_v37 }
0x1925   : > { %v7733_v39 = vadd.f32 %v7732_v36, %v14052_v50  ;;  %9050 = vmatmul.msk.f32.gmra.mxu0 %vm508_vm9, %v7640_v52 }
0x1926   : > { %v7842_v14 = vadd.f32 %v9878_v18, %v7841_v48 }
0x1927   : > { %v14073_v44 = vadd.f32 %v7733_v39, %v15258_v17  ;;  %v15263_v17 = vld [vmem:[#allocation7_spill] sm:$0xff] }
0x1928   : > { %v14129_v32 = vsel %vm7843_vm0, %v9878_v18, %v7842_v14 }
0x1929   : > { %v7796_v4 = vsel %vm508_vm9, %v14073_v44, 0.0 }
0x192a   : > { %7797 = vadd.xlane.f32.xlu2 %v7796_v4 }
0x192b   : > { %v7572_v5 = vpop.permute.xlu1 %7571 }
0x192c   : > { %v7735_v26 = vpop.f32.mrf.mxu0  ;;  %v7641_v38 = vsel %vm7629_vm6, %v7624_v61, %v7572_v5 }
0x192d   : > { %v7736_v6 = vadd.f32 %v7735_v26, %v14052_v50  ;;  %9051 = vmatmul.msk.f32.gmra.mxu0 %vm508_vm9, %v7641_v38 }
0x192f   : > { %v14084_v27 = vadd.f32 %v7736_v6, %v15259_v24 }
0x1931   : > { %v7799_v49 = vsel %vm508_vm9, %v14084_v27, 0.0 }
0x1932   : > { %7800 = vadd.xlane.f32.xlu0 %v7799_v49 }
0x1933   : > { %v7574_v43 = vpop.permute.xlu1 %7573 }
0x1934   : > { %v7738_v19 = vpop.f32.mrf.mxu0  ;;  %v7642_v58 = vsel %vm7629_vm6, %v7625_v12, %v7574_v43 }
0x1935   : > { %v7739_v28 = vadd.f32 %v7738_v19, %v14052_v50  ;;  %9052 = vmatmul.msk.f32.gmra.mxu0 %vm508_vm9, %v7642_v58 }
0x1937   : > { %v14095_v23 = vadd.f32 %v7739_v28, %v15260_v13 }
0x1939   : > { %v7802_v51 = vsel %vm508_vm9, %v14095_v23, 0.0 }
0x193a   : > { %7803 = vadd.xlane.f32.xlu1 %v7802_v51 }
0x193b   : > { %v7576_v29 = vpop.permute.xlu1 %7575 }
0x193c   : > { %v7741_v0 = vpop.f32.mrf.mxu0  ;;  %v7643_v62 = vsel %vm7629_vm6, %v7626_v10, %v7576_v29  ;;  %v15265_v10 = vld [vmem:[#allocation139_spill] sm:$0xff] }
0x193d   : > { %v7742_v33 = vadd.f32 %v7741_v0, %v14052_v50  ;;  %9053 = vmatmul.msk.f32.gmra.mxu0 %vm508_vm9, %v7643_v62 }
0x193f   : > { %v14107_v57 = vadd.f32 %v7742_v33, %v15261_v40 }
0x1941   : > { %v7805_v47 = vsel %vm508_vm9, %v14107_v57, 0.0 }
0x1942   : > { %7806 = vadd.xlane.f32.xlu2 %v7805_v47 }
0x1943   : > { %v7578_v56 = vpop.permute.xlu1 %7577 }
0x1944   : > { %v7744_v59 = vpop.f32.mrf.mxu0  ;;  %v7644_v3 = vsel %vm7629_vm6, %v7627_v53, %v7578_v56  ;;  %v15266_v53 = vld [vmem:[#allocation140_spill] sm:$0xff] }
0x1945   : > { %v7745_v22 = vadd.f32 %v7744_v59, %v14052_v50  ;;  %9054 = vmatmul.msk.f32.gmra.mxu0 %vm508_vm9, %v7644_v3 }
0x1947   : > { %v14119_v55 = vadd.f32 %v7745_v22, %v15262_v54 }
0x1949   : > { %v7808_v7 = vsel %vm508_vm9, %v14119_v55, 0.0 }
0x194a   : > { %7809 = vadd.xlane.f32.xlu1 %v7808_v7  ;;  %v14194_v7 = vld [vmem:[%s14572_s3 + $0x2] ss:$0 sm:$0xff] }
0x194b   : > { %v7580_v8 = vpop.permute.xlu1 %7579 }
0x194c   : > { %v7645_v15 = vsel %vm7629_vm6, %v7628_v45, %v7580_v8  ;;  %v15267_v45 = vld [vmem:[#allocation141_spill] sm:$0xff] }
0x194d   : > { %9055 = vmatmul.msk.f32.gmra.mxu0 %vm508_vm9, %v7645_v15 }
0x1957   : > { %v7747_v41 = vpop.f32.mrf.mxu0 }
0x1958   : > { %v7748_v52 = vadd.f32 %v7747_v41, %v14052_v50 }
0x195a   : > { %v14140_v16 = vadd.f32 %v7748_v52, %v15263_v17 }
0x195c   : > { %v7811_v4 = vsel %vm508_vm9, %v14140_v16, 0.0 }
0x195f   : > { %v7750_v61 = vpop.f32.mrf.mxu0 }
0x1960   : > { %v7751_v38 = vadd.f32 %v7750_v61, %v14052_v50  ;;  %v15269_v61 = vld [vmem:[#allocation143_spill] sm:$0xff] }
0x1962   : > { %v14153_v49 = vadd.f32 %v7751_v38, %v15264_v25 }
0x1964   : > { %v7814_v19 = vsel %vm508_vm9, %v14153_v49, 0.0 }
0x1967   : > { %v7753_v24 = vpop.f32.mrf.mxu0 }
0x1968   : > { %v7754_v60 = vadd.f32 %v7753_v24, %v14052_v50 }
0x196a   : > { %v14167_v29 = vadd.f32 %v7754_v60, %v15265_v10 }
0x196c   : > { %v7817_v1 = vsel %vm508_vm9, %v14167_v29, 0.0 }
0x196f   : > { %v7792_v21 = vpop.xlane.xlu0 %7791 }
0x1970   : > { %v7845_v46 = vmul.f32 %v14129_v32, %v7792_v21  ;;  %v15268_v21 = vld [vmem:[#allocation142_spill] sm:$0xff] }
0x1972   : > { %v14133_v30 = vsub.f32 %v14056_v9, %v7845_v46 }
0x1974   : > { %v7877_v36 = vmul.f32 %v14133_v30, %v14133_v30 }
0x1976   : > { %v7893_v39 = vsel %vm508_vm9, %v7877_v36, 0.0 }
0x1977   : > { %7894 = vadd.xlane.f32.xlu0 %v7893_v39 }
0x197f   : > { %7812 = vadd.xlane.f32.xlu0 %v7811_v4 }
0x1990   : > { %v7795_v5 = vpop.xlane.xlu1 %7794 }
0x1991   : > { %v7846_v9 = vmul.f32 %v14129_v32, %v7795_v5 }
0x1993   : > { %v14146_v63 = vsub.f32 %v14062_v34, %v7846_v9 }
0x1995   : > { %v7878_v26 = vmul.f32 %v14146_v63, %v14146_v63 }
0x1997   : > { %v7896_v6 = vsel %vm508_vm9, %v7878_v26, 0.0  ;;  %v15270_v26 = vld [vmem:[#allocation144_spill] sm:$0xff] }
0x1998   : > { %7897 = vadd.xlane.f32.xlu2 %v7896_v6 }
0x199d   : > { %v7798_v12 = vpop.xlane.xlu2 %7797 }
0x199e   : > { %v7847_v43 = vmul.f32 %v14129_v32, %v7798_v12  ;;  %v15271_v12 = vld [vmem:[#allocation145_spill] sm:$0xff] }
0x19a0   : > { %v14159_v34 = vsub.f32 %v14073_v44, %v7847_v43  ;;  %7815 = vadd.xlane.f32.xlu2 %v7814_v19 }
0x19a2   : > { %v7879_v58 = vmul.f32 %v14159_v34, %v14159_v34  ;;  %v7756_v28 = vpop.f32.mrf.mxu0 }
0x19a3   : > { %v7757_v33 = vadd.f32 %v7756_v28, %v14052_v50 }
0x19a4   : > { %v7899_v13 = vsel %vm508_vm9, %v7879_v58, 0.0 }
0x19a5   : > { %v7801_v11 = vpop.xlane.xlu0 %7800  ;;  %7900 = vadd.xlane.f32.xlu1 %v7899_v13  ;;  %v14180_v56 = vadd.f32 %v7757_v33, %v15266_v53  ;;  %v351_v33 = vld [vmem:[%s14571_s2 + $0x58] sm:$0xff] }
0x19a6   : > { %v7848_v51 = vmul.f32 %v14129_v32, %v7801_v11 }
0x19a7   : > { %v7820_v54 = vsel %vm508_vm9, %v14180_v56, 0.0 }
0x19a8   : > { %v14170_v0 = vsub.f32 %v14084_v27, %v7848_v51 }
0x19aa   : > { %v7880_v44 = vmul.f32 %v14170_v0, %v14170_v0  ;;  %v7759_v62 = vpop.f32.mrf.mxu0 }
0x19ab   : > { %v7760_v22 = vadd.f32 %v7759_v62, %v14052_v50  ;;  %v352_v62 = vld [vmem:[%s14571_s2 + $0x60] sm:$0xff] }
0x19ac   : > { %v7902_v40 = vsel %vm508_vm9, %v7880_v44, 0.0  ;;  %8247 = vmatpush.msrb.mxu1 %v352_v62 }
0x19ad   : > { %7903 = vadd.xlane.f32.xlu0 %v7902_v40  ;;  %7818 = vadd.xlane.f32.xlu1 %v7817_v1  ;;  %v7804_v20 = vpop.xlane.xlu1 %7803  ;;  %v14198_v8 = vadd.f32 %v7760_v22, %v15267_v45  ;;  %v349_v1 = vld [vmem:[%s14571_s2 + $0x48] sm:$0xff] }
0x19ae   : > { %v7849_v47 = vmul.f32 %v14129_v32, %v7804_v20  ;;  %8248 = vmatpush.msrb.mxu1 %v351_v33 }
0x19af   : > { %v7823_v35 = vsel %vm508_vm9, %v14198_v8, 0.0 }
0x19b0   : > { %v14183_v27 = vsub.f32 %v14095_v23, %v7849_v47 }
0x19b2   : > { %v7881_v59 = vmul.f32 %v14183_v27, %v14183_v27  ;;  %v7762_v3 = vpop.f32.mrf.mxu0 }
0x19b3   : > { %v7763_v18 = vadd.f32 %v7762_v3, %v14052_v50 }
0x19b4   : > { %v7905_v2 = vsel %vm508_vm9, %v7881_v59, 0.0 }
0x19b5   : > { %v7807_v42 = vpop.xlane.xlu2 %7806  ;;  %7821 = vadd.xlane.f32.xlu1 %v7820_v54  ;;  %7906 = vadd.xlane.f32.xlu0 %v7905_v2  ;;  %v14213_v46 = vadd.f32 %v7763_v18, %v15268_v21 }
0x19b6   : > { %v7850_v23 = vmul.f32 %v14129_v32, %v7807_v42 }
0x19b7   : > { %v7826_v39 = vsel %vm508_vm9, %v14213_v46, 0.0 }
0x19b8   : > { %v14201_v15 = vsub.f32 %v14107_v57, %v7850_v23  ;;  %8167 = vrot.lane.b32.xlu2 %v14194_v7, %s9989_s26 }
0x19ba   : > { %v7882_v31 = vmul.f32 %v14201_v15, %v14201_v15  ;;  %v7765_v14 = vpop.f32.mrf.mxu0 }
0x19bb   : > { %v7766_v52 = vadd.f32 %v7765_v14, %v14052_v50 }
0x19bc   : > { %v7908_v37 = vsel %vm508_vm9, %v7882_v31, 0.0 }
0x19bd   : > { %7824 = vadd.xlane.f32.xlu1 %v7823_v35  ;;  %7909 = vadd.xlane.f32.xlu0 %v7908_v37  ;;  %v7810_v48 = vpop.xlane.xlu1 %7809  ;;  %v14225_v5 = vadd.f32 %v7766_v52, %v15269_v61 }
0x19be   : > { %v7851_v57 = vmul.f32 %v14129_v32, %v7810_v48 }
0x19c0   : > { %v14216_v41 = vsub.f32 %v14119_v55, %v7851_v57  ;;  %v7829_v55 = vsel %vm508_vm9, %v14225_v5, 0.0 }
0x19c2   : > { %v7883_v36 = vmul.f32 %v14216_v41, %v14216_v41  ;;  %v7768_v4 = vpop.f32.mrf.mxu0 }
0x19c3   : > { %v7769_v9 = vadd.f32 %v7768_v4, %v14052_v50 }
0x19c4   : > { %v7911_v17 = vsel %vm508_vm9, %v7883_v36, 0.0 }
0x19c5   : > { %7827 = vadd.xlane.f32.xlu1 %v7826_v39  ;;  %7912 = vadd.xlane.f32.xlu0 %v7911_v17  ;;  %v14231_v38 = vadd.f32 %v7769_v9, %v15270_v26 }
0x19c7   : > { %v7832_v25 = vsel %vm508_vm9, %v14231_v38, 0.0 }
0x19ca   : > { %v7771_v6 = vpop.f32.mrf.mxu0 }
0x19cb   : > { %v7772_v24 = vadd.f32 %v7771_v6, %v14052_v50 }
0x19cd   : > { %7830 = vadd.xlane.f32.xlu0 %v7829_v55  ;;  %v14237_v43 = vadd.f32 %v7772_v24, %v15271_v12 }
0x19cf   : > { %v7835_v19 = vsel %vm508_vm9, %v14237_v43, 0.0 }
0x19d5   : > { %7833 = vadd.xlane.f32.xlu0 %v7832_v25 }
0x19dd   : > { %7836 = vadd.xlane.f32.xlu0 %v7835_v19 }
0x19ea   : > { %v7895_v58 = vpop.xlane.xlu0 %7894 }
0x19eb   : > { %v7941_v28 = vmul.f32 %v7895_v58, %v14129_v32 }
0x19ed   : > { %v7957_v60 = vadd.f32 1e-05, %v7941_v28 }
0x19ef   : > { %9879 = vrsqrt.f32 %v7957_v60  ;;  %vm7979_vm7 = vweird.f32 %v7957_v60 }
0x19f2   : > { %v7813_v13 = vpop.xlane.xlu0 %7812 }
0x19f3   : > { %v7852_v11 = vmul.f32 %v14129_v32, %v7813_v13 }
0x19f5   : > { %v14244_v50 = vsub.f32 %v14140_v16, %v7852_v11  ;;  %v9880_v44 = vpop.eup %9879  ;;  %v350_v16 = vld [vmem:[%s14571_s2 + $0x50] sm:$0xff] }
0x19f6   : > { %v7974_v40 = vmul.f32 %v9880_v44, %v7957_v60  ;;  %8249 = vmatpush.msrb.mxu1 %v350_v16  ;;  %vm7980_vm11 = vweird.f32 %v9880_v44 }
0x19f7   : > { %v7884_v51 = vmul.f32 %v14244_v50, %v14244_v50  ;;  %vm7981_vm8 = vmor %vm7979_vm7, %vm7980_vm11 }
0x19f8   : > { %v7975_v20 = vmul.f32 %v9880_v44, %v7974_v40  ;;  %8250 = vmatpush.msrb.mxu1 %v349_v1 }
0x19f9   : > { %v7914_v10 = vsel %vm508_vm9, %v7884_v51, 0.0 }
0x19fa   : > { %7915 = vadd.xlane.f32.xlu2 %v7914_v10  ;;  %v7976_v47 = vmul.f32 0.5, %v7975_v20 }
0x19fc   : > { %v7977_v53 = vsub.f32 1.5, %v7976_v47 }
0x19fe   : > { %v7978_v54 = vmul.f32 %v9880_v44, %v7977_v53 }
0x1a00   : > { %v7982_v2 = vsel %vm7981_vm8, %v9880_v44, %v7978_v54 }
0x1a01   : > { %v8133_v31 = vmul.f32 %v7982_v2, %v14133_v30 }
0x1a03   : > { %v8150_v21 = vmul.f32 %v14194_v7, %v8133_v31 }
0x1a0b   : > { %v7898_v59 = vpop.xlane.xlu2 %7897 }
0x1a0c   : > { %v7942_v3 = vmul.f32 %v7898_v59, %v14129_v32 }
0x1a0e   : > { %v7958_v22 = vadd.f32 1e-05, %v7942_v3 }
0x1a10   : > { %9881 = vrsqrt.f32 %v7958_v22  ;;  %vm7989_vm13 = vweird.f32 %v7958_v22 }
0x1a13   : > { %v7816_v42 = vpop.xlane.xlu2 %7815 }
0x1a14   : > { %v7853_v23 = vmul.f32 %v14129_v32, %v7816_v42 }
0x1a16   : > { %v9882_v45 = vpop.eup %9881  ;;  %v14265_v18 = vsub.f32 %v14153_v49, %v7853_v23 }
0x1a17   : > { %v7984_v35 = vmul.f32 %v9882_v45, %v7958_v22  ;;  %vm7990_vm12 = vweird.f32 %v9882_v45 }
0x1a18   : > { %v7901_v37 = vpop.xlane.xlu1 %7900  ;;  %v7885_v48 = vmul.f32 %v14265_v18, %v14265_v18  ;;  %vm7991_vm14 = vmor %vm7989_vm13, %vm7990_vm12 }
0x1a19   : > { %v7985_v14 = vmul.f32 %v9882_v45, %v7984_v35  ;;  %v7943_v57 = vmul.f32 %v7901_v37, %v14129_v32 }
0x1a1a   : > { %v7917_v36 = vsel %vm508_vm9, %v7885_v48, 0.0 }
0x1a1b   : > { %v7986_v52 = vmul.f32 0.5, %v7985_v14  ;;  %v7959_v39 = vadd.f32 1e-05, %v7943_v57  ;;  %7918 = vadd.xlane.f32.xlu1 %v7917_v36  ;;  %v14272_v17 = vpop.permute.xlu2 %8167 }
0x1a1c   : > { %v8170_v30 = vadd.f32 %v14272_v17, %v8150_v21 }
0x1a1d   : > { %v7987_v49 = vsub.f32 1.5, %v7986_v52  ;;  %9883 = vrsqrt.f32 %v7959_v39  ;;  %vm7999_vm1 = vweird.f32 %v7959_v39 }
0x1a1e   : > { %9056 = vmatmul.msk.f32.vlgmr.msrb.gmra.mxu1 %vm508_vm9, %v8170_v30 }
0x1a1f   : > { %v7988_v4 = vmul.f32 %v9882_v45, %v7987_v49 }
0x1a20   : > { %v7904_v61 = vpop.xlane.xlu0 %7903  ;;  %v7819_v9 = vpop.xlane.xlu1 %7818 }
0x1a21   : > { %v7992_v55 = vsel %vm7991_vm14, %v9882_v45, %v7988_v4  ;;  %v7944_v26 = vmul.f32 %v7904_v61, %v14129_v32  ;;  %v7854_v6 = vmul.f32 %v14129_v32, %v7819_v9 }
0x1a22   : > { %v8134_v24 = vmul.f32 %v7992_v55, %v14146_v63 }
0x1a23   : > { %v9884_v25 = vpop.eup %9883  ;;  %v7960_v12 = vadd.f32 1e-05, %v7944_v26  ;;  %v14280_v19 = vsub.f32 %v14167_v29, %v7854_v6 }
0x1a24   : > { %v7994_v58 = vmul.f32 %v9884_v25, %v7959_v39  ;;  %v8151_v28 = vmul.f32 %v14194_v7, %v8134_v24  ;;  %vm8000_vm10 = vweird.f32 %v9884_v25 }
0x1a25   : > { %9885 = vrsqrt.f32 %v7960_v12  ;;  %v7886_v60 = vmul.f32 %v14280_v19, %v14280_v19  ;;  %vm8001_vm2 = vmor %vm7999_vm1, %vm8000_vm10  ;;  %vm8009_vm3 = vweird.f32 %v7960_v12 }
0x1a26   : > { %v7995_v13 = vmul.f32 %v9884_v25, %v7994_v58  ;;  %v8171_v11 = vadd.f32 %v14272_v17, %v8151_v28 }
0x1a27   : > { %v7920_v51 = vsel %vm508_vm9, %v7886_v60, 0.0 }
0x1a28   : > { %v7996_v10 = vmul.f32 0.5, %v7995_v13  ;;  %9057 = vmatmul.msk.f32.gmra.mxu1 %vm508_vm9, %v8171_v11  ;;  %v7907_v63 = vpop.xlane.xlu0 %7906  ;;  %7921 = vadd.xlane.f32.xlu1 %v7920_v51  ;;  %v7822_v44 = vpop.xlane.xlu1 %7821 }
0x1a29   : > { %v7945_v29 = vmul.f32 %v7907_v63, %v14129_v32  ;;  %v7855_v62 = vmul.f32 %v14129_v32, %v7822_v44 }
0x1a2a   : > { %v7997_v33 = vsub.f32 1.5, %v7996_v10 }
0x1a2b   : > { %v9886_v40 = vpop.eup %9885  ;;  %v7961_v16 = vadd.f32 1e-05, %v7945_v29  ;;  %v14291_v1 = vsub.f32 %v14180_v56, %v7855_v62 }
0x1a2c   : > { %v7998_v20 = vmul.f32 %v9884_v25, %v7997_v33  ;;  %v8004_v47 = vmul.f32 %v9886_v40, %v7960_v12  ;;  %vm8010_vm15 = vweird.f32 %v9886_v40 }
0x1a2d   : > { %9887 = vrsqrt.f32 %v7961_v16  ;;  %v7887_v53 = vmul.f32 %v14291_v1, %v14291_v1  ;;  %vm8011_vm4 = vmor %vm8009_vm3, %vm8010_vm15  ;;  %vm8019_vm6 = vweird.f32 %v7961_v16 }
0x1a2e   : > { %v8002_v59 = vsel %vm8001_vm2, %v9884_v25, %v7998_v20  ;;  %v8005_v3 = vmul.f32 %v9886_v40, %v8004_v47 }
0x1a2f   : > { %v8135_v22 = vmul.f32 %v8002_v59, %v14159_v34  ;;  %v7923_v54 = vsel %vm508_vm9, %v7887_v53, 0.0 }
0x1a30   : > { %v8006_v2 = vmul.f32 0.5, %v8005_v3  ;;  %v7910_v42 = vpop.xlane.xlu0 %7909  ;;  %7924 = vadd.xlane.f32.xlu1 %v7923_v54  ;;  %v7825_v23 = vpop.xlane.xlu1 %7824 }
0x1a31   : > { %v7946_v56 = vmul.f32 %v7910_v42, %v14129_v32  ;;  %v7856_v45 = vmul.f32 %v14129_v32, %v7825_v23  ;;  %v8152_v31 = vmul.f32 %v14194_v7, %v8135_v22 }
0x1a32   : > { %v8007_v35 = vsub.f32 1.5, %v8006_v2 }
0x1a33   : > { %v9888_v37 = vpop.eup %9887  ;;  %v7962_v48 = vadd.f32 1e-05, %v7946_v56  ;;  %v14301_v14 = vsub.f32 %v14198_v8, %v7856_v45  ;;  %v8172_v34 = vadd.f32 %v14272_v17, %v8152_v31 }
0x1a34   : > { %v8008_v57 = vmul.f32 %v9886_v40, %v8007_v35  ;;  %v8014_v21 = vmul.f32 %v9888_v37, %v7961_v16  ;;  %vm8020_vm5 = vweird.f32 %v9888_v37 }
0x1a35   : > { %9889 = vrsqrt.f32 %v7962_v48  ;;  %9058 = vmatmul.msk.f32.gmra.mxu1 %vm508_vm9, %v8172_v34  ;;  %v7888_v36 = vmul.f32 %v14301_v14, %v14301_v14  ;;  %vm8021_vm0 = vmor %vm8019_vm6, %vm8020_vm5  ;;  %vm8029_vm7 = vweird.f32 %v7962_v48 }
0x1a36   : > { %v8012_v52 = vsel %vm8011_vm4, %v9886_v40, %v8008_v57  ;;  %v8015_v39 = vmul.f32 %v9888_v37, %v8014_v21 }
0x1a37   : > { %v8136_v30 = vmul.f32 %v8012_v52, %v14170_v0  ;;  %v7926_v49 = vsel %vm508_vm9, %v7888_v36, 0.0 }
0x1a38   : > { %v8016_v8 = vmul.f32 0.5, %v8015_v39  ;;  %v7913_v4 = vpop.xlane.xlu0 %7912  ;;  %7927 = vadd.xlane.f32.xlu0 %v7926_v49  ;;  %v7828_v61 = vpop.xlane.xlu1 %7827  ;;  %v368_v39 = vld [vmem:[%s14571_s2 + $0xe0] sm:$0xff]  ;;  %v365_v49 = vld [vmem:[%s14571_s2 + $0xc8] sm:$0xff] }
0x1a39   : > { %v7947_v9 = vmul.f32 %v7913_v4, %v14129_v32  ;;  %v7857_v55 = vmul.f32 %v14129_v32, %v7828_v61  ;;  %v8153_v26 = vmul.f32 %v14194_v7, %v8136_v30  ;;  %8319 = vmatpush.msrb.mxu2 %v368_v39  ;;  %9080 = vmatpush.msra.mxu3 %v368_v39  ;;  %v366_v30 = vld [vmem:[%s14571_s2 + $0xd0] sm:$0xff]  ;;  %v363_v4 = vld [vmem:[%s14571_s2 + $0xb8] sm:$0xff] }
0x1a3a   : > { %v8017_v6 = vsub.f32 1.5, %v8016_v8  ;;  %v364_v8 = vld [vmem:[%s14571_s2 + $0xc0] sm:$0xff] }
0x1a3b   : > { %v9890_v24 = vpop.eup %9889  ;;  %v7963_v25 = vadd.f32 1e-05, %v7947_v9  ;;  %v14313_v12 = vsub.f32 %v14213_v46, %v7857_v55  ;;  %v8173_v0 = vadd.f32 %v14272_v17, %v8153_v26  ;;  %v362_v55 = vld [vmem:[%s14571_s2 + $0xb0] sm:$0xff] }
0x1a3c   : > { %v8018_v58 = vmul.f32 %v9888_v37, %v8017_v6  ;;  %v8024_v28 = vmul.f32 %v9890_v24, %v7962_v48  ;;  %vm8030_vm11 = vweird.f32 %v9890_v24  ;;  %v361_v6 = vld [vmem:[%s14571_s2 + $0xa8] sm:$0xff] }
0x1a3d   : > { %9891 = vrsqrt.f32 %v7963_v25  ;;  %9059 = vmatmul.msk.f32.gmra.mxu1 %vm508_vm9, %v8173_v0  ;;  %v7889_v60 = vmul.f32 %v14313_v12, %v14313_v12  ;;  %vm8031_vm8 = vmor %vm8029_vm7, %vm8030_vm11  ;;  %vm8039_vm13 = vweird.f32 %v7963_v25 }
0x1a3e   : > { %v8022_v13 = vsel %vm8021_vm0, %v9888_v37, %v8018_v58  ;;  %v8025_v11 = vmul.f32 %v9890_v24, %v8024_v28  ;;  %v358_v58 = vld [vmem:[%s14571_s2 + $0x90] sm:$0xff] }
0x1a3f   : > { %v8137_v51 = vmul.f32 %v8022_v13, %v14183_v27  ;;  %v7929_v10 = vsel %vm508_vm9, %v7889_v60, 0.0  ;;  %v357_v60 = vld [vmem:[%s14571_s2 + $0x88] sm:$0xff] }
0x1a40   : > { %v8026_v46 = vmul.f32 0.5, %v8025_v11  ;;  %v7831_v63 = vpop.xlane.xlu0 %7830  ;;  %7930 = vadd.xlane.f32.xlu1 %v7929_v10  ;;  %v356_v11 = vld [vmem:[%s14571_s2 + $0x80] sm:$0xff]  ;;  %v355_v10 = vld [vmem:[%s14571_s2 + $0x78] sm:$0xff] }
0x1a41   : > { %v7858_v44 = vmul.f32 %v14129_v32, %v7831_v63  ;;  %v8154_v29 = vmul.f32 %v14194_v7, %v8137_v51  ;;  %v354_v63 = vld [vmem:[%s14571_s2 + $0x70] sm:$0xff] }
0x1a42   : > { %v8027_v62 = vsub.f32 1.5, %v8026_v46 }
0x1a43   : > { %v9892_v33 = vpop.eup %9891  ;;  %v14324_v40 = vsub.f32 %v14225_v5, %v7858_v44  ;;  %v8174_v16 = vadd.f32 %v14272_v17, %v8154_v29  ;;  %v353_v29 = vld [vmem:[%s14571_s2 + $0x68] sm:$0xff] }
0x1a44   : > { %v8028_v20 = vmul.f32 %v9890_v24, %v8027_v62  ;;  %v8034_v27 = vmul.f32 %v9892_v33, %v7963_v25  ;;  %vm8040_vm12 = vweird.f32 %v9892_v33  ;;  %v359_v25 = vld [vmem:[%s14571_s2 + $0x98] sm:$0xff] }
0x1a45   : > { %9060 = vmatmul.msk.f32.gmra.mxu1 %vm508_vm9, %v8174_v16  ;;  %v7890_v47 = vmul.f32 %v14324_v40, %v14324_v40  ;;  %vm8041_vm14 = vmor %vm8039_vm13, %vm8040_vm12 }
0x1a46   : > { %v8032_v53 = vsel %vm8031_vm8, %v9890_v24, %v8028_v20  ;;  %v8035_v59 = vmul.f32 %v9892_v33, %v8034_v27  ;;  %v360_v24 = vld [vmem:[%s14571_s2 + $0xa0] sm:$0xff] }
0x1a47   : > { %v8138_v3 = vmul.f32 %v8032_v53, %v14201_v15  ;;  %v7932_v22 = vsel %vm508_vm9, %v7890_v47, 0.0 }
0x1a48   : > { %v8036_v54 = vmul.f32 0.5, %v8035_v59  ;;  %v7834_v5 = vpop.xlane.xlu0 %7833  ;;  %7933 = vadd.xlane.f32.xlu0 %v7932_v22  ;;  %v14414_v59 = vld [vmem:[%s14572_s3 + $0x3] ss:$0 sm:$0xff] }
0x1a49   : > { %v7859_v2 = vmul.f32 %v14129_v32, %v7834_v5  ;;  %v8155_v42 = vmul.f32 %v14194_v7, %v8138_v3 }
0x1a4a   : > { %v8037_v23 = vsub.f32 1.5, %v8036_v54 }
0x1a4b   : > { %v14335_v56 = vsub.f32 %v14231_v38, %v7859_v2  ;;  %v8175_v45 = vadd.f32 %v14272_v17, %v8155_v42 }
0x1a4c   : > { %v8038_v31 = vmul.f32 %v9892_v33, %v8037_v23 }
0x1a4d   : > { %9061 = vmatmul.msk.f32.gmra.mxu1 %vm508_vm9, %v8175_v45  ;;  %v7891_v15 = vmul.f32 %v14335_v56, %v14335_v56 }
0x1a4e   : > { %v8042_v35 = vsel %vm8041_vm14, %v9892_v33, %v8038_v31 }
0x1a4f   : > { %v8139_v37 = vmul.f32 %v8042_v35, %v14216_v41  ;;  %v7935_v48 = vsel %vm508_vm9, %v7891_v15, 0.0 }
0x1a50   : > { %v7837_v34 = vpop.xlane.xlu0 %7836  ;;  %7936 = vadd.xlane.f32.xlu1 %v7935_v48 }
0x1a51   : > { %v7860_v38 = vmul.f32 %v14129_v32, %v7837_v34  ;;  %v8156_v57 = vmul.f32 %v14194_v7, %v8139_v37 }
0x1a53   : > { %v14346_v21 = vsub.f32 %v14237_v43, %v7860_v38  ;;  %v8176_v36 = vadd.f32 %v14272_v17, %v8156_v57  ;;  %v367_v43 = vld [vmem:[%s14571_s2 + $0xd8] sm:$0xff] }
0x1a54   : > { %8320 = vmatpush.msrb.mxu2 %v367_v43  ;;  %9081 = vmatpush.msra.mxu3 %v367_v43 }
0x1a55   : > { %9062 = vmatmul.msk.f32.gmra.mxu1 %vm508_vm9, %v8176_v36  ;;  %v7892_v52 = vmul.f32 %v14346_v21, %v14346_v21 }
0x1a56   : > { %8321 = vmatpush.msrb.mxu2 %v366_v30  ;;  %9082 = vmatpush.msra.mxu3 %v366_v30 }
0x1a57   : > { %v7938_v41 = vsel %vm508_vm9, %v7892_v52, 0.0 }
0x1a58   : > { %7939 = vadd.xlane.f32.xlu2 %v7938_v41  ;;  %8322 = vmatpush.msrb.mxu2 %v365_v49 }
0x1a59   : > { %9083 = vmatpush.msra.mxu3 %v365_v49 }
0x1a5a   : > { %8323 = vmatpush.msrb.mxu2 %v364_v8 }
0x1a5b   : > { %9084 = vmatpush.msra.mxu3 %v364_v8 }
0x1a5c   : > { %8316 = vrot.lane.b32.xlu0 %v14194_v7, %s9987_s6  ;;  %8324 = vmatpush.msrb.mxu2 %v363_v4 }
0x1a5d   : > { %9085 = vmatpush.msra.mxu3 %v363_v4 }
0x1a5e   : > { %8325 = vmatpush.msrb.mxu2 %v362_v55 }
0x1a5f   : > { %9086 = vmatpush.msra.mxu3 %v362_v55 }
0x1a60   : > { %8326 = vmatpush.msrb.mxu2 %v361_v6 }
0x1a61   : > { %9087 = vmatpush.msra.mxu3 %v361_v6 }
0x1a62   : > { %8327 = vmatpush.msrb.mxu2 %v360_v24 }
0x1a63   : > { %9088 = vmatpush.msra.mxu3 %v360_v24 }
0x1a64   : > { %8328 = vmatpush.msrb.mxu2 %v359_v25 }
0x1a65   : > { %9089 = vmatpush.msra.mxu3 %v359_v25 }
0x1a66   : > { %8329 = vmatpush.msrb.mxu2 %v358_v58 }
0x1a67   : > { %9090 = vmatpush.msra.mxu3 %v358_v58 }
0x1a68   : > { %8330 = vmatpush.msrb.mxu2 %v357_v60 }
0x1a69   : > { %8556 = vrot.lane.b32.xlu1 %v14194_v7, %s9988_s7  ;;  %9091 = vmatpush.msra.mxu3 %v357_v60 }
0x1a6a   : > { %8331 = vmatpush.msrb.mxu2 %v356_v11 }
0x1a6b   : > { %9092 = vmatpush.msra.mxu3 %v356_v11 }
0x1a6c   : > { %8332 = vmatpush.msrb.mxu2 %v355_v10 }
0x1a6d   : > { %v7916_v61 = vpop.xlane.xlu2 %7915  ;;  %9093 = vmatpush.msra.mxu3 %v355_v10 }
0x1a6e   : > { %v7948_v9 = vmul.f32 %v7916_v61, %v14129_v32  ;;  %8333 = vmatpush.msrb.mxu2 %v354_v63 }
0x1a6f   : > { %9094 = vmatpush.msra.mxu3 %v354_v63 }
0x1a70   : > { %v7964_v26 = vadd.f32 1e-05, %v7948_v9  ;;  %8334 = vmatpush.msrb.mxu2 %v353_v29 }
0x1a71   : > { %9095 = vmatpush.msra.mxu3 %v353_v29 }
0x1a72   : > { %9893 = vrsqrt.f32 %v7964_v26  ;;  %vm8049_vm1 = vweird.f32 %v7964_v26 }
0x1a78   : > { %v9894_v0 = vpop.eup %9893 }
0x1a79   : > { %v8044_v28 = vmul.f32 %v9894_v0, %v7964_v26  ;;  %vm8050_vm10 = vweird.f32 %v9894_v0 }
0x1a7a   : > { %vm8051_vm2 = vmor %vm8049_vm1, %vm8050_vm10 }
0x1a7b   : > { %v8045_v13 = vmul.f32 %v9894_v0, %v8044_v28 }
0x1a7d   : > { %v8046_v51 = vmul.f32 0.5, %v8045_v13 }
0x1a7f   : > { %v8047_v46 = vsub.f32 1.5, %v8046_v51 }
0x1a81   : > { %v8048_v44 = vmul.f32 %v9894_v0, %v8047_v46 }
0x1a83   : > { %v8052_v62 = vsel %vm8051_vm2, %v9894_v0, %v8048_v44 }
0x1a84   : > { %v8140_v33 = vmul.f32 %v8052_v62, %v14244_v50 }
0x1a86   : > { %v8157_v16 = vmul.f32 %v14194_v7, %v8140_v33 }
0x1a88   : > { %v8177_v20 = vadd.f32 %v14272_v17, %v8157_v16 }
0x1a8a   : > { %9063 = vmatmul.msk.f32.gmra.mxu1 %vm508_vm9, %v8177_v20 }
0x1a8e   : > { %v7919_v27 = vpop.xlane.xlu1 %7918 }
0x1a8f   : > { %v7949_v47 = vmul.f32 %v7919_v27, %v14129_v32 }
0x1a91   : > { %v7965_v53 = vadd.f32 1e-05, %v7949_v47 }
0x1a93   : > { %9895 = vrsqrt.f32 %v7965_v53  ;;  %vm8059_vm3 = vweird.f32 %v7965_v53 }
0x1a99   : > { %v9896_v3 = vpop.eup %9895 }
0x1a9a   : > { %v8054_v22 = vmul.f32 %v9896_v3, %v7965_v53  ;;  %vm8060_vm15 = vweird.f32 %v9896_v3 }
0x1a9b   : > { %v8252_v54 = vpop.f32.mrf.mxu1  ;;  %v7922_v50 = vpop.xlane.xlu1 %7921  ;;  %vm8061_vm4 = vmor %vm8059_vm3, %vm8060_vm15 }
0x1a9c   : > { %v8055_v5 = vmul.f32 %v9896_v3, %v8054_v22  ;;  %v8253_v2 = vadd.f32 %v14414_v59, %v8252_v54  ;;  %v7950_v42 = vmul.f32 %v7922_v50, %v14129_v32 }
0x1a9e   : > { %v8056_v23 = vmul.f32 0.5, %v8055_v5  ;;  %v8300_v45 = vmax.f32 %v8253_v2, 0.0  ;;  %v7966_v31 = vadd.f32 1e-05, %v7950_v42 }
0x1aa0   : > { %v8057_v15 = vsub.f32 1.5, %v8056_v23  ;;  %9897 = vrsqrt.f32 %v7966_v31  ;;  %8335 = vmatmul.f32.vlgmr.msrb.gmra.mxu2 %v8300_v45  ;;  %vm8069_vm6 = vweird.f32 %v7966_v31 }
0x1aa2   : > { %v8058_v35 = vmul.f32 %v9896_v3, %v8057_v15 }
0x1aa3   : > { %v7925_v37 = vpop.xlane.xlu1 %7924 }
0x1aa4   : > { %v8062_v48 = vsel %vm8061_vm4, %v9896_v3, %v8058_v35  ;;  %v7951_v34 = vmul.f32 %v7925_v37, %v14129_v32 }
0x1aa5   : > { %v8141_v38 = vmul.f32 %v8062_v48, %v14265_v18  ;;  %v8255_v57 = vpop.f32.mrf.mxu1 }
0x1aa6   : > { %v9898_v36 = vpop.eup %9897  ;;  %v7967_v52 = vadd.f32 1e-05, %v7951_v34  ;;  %v8256_v41 = vadd.f32 %v14414_v59, %v8255_v57 }
0x1aa7   : > { %v8064_v39 = vmul.f32 %v9898_v36, %v7966_v31  ;;  %v8158_v43 = vmul.f32 %v14194_v7, %v8141_v38  ;;  %vm8070_vm5 = vweird.f32 %v9898_v36 }
0x1aa8   : > { %9899 = vrsqrt.f32 %v7967_v52  ;;  %v8301_v30 = vmax.f32 %v8256_v41, 0.0  ;;  %vm8071_vm0 = vmor %vm8069_vm6, %vm8070_vm5  ;;  %vm8079_vm7 = vweird.f32 %v7967_v52 }
0x1aa9   : > { %v8065_v49 = vmul.f32 %v9898_v36, %v8064_v39  ;;  %v8178_v8 = vadd.f32 %v14272_v17, %v8158_v43 }
0x1aaa   : > { %8338 = vmatmul.f32.gmra.mxu2 %v8301_v30 }
0x1aab   : > { %v8066_v4 = vmul.f32 0.5, %v8065_v49  ;;  %9064 = vmatmul.msk.f32.gmra.mxu1 %vm508_vm9, %v8178_v8  ;;  %v7928_v61 = vpop.xlane.xlu0 %7927 }
0x1aac   : > { %v7952_v18 = vmul.f32 %v7928_v61, %v14129_v32 }
0x1aad   : > { %v8067_v9 = vsub.f32 1.5, %v8066_v4 }
0x1aae   : > { %v9900_v55 = vpop.eup %9899  ;;  %v7968_v26 = vadd.f32 1e-05, %v7952_v18 }
0x1aaf   : > { %v8068_v6 = vmul.f32 %v9898_v36, %v8067_v9  ;;  %v8074_v24 = vmul.f32 %v9900_v55, %v7967_v52  ;;  %vm8080_vm11 = vweird.f32 %v9900_v55 }
0x1ab0   : > { %9901 = vrsqrt.f32 %v7968_v26  ;;  %vm8081_vm8 = vmor %vm8079_vm7, %vm8080_vm11  ;;  %vm8089_vm13 = vweird.f32 %v7968_v26 }
0x1ab1   : > { %v8072_v25 = vsel %vm8071_vm0, %v9898_v36, %v8068_v6  ;;  %v8075_v0 = vmul.f32 %v9900_v55, %v8074_v24 }
0x1ab2   : > { %v8142_v58 = vmul.f32 %v8072_v25, %v14280_v19  ;;  %v8258_v28 = vpop.f32.mrf.mxu1 }
0x1ab3   : > { %v8076_v60 = vmul.f32 0.5, %v8075_v0  ;;  %v8259_v13 = vadd.f32 %v14414_v59, %v8258_v28  ;;  %v7931_v11 = vpop.xlane.xlu1 %7930 }
0x1ab4   : > { %v7953_v51 = vmul.f32 %v7931_v11, %v14129_v32  ;;  %v8159_v10 = vmul.f32 %v14194_v7, %v8142_v58 }
0x1ab5   : > { %v8077_v46 = vsub.f32 1.5, %v8076_v60  ;;  %v8302_v63 = vmax.f32 %v8259_v13, 0.0 }
0x1ab6   : > { %v9902_v44 = vpop.eup %9901  ;;  %v7969_v29 = vadd.f32 1e-05, %v7953_v51  ;;  %v8179_v62 = vadd.f32 %v14272_v17, %v8159_v10 }
0x1ab7   : > { %v8078_v33 = vmul.f32 %v9900_v55, %v8077_v46  ;;  %v8084_v16 = vmul.f32 %v9902_v44, %v7968_v26  ;;  %8341 = vmatmul.f32.gmra.mxu2 %v8302_v63  ;;  %vm8090_vm12 = vweird.f32 %v9902_v44 }
0x1ab8   : > { %9903 = vrsqrt.f32 %v7969_v29  ;;  %9065 = vmatmul.msk.f32.gmra.mxu1 %vm508_vm9, %v8179_v62  ;;  %vm8091_vm14 = vmor %vm8089_vm13, %vm8090_vm12  ;;  %vm8099_vm1 = vweird.f32 %v7969_v29  ;;  %vm8535_vm13 = vcmask 1041409  }
0x1ab9   : > { %v8082_v19 = vsel %vm8081_vm8, %v9900_v55, %v8078_v33  ;;  %v8085_v20 = vmul.f32 %v9902_v44, %v8084_v16 }
0x1aba   : > { %v8143_v27 = vmul.f32 %v8082_v19, %v14291_v1  ;;  %v8261_v47 = vpop.f32.mrf.mxu1 }
0x1abb   : > { %v8086_v53 = vmul.f32 0.5, %v8085_v20  ;;  %v8262_v3 = vadd.f32 %v14414_v59, %v8261_v47  ;;  %v7934_v22 = vpop.xlane.xlu0 %7933 }
0x1abc   : > { %v7954_v54 = vmul.f32 %v7934_v22, %v14129_v32  ;;  %v8160_v50 = vmul.f32 %v14194_v7, %v8143_v27 }
0x1abd   : > { %v8087_v5 = vsub.f32 1.5, %v8086_v53  ;;  %v8303_v2 = vmax.f32 %v8262_v3, 0.0 }
0x1abe   : > { %v9904_v42 = vpop.eup %9903  ;;  %v7970_v23 = vadd.f32 1e-05, %v7954_v54  ;;  %v8180_v45 = vadd.f32 %v14272_v17, %v8160_v50 }
0x1abf   : > { %v8088_v31 = vmul.f32 %v9902_v44, %v8087_v5  ;;  %v8094_v15 = vmul.f32 %v9904_v42, %v7969_v29  ;;  %8344 = vmatmul.f32.gmra.mxu2 %v8303_v2  ;;  %vm8100_vm10 = vweird.f32 %v9904_v42 }
0x1ac0   : > { %9905 = vrsqrt.f32 %v7970_v23  ;;  %9066 = vmatmul.msk.f32.gmra.mxu1 %vm508_vm9, %v8180_v45  ;;  %vm8101_vm2 = vmor %vm8099_vm1, %vm8100_vm10  ;;  %vm8109_vm3 = vweird.f32 %v7970_v23  ;;  %vm8539_vm10 = vcmask 1043459   ;;  %vm8541_vm1 = vcmask 1044484  }
0x1ac1   : > { %v8092_v1 = vsel %vm8091_vm14, %v9902_v44, %v8088_v31  ;;  %v8095_v35 = vmul.f32 %v9904_v42, %v8094_v15  ;;  %vm8537_vm14 = vcmask 1042434  }
0x1ac2   : > { %v8144_v37 = vmul.f32 %v8092_v1, %v14301_v14  ;;  %v8264_v48 = vpop.f32.mrf.mxu1 }
0x1ac3   : > { %v8096_v34 = vmul.f32 0.5, %v8095_v35  ;;  %v8265_v38 = vadd.f32 %v14414_v59, %v8264_v48  ;;  %v7937_v57 = vpop.xlane.xlu1 %7936 }
0x1ac4   : > { %v7955_v36 = vmul.f32 %v7937_v57, %v14129_v32  ;;  %v8161_v52 = vmul.f32 %v14194_v7, %v8144_v37 }
0x1ac5   : > { %v8097_v41 = vsub.f32 1.5, %v8096_v34  ;;  %v8304_v39 = vmax.f32 %v8265_v38, 0.0 }
0x1ac6   : > { %v9906_v43 = vpop.eup %9905  ;;  %v7971_v30 = vadd.f32 1e-05, %v7955_v36  ;;  %v8181_v49 = vadd.f32 %v14272_v17, %v8161_v52 }
0x1ac7   : > { %v8098_v8 = vmul.f32 %v9904_v42, %v8097_v41  ;;  %v8104_v4 = vmul.f32 %v9906_v43, %v7970_v23  ;;  %8347 = vmatmul.f32.gmra.mxu2 %v8304_v39  ;;  %vm8110_vm15 = vweird.f32 %v9906_v43 }
0x1ac8   : > { %9907 = vrsqrt.f32 %v7971_v30  ;;  %9067 = vmatmul.msk.f32.gmra.mxu1 %vm508_vm9, %v8181_v49  ;;  %vm8111_vm4 = vmor %vm8109_vm3, %vm8110_vm15  ;;  %vm8119_vm6 = vweird.f32 %v7971_v30  ;;  %vm8545_vm15 = vcmask 1046534   ;;  %vm8547_vm3 = vcmask 1047559  }
0x1ac9   : > { %v8102_v14 = vsel %vm8101_vm2, %v9904_v42, %v8098_v8  ;;  %v8105_v61 = vmul.f32 %v9906_v43, %v8104_v4  ;;  %vm8543_vm2 = vcmask 1045509  }
0x1aca   : > { %v8145_v18 = vmul.f32 %v8102_v14, %v14313_v12  ;;  %v8267_v9 = vpop.f32.mrf.mxu1 }
0x1acb   : > { %v8106_v55 = vmul.f32 0.5, %v8105_v61  ;;  %v8268_v26 = vadd.f32 %v14414_v59, %v8267_v9  ;;  %v7940_v6 = vpop.xlane.xlu2 %7939 }
0x1acc   : > { %v7956_v24 = vmul.f32 %v7940_v6, %v14129_v32  ;;  %v8162_v25 = vmul.f32 %v14194_v7, %v8145_v18 }
0x1acd   : > { %v8107_v0 = vsub.f32 1.5, %v8106_v55  ;;  %v8305_v58 = vmax.f32 %v8268_v26, 0.0 }
0x1ace   : > { %v9908_v28 = vpop.eup %9907  ;;  %v7972_v60 = vadd.f32 1e-05, %v7956_v24  ;;  %v8182_v13 = vadd.f32 %v14272_v17, %v8162_v25 }
0x1acf   : > { %v8108_v11 = vmul.f32 %v9906_v43, %v8107_v0  ;;  %v8114_v51 = vmul.f32 %v9908_v28, %v7971_v30  ;;  %8350 = vmatmul.f32.gmra.mxu2 %v8305_v58  ;;  %vm8120_vm5 = vweird.f32 %v9908_v28 }
0x1ad0   : > { %9909 = vrsqrt.f32 %v7972_v60  ;;  %9068 = vmatmul.msk.f32.gmra.mxu1 %vm508_vm9, %v8182_v13  ;;  %vm8121_vm0 = vmor %vm8119_vm6, %vm8120_vm5  ;;  %vm8129_vm7 = vweird.f32 %v7972_v60 }
0x1ad1   : > { %v8112_v12 = vsel %vm8111_vm4, %v9906_v43, %v8108_v11  ;;  %v8115_v10 = vmul.f32 %v9908_v28, %v8114_v51  ;;  %vm8586_vm4 = vcmask 80896  }
0x1ad2   : > { %v8146_v32 = vmul.f32 %v8112_v12, %v14324_v40  ;;  %v8270_v46 = vpop.f32.mrf.mxu1 }
0x1ad3   : > { %v8116_v63 = vmul.f32 0.5, %v8115_v10  ;;  %v8271_v44 = vadd.f32 %v14414_v59, %v8270_v46  ;;  %v10002_v46 = vmov 8.0  }
0x1ad4   : > { %v8163_v29 = vmul.f32 %v14194_v7, %v8146_v32  ;;  %9911 = vrcp.f32 %v10002_v46 }
0x1ad5   : > { %v8117_v62 = vsub.f32 1.5, %v8116_v63  ;;  %v8306_v33 = vmax.f32 %v8271_v44, 0.0 }
0x1ad6   : > { %v9910_v16 = vpop.eup %9909  ;;  %v8183_v19 = vadd.f32 %v14272_v17, %v8163_v29 }
0x1ad7   : > { %v8118_v20 = vmul.f32 %v9908_v28, %v8117_v62  ;;  %v8124_v27 = vmul.f32 %v9910_v16, %v7972_v60  ;;  %8353 = vmatmul.f32.gmra.mxu2 %v8306_v33  ;;  %vm8130_vm11 = vweird.f32 %v9910_v16 }
0x1ad8   : > { %9069 = vmatmul.msk.f32.gmra.mxu1 %vm508_vm9, %v8183_v19  ;;  %vm8131_vm8 = vmor %vm8129_vm7, %vm8130_vm11  ;;  %v372_v19 = vld [vmem:[%s14571_s2 + $0x100] sm:$0xff] }
0x1ad9   : > { %v8122_v40 = vsel %vm8121_vm0, %v9908_v28, %v8118_v20  ;;  %v8125_v47 = vmul.f32 %v9910_v16, %v8124_v27  ;;  %v14471_v28 = vpop.permute.xlu0 %8316  ;;  %v371_v20 = vld [vmem:[%s14571_s2 + $0xf8] sm:$0xff]  ;;  %8575 = vmatpush.msrb.mxu3 %v372_v19 }
0x1ada   : > { %v8147_v53 = vmul.f32 %v8122_v40, %v14335_v56 }
0x1adb   : > { %v8126_v3 = vmul.f32 0.5, %v8125_v47  ;;  %8576 = vmatpush.msrb.mxu3 %v371_v20 }
0x1adc   : > { %v8164_v22 = vmul.f32 %v14194_v7, %v8147_v53 }
0x1add   : > { %v8127_v54 = vsub.f32 1.5, %v8126_v3 }
0x1ade   : > { %v8184_v50 = vadd.f32 %v14272_v17, %v8164_v22  ;;  %v370_v22 = vld [vmem:[%s14571_s2 + $0xf0] sm:$0xff] }
0x1adf   : > { %v8128_v5 = vmul.f32 %v9910_v16, %v8127_v54  ;;  %8577 = vmatpush.msrb.mxu3 %v370_v22 }
0x1ae0   : > { %9070 = vmatmul.msk.f32.gmra.mxu1 %vm508_vm9, %v8184_v50  ;;  %v9912_v50 = vpop.eup %9911 }
0x1ae1   : > { %v8132_v2 = vsel %vm8131_vm8, %v9910_v16, %v8128_v5  ;;  %vm8501_vm12 = vweird.f32 %v9912_v50 }
0x1ae2   : > { %v8148_v42 = vmul.f32 %v8132_v2, %v14346_v21 }
0x1ae4   : > { %v8165_v23 = vmul.f32 %v14194_v7, %v8148_v42  ;;  %v369_v42 = vld [vmem:[%s14571_s2 + $0xe8] sm:$0xff] }
0x1ae5   : > { %8578 = vmatpush.msrb.mxu3 %v369_v42 }
0x1ae6   : > { %v8185_v45 = vadd.f32 %v14272_v17, %v8165_v23 }
0x1ae8   : > { %9071 = vmatmul.msk.f32.gmra.mxu1 %vm508_vm9, %v8185_v45 }
0x1b07   : > { %v8273_v56 = vpop.f32.mrf.mxu1 }
0x1b08   : > { %v8274_v31 = vadd.f32 %v14414_v59, %v8273_v56 }
0x1b0a   : > { %v8307_v15 = vmax.f32 %v8274_v31, 0.0 }
0x1b0c   : > { %8356 = vmatmul.f32.gmra.mxu2 %v8307_v15  ;;  %v8497_v15 = vmul.f32 8.0, %v9912_v50 }
0x1b23   : > { %v8336_v57 = vpop.f32.mrf.mxu2 }
0x1b24   : > { %v8337_v11 = vadd.f32 %v8336_v57, %v14471_v28 }
0x1b26   : > { %v8384_v29 = vsel %vm508_vm9, %v8337_v11, 0.0 }
0x1b27   : > { %v8385_v47 = vrot.slane %v8384_v29, 4 }
0x1b28   : > { %v8276_v1 = vpop.f32.mrf.mxu1 }
0x1b29   : > { %v8277_v35 = vadd.f32 %v14414_v59, %v8276_v1  ;;  %v8386_v56 = vadd.f32 %v8385_v47, %v8384_v29 }
0x1b2b   : > { %v8308_v37 = vmax.f32 %v8277_v35, 0.0 }
0x1b2d   : > { %8359 = vmatmul.f32.gmra.mxu2 %v8308_v37  ;;  %v8339_v39 = vpop.f32.mrf.mxu2 }
0x1b2e   : > { %v8340_v60 = vadd.f32 %v8339_v39, %v14471_v28 }
0x1b30   : > { %v8391_v32 = vsel %vm508_vm9, %v8340_v60, 0.0 }
0x1b31   : > { %v8392_v33 = vrot.slane %v8391_v32, 4 }
0x1b33   : > { %v8393_v5 = vadd.f32 %v8392_v33, %v8391_v32 }
0x1b35   : > { %v8279_v48 = vpop.f32.mrf.mxu1  ;;  %v8394_v35 = vrot.slane %v8393_v5, 2 }
0x1b36   : > { %v8280_v34 = vadd.f32 %v14414_v59, %v8279_v48 }
0x1b37   : > { %v8395_v57 = vadd.f32 %v8394_v35, %v8393_v5 }
0x1b38   : > { %v8309_v21 = vmax.f32 %v8280_v34, 0.0 }
0x1b3a   : > { %8362 = vmatmul.f32.gmra.mxu2 %v8309_v21  ;;  %v8342_v8 = vpop.f32.mrf.mxu2  ;;  %v8387_v21 = vrot.slane %v8386_v56, 2 }
0x1b3b   : > { %v8343_v13 = vadd.f32 %v8342_v8, %v14471_v28  ;;  %v8396_v8 = vrot.slane %v8395_v57, 1 }
0x1b3c   : > { %v8388_v39 = vadd.f32 %v8387_v21, %v8386_v56 }
0x1b3d   : > { %v8282_v7 = vpop.f32.mrf.mxu1  ;;  %v8398_v63 = vsel %vm508_vm9, %v8343_v13, 0.0 }
0x1b3e   : > { %v8283_v17 = vadd.f32 %v14414_v59, %v8282_v7  ;;  %v8399_v27 = vrot.slane %v8398_v63, 4 }
0x1b40   : > { %v8310_v38 = vmax.f32 %v8283_v17, 0.0  ;;  %v8400_v23 = vadd.f32 %v8399_v27, %v8398_v63  ;;  %v8498_v17 = vsub.f32 1.0, %v8497_v15 }
0x1b42   : > { %8365 = vmatmul.f32.gmra.mxu2 %v8310_v38  ;;  %v8345_v9 = vpop.f32.mrf.mxu2  ;;  %v8401_v48 = vrot.slane %v8400_v23, 2 }
0x1b43   : > { %v8346_v51 = vadd.f32 %v8345_v9, %v14471_v28 }
0x1b45   : > { %v8285_v36 = vpop.f32.mrf.mxu1  ;;  %v8405_v62 = vsel %vm508_vm9, %v8346_v51, 0.0 }
0x1b46   : > { %v8286_v52 = vadd.f32 %v14414_v59, %v8285_v36  ;;  %v8406_v53 = vrot.slane %v8405_v62, 4 }
0x1b48   : > { %v8311_v41 = vmax.f32 %v8286_v52, 0.0  ;;  %v8407_v31 = vadd.f32 %v8406_v53, %v8405_v62  ;;  %v8402_v52 = vadd.f32 %v8401_v48, %v8400_v23 }
0x1b4a   : > { %8368 = vmatmul.f32.vlgmr.msra.gmra.mxu3 %v8311_v41  ;;  %v8348_v25 = vpop.f32.mrf.mxu2  ;;  %v8408_v7 = vrot.slane %v8407_v31, 2 }
0x1b4b   : > { %v8349_v10 = vadd.f32 %v8348_v25, %v14471_v28 }
0x1b4d   : > { %v8288_v43 = vpop.f32.mrf.mxu1  ;;  %v8412_v16 = vsel %vm508_vm9, %v8349_v10, 0.0 }
0x1b4e   : > { %v8289_v30 = vadd.f32 %v14414_v59, %v8288_v43  ;;  %v8413_v54 = vrot.slane %v8412_v16, 4  ;;  %v8409_v43 = vadd.f32 %v8408_v7, %v8407_v31 }
0x1b50   : > { %v8312_v49 = vmax.f32 %v8289_v30, 0.0  ;;  %v8414_v1 = vadd.f32 %v8413_v54, %v8412_v16  ;;  %v8499_v30 = vmul.f32 %v9912_v50, %v8498_v17 }
0x1b52   : > { %8371 = vmatmul.f32.gmra.mxu3 %v8312_v49  ;;  %v8351_v58 = vpop.f32.mrf.mxu2  ;;  %v8415_v38 = vrot.slane %v8414_v1, 2 }
0x1b54   : > { %v8416_v49 = vadd.f32 %v8415_v38, %v8414_v1 }
0x1b55   : > { %v8291_v4 = vpop.f32.mrf.mxu1 }
0x1b56   : > { %v8292_v14 = vadd.f32 %v14414_v59, %v8291_v4 }
0x1b58   : > { %v8313_v61 = vmax.f32 %v8292_v14, 0.0 }
0x1b5a   : > { %8374 = vmatmul.f32.gmra.mxu3 %v8313_v61  ;;  %v8354_v12 = vpop.f32.mrf.mxu2  ;;  %v8403_v61 = vrot.slane %v8402_v52, 1 }
0x1b5b   : > { %v8355_v44 = vadd.f32 %v8354_v12, %v14471_v28 }
0x1b5c   : > { %v8404_v13 = vadd.f32 %v8403_v61, %v8402_v52 }
0x1b5d   : > { %v8294_v18 = vpop.f32.mrf.mxu1  ;;  %v8426_v3 = vsel %vm508_vm9, %v8355_v44, 0.0 }
0x1b5e   : > { %v8295_v55 = vadd.f32 %v14414_v59, %v8294_v18  ;;  %v8427_v45 = vrot.slane %v8426_v3, 4 }
0x1b60   : > { %v8314_v26 = vmax.f32 %v8295_v55, 0.0  ;;  %v8428_v34 = vadd.f32 %v8427_v45, %v8426_v3  ;;  %v8389_v55 = vrot.slane %v8388_v39, 1 }
0x1b62   : > { %8377 = vmatmul.f32.gmra.mxu3 %v8314_v26  ;;  %v8429_v41 = vrot.slane %v8428_v34, 2  ;;  %v8410_v26 = vrot.slane %v8409_v43, 1  ;;  %v8390_v51 = vadd.f32 %v8389_v55, %v8388_v39 }
0x1b64   : > { %v8430_v18 = vadd.f32 %v8429_v41, %v8428_v34  ;;  %v8411_v12 = vadd.f32 %v8410_v26, %v8409_v43 }
0x1b65   : > { %v8297_v6 = vpop.f32.mrf.mxu1 }
0x1b66   : > { %v8298_v24 = vadd.f32 %v14414_v59, %v8297_v6  ;;  %v8352_v59 = vadd.f32 %v8351_v58, %v14471_v28  ;;  %v8500_v6 = vadd.f32 %v9912_v50, %v8499_v30  ;;  %v8431_v11 = vrot.slane %v8430_v18, 1 }
0x1b68   : > { %v8315_v0 = vmax.f32 %v8298_v24, 0.0  ;;  %v8419_v40 = vsel %vm508_vm9, %v8352_v59, 0.0  ;;  %v8417_v24 = vrot.slane %v8416_v49, 1  ;;  %v14501_v32 = vsel %vm8501_vm12, %v9912_v50, %v8500_v6 }
0x1b69   : > { %v8420_v2 = vrot.slane %v8419_v40, 4  ;;  %v8505_v29 = vmul.f32 %v14501_v32, %v8404_v13  ;;  %v8432_v62 = vadd.f32 %v8431_v11, %v8430_v18  ;;  %v8503_v33 = vmul.f32 %v14501_v32, %v8390_v51 }
0x1b6a   : > { %8380 = vmatmul.f32.gmra.mxu3 %v8315_v0  ;;  %v8397_v0 = vadd.f32 %v8396_v8, %v8395_v57  ;;  %v8418_v59 = vadd.f32 %v8417_v24, %v8416_v49  ;;  %v8506_v16 = vmul.f32 %v14501_v32, %v8411_v12 }
0x1b6b   : > { %v8421_v37 = vadd.f32 %v8420_v2, %v8419_v40  ;;  %v8509_v3 = vmul.f32 %v14501_v32, %v8432_v62 }
0x1b6c   : > { %v8504_v46 = vmul.f32 %v14501_v32, %v8397_v0  ;;  %v8507_v20 = vmul.f32 %v14501_v32, %v8418_v59 }
0x1b6d   : > { %v8422_v36 = vrot.slane %v8421_v37, 2 }
0x1b6e   : > { %v8536_v27 = vsel %vm8535_vm13, %v8504_v46, %v8503_v33 }
0x1b6f   : > { %v8423_v4 = vadd.f32 %v8422_v36, %v8421_v37  ;;  %v8538_v53 = vsel %vm8537_vm14, %v8505_v29, %v8536_v27 }
0x1b70   : > { %v8540_v22 = vsel %vm8539_vm10, %v8506_v16, %v8538_v53 }
0x1b71   : > { %v8424_v58 = vrot.slane %v8423_v4, 1  ;;  %v8542_v50 = vsel %vm8541_vm1, %v8507_v20, %v8540_v22 }
0x1b73   : > { %v8425_v63 = vadd.f32 %v8424_v58, %v8423_v4 }
0x1b75   : > { %v8508_v40 = vmul.f32 %v14501_v32, %v8425_v63 }
0x1b77   : > { %v8544_v2 = vsel %vm8543_vm2, %v8508_v40, %v8542_v50 }
0x1b78   : > { %v8546_v42 = vsel %vm8545_vm15, %v8509_v3, %v8544_v2 }
0x1b8f   : > { %v8357_v14 = vpop.f32.mrf.mxu2 }
0x1b90   : > { %v8358_v9 = vadd.f32 %v8357_v14, %v14471_v28 }
0x1b92   : > { %v8433_v25 = vsel %vm508_vm9, %v8358_v9, 0.0 }
0x1b93   : > { %v8434_v60 = vrot.slane %v8433_v25, 4 }
0x1b95   : > { %v8435_v10 = vadd.f32 %v8434_v60, %v8433_v25 }
0x1b97   : > { %v8436_v44 = vrot.slane %v8435_v10, 2 }
0x1b99   : > { %v8437_v19 = vadd.f32 %v8436_v44, %v8435_v10 }
0x1b9b   : > { %v8438_v47 = vrot.slane %v8437_v19, 1 }
0x1b9d   : > { %v8439_v54 = vadd.f32 %v8438_v47, %v8437_v19 }
0x1b9f   : > { %v8510_v5 = vmul.f32 %v14501_v32, %v8439_v54 }
0x1ba1   : > { %v8548_v23 = vsel %vm8547_vm3, %v8510_v5, %v8546_v42 }
0x1ba2   : > { %9072 = vmatmul.msk.f32.vlgmr.msrb.gmra.mxu3 %vm508_vm9, %v8548_v23 }
0x1bb0   : > { %v8360_v45 = vpop.f32.mrf.mxu2 }
0x1bb1   : > { %v8361_v48 = vadd.f32 %v8360_v45, %v14471_v28 }
0x1bb3   : > { %v8440_v38 = vsel %vm508_vm9, %v8361_v48, 0.0 }
0x1bb4   : > { %v8441_v30 = vrot.slane %v8440_v38, 4 }
0x1bb6   : > { %v8442_v9 = vadd.f32 %v8441_v30, %v8440_v38 }
0x1bb8   : > { %v8443_v60 = vrot.slane %v8442_v9, 2 }
0x1bba   : > { %v8444_v63 = vadd.f32 %v8443_v60, %v8442_v9 }
0x1bbc   : > { %v8445_v47 = vrot.slane %v8444_v63, 1 }
0x1bbd   : > { %v8363_v56 = vpop.f32.mrf.mxu2 }
0x1bbe   : > { %v8364_v35 = vadd.f32 %v8363_v56, %v14471_v28  ;;  %v8446_v45 = vadd.f32 %v8445_v47, %v8444_v63 }
0x1bc0   : > { %v8447_v7 = vsel %vm508_vm9, %v8364_v35, 0.0 }
0x1bc1   : > { %v8448_v36 = vrot.slane %v8447_v7, 4 }
0x1bc3   : > { %v8449_v14 = vadd.f32 %v8448_v36, %v8447_v7 }
0x1bc5   : > { %v8366_v15 = vpop.f32.mrf.mxu2  ;;  %v8450_v6 = vrot.slane %v8449_v14, 2 }
0x1bc6   : > { %v8367_v37 = vadd.f32 %v8366_v15, %v14471_v28 }
0x1bc7   : > { %v8451_v12 = vadd.f32 %v8450_v6, %v8449_v14 }
0x1bc8   : > { %v8454_v17 = vsel %vm508_vm9, %v8367_v37, 0.0 }
0x1bc9   : > { %v8455_v39 = vrot.slane %v8454_v17, 4  ;;  %v8452_v33 = vrot.slane %v8451_v12, 1 }
0x1bcb   : > { %v8456_v18 = vadd.f32 %v8455_v39, %v8454_v17  ;;  %v8453_v50 = vadd.f32 %v8452_v33, %v8451_v12 }
0x1bcd   : > { %v8369_v31 = vpop.f32.mrf.mxu3  ;;  %v8457_v0 = vrot.slane %v8456_v18, 2 }
0x1bce   : > { %v8370_v34 = vadd.f32 %v8369_v31, %v14471_v28 }
0x1bcf   : > { %v8458_v46 = vadd.f32 %v8457_v0, %v8456_v18 }
0x1bd0   : > { %v8461_v57 = vsel %vm508_vm9, %v8370_v34, 0.0  ;;  %v8511_v34 = vmul.f32 %v14501_v32, %v8446_v45 }
0x1bd1   : > { %v8462_v49 = vrot.slane %v8461_v57, 4  ;;  %v8459_v27 = vrot.slane %v8458_v46, 1 }
0x1bd3   : > { %v8463_v55 = vadd.f32 %v8462_v49, %v8461_v57  ;;  %v8460_v42 = vadd.f32 %v8459_v27, %v8458_v46 }
0x1bd5   : > { %v8372_v1 = vpop.f32.mrf.mxu3  ;;  %v8464_v13 = vrot.slane %v8463_v55, 2 }
0x1bd6   : > { %v8373_v21 = vadd.f32 %v8372_v1, %v14471_v28  ;;  %v8512_v1 = vmul.f32 %v14501_v32, %v8453_v50 }
0x1bd7   : > { %v8465_v44 = vadd.f32 %v8464_v13, %v8463_v55 }
0x1bd8   : > { %v8468_v52 = vsel %vm508_vm9, %v8373_v21, 0.0  ;;  %v8549_v38 = vsel %vm8535_vm13, %v8512_v1, %v8511_v34 }
0x1bd9   : > { %v8469_v8 = vrot.slane %v8468_v52, 4  ;;  %v8466_v53 = vrot.slane %v8465_v44, 1 }
0x1bdb   : > { %v8470_v26 = vadd.f32 %v8469_v8, %v8468_v52  ;;  %v8467_v56 = vadd.f32 %v8466_v53, %v8465_v44 }
0x1bdd   : > { %v8375_v41 = vpop.f32.mrf.mxu3  ;;  %v8471_v11 = vrot.slane %v8470_v26, 2  ;;  %v8514_v21 = vmul.f32 %v14501_v32, %v8467_v56 }
0x1bde   : > { %v8376_v43 = vadd.f32 %v8375_v41, %v14471_v28 }
0x1bdf   : > { %v8472_v62 = vadd.f32 %v8471_v11, %v8470_v26 }
0x1be0   : > { %v8475_v4 = vsel %vm508_vm9, %v8376_v43, 0.0 }
0x1be1   : > { %v8476_v61 = vrot.slane %v8475_v4, 4  ;;  %v8473_v22 = vrot.slane %v8472_v62, 1 }
0x1be3   : > { %v8477_v24 = vadd.f32 %v8476_v61, %v8475_v4  ;;  %v8474_v15 = vadd.f32 %v8473_v22, %v8472_v62  ;;  %v8557_v61 = vpop.permute.xlu1 %8556 }
0x1be5   : > { %v8378_v25 = vpop.f32.mrf.mxu3  ;;  %v8478_v10 = vrot.slane %v8477_v24, 2  ;;  %v8515_v17 = vmul.f32 %v14501_v32, %v8474_v15 }
0x1be6   : > { %v8379_v58 = vadd.f32 %v8378_v25, %v14471_v28 }
0x1be7   : > { %v8479_v16 = vadd.f32 %v8478_v10, %v8477_v24 }
0x1be8   : > { %v8482_v51 = vsel %vm508_vm9, %v8379_v58, 0.0 }
0x1be9   : > { %v8483_v59 = vrot.slane %v8482_v51, 4  ;;  %v8480_v5 = vrot.slane %v8479_v16, 1 }
0x1beb   : > { %v8484_v29 = vadd.f32 %v8483_v59, %v8482_v51  ;;  %v8481_v35 = vadd.f32 %v8480_v5, %v8479_v16 }
0x1bed   : > { %v8485_v19 = vrot.slane %v8484_v29, 2  ;;  %v8381_v20 = vpop.f32.mrf.mxu3  ;;  %v8516_v57 = vmul.f32 %v14501_v32, %v8481_v35 }
0x1bee   : > { %v8382_v40 = vadd.f32 %v8381_v20, %v14471_v28  ;;  %v8513_v28 = vmul.f32 %v14501_v32, %v8460_v42 }
0x1bef   : > { %v8486_v3 = vadd.f32 %v8485_v19, %v8484_v29 }
0x1bf0   : > { %v8489_v54 = vsel %vm508_vm9, %v8382_v40, 0.0  ;;  %v8550_v52 = vsel %vm8537_vm14, %v8513_v28, %v8549_v38 }
0x1bf1   : > { %v8490_v2 = vrot.slane %v8489_v54, 4  ;;  %v8487_v23 = vrot.slane %v8486_v3, 1  ;;  %v8551_v43 = vsel %vm8539_vm10, %v8514_v21, %v8550_v52 }
0x1bf2   : > { %v8552_v30 = vsel %vm8541_vm1, %v8515_v17, %v8551_v43 }
0x1bf3   : > { %v8491_v31 = vadd.f32 %v8490_v2, %v8489_v54  ;;  %v8488_v48 = vadd.f32 %v8487_v23, %v8486_v3  ;;  %v8553_v8 = vsel %vm8543_vm2, %v8516_v57, %v8552_v30 }
0x1bf5   : > { %v8492_v37 = vrot.slane %v8491_v31, 2  ;;  %v8517_v41 = vmul.f32 %v14501_v32, %v8488_v48 }
0x1bf7   : > { %v8493_v7 = vadd.f32 %v8492_v37, %v8491_v31  ;;  %v8554_v4 = vsel %vm8545_vm15, %v8517_v41, %v8553_v8 }
0x1bf9   : > { %v8494_v36 = vrot.slane %v8493_v7, 1 }
0x1bfb   : > { %v8495_v39 = vadd.f32 %v8494_v36, %v8493_v7 }
0x1bfd   : > { %v8518_v49 = vmul.f32 %v14501_v32, %v8495_v39 }
0x1bff   : > { %v8555_v14 = vsel %vm8547_vm3, %v8518_v49, %v8554_v4 }
0x1c00   : > { %9073 = vmatmul.msk.f32.gmra.mxu3 %vm508_vm9, %v8555_v14 }
0x1c25   : > { %v8580_v18 = vpop.f32.mrf.mxu3 }
0x1c26   : > { %v8581_v32 = vadd.f32 %v8580_v18, %v8557_v61 }
0x1c28   : > { %8587 = vst.msk [vmem:[%s338_s11] sm:$0xff] %vm8586_vm4, %v8581_v32 }
0x1c83   : > { %v8583_v9 = vpop.f32.mrf.mxu3 }
0x1c84   : > { %v8584_v55 = vadd.f32 %v8583_v9, %v8557_v61 }
0x1c86   : > { %8588 = vst.msk [vmem:[%s338_s11 + $0x8] sm:$0xff] %vm8586_vm4, %v8584_v55 }
0x1c87 PF: > { %p14_p5 = scmp.ge.s32.totalorder %s10048_s20, 4   ;;  %s15272_s15 = smov %s9974_s16 }
0x1c88   : > { %s15273_s16 = smov %s9978_s17  ;;  %s15274_s17 = smov %s10058_s23 }
0x1c89   : > { %s15275_s18 = smov %s10048_s20  ;;  %16 = sbr.rel (!%p14_p5) target bundleno = 3 (0x3), region = 122 }
0x1c8e   :  { %8611 = vsyncpa [#allocation4], 1 }
0x1c8f   :  { %8613 = vsyncpa [#allocation4 + $0x1], 1 }

</bundles_post_ra>
